<compile_context>
chip_gen: v6e
topology: v6e:2x2x1
jax: 0.10.0
libtpu: 0.0.40
codegen_flags: <defaults>
</compile_context>

<pallas_src>
import functools

import jax
import jax.numpy as jnp
from jax.experimental import pallas as pl
from jax.experimental.pallas import tpu as pltpu

BN_EPS = 1e-5
_VMEM_LIMIT = 32 * 1024 * 1024     # safe on v5e/v6e (128 MiB) and v7x (64 MiB physical)
_VMEM_BUDGET = 20 * 1024 * 1024    # per-grid-step working-set target (leaves headroom)


def _round_up(x, m):
    return (x + m - 1) // m * m


def _lane_pad(c):
    return _round_up(c, 128)


def _pick_batch_tile(n, per_image_bytes, budget=_VMEM_BUDGET):
    """Largest divisor of n whose per-step working set fits the VMEM budget, preferring
    choices that keep the grid length >= 2 (so v7x's two TensorCores are both used)."""
    divs = [d for d in range(1, n + 1) if n % d == 0]
    fit = [d for d in divs if d * per_image_bytes <= budget] or [1]
    pref = [d for d in fit if n // d >= 2]
    return max(pref) if pref else max(fit)


# ----------------------------------------------------------------------------
# Pallas kernels
# ----------------------------------------------------------------------------
def _conv_pool_wide(x_ref, w_ref, scale_ref, shift_ref, *, Ho, Wrow, Cin):
    """Fused Conv3x3(pad=1) + MaxPool2d(2) + BN(eval) + ReLU for a tile of B images.

    x_ref:     (B, 4, Rpad, Cin) bf16 pool-parity slabs; slab (a, b) row i*Wrow + j holds
               x_pad[2i + a, 2j + b, :]  (cols j in [Wo+1, Wrow) and the trailing row
               groups are zero padding).
    w_ref:     (9*Cin, Cout) bf16, row index = (dy*3 + dx)*Cin + cin.
    scale_ref: (1, Cout) f32 folded BN scale (strictly positive).
    shift_ref: (1, Cout) f32 folded conv bias + BN shift.

    Returns (B*M, Cout) f32 with M = Ho*Wrow; columns j >= Wo of each row group are junk.
    """
    B = x_ref.shape[0]
    M = Ho * Wrow
    pooled = None
    for py in range(2):              # 2x2 pool position (rows)
        for px in range(2):          # 2x2 pool position (cols)
            taps = []
            for dy in range(3):      # 3x3 conv taps, lane-concatenated -> K = 9*Cin
                for dx in range(3):
                    u, v = py + dy, px + dx
                    ab = (u % 2) * 2 + (v % 2)
                    s = (u // 2) * Wrow + (v // 2)
                    taps.append(x_ref[:, ab, s:s + M, :])          # (B, M, Cin) bf16
            patch = jnp.concatenate(taps, axis=-1)                 # (B, M, 9*Cin)
            y = jnp.dot(patch.reshape(B * M, 9 * Cin), w_ref[...],
                        preferred_element_type=jnp.float32)        # (B*M, Cout) f32
            pooled = y if pooled is None else jnp.maximum(pooled, y)
    # BN(eval) + ReLU once, after the pool max -- identical to conv->BN->ReLU->pool
    # because the folded BN scale is > 0 and ReLU is monotone.
    return jnp.maximum(pooled * scale_ref[...] + shift_ref[...], 0.0)


def conv_block_kernel(x_ref, w_ref, scale_ref, shift_ref, o_ref, *, Ho, Wrow, Cin):
    act = _conv_pool_wide(x_ref, w_ref, scale_ref, shift_ref, Ho=Ho, Wrow=Wrow, Cin=Cin)
    o_ref[...] = act.astype(o_ref.dtype)                           # (B*M, Cout) bf16


def conv_block1_kernel(x_ref, w_ref, scale_ref, shift_ref, o_ref):
    """First block: the 9 taps are packed host-side into the channel dim (K = 9*Cin),
    and the 4 pool positions are folded into the matmul M dimension for free."""
    B, _, M, K = x_ref.shape
    y = jnp.dot(x_ref[...].reshape(B * 4 * M, K), w_ref[...],
                preferred_element_type=jnp.float32)                # (B*4*M, Cout)
    Cout = y.shape[-1]
    y = y.reshape(B, 4, M, Cout)
    pooled = jnp.maximum(jnp.maximum(y[:, 0], y[:, 1]),
                         jnp.maximum(y[:, 2], y[:, 3]))            # (B, M, Cout)
    act = jnp.maximum(pooled.reshape(B * M, Cout) * scale_ref[...] + shift_ref[...], 0.0)
    o_ref[...] = act.astype(o_ref.dtype)                           # (B*M, Cout) bf16


def conv_block_head_kernel(x_ref, w_ref, scale_ref, shift_ref, wfc_ref, bfc_ref,
                           emb_ref, logit_ref, *, Ho, Wo, Wrow, Cin):
    """Last conv block fused with the global spatial max pool + Linear head."""
    B = x_ref.shape[0]
    M = Ho * Wrow
    act = _conv_pool_wide(x_ref, w_ref, scale_ref, shift_ref, Ho=Ho, Wrow=Wrow, Cin=Cin)
    Cout = act.shape[-1]
    # Mask the junk columns j >= Wo of every row group.  act >= 0 after ReLU so 0.0 is a
    # safe fill for the max -- this masking is load-bearing for the global max.
    col = jax.lax.broadcasted_iota(jnp.int32, (B * M, 1), 0) % Wrow
    act = jnp.where(col < Wo, act, 0.0)
    emb = jnp.max(act.reshape(B, M, Cout), axis=1)                 # (B, Cout) global max
    emb_ref[:, 0, :] = emb.astype(emb_ref.dtype)
    logits = jnp.dot(emb, wfc_ref[...], preferred_element_type=jnp.float32) + bfc_ref[...]
    logit_ref[:, 0, :] = logits.astype(logit_ref.dtype)


# ----------------------------------------------------------------------------
# Host-side (XLA) layout prep -- cheap, single fused pass per block boundary
# ----------------------------------------------------------------------------
def _pack_first_block(x_nhwc):
    """(N,H,W,Cin) bf16 -> ((N, 4, Ho*Wrow, 9*Cin) bf16, Ho, Wo, Wrow).

    Pool position pp=(py,px), pool cell (i,j), tap t=(dy,dx): channel block t holds
    x_pad[2i+py+dy, 2j+px+dx, :].  Cols j in [Wo, Wrow) are zero padding (junk outputs)."""
    N, H, W, C = x_nhwc.shape
    Ho, Wo = H // 2, W // 2
    Wrow = _round_up(Wo + 1, 8)
    xp = jnp.pad(x_nhwc, ((0, 0), (1, 1), (1, 1), (0, 0)))[:, :2 * Ho + 2, :2 * Wo + 2, :]
    planes = []
    for py in range(2):
        for px in range(2):
            taps = [xp[:, py + dy: py + dy + 2 * Ho: 2,
                       px + dx: px + dx + 2 * Wo: 2, :]
                    for dy in range(3) for dx in range(3)]          # 9 x (N,Ho,Wo,C)
            planes.append(jnp.concatenate(taps, axis=-1))           # (N,Ho,Wo,9C)
    xpk = jnp.stack(planes, axis=1)                                 # (N,4,Ho,Wo,9C)
    xpk = jnp.pad(xpk, ((0, 0), (0, 0), (0, 0), (0, Wrow - Wo), (0, 0)))
    return xpk.reshape(N, 4, Ho * Wrow, 9 * C), Ho, Wo, Wrow


def _slabs_from_block_output(out, Ho_prev, Wo_prev, Wrow_prev):
    """Previous block output (N*M_prev, C) bf16 (row stride Wrow_prev, real cols < Wo_prev)
    -> pool-parity slabs ((N, 4, (Ho+2)*Wrow, C), Ho, Wo, Wrow) for the next block.
    Junk-column strip + pad + parity slicing fuse into one XLA gather pass."""
    C = out.shape[-1]
    N = out.shape[0] // (Ho_prev * Wrow_prev)
    y = out.reshape(N, Ho_prev, Wrow_prev, C)[:, :, :Wo_prev, :]    # real (H, W) feature map
    H, W = Ho_prev, Wo_prev
    Ho, Wo = H // 2, W // 2
    Wrow = _round_up(Wo + 1, 8)
    xp = jnp.pad(y, ((0, 0), (1, 1), (1, 1), (0, 0)))[:, :2 * Ho + 2, :2 * Wo + 2, :]
    slabs = []
    for a in range(2):
        for b in range(2):
            s = xp[:, a::2, b::2, :]                                # (N, Ho+1, Wo+1, C)
            s = jnp.pad(s, ((0, 0), (0, 1), (0, Wrow - (Wo + 1)), (0, 0)))
            slabs.append(s.reshape(N, (Ho + 2) * Wrow, C))
    x4 = jnp.stack(slabs, axis=1)                                   # (N, 4, Rpad, C)
    return x4, Ho, Wo, Wrow


# ----------------------------------------------------------------------------
# pallas_call wrappers
# ----------------------------------------------------------------------------
def conv_block1(xpk, Ho, Wo, Wrow, w9, scale, shift):
    N, _, M, K = xpk.shape
    Cout = w9.shape[-1]
    w = w9.reshape(K, Cout).astype(jnp.bfloat16)
    per_img = (2 * 4 * M * _lane_pad(K) * 2          # double-buffered input block
               + 2 * M * _lane_pad(Cout) * 2         # double-buffered output block
               + 6 * M * _lane_pad(Cout) * 4)        # f32 matmul result + pool/act temps
    B = _pick_batch_tile(N, per_img)
    return pl.pallas_call(
        conv_block1_kernel,
        out_shape=jax.ShapeDtypeStruct((N * M, Cout), jnp.bfloat16),
        grid=(N // B,),
        in_specs=[
            pl.BlockSpec((B, 4, M, K), lambda n: (n, 0, 0, 0)),
            pl.BlockSpec((K, Cout), lambda n: (0, 0)),
            pl.BlockSpec((1, Cout), lambda n: (0, 0)),
            pl.BlockSpec((1, Cout), lambda n: (0, 0)),
        ],
        out_specs=pl.BlockSpec((B * M, Cout), lambda n: (n, 0)),
        compiler_params=pltpu.CompilerParams(
            dimension_semantics=("parallel",), vmem_limit_bytes=_VMEM_LIMIT),
    )(xpk, w, scale, shift)


def conv_block(x4, Ho, Wo, Wrow, w9, scale, shift):
    N, _, Rpad, Cin = x4.shape
    Cout = w9.shape[-1]
    M = Ho * Wrow
    w = w9.reshape(9 * Cin, Cout).astype(jnp.bfloat16)
    per_img = (2 * 4 * Rpad * _lane_pad(Cin) * 2     # double-buffered input slabs
               + 2 * M * _lane_pad(Cout) * 2         # double-buffered output block
               + 2 * M * _lane_pad(9 * Cin) * 2      # widened K=9*Cin patch (+ headroom)
               + 2 * M * _lane_pad(Cout) * 4)        # f32 matmul result + running max
    B = _pick_batch_tile(N, per_img)
    return pl.pallas_call(
        functools.partial(conv_block_kernel, Ho=Ho, Wrow=Wrow, Cin=Cin),
        out_shape=jax.ShapeDtypeStruct((N * M, Cout), jnp.bfloat16),
        grid=(N // B,),
        in_specs=[
            pl.BlockSpec((B, 4, Rpad, Cin), lambda n: (n, 0, 0, 0)),
            pl.BlockSpec((9 * Cin, Cout), lambda n: (0, 0)),
            pl.BlockSpec((1, Cout), lambda n: (0, 0)),
            pl.BlockSpec((1, Cout), lambda n: (0, 0)),
        ],
        out_specs=pl.BlockSpec((B * M, Cout), lambda n: (n, 0)),
        compiler_params=pltpu.CompilerParams(
            dimension_semantics=("parallel",), vmem_limit_bytes=_VMEM_LIMIT),
    )(x4, w, scale, shift)


def conv_block_head(x4, Ho, Wo, Wrow, w9, scale, shift, w_fc, b_fc):
    N, _, Rpad, Cin = x4.shape
    Cout = w9.shape[-1]
    num_class = w_fc.shape[-1]
    M = Ho * Wrow
    w = w9.reshape(9 * Cin, Cout).astype(jnp.bfloat16)
    per_img = (2 * 4 * Rpad * _lane_pad(Cin) * 2
               + 2 * M * _lane_pad(9 * Cin) * 2
               + 2 * M * _lane_pad(Cout) * 4)
    B = _pick_batch_tile(N, per_img)
    emb, logits = pl.pallas_call(
        functools.partial(conv_block_head_kernel, Ho=Ho, Wo=Wo, Wrow=Wrow, Cin=Cin),
        out_shape=(jax.ShapeDtypeStruct((N, 1, Cout), jnp.float32),
                   jax.ShapeDtypeStruct((N, 1, num_class), jnp.float32)),
        grid=(N // B,),
        in_specs=[
            pl.BlockSpec((B, 4, Rpad, Cin), lambda n: (n, 0, 0, 0)),
            pl.BlockSpec((9 * Cin, Cout), lambda n: (0, 0)),
            pl.BlockSpec((1, Cout), lambda n: (0, 0)),
            pl.BlockSpec((1, Cout), lambda n: (0, 0)),
            pl.BlockSpec((Cout, num_class), lambda n: (0, 0)),
            pl.BlockSpec((1, num_class), lambda n: (0, 0)),
        ],
        out_specs=(pl.BlockSpec((B, 1, Cout), lambda n: (n, 0, 0)),
                   pl.BlockSpec((B, 1, num_class), lambda n: (n, 0, 0))),
        compiler_params=pltpu.CompilerParams(
            dimension_semantics=("parallel",), vmem_limit_bytes=_VMEM_LIMIT),
    )(x4, w, scale, shift, w_fc, b_fc)
    return emb[:, 0, :], logits[:, 0, :]


def classifier_forward(x_nchw, params, is_emb=False):
    """Classifier.forward: encoder(x) [-> fc]."""
    x = jnp.transpose(x_nchw, (0, 2, 3, 1)).astype(jnp.bfloat16)   # NCHW -> NHWC, early bf16
    blocks = params["blocks"]

    w9, scale, shift = blocks[0]
    xpk, Ho, Wo, Wrow = _pack_first_block(x)
    out = conv_block1(xpk, Ho, Wo, Wrow, w9, scale, shift)

    for (w9, scale, shift) in blocks[1:-1]:
        x4, Ho, Wo, Wrow = _slabs_from_block_output(out, Ho, Wo, Wrow)
        out = conv_block(x4, Ho, Wo, Wrow, w9, scale, shift)

    w9, scale, shift = blocks[-1]
    w_fc, b_fc = params["fc"]
    x4, Ho, Wo, Wrow = _slabs_from_block_output(out, Ho, Wo, Wrow)
    emb, logits = conv_block_head(x4, Ho, Wo, Wrow, w9, scale, shift, w_fc, b_fc)
    return emb if is_emb else logits


# ----------------------------------------------------------------------------
# Deterministic parameter init (shapes from the PyTorch module __init__)
# ----------------------------------------------------------------------------
def init_params(key, num_class=5, x_dim=3, hid_dim=64, z_dim=64):
    params = {"blocks": []}
    chans = [x_dim, hid_dim, hid_dim, hid_dim, z_dim]
    for b in range(4):
        cin, cout = chans[b], chans[b + 1]
        key, kw, kb = jax.random.split(key, 3)
        # PyTorch conv weight: (Cout, Cin, 3, 3)
        w_pt = 0.1 * jax.random.normal(kw, (cout, cin, 3, 3), jnp.float32)
        bias = 0.1 * jax.random.normal(kb, (cout,), jnp.float32)
        # -> (ky, kx, cin, cout) -> (9, cin, cout), tap index dy*3+dx
        w9 = jnp.transpose(w_pt, (2, 3, 1, 0)).reshape(9, cin, cout)
        # BatchNorm2d eval-mode fold: gamma=1, beta=0, mean=0, var=1.
        # NOTE: the kernels apply BN+ReLU *after* the 2x2 pool max, which requires the
        # folded scale below to be strictly positive (true for these default stats).
        gamma = jnp.ones((cout,), jnp.float32)
        beta = jnp.zeros((cout,), jnp.float32)
        run_mean = jnp.zeros((cout,), jnp.float32)
        run_var = jnp.ones((cout,), jnp.float32)
        s = gamma / jnp.sqrt(run_var + BN_EPS)
        t = beta - run_mean * s
        scale = s.reshape(1, cout)
        shift = (bias * s + t).reshape(1, cout)
        params["blocks"].append((w9, scale, shift))

    key, kw, kb = jax.random.split(key, 3)
    # PyTorch fc: weight (num_class, hdim), bias (num_class,)
    w_fc_pt = 0.1 * jax.random.normal(kw, (num_class, z_dim), jnp.float32)
    b_fc = 0.1 * jax.random.normal(kb, (num_class,), jnp.float32)
    params["fc"] = (w_fc_pt.T, b_fc.reshape(1, num_class))
    return params


# ----------------------------------------------------------------------------
# Pure-JAX reference (same math / same bf16 rounding points, no Pallas)
# ----------------------------------------------------------------------------
def classifier_forward_ref(x_nchw, params):
    x = jnp.transpose(x_nchw, (0, 2, 3, 1)).astype(jnp.bfloat16)
    n_blocks = len(params["blocks"])
    for bi, (w9, scale, shift) in enumerate(params["blocks"]):
        N, H, W, Cin = x.shape
        Cout = w9.shape[-1]
        xp = jnp.pad(x, ((0, 0), (1, 1), (1, 1), (0, 0)))
        w_b = w9.astype(jnp.bfloat16)
        y = jnp.zeros((N, H, W, Cout), jnp.float32)
        for dy in range(3):
            for dx in range(3):
                y = y + jnp.einsum("nhwc,co->nhwo",
                                   xp[:, dy:dy + H, dx:dx + W, :], w_b[dy * 3 + dx],
                                   preferred_element_type=jnp.float32)
        Ho, Wo = H // 2, W // 2
        y = y[:, :2 * Ho, :2 * Wo, :].reshape(N, Ho, 2, Wo, 2, Cout)
        pooled = jnp.max(jnp.max(y, axis=4), axis=2)
        act = jnp.maximum(pooled * scale[None] + shift[None], 0.0)
        # Blocks 1..n-1 are stored in bf16 by the kernels; the fused head keeps f32.
        x = act.astype(jnp.bfloat16) if bi < n_blocks - 1 else act
    emb = jnp.max(x.reshape(x.shape[0], -1, x.shape[-1]), axis=1)
    w_fc, b_fc = params["fc"]
    return emb, emb @ w_fc + b_fc


# ----------------------------------------------------------------------------
if __name__ == "__main__":
    key = jax.random.PRNGKey(0)
    kx, kp = jax.random.split(key)

    # Small, shape-consistent input: batch=2, RGB, 32x32 (32 -> 16 -> 8 -> 4 -> 2 -> global max)
    x = jax.random.normal(kx, (2, 3, 32, 32), jnp.float32)       # NCHW like PyTorch
    params = init_params(kp, num_class=5)

    fwd_logits = jax.jit(functools.partial(classifier_forward, is_emb=False))
    fwd_emb = jax.jit(functools.partial(classifier_forward, is_emb=True))
    logits = fwd_logits(x, params)
    emb = fwd_emb(x, params)
    jax.block_until_ready((logits, emb))

    emb_ref, logits_ref = classifier_forward_ref(x, params)
    assert logits.shape == (2, 5), logits.shape
    assert emb.shape == (2, 64), emb.shape
    assert jnp.allclose(logits, logits_ref, atol=1e-2, rtol=1e-2), (
        float(jnp.max(jnp.abs(logits - logits_ref))))
    assert jnp.allclose(emb, emb_ref, atol=1e-2, rtol=1e-2), (
        float(jnp.max(jnp.abs(emb - emb_ref))))

    print("KERNEL_OK")
</pallas_src>

<mosaic_0001>
module attributes {stable_mosaic.version = 11 : i64} {
  func.func @conv_block1_kernel(%arg0: i32, %arg1: memref<1x4x384x27xbf16, #tpu.memory_space<vmem>>, %arg2: memref<27x64xbf16, #tpu.memory_space<vmem>>, %arg3: memref<1x64xf32, #tpu.memory_space<vmem>>, %arg4: memref<1x64xf32, #tpu.memory_space<vmem>>, %arg5: memref<384x64xbf16, #tpu.memory_space<vmem>>) attributes {dimension_semantics = [#tpu.dimension_semantics<parallel>], iteration_bounds = array<i64: 2>, scalar_prefetch = 0 : i64, scratch_operands = 0 : i64, tpu.core_type = #tpu.core_type<tc>, window_params = [{transform_indices = @transform_0, window_bounds = array<i64: 1, 4, 384, 27>}, {pipeline_mode = #tpu.pipeline_mode<synchronous>, transform_indices = @transform_1, window_bounds = array<i64: 27, 64>}, {pipeline_mode = #tpu.pipeline_mode<synchronous>, transform_indices = @transform_2, window_bounds = array<i64: 1, 64>}, {pipeline_mode = #tpu.pipeline_mode<synchronous>, transform_indices = @transform_3, window_bounds = array<i64: 1, 64>}, {transform_indices = @transform_4, window_bounds = array<i64: 384, 64>}]} {
    %c0 = arith.constant 0 : index
    %c0_0 = arith.constant 0 : index
    %c0_1 = arith.constant 0 : index
    %c0_2 = arith.constant 0 : index
    %0 = vector.load %arg1[%c0, %c0_0, %c0_1, %c0_2] : memref<1x4x384x27xbf16, #tpu.memory_space<vmem>>, vector<1x4x384x27xbf16>
    %1 = vector.shape_cast %0 : vector<1x4x384x27xbf16> to vector<1536x27xbf16>
    %c0_3 = arith.constant 0 : index
    %c0_4 = arith.constant 0 : index
    %2 = vector.load %arg2[%c0_3, %c0_4] : memref<27x64xbf16, #tpu.memory_space<vmem>>, vector<27x64xbf16>
    %cst = arith.constant dense<0.000000e+00> : vector<1536x64xf32>
    %3 = tpu.matmul %1, %2, %cst {dimension_numbers = #tpu.dot_dimension_numbers<[1], [0], [0], [1], [0, 0, 1, 1], [], []>} : vector<1536x27xbf16>, vector<27x64xbf16>, vector<1536x64xf32> -> vector<1536x64xf32>
    %4 = vector.shape_cast %3 : vector<1536x64xf32> to vector<1x4x384x64xf32>
    %5 = vector.extract_strided_slice %4 {offsets = [0, 0, 0, 0], sizes = [1, 1, 384, 64], strides = [1, 1, 1, 1]} : vector<1x4x384x64xf32> to vector<1x1x384x64xf32>
    %6 = vector.shape_cast %5 : vector<1x1x384x64xf32> to vector<1x384x64xf32>
    %7 = vector.extract_strided_slice %4 {offsets = [0, 1, 0, 0], sizes = [1, 1, 384, 64], strides = [1, 1, 1, 1]} : vector<1x4x384x64xf32> to vector<1x1x384x64xf32>
    %8 = vector.shape_cast %7 : vector<1x1x384x64xf32> to vector<1x384x64xf32>
    %9 = arith.maximumf %6, %8 : vector<1x384x64xf32>
    %10 = vector.extract_strided_slice %4 {offsets = [0, 2, 0, 0], sizes = [1, 1, 384, 64], strides = [1, 1, 1, 1]} : vector<1x4x384x64xf32> to vector<1x1x384x64xf32>
    %11 = vector.shape_cast %10 : vector<1x1x384x64xf32> to vector<1x384x64xf32>
    %12 = vector.extract_strided_slice %4 {offsets = [0, 3, 0, 0], sizes = [1, 1, 384, 64], strides = [1, 1, 1, 1]} : vector<1x4x384x64xf32> to vector<1x1x384x64xf32>
    %13 = vector.shape_cast %12 : vector<1x1x384x64xf32> to vector<1x384x64xf32>
    %14 = arith.maximumf %11, %13 : vector<1x384x64xf32>
    %15 = arith.maximumf %9, %14 : vector<1x384x64xf32>
    %16 = vector.shape_cast %15 : vector<1x384x64xf32> to vector<384x64xf32>
    %c0_5 = arith.constant 0 : index
    %c0_6 = arith.constant 0 : index
    %17 = vector.load %arg3[%c0_5, %c0_6] : memref<1x64xf32, #tpu.memory_space<vmem>>, vector<1x64xf32>
    %18 = vector.broadcast %17 : vector<1x64xf32> to vector<384x64xf32>
    %19 = arith.mulf %16, %18 : vector<384x64xf32>
    %c0_7 = arith.constant 0 : index
    %c0_8 = arith.constant 0 : index
    %20 = vector.load %arg4[%c0_7, %c0_8] : memref<1x64xf32, #tpu.memory_space<vmem>>, vector<1x64xf32>
    %21 = vector.broadcast %20 : vector<1x64xf32> to vector<384x64xf32>
    %22 = arith.addf %19, %21 : vector<384x64xf32>
    %cst_9 = arith.constant 0.000000e+00 : f32
    %23 = vector.broadcast %cst_9 : f32 to vector<384x64xf32>
    %24 = arith.maximumf %22, %23 : vector<384x64xf32>
    %25 = arith.truncf %24 : vector<384x64xf32> to vector<384x64xbf16>
    %c0_10 = arith.constant 0 : index
    %c0_11 = arith.constant 0 : index
    %26 = vector.load %arg5[%c0_10, %c0_11] : memref<384x64xbf16, #tpu.memory_space<vmem>>, vector<384x64xbf16>
    tpu.vector_store %arg5[%c0_10, %c0_11], %25 {strides = array<i32>} : memref<384x64xbf16, #tpu.memory_space<vmem>>, vector<384x64xbf16>,
    return
  }
  func.func @transform_0(%arg0: i32) -> (i32, i32, i32, i32) {
    %c0_i32 = arith.constant 0 : i32
    %c0_i32_0 = arith.constant 0 : i32
    %c0_i32_1 = arith.constant 0 : i32
    %c0_i32_2 = arith.constant 0 : i32
    return %arg0, %c0_i32, %c0_i32_0, %c0_i32_1 : i32, i32, i32, i32
  }
  func.func @transform_1(%arg0: i32) -> (i32, i32) {
    %c0_i32 = arith.constant 0 : i32
    %c0_i32_0 = arith.constant 0 : i32
    %c0_i32_1 = arith.constant 0 : i32
    return %c0_i32, %c0_i32_0 : i32, i32
  }
  func.func @transform_2(%arg0: i32) -> (i32, i32) {
    %c0_i32 = arith.constant 0 : i32
    %c0_i32_0 = arith.constant 0 : i32
    %c0_i32_1 = arith.constant 0 : i32
    return %c0_i32, %c0_i32_0 : i32, i32
  }
  func.func @transform_3(%arg0: i32) -> (i32, i32) {
    %c0_i32 = arith.constant 0 : i32
    %c0_i32_0 = arith.constant 0 : i32
    %c0_i32_1 = arith.constant 0 : i32
    return %c0_i32, %c0_i32_0 : i32, i32
  }
  func.func @transform_4(%arg0: i32) -> (i32, i32) {
    %c0_i32 = arith.constant 0 : i32
    %c0_i32_0 = arith.constant 0 : i32
    return %arg0, %c0_i32 : i32, i32
  }
}

module attributes {stable_mosaic.version = 11 : i64} {
  func.func @conv_block_kernel(%arg0: i32, %arg1: memref<1x4x160x64xbf16, #tpu.memory_space<vmem>>, %arg2: memref<576x64xbf16, #tpu.memory_space<vmem>>, %arg3: memref<1x64xf32, #tpu.memory_space<vmem>>, %arg4: memref<1x64xf32, #tpu.memory_space<vmem>>, %arg5: memref<128x64xbf16, #tpu.memory_space<vmem>>) attributes {dimension_semantics = [#tpu.dimension_semantics<parallel>], iteration_bounds = array<i64: 2>, scalar_prefetch = 0 : i64, scratch_operands = 0 : i64, tpu.core_type = #tpu.core_type<tc>, window_params = [{transform_indices = @transform_0, window_bounds = array<i64: 1, 4, 160, 64>}, {pipeline_mode = #tpu.pipeline_mode<synchronous>, transform_indices = @transform_1, window_bounds = array<i64: 576, 64>}, {pipeline_mode = #tpu.pipeline_mode<synchronous>, transform_indices = @transform_2, window_bounds = array<i64: 1, 64>}, {pipeline_mode = #tpu.pipeline_mode<synchronous>, transform_indices = @transform_3, window_bounds = array<i64: 1, 64>}, {transform_indices = @transform_4, window_bounds = array<i64: 128, 64>}]} {
    %c0 = arith.constant 0 : index
    %c0_0 = arith.constant 0 : index
    %c0_1 = arith.constant 0 : index
    %c0_2 = arith.constant 0 : index
    %0 = vector.load %arg1[%c0, %c0_0, %c0_1, %c0_2] : memref<1x4x160x64xbf16, #tpu.memory_space<vmem>>, vector<1x1x128x64xbf16>
    %1 = vector.shape_cast %0 : vector<1x1x128x64xbf16> to vector<1x128x64xbf16>
    %c0_3 = arith.constant 0 : index
    %c1 = arith.constant 1 : index
    %c0_4 = arith.constant 0 : index
    %c0_5 = arith.constant 0 : index
    %2 = vector.load %arg1[%c0_3, %c1, %c0_4, %c0_5] : memref<1x4x160x64xbf16, #tpu.memory_space<vmem>>, vector<1x1x128x64xbf16>
    %3 = vector.shape_cast %2 : vector<1x1x128x64xbf16> to vector<1x128x64xbf16>
    %c0_6 = arith.constant 0 : index
    %c0_7 = arith.constant 0 : index
    %c1_8 = arith.constant 1 : index
    %c0_9 = arith.constant 0 : index
    %4 = vector.load %arg1[%c0_6, %c0_7, %c1_8, %c0_9] : memref<1x4x160x64xbf16, #tpu.memory_space<vmem>>, vector<1x1x128x64xbf16>
    %5 = vector.shape_cast %4 : vector<1x1x128x64xbf16> to vector<1x128x64xbf16>
    %c0_10 = arith.constant 0 : index
    %c2 = arith.constant 2 : index
    %c0_11 = arith.constant 0 : index
    %c0_12 = arith.constant 0 : index
    %6 = vector.load %arg1[%c0_10, %c2, %c0_11, %c0_12] : memref<1x4x160x64xbf16, #tpu.memory_space<vmem>>, vector<1x1x128x64xbf16>
    %7 = vector.shape_cast %6 : vector<1x1x128x64xbf16> to vector<1x128x64xbf16>
    %c0_13 = arith.constant 0 : index
    %c3 = arith.constant 3 : index
    %c0_14 = arith.constant 0 : index
    %c0_15 = arith.constant 0 : index
    %8 = vector.load %arg1[%c0_13, %c3, %c0_14, %c0_15] : memref<1x4x160x64xbf16, #tpu.memory_space<vmem>>, vector<1x1x128x64xbf16>
    %9 = vector.shape_cast %8 : vector<1x1x128x64xbf16> to vector<1x128x64xbf16>
    %c0_16 = arith.constant 0 : index
    %c2_17 = arith.constant 2 : index
    %c1_18 = arith.constant 1 : index
    %c0_19 = arith.constant 0 : index
    %10 = vector.load %arg1[%c0_16, %c2_17, %c1_18, %c0_19] : memref<1x4x160x64xbf16, #tpu.memory_space<vmem>>, vector<1x1x128x64xbf16>
    %11 = vector.shape_cast %10 : vector<1x1x128x64xbf16> to vector<1x128x64xbf16>
    %c0_20 = arith.constant 0 : index
    %c0_21 = arith.constant 0 : index
    %c16 = arith.constant 16 : index
    %c0_22 = arith.constant 0 : index
    %12 = vector.load %arg1[%c0_20, %c0_21, %c16, %c0_22] : memref<1x4x160x64xbf16, #tpu.memory_space<vmem>>, vector<1x1x128x64xbf16>
    %13 = vector.shape_cast %12 : vector<1x1x128x64xbf16> to vector<1x128x64xbf16>
    %c0_23 = arith.constant 0 : index
    %c1_24 = arith.constant 1 : index
    %c16_25 = arith.constant 16 : index
    %c0_26 = arith.constant 0 : index
    %14 = vector.load %arg1[%c0_23, %c1_24, %c16_25, %c0_26] : memref<1x4x160x64xbf16, #tpu.memory_space<vmem>>, vector<1x1x128x64xbf16>
    %15 = vector.shape_cast %14 : vector<1x1x128x64xbf16> to vector<1x128x64xbf16>
    %c0_27 = arith.constant 0 : index
    %c0_28 = arith.constant 0 : index
    %c17 = arith.constant 17 : index
    %c0_29 = arith.constant 0 : index
    %16 = vector.load %arg1[%c0_27, %c0_28, %c17, %c0_29] : memref<1x4x160x64xbf16, #tpu.memory_space<vmem>>, vector<1x1x128x64xbf16>
    %17 = vector.shape_cast %16 : vector<1x1x128x64xbf16> to vector<1x128x64xbf16>
    %18 = tpu.concatenate %1, %3, %5, %7, %9, %11, %13, %15, %17 in 2 : vector<1x128x64xbf16>, vector<1x128x64xbf16>, vector<1x128x64xbf16>, vector<1x128x64xbf16>, vector<1x128x64xbf16>, vector<1x128x64xbf16>, vector<1x128x64xbf16>, vector<1x128x64xbf16>, vector<1x128x64xbf16> -> vector<1x128x576xbf16>
    %19 = vector.shape_cast %18 : vector<1x128x576xbf16> to vector<128x576xbf16>
    %c0_30 = arith.constant 0 : index
    %c0_31 = arith.constant 0 : index
    %20 = vector.load %arg2[%c0_30, %c0_31] : memref<576x64xbf16, #tpu.memory_space<vmem>>, vector<576x64xbf16>
    %cst = arith.constant dense<0.000000e+00> : vector<128x64xf32>
    %21 = tpu.matmul %19, %20, %cst {dimension_numbers = #tpu.dot_dimension_numbers<[1], [0], [0], [1], [0, 0, 1, 1], [], []>} : vector<128x576xbf16>, vector<576x64xbf16>, vector<128x64xf32> -> vector<128x64xf32>
    %c0_32 = arith.constant 0 : index
    %c1_33 = arith.constant 1 : index
    %c0_34 = arith.constant 0 : index
    %c0_35 = arith.constant 0 : index
    %22 = vector.load %arg1[%c0_32, %c1_33, %c0_34, %c0_35] : memref<1x4x160x64xbf16, #tpu.memory_space<vmem>>, vector<1x1x128x64xbf16>
    %23 = vector.shape_cast %22 : vector<1x1x128x64xbf16> to vector<1x128x64xbf16>
    %c0_36 = arith.constant 0 : index
    %c0_37 = arith.constant 0 : index
    %c1_38 = arith.constant 1 : index
    %c0_39 = arith.constant 0 : index
    %24 = vector.load %arg1[%c0_36, %c0_37, %c1_38, %c0_39] : memref<1x4x160x64xbf16, #tpu.memory_space<vmem>>, vector<1x1x128x64xbf16>
    %25 = vector.shape_cast %24 : vector<1x1x128x64xbf16> to vector<1x128x64xbf16>
    %c0_40 = arith.constant 0 : index
    %c1_41 = arith.constant 1 : index
    %c1_42 = arith.constant 1 : index
    %c0_43 = arith.constant 0 : index
    %26 = vector.load %arg1[%c0_40, %c1_41, %c1_42, %c0_43] : memref<1x4x160x64xbf16, #tpu.memory_space<vmem>>, vector<1x1x128x64xbf16>
    %27 = vector.shape_cast %26 : vector<1x1x128x64xbf16> to vector<1x128x64xbf16>
    %c0_44 = arith.constant 0 : index
    %c3_45 = arith.constant 3 : index
    %c0_46 = arith.constant 0 : index
    %c0_47 = arith.constant 0 : index
    %28 = vector.load %arg1[%c0_44, %c3_45, %c0_46, %c0_47] : memref<1x4x160x64xbf16, #tpu.memory_space<vmem>>, vector<1x1x128x64xbf16>
    %29 = vector.shape_cast %28 : vector<1x1x128x64xbf16> to vector<1x128x64xbf16>
    %c0_48 = arith.constant 0 : index
    %c2_49 = arith.constant 2 : index
    %c1_50 = arith.constant 1 : index
    %c0_51 = arith.constant 0 : index
    %30 = vector.load %arg1[%c0_48, %c2_49, %c1_50, %c0_51] : memref<1x4x160x64xbf16, #tpu.memory_space<vmem>>, vector<1x1x128x64xbf16>
    %31 = vector.shape_cast %30 : vector<1x1x128x64xbf16> to vector<1x128x64xbf16>
    %c0_52 = arith.constant 0 : index
    %c3_53 = arith.constant 3 : index
    %c1_54 = arith.constant 1 : index
    %c0_55 = arith.constant 0 : index
    %32 = vector.load %arg1[%c0_52, %c3_53, %c1_54, %c0_55] : memref<1x4x160x64xbf16, #tpu.memory_space<vmem>>, vector<1x1x128x64xbf16>
    %33 = vector.shape_cast %32 : vector<1x1x128x64xbf16> to vector<1x128x64xbf16>
    %c0_56 = arith.constant 0 : index
    %c1_57 = arith.constant 1 : index
    %c16_58 = arith.constant 16 : index
    %c0_59 = arith.constant 0 : index
    %34 = vector.load %arg1[%c0_56, %c1_57, %c16_58, %c0_59] : memref<1x4x160x64xbf16, #tpu.memory_space<vmem>>, vector<1x1x128x64xbf16>
    %35 = vector.shape_cast %34 : vector<1x1x128x64xbf16> to vector<1x128x64xbf16>
    %c0_60 = arith.constant 0 : index
    %c0_61 = arith.constant 0 : index
    %c17_62 = arith.constant 17 : index
    %c0_63 = arith.constant 0 : index
    %36 = vector.load %arg1[%c0_60, %c0_61, %c17_62, %c0_63] : memref<1x4x160x64xbf16, #tpu.memory_space<vmem>>, vector<1x1x128x64xbf16>
    %37 = vector.shape_cast %36 : vector<1x1x128x64xbf16> to vector<1x128x64xbf16>
    %c0_64 = arith.constant 0 : index
    %c1_65 = arith.constant 1 : index
    %c17_66 = arith.constant 17 : index
    %c0_67 = arith.constant 0 : index
    %38 = vector.load %arg1[%c0_64, %c1_65, %c17_66, %c0_67] : memref<1x4x160x64xbf16, #tpu.memory_space<vmem>>, vector<1x1x128x64xbf16>
    %39 = vector.shape_cast %38 : vector<1x1x128x64xbf16> to vector<1x128x64xbf16>
    %40 = tpu.concatenate %23, %25, %27, %29, %31, %33, %35, %37, %39 in 2 : vector<1x128x64xbf16>, vector<1x128x64xbf16>, vector<1x128x64xbf16>, vector<1x128x64xbf16>, vector<1x128x64xbf16>, vector<1x128x64xbf16>, vector<1x128x64xbf16>, vector<1x128x64xbf16>, vector<1x128x64xbf16> -> vector<1x128x576xbf16>
    %41 = vector.shape_cast %40 : vector<1x128x576xbf16> to vector<128x576xbf16>
    %c0_68 = arith.constant 0 : index
    %c0_69 = arith.constant 0 : index
    %42 = vector.load %arg2[%c0_68, %c0_69] : memref<576x64xbf16, #tpu.memory_space<vmem>>, vector<576x64xbf16>
    %cst_70 = arith.constant dense<0.000000e+00> : vector<128x64xf32>
    %43 = tpu.matmul %41, %42, %cst_70 {dimension_numbers = #tpu.dot_dimension_numbers<[1], [0], [0], [1], [0, 0, 1, 1], [], []>} : vector<128x576xbf16>, vector<576x64xbf16>, vector<128x64xf32> -> vector<128x64xf32>
    %44 = arith.maximumf %21, %43 : vector<128x64xf32>
    %c0_71 = arith.constant 0 : index
    %c2_72 = arith.constant 2 : index
    %c0_73 = arith.constant 0 : index
    %c0_74 = arith.constant 0 : index
    %45 = vector.load %arg1[%c0_71, %c2_72, %c0_73, %c0_74] : memref<1x4x160x64xbf16, #tpu.memory_space<vmem>>, vector<1x1x128x64xbf16>
    %46 = vector.shape_cast %45 : vector<1x1x128x64xbf16> to vector<1x128x64xbf16>
    %c0_75 = arith.constant 0 : index
    %c3_76 = arith.constant 3 : index
    %c0_77 = arith.constant 0 : index
    %c0_78 = arith.constant 0 : index
    %47 = vector.load %arg1[%c0_75, %c3_76, %c0_77, %c0_78] : memref<1x4x160x64xbf16, #tpu.memory_space<vmem>>, vector<1x1x128x64xbf16>
    %48 = vector.shape_cast %47 : vector<1x1x128x64xbf16> to vector<1x128x64xbf16>
    %c0_79 = arith.constant 0 : index
    %c2_80 = arith.constant 2 : index
    %c1_81 = arith.constant 1 : index
    %c0_82 = arith.constant 0 : index
    %49 = vector.load %arg1[%c0_79, %c2_80, %c1_81, %c0_82] : memref<1x4x160x64xbf16, #tpu.memory_space<vmem>>, vector<1x1x128x64xbf16>
    %50 = vector.shape_cast %49 : vector<1x1x128x64xbf16> to vector<1x128x64xbf16>
    %c0_83 = arith.constant 0 : index
    %c0_84 = arith.constant 0 : index
    %c16_85 = arith.constant 16 : index
    %c0_86 = arith.constant 0 : index
    %51 = vector.load %arg1[%c0_83, %c0_84, %c16_85, %c0_86] : memref<1x4x160x64xbf16, #tpu.memory_space<vmem>>, vector<1x1x128x64xbf16>
    %52 = vector.shape_cast %51 : vector<1x1x128x64xbf16> to vector<1x128x64xbf16>
    %c0_87 = arith.constant 0 : index
    %c1_88 = arith.constant 1 : index
    %c16_89 = arith.constant 16 : index
    %c0_90 = arith.constant 0 : index
    %53 = vector.load %arg1[%c0_87, %c1_88, %c16_89, %c0_90] : memref<1x4x160x64xbf16, #tpu.memory_space<vmem>>, vector<1x1x128x64xbf16>
    %54 = vector.shape_cast %53 : vector<1x1x128x64xbf16> to vector<1x128x64xbf16>
    %c0_91 = arith.constant 0 : index
    %c0_92 = arith.constant 0 : index
    %c17_93 = arith.constant 17 : index
    %c0_94 = arith.constant 0 : index
    %55 = vector.load %arg1[%c0_91, %c0_92, %c17_93, %c0_94] : memref<1x4x160x64xbf16, #tpu.memory_space<vmem>>, vector<1x1x128x64xbf16>
    %56 = vector.shape_cast %55 : vector<1x1x128x64xbf16> to vector<1x128x64xbf16>
    %c0_95 = arith.constant 0 : index
    %c2_96 = arith.constant 2 : index
    %c16_97 = arith.constant 16 : index
    %c0_98 = arith.constant 0 : index
    %57 = vector.load %arg1[%c0_95, %c2_96, %c16_97, %c0_98] : memref<1x4x160x64xbf16, #tpu.memory_space<vmem>>, vector<1x1x128x64xbf16>
    %58 = vector.shape_cast %57 : vector<1x1x128x64xbf16> to vector<1x128x64xbf16>
    %c0_99 = arith.constant 0 : index
    %c3_100 = arith.constant 3 : index
    %c16_101 = arith.constant 16 : index
    %c0_102 = arith.constant 0 : index
    %59 = vector.load %arg1[%c0_99, %c3_100, %c16_101, %c0_102] : memref<1x4x160x64xbf16, #tpu.memory_space<vmem>>, vector<1x1x128x64xbf16>
    %60 = vector.shape_cast %59 : vector<1x1x128x64xbf16> to vector<1x128x64xbf16>
    %c0_103 = arith.constant 0 : index
    %c2_104 = arith.constant 2 : index
    %c17_105 = arith.constant 17 : index
    %c0_106 = arith.constant 0 : index
    %61 = vector.load %arg1[%c0_103, %c2_104, %c17_105, %c0_106] : memref<1x4x160x64xbf16, #tpu.memory_space<vmem>>, vector<1x1x128x64xbf16>
    %62 = vector.shape_cast %61 : vector<1x1x128x64xbf16> to vector<1x128x64xbf16>
    %63 = tpu.concatenate %46, %48, %50, %52, %54, %56, %58, %60, %62 in 2 : vector<1x128x64xbf16>, vector<1x128x64xbf16>, vector<1x128x64xbf16>, vector<1x128x64xbf16>, vector<1x128x64xbf16>, vector<1x128x64xbf16>, vector<1x128x64xbf16>, vector<1x128x64xbf16>, vector<1x128x64xbf16> -> vector<1x128x576xbf16>
    %64 = vector.shape_cast %63 : vector<1x128x576xbf16> to vector<128x576xbf16>
    %c0_107 = arith.constant 0 : index
    %c0_108 = arith.constant 0 : index
    %65 = vector.load %arg2[%c0_107, %c0_108] : memref<576x64xbf16, #tpu.memory_space<vmem>>, vector<576x64xbf16>
    %cst_109 = arith.constant dense<0.000000e+00> : vector<128x64xf32>
    %66 = tpu.matmul %64, %65, %cst_109 {dimension_numbers = #tpu.dot_dimension_numbers<[1], [0], [0], [1], [0, 0, 1, 1], [], []>} : vector<128x576xbf16>, vector<576x64xbf16>, vector<128x64xf32> -> vector<128x64xf32>
    %67 = arith.maximumf %44, %66 : vector<128x64xf32>
    %c0_110 = arith.constant 0 : index
    %c3_111 = arith.constant 3 : index
    %c0_112 = arith.constant 0 : index
    %c0_113 = arith.constant 0 : index
    %68 = vector.load %arg1[%c0_110, %c3_111, %c0_112, %c0_113] : memref<1x4x160x64xbf16, #tpu.memory_space<vmem>>, vector<1x1x128x64xbf16>
    %69 = vector.shape_cast %68 : vector<1x1x128x64xbf16> to vector<1x128x64xbf16>
    %c0_114 = arith.constant 0 : index
    %c2_115 = arith.constant 2 : index
    %c1_116 = arith.constant 1 : index
    %c0_117 = arith.constant 0 : index
    %70 = vector.load %arg1[%c0_114, %c2_115, %c1_116, %c0_117] : memref<1x4x160x64xbf16, #tpu.memory_space<vmem>>, vector<1x1x128x64xbf16>
    %71 = vector.shape_cast %70 : vector<1x1x128x64xbf16> to vector<1x128x64xbf16>
    %c0_118 = arith.constant 0 : index
    %c3_119 = arith.constant 3 : index
    %c1_120 = arith.constant 1 : index
    %c0_121 = arith.constant 0 : index
    %72 = vector.load %arg1[%c0_118, %c3_119, %c1_120, %c0_121] : memref<1x4x160x64xbf16, #tpu.memory_space<vmem>>, vector<1x1x128x64xbf16>
    %73 = vector.shape_cast %72 : vector<1x1x128x64xbf16> to vector<1x128x64xbf16>
    %c0_122 = arith.constant 0 : index
    %c1_123 = arith.constant 1 : index
    %c16_124 = arith.constant 16 : index
    %c0_125 = arith.constant 0 : index
    %74 = vector.load %arg1[%c0_122, %c1_123, %c16_124, %c0_125] : memref<1x4x160x64xbf16, #tpu.memory_space<vmem>>, vector<1x1x128x64xbf16>
    %75 = vector.shape_cast %74 : vector<1x1x128x64xbf16> to vector<1x128x64xbf16>
    %c0_126 = arith.constant 0 : index
    %c0_127 = arith.constant 0 : index
    %c17_128 = arith.constant 17 : index
    %c0_129 = arith.constant 0 : index
    %76 = vector.load %arg1[%c0_126, %c0_127, %c17_128, %c0_129] : memref<1x4x160x64xbf16, #tpu.memory_space<vmem>>, vector<1x1x128x64xbf16>
    %77 = vector.shape_cast %76 : vector<1x1x128x64xbf16> to vector<1x128x64xbf16>
    %c0_130 = arith.constant 0 : index
    %c1_131 = arith.constant 1 : index
    %c17_132 = arith.constant 17 : index
    %c0_133 = arith.constant 0 : index
    %78 = vector.load %arg1[%c0_130, %c1_131, %c17_132, %c0_133] : memref<1x4x160x64xbf16, #tpu.memory_space<vmem>>, vector<1x1x128x64xbf16>
    %79 = vector.shape_cast %78 : vector<1x1x128x64xbf16> to vector<1x128x64xbf16>
    %c0_134 = arith.constant 0 : index
    %c3_135 = arith.constant 3 : index
    %c16_136 = arith.constant 16 : index
    %c0_137 = arith.constant 0 : index
    %80 = vector.load %arg1[%c0_134, %c3_135, %c16_136, %c0_137] : memref<1x4x160x64xbf16, #tpu.memory_space<vmem>>, vector<1x1x128x64xbf16>
    %81 = vector.shape_cast %80 : vector<1x1x128x64xbf16> to vector<1x128x64xbf16>
    %c0_138 = arith.constant 0 : index
    %c2_139 = arith.constant 2 : index
    %c17_140 = arith.constant 17 : index
    %c0_141 = arith.constant 0 : index
    %82 = vector.load %arg1[%c0_138, %c2_139, %c17_140, %c0_141] : memref<1x4x160x64xbf16, #tpu.memory_space<vmem>>, vector<1x1x128x64xbf16>
    %83 = vector.shape_cast %82 : vector<1x1x128x64xbf16> to vector<1x128x64xbf16>
    %c0_142 = arith.constant 0 : index
    %c3_143 = arith.constant 3 : index
    %c17_144 = arith.constant 17 : index
    %c0_145 = arith.constant 0 : index
    %84 = vector.load %arg1[%c0_142, %c3_143, %c17_144, %c0_145] : memref<1x4x160x64xbf16, #tpu.memory_space<vmem>>, vector<1x1x128x64xbf16>
    %85 = vector.shape_cast %84 : vector<1x1x128x64xbf16> to vector<1x128x64xbf16>
    %86 = tpu.concatenate %69, %71, %73, %75, %77, %79, %81, %83, %85 in 2 : vector<1x128x64xbf16>, vector<1x128x64xbf16>, vector<1x128x64xbf16>, vector<1x128x64xbf16>, vector<1x128x64xbf16>, vector<1x128x64xbf16>, vector<1x128x64xbf16>, vector<1x128x64xbf16>, vector<1x128x64xbf16> -> vector<1x128x576xbf16>
    %87 = vector.shape_cast %86 : vector<1x128x576xbf16> to vector<128x576xbf16>
    %c0_146 = arith.constant 0 : index
    %c0_147 = arith.constant 0 : index
    %88 = vector.load %arg2[%c0_146, %c0_147] : memref<576x64xbf16, #tpu.memory_space<vmem>>, vector<576x64xbf16>
    %cst_148 = arith.constant dense<0.000000e+00> : vector<128x64xf32>
    %89 = tpu.matmul %87, %88, %cst_148 {dimension_numbers = #tpu.dot_dimension_numbers<[1], [0], [0], [1], [0, 0, 1, 1], [], []>} : vector<128x576xbf16>, vector<576x64xbf16>, vector<128x64xf32> -> vector<128x64xf32>
    %90 = arith.maximumf %67, %89 : vector<128x64xf32>
    %c0_149 = arith.constant 0 : index
    %c0_150 = arith.constant 0 : index
    %91 = vector.load %arg3[%c0_149, %c0_150] : memref<1x64xf32, #tpu.memory_space<vmem>>, vector<1x64xf32>
    %92 = vector.broadcast %91 : vector<1x64xf32> to vector<128x64xf32>
    %93 = arith.mulf %90, %92 : vector<128x64xf32>
    %c0_151 = arith.constant 0 : index
    %c0_152 = arith.constant 0 : index
    %94 = vector.load %arg4[%c0_151, %c0_152] : memref<1x64xf32, #tpu.memory_space<vmem>>, vector<1x64xf32>
    %95 = vector.broadcast %94 : vector<1x64xf32> to vector<128x64xf32>
    %96 = arith.addf %93, %95 : vector<128x64xf32>
    %cst_153 = arith.constant 0.000000e+00 : f32
    %97 = vector.broadcast %cst_153 : f32 to vector<128x64xf32>
    %98 = arith.maximumf %96, %97 : vector<128x64xf32>
    %99 = arith.truncf %98 : vector<128x64xf32> to vector<128x64xbf16>
    %c0_154 = arith.constant 0 : index
    %c0_155 = arith.constant 0 : index
    %100 = vector.load %arg5[%c0_154, %c0_155] : memref<128x64xbf16, #tpu.memory_space<vmem>>, vector<128x64xbf16>
    tpu.vector_store %arg5[%c0_154, %c0_155], %99 {strides = array<i32>} : memref<128x64xbf16, #tpu.memory_space<vmem>>, vector<128x64xbf16>,
    return
  }
  func.func @transform_0(%arg0: i32) -> (i32, i32, i32, i32) {
    %c0_i32 = arith.constant 0 : i32
    %c0_i32_0 = arith.constant 0 : i32
    %c0_i32_1 = arith.constant 0 : i32
    %c0_i32_2 = arith.constant 0 : i32
    return %arg0, %c0_i32, %c0_i32_0, %c0_i32_1 : i32, i32, i32, i32
  }
  func.func @transform_1(%arg0: i32) -> (i32, i32) {
    %c0_i32 = arith.constant 0 : i32
    %c0_i32_0 = arith.constant 0 : i32
    %c0_i32_1 = arith.constant 0 : i32
    return %c0_i32, %c0_i32_0 : i32, i32
  }
  func.func @transform_2(%arg0: i32) -> (i32, i32) {
    %c0_i32 = arith.constant 0 : i32
    %c0_i32_0 = arith.constant 0 : i32
    %c0_i32_1 = arith.constant 0 : i32
    return %c0_i32, %c0_i32_0 : i32, i32
  }
  func.func @transform_3(%arg0: i32) -> (i32, i32) {
    %c0_i32 = arith.constant 0 : i32
    %c0_i32_0 = arith.constant 0 : i32
    %c0_i32_1 = arith.constant 0 : i32
    return %c0_i32, %c0_i32_0 : i32, i32
  }
  func.func @transform_4(%arg0: i32) -> (i32, i32) {
    %c0_i32 = arith.constant 0 : i32
    %c0_i32_0 = arith.constant 0 : i32
    return %arg0, %c0_i32 : i32, i32
  }
}

module attributes {stable_mosaic.version = 11 : i64} {
  func.func @conv_block_kernel(%arg0: i32, %arg1: memref<1x4x48x64xbf16, #tpu.memory_space<vmem>>, %arg2: memref<576x64xbf16, #tpu.memory_space<vmem>>, %arg3: memref<1x64xf32, #tpu.memory_space<vmem>>, %arg4: memref<1x64xf32, #tpu.memory_space<vmem>>, %arg5: memref<32x64xbf16, #tpu.memory_space<vmem>>) attributes {dimension_semantics = [#tpu.dimension_semantics<parallel>], iteration_bounds = array<i64: 2>, scalar_prefetch = 0 : i64, scratch_operands = 0 : i64, tpu.core_type = #tpu.core_type<tc>, window_params = [{transform_indices = @transform_0, window_bounds = array<i64: 1, 4, 48, 64>}, {pipeline_mode = #tpu.pipeline_mode<synchronous>, transform_indices = @transform_1, window_bounds = array<i64: 576, 64>}, {pipeline_mode = #tpu.pipeline_mode<synchronous>, transform_indices = @transform_2, window_bounds = array<i64: 1, 64>}, {pipeline_mode = #tpu.pipeline_mode<synchronous>, transform_indices = @transform_3, window_bounds = array<i64: 1, 64>}, {transform_indices = @transform_4, window_bounds = array<i64: 32, 64>}]} {
    %c0 = arith.constant 0 : index
    %c0_0 = arith.constant 0 : index
    %c0_1 = arith.constant 0 : index
    %c0_2 = arith.constant 0 : index
    %0 = vector.load %arg1[%c0, %c0_0, %c0_1, %c0_2] : memref<1x4x48x64xbf16, #tpu.memory_space<vmem>>, vector<1x1x32x64xbf16>
    %1 = vector.shape_cast %0 : vector<1x1x32x64xbf16> to vector<1x32x64xbf16>
    %c0_3 = arith.constant 0 : index
    %c1 = arith.constant 1 : index
    %c0_4 = arith.constant 0 : index
    %c0_5 = arith.constant 0 : index
    %2 = vector.load %arg1[%c0_3, %c1, %c0_4, %c0_5] : memref<1x4x48x64xbf16, #tpu.memory_space<vmem>>, vector<1x1x32x64xbf16>
    %3 = vector.shape_cast %2 : vector<1x1x32x64xbf16> to vector<1x32x64xbf16>
    %c0_6 = arith.constant 0 : index
    %c0_7 = arith.constant 0 : index
    %c1_8 = arith.constant 1 : index
    %c0_9 = arith.constant 0 : index
    %4 = vector.load %arg1[%c0_6, %c0_7, %c1_8, %c0_9] : memref<1x4x48x64xbf16, #tpu.memory_space<vmem>>, vector<1x1x32x64xbf16>
    %5 = vector.shape_cast %4 : vector<1x1x32x64xbf16> to vector<1x32x64xbf16>
    %c0_10 = arith.constant 0 : index
    %c2 = arith.constant 2 : index
    %c0_11 = arith.constant 0 : index
    %c0_12 = arith.constant 0 : index
    %6 = vector.load %arg1[%c0_10, %c2, %c0_11, %c0_12] : memref<1x4x48x64xbf16, #tpu.memory_space<vmem>>, vector<1x1x32x64xbf16>
    %7 = vector.shape_cast %6 : vector<1x1x32x64xbf16> to vector<1x32x64xbf16>
    %c0_13 = arith.constant 0 : index
    %c3 = arith.constant 3 : index
    %c0_14 = arith.constant 0 : index
    %c0_15 = arith.constant 0 : index
    %8 = vector.load %arg1[%c0_13, %c3, %c0_14, %c0_15] : memref<1x4x48x64xbf16, #tpu.memory_space<vmem>>, vector<1x1x32x64xbf16>
    %9 = vector.shape_cast %8 : vector<1x1x32x64xbf16> to vector<1x32x64xbf16>
    %c0_16 = arith.constant 0 : index
    %c2_17 = arith.constant 2 : index
    %c1_18 = arith.constant 1 : index
    %c0_19 = arith.constant 0 : index
    %10 = vector.load %arg1[%c0_16, %c2_17, %c1_18, %c0_19] : memref<1x4x48x64xbf16, #tpu.memory_space<vmem>>, vector<1x1x32x64xbf16>
    %11 = vector.shape_cast %10 : vector<1x1x32x64xbf16> to vector<1x32x64xbf16>
    %c0_20 = arith.constant 0 : index
    %c0_21 = arith.constant 0 : index
    %c8 = arith.constant 8 : index
    %c0_22 = arith.constant 0 : index
    %12 = vector.load %arg1[%c0_20, %c0_21, %c8, %c0_22] : memref<1x4x48x64xbf16, #tpu.memory_space<vmem>>, vector<1x1x32x64xbf16>
    %13 = vector.shape_cast %12 : vector<1x1x32x64xbf16> to vector<1x32x64xbf16>
    %c0_23 = arith.constant 0 : index
    %c1_24 = arith.constant 1 : index
    %c8_25 = arith.constant 8 : index
    %c0_26 = arith.constant 0 : index
    %14 = vector.load %arg1[%c0_23, %c1_24, %c8_25, %c0_26] : memref<1x4x48x64xbf16, #tpu.memory_space<vmem>>, vector<1x1x32x64xbf16>
    %15 = vector.shape_cast %14 : vector<1x1x32x64xbf16> to vector<1x32x64xbf16>
    %c0_27 = arith.constant 0 : index
    %c0_28 = arith.constant 0 : index
    %c9 = arith.constant 9 : index
    %c0_29 = arith.constant 0 : index
    %16 = vector.load %arg1[%c0_27, %c0_28, %c9, %c0_29] : memref<1x4x48x64xbf16, #tpu.memory_space<vmem>>, vector<1x1x32x64xbf16>
    %17 = vector.shape_cast %16 : vector<1x1x32x64xbf16> to vector<1x32x64xbf16>
    %18 = tpu.concatenate %1, %3, %5, %7, %9, %11, %13, %15, %17 in 2 : vector<1x32x64xbf16>, vector<1x32x64xbf16>, vector<1x32x64xbf16>, vector<1x32x64xbf16>, vector<1x32x64xbf16>, vector<1x32x64xbf16>, vector<1x32x64xbf16>, vector<1x32x64xbf16>, vector<1x32x64xbf16> -> vector<1x32x576xbf16>
    %19 = vector.shape_cast %18 : vector<1x32x576xbf16> to vector<32x576xbf16>
    %c0_30 = arith.constant 0 : index
    %c0_31 = arith.constant 0 : index
    %20 = vector.load %arg2[%c0_30, %c0_31] : memref<576x64xbf16, #tpu.memory_space<vmem>>, vector<576x64xbf16>
    %cst = arith.constant dense<0.000000e+00> : vector<32x64xf32>
    %21 = tpu.matmul %19, %20, %cst {dimension_numbers = #tpu.dot_dimension_numbers<[1], [0], [0], [1], [0, 0, 1, 1], [], []>} : vector<32x576xbf16>, vector<576x64xbf16>, vector<32x64xf32> -> vector<32x64xf32>
    %c0_32 = arith.constant 0 : index
    %c1_33 = arith.constant 1 : index
    %c0_34 = arith.constant 0 : index
    %c0_35 = arith.constant 0 : index
    %22 = vector.load %arg1[%c0_32, %c1_33, %c0_34, %c0_35] : memref<1x4x48x64xbf16, #tpu.memory_space<vmem>>, vector<1x1x32x64xbf16>
    %23 = vector.shape_cast %22 : vector<1x1x32x64xbf16> to vector<1x32x64xbf16>
    %c0_36 = arith.constant 0 : index
    %c0_37 = arith.constant 0 : index
    %c1_38 = arith.constant 1 : index
    %c0_39 = arith.constant 0 : index
    %24 = vector.load %arg1[%c0_36, %c0_37, %c1_38, %c0_39] : memref<1x4x48x64xbf16, #tpu.memory_space<vmem>>, vector<1x1x32x64xbf16>
    %25 = vector.shape_cast %24 : vector<1x1x32x64xbf16> to vector<1x32x64xbf16>
    %c0_40 = arith.constant 0 : index
    %c1_41 = arith.constant 1 : index
    %c1_42 = arith.constant 1 : index
    %c0_43 = arith.constant 0 : index
    %26 = vector.load %arg1[%c0_40, %c1_41, %c1_42, %c0_43] : memref<1x4x48x64xbf16, #tpu.memory_space<vmem>>, vector<1x1x32x64xbf16>
    %27 = vector.shape_cast %26 : vector<1x1x32x64xbf16> to vector<1x32x64xbf16>
    %c0_44 = arith.constant 0 : index
    %c3_45 = arith.constant 3 : index
    %c0_46 = arith.constant 0 : index
    %c0_47 = arith.constant 0 : index
    %28 = vector.load %arg1[%c0_44, %c3_45, %c0_46, %c0_47] : memref<1x4x48x64xbf16, #tpu.memory_space<vmem>>, vector<1x1x32x64xbf16>
    %29 = vector.shape_cast %28 : vector<1x1x32x64xbf16> to vector<1x32x64xbf16>
    %c0_48 = arith.constant 0 : index
    %c2_49 = arith.constant 2 : index
    %c1_50 = arith.constant 1 : index
    %c0_51 = arith.constant 0 : index
    %30 = vector.load %arg1[%c0_48, %c2_49, %c1_50, %c0_51] : memref<1x4x48x64xbf16, #tpu.memory_space<vmem>>, vector<1x1x32x64xbf16>
    %31 = vector.shape_cast %30 : vector<1x1x32x64xbf16> to vector<1x32x64xbf16>
    %c0_52 = arith.constant 0 : index
    %c3_53 = arith.constant 3 : index
    %c1_54 = arith.constant 1 : index
    %c0_55 = arith.constant 0 : index
    %32 = vector.load %arg1[%c0_52, %c3_53, %c1_54, %c0_55] : memref<1x4x48x64xbf16, #tpu.memory_space<vmem>>, vector<1x1x32x64xbf16>
    %33 = vector.shape_cast %32 : vector<1x1x32x64xbf16> to vector<1x32x64xbf16>
    %c0_56 = arith.constant 0 : index
    %c1_57 = arith.constant 1 : index
    %c8_58 = arith.constant 8 : index
    %c0_59 = arith.constant 0 : index
    %34 = vector.load %arg1[%c0_56, %c1_57, %c8_58, %c0_59] : memref<1x4x48x64xbf16, #tpu.memory_space<vmem>>, vector<1x1x32x64xbf16>
    %35 = vector.shape_cast %34 : vector<1x1x32x64xbf16> to vector<1x32x64xbf16>
    %c0_60 = arith.constant 0 : index
    %c0_61 = arith.constant 0 : index
    %c9_62 = arith.constant 9 : index
    %c0_63 = arith.constant 0 : index
    %36 = vector.load %arg1[%c0_60, %c0_61, %c9_62, %c0_63] : memref<1x4x48x64xbf16, #tpu.memory_space<vmem>>, vector<1x1x32x64xbf16>
    %37 = vector.shape_cast %36 : vector<1x1x32x64xbf16> to vector<1x32x64xbf16>
    %c0_64 = arith.constant 0 : index
    %c1_65 = arith.constant 1 : index
    %c9_66 = arith.constant 9 : index
    %c0_67 = arith.constant 0 : index
    %38 = vector.load %arg1[%c0_64, %c1_65, %c9_66, %c0_67] : memref<1x4x48x64xbf16, #tpu.memory_space<vmem>>, vector<1x1x32x64xbf16>
    %39 = vector.shape_cast %38 : vector<1x1x32x64xbf16> to vector<1x32x64xbf16>
    %40 = tpu.concatenate %23, %25, %27, %29, %31, %33, %35, %37, %39 in 2 : vector<1x32x64xbf16>, vector<1x32x64xbf16>, vector<1x32x64xbf16>, vector<1x32x64xbf16>, vector<1x32x64xbf16>, vector<1x32x64xbf16>, vector<1x32x64xbf16>, vector<1x32x64xbf16>, vector<1x32x64xbf16> -> vector<1x32x576xbf16>
    %41 = vector.shape_cast %40 : vector<1x32x576xbf16> to vector<32x576xbf16>
    %c0_68 = arith.constant 0 : index
    %c0_69 = arith.constant 0 : index
    %42 = vector.load %arg2[%c0_68, %c0_69] : memref<576x64xbf16, #tpu.memory_space<vmem>>, vector<576x64xbf16>
    %cst_70 = arith.constant dense<0.000000e+00> : vector<32x64xf32>
    %43 = tpu.matmul %41, %42, %cst_70 {dimension_numbers = #tpu.dot_dimension_numbers<[1], [0], [0], [1], [0, 0, 1, 1], [], []>} : vector<32x576xbf16>, vector<576x64xbf16>, vector<32x64xf32> -> vector<32x64xf32>
    %44 = arith.maximumf %21, %43 : vector<32x64xf32>
    %c0_71 = arith.constant 0 : index
    %c2_72 = arith.constant 2 : index
    %c0_73 = arith.constant 0 : index
    %c0_74 = arith.constant 0 : index
    %45 = vector.load %arg1[%c0_71, %c2_72, %c0_73, %c0_74] : memref<1x4x48x64xbf16, #tpu.memory_space<vmem>>, vector<1x1x32x64xbf16>
    %46 = vector.shape_cast %45 : vector<1x1x32x64xbf16> to vector<1x32x64xbf16>
    %c0_75 = arith.constant 0 : index
    %c3_76 = arith.constant 3 : index
    %c0_77 = arith.constant 0 : index
    %c0_78 = arith.constant 0 : index
    %47 = vector.load %arg1[%c0_75, %c3_76, %c0_77, %c0_78] : memref<1x4x48x64xbf16, #tpu.memory_space<vmem>>, vector<1x1x32x64xbf16>
    %48 = vector.shape_cast %47 : vector<1x1x32x64xbf16> to vector<1x32x64xbf16>
    %c0_79 = arith.constant 0 : index
    %c2_80 = arith.constant 2 : index
    %c1_81 = arith.constant 1 : index
    %c0_82 = arith.constant 0 : index
    %49 = vector.load %arg1[%c0_79, %c2_80, %c1_81, %c0_82] : memref<1x4x48x64xbf16, #tpu.memory_space<vmem>>, vector<1x1x32x64xbf16>
    %50 = vector.shape_cast %49 : vector<1x1x32x64xbf16> to vector<1x32x64xbf16>
    %c0_83 = arith.constant 0 : index
    %c0_84 = arith.constant 0 : index
    %c8_85 = arith.constant 8 : index
    %c0_86 = arith.constant 0 : index
    %51 = vector.load %arg1[%c0_83, %c0_84, %c8_85, %c0_86] : memref<1x4x48x64xbf16, #tpu.memory_space<vmem>>, vector<1x1x32x64xbf16>
    %52 = vector.shape_cast %51 : vector<1x1x32x64xbf16> to vector<1x32x64xbf16>
    %c0_87 = arith.constant 0 : index
    %c1_88 = arith.constant 1 : index
    %c8_89 = arith.constant 8 : index
    %c0_90 = arith.constant 0 : index
    %53 = vector.load %arg1[%c0_87, %c1_88, %c8_89, %c0_90] : memref<1x4x48x64xbf16, #tpu.memory_space<vmem>>, vector<1x1x32x64xbf16>
    %54 = vector.shape_cast %53 : vector<1x1x32x64xbf16> to vector<1x32x64xbf16>
    %c0_91 = arith.constant 0 : index
    %c0_92 = arith.constant 0 : index
    %c9_93 = arith.constant 9 : index
    %c0_94 = arith.constant 0 : index
    %55 = vector.load %arg1[%c0_91, %c0_92, %c9_93, %c0_94] : memref<1x4x48x64xbf16, #tpu.memory_space<vmem>>, vector<1x1x32x64xbf16>
    %56 = vector.shape_cast %55 : vector<1x1x32x64xbf16> to vector<1x32x64xbf16>
    %c0_95 = arith.constant 0 : index
    %c2_96 = arith.constant 2 : index
    %c8_97 = arith.constant 8 : index
    %c0_98 = arith.constant 0 : index
    %57 = vector.load %arg1[%c0_95, %c2_96, %c8_97, %c0_98] : memref<1x4x48x64xbf16, #tpu.memory_space<vmem>>, vector<1x1x32x64xbf16>
    %58 = vector.shape_cast %57 : vector<1x1x32x64xbf16> to vector<1x32x64xbf16>
    %c0_99 = arith.constant 0 : index
    %c3_100 = arith.constant 3 : index
    %c8_101 = arith.constant 8 : index
    %c0_102 = arith.constant 0 : index
    %59 = vector.load %arg1[%c0_99, %c3_100, %c8_101, %c0_102] : memref<1x4x48x64xbf16, #tpu.memory_space<vmem>>, vector<1x1x32x64xbf16>
    %60 = vector.shape_cast %59 : vector<1x1x32x64xbf16> to vector<1x32x64xbf16>
    %c0_103 = arith.constant 0 : index
    %c2_104 = arith.constant 2 : index
    %c9_105 = arith.constant 9 : index
    %c0_106 = arith.constant 0 : index
    %61 = vector.load %arg1[%c0_103, %c2_104, %c9_105, %c0_106] : memref<1x4x48x64xbf16, #tpu.memory_space<vmem>>, vector<1x1x32x64xbf16>
    %62 = vector.shape_cast %61 : vector<1x1x32x64xbf16> to vector<1x32x64xbf16>
    %63 = tpu.concatenate %46, %48, %50, %52, %54, %56, %58, %60, %62 in 2 : vector<1x32x64xbf16>, vector<1x32x64xbf16>, vector<1x32x64xbf16>, vector<1x32x64xbf16>, vector<1x32x64xbf16>, vector<1x32x64xbf16>, vector<1x32x64xbf16>, vector<1x32x64xbf16>, vector<1x32x64xbf16> -> vector<1x32x576xbf16>
    %64 = vector.shape_cast %63 : vector<1x32x576xbf16> to vector<32x576xbf16>
    %c0_107 = arith.constant 0 : index
    %c0_108 = arith.constant 0 : index
    %65 = vector.load %arg2[%c0_107, %c0_108] : memref<576x64xbf16, #tpu.memory_space<vmem>>, vector<576x64xbf16>
    %cst_109 = arith.constant dense<0.000000e+00> : vector<32x64xf32>
    %66 = tpu.matmul %64, %65, %cst_109 {dimension_numbers = #tpu.dot_dimension_numbers<[1], [0], [0], [1], [0, 0, 1, 1], [], []>} : vector<32x576xbf16>, vector<576x64xbf16>, vector<32x64xf32> -> vector<32x64xf32>
    %67 = arith.maximumf %44, %66 : vector<32x64xf32>
    %c0_110 = arith.constant 0 : index
    %c3_111 = arith.constant 3 : index
    %c0_112 = arith.constant 0 : index
    %c0_113 = arith.constant 0 : index
    %68 = vector.load %arg1[%c0_110, %c3_111, %c0_112, %c0_113] : memref<1x4x48x64xbf16, #tpu.memory_space<vmem>>, vector<1x1x32x64xbf16>
    %69 = vector.shape_cast %68 : vector<1x1x32x64xbf16> to vector<1x32x64xbf16>
    %c0_114 = arith.constant 0 : index
    %c2_115 = arith.constant 2 : index
    %c1_116 = arith.constant 1 : index
    %c0_117 = arith.constant 0 : index
    %70 = vector.load %arg1[%c0_114, %c2_115, %c1_116, %c0_117] : memref<1x4x48x64xbf16, #tpu.memory_space<vmem>>, vector<1x1x32x64xbf16>
    %71 = vector.shape_cast %70 : vector<1x1x32x64xbf16> to vector<1x32x64xbf16>
    %c0_118 = arith.constant 0 : index
    %c3_119 = arith.constant 3 : index
    %c1_120 = arith.constant 1 : index
    %c0_121 = arith.constant 0 : index
    %72 = vector.load %arg1[%c0_118, %c3_119, %c1_120, %c0_121] : memref<1x4x48x64xbf16, #tpu.memory_space<vmem>>, vector<1x1x32x64xbf16>
    %73 = vector.shape_cast %72 : vector<1x1x32x64xbf16> to vector<1x32x64xbf16>
    %c0_122 = arith.constant 0 : index
    %c1_123 = arith.constant 1 : index
    %c8_124 = arith.constant 8 : index
    %c0_125 = arith.constant 0 : index
    %74 = vector.load %arg1[%c0_122, %c1_123, %c8_124, %c0_125] : memref<1x4x48x64xbf16, #tpu.memory_space<vmem>>, vector<1x1x32x64xbf16>
    %75 = vector.shape_cast %74 : vector<1x1x32x64xbf16> to vector<1x32x64xbf16>
    %c0_126 = arith.constant 0 : index
    %c0_127 = arith.constant 0 : index
    %c9_128 = arith.constant 9 : index
    %c0_129 = arith.constant 0 : index
    %76 = vector.load %arg1[%c0_126, %c0_127, %c9_128, %c0_129] : memref<1x4x48x64xbf16, #tpu.memory_space<vmem>>, vector<1x1x32x64xbf16>
    %77 = vector.shape_cast %76 : vector<1x1x32x64xbf16> to vector<1x32x64xbf16>
    %c0_130 = arith.constant 0 : index
    %c1_131 = arith.constant 1 : index
    %c9_132 = arith.constant 9 : index
    %c0_133 = arith.constant 0 : index
    %78 = vector.load %arg1[%c0_130, %c1_131, %c9_132, %c0_133] : memref<1x4x48x64xbf16, #tpu.memory_space<vmem>>, vector<1x1x32x64xbf16>
    %79 = vector.shape_cast %78 : vector<1x1x32x64xbf16> to vector<1x32x64xbf16>
    %c0_134 = arith.constant 0 : index
    %c3_135 = arith.constant 3 : index
    %c8_136 = arith.constant 8 : index
    %c0_137 = arith.constant 0 : index
    %80 = vector.load %arg1[%c0_134, %c3_135, %c8_136, %c0_137] : memref<1x4x48x64xbf16, #tpu.memory_space<vmem>>, vector<1x1x32x64xbf16>
    %81 = vector.shape_cast %80 : vector<1x1x32x64xbf16> to vector<1x32x64xbf16>
    %c0_138 = arith.constant 0 : index
    %c2_139 = arith.constant 2 : index
    %c9_140 = arith.constant 9 : index
    %c0_141 = arith.constant 0 : index
    %82 = vector.load %arg1[%c0_138, %c2_139, %c9_140, %c0_141] : memref<1x4x48x64xbf16, #tpu.memory_space<vmem>>, vector<1x1x32x64xbf16>
    %83 = vector.shape_cast %82 : vector<1x1x32x64xbf16> to vector<1x32x64xbf16>
    %c0_142 = arith.constant 0 : index
    %c3_143 = arith.constant 3 : index
    %c9_144 = arith.constant 9 : index
    %c0_145 = arith.constant 0 : index
    %84 = vector.load %arg1[%c0_142, %c3_143, %c9_144, %c0_145] : memref<1x4x48x64xbf16, #tpu.memory_space<vmem>>, vector<1x1x32x64xbf16>
    %85 = vector.shape_cast %84 : vector<1x1x32x64xbf16> to vector<1x32x64xbf16>
    %86 = tpu.concatenate %69, %71, %73, %75, %77, %79, %81, %83, %85 in 2 : vector<1x32x64xbf16>, vector<1x32x64xbf16>, vector<1x32x64xbf16>, vector<1x32x64xbf16>, vector<1x32x64xbf16>, vector<1x32x64xbf16>, vector<1x32x64xbf16>, vector<1x32x64xbf16>, vector<1x32x64xbf16> -> vector<1x32x576xbf16>
    %87 = vector.shape_cast %86 : vector<1x32x576xbf16> to vector<32x576xbf16>
    %c0_146 = arith.constant 0 : index
    %c0_147 = arith.constant 0 : index
    %88 = vector.load %arg2[%c0_146, %c0_147] : memref<576x64xbf16, #tpu.memory_space<vmem>>, vector<576x64xbf16>
    %cst_148 = arith.constant dense<0.000000e+00> : vector<32x64xf32>
    %89 = tpu.matmul %87, %88, %cst_148 {dimension_numbers = #tpu.dot_dimension_numbers<[1], [0], [0], [1], [0, 0, 1, 1], [], []>} : vector<32x576xbf16>, vector<576x64xbf16>, vector<32x64xf32> -> vector<32x64xf32>
    %90 = arith.maximumf %67, %89 : vector<32x64xf32>
    %c0_149 = arith.constant 0 : index
    %c0_150 = arith.constant 0 : index
    %91 = vector.load %arg3[%c0_149, %c0_150] : memref<1x64xf32, #tpu.memory_space<vmem>>, vector<1x64xf32>
    %92 = vector.broadcast %91 : vector<1x64xf32> to vector<32x64xf32>
    %93 = arith.mulf %90, %92 : vector<32x64xf32>
    %c0_151 = arith.constant 0 : index
    %c0_152 = arith.constant 0 : index
    %94 = vector.load %arg4[%c0_151, %c0_152] : memref<1x64xf32, #tpu.memory_space<vmem>>, vector<1x64xf32>
    %95 = vector.broadcast %94 : vector<1x64xf32> to vector<32x64xf32>
    %96 = arith.addf %93, %95 : vector<32x64xf32>
    %cst_153 = arith.constant 0.000000e+00 : f32
    %97 = vector.broadcast %cst_153 : f32 to vector<32x64xf32>
    %98 = arith.maximumf %96, %97 : vector<32x64xf32>
    %99 = arith.truncf %98 : vector<32x64xf32> to vector<32x64xbf16>
    %c0_154 = arith.constant 0 : index
    %c0_155 = arith.constant 0 : index
    %100 = vector.load %arg5[%c0_154, %c0_155] : memref<32x64xbf16, #tpu.memory_space<vmem>>, vector<32x64xbf16>
    tpu.vector_store %arg5[%c0_154, %c0_155], %99 {strides = array<i32>} : memref<32x64xbf16, #tpu.memory_space<vmem>>, vector<32x64xbf16>,
    return
  }
  func.func @transform_0(%arg0: i32) -> (i32, i32, i32, i32) {
    %c0_i32 = arith.constant 0 : i32
    %c0_i32_0 = arith.constant 0 : i32
    %c0_i32_1 = arith.constant 0 : i32
    %c0_i32_2 = arith.constant 0 : i32
    return %arg0, %c0_i32, %c0_i32_0, %c0_i32_1 : i32, i32, i32, i32
  }
  func.func @transform_1(%arg0: i32) -> (i32, i32) {
    %c0_i32 = arith.constant 0 : i32
    %c0_i32_0 = arith.constant 0 : i32
    %c0_i32_1 = arith.constant 0 : i32
    return %c0_i32, %c0_i32_0 : i32, i32
  }
  func.func @transform_2(%arg0: i32) -> (i32, i32) {
    %c0_i32 = arith.constant 0 : i32
    %c0_i32_0 = arith.constant 0 : i32
    %c0_i32_1 = arith.constant 0 : i32
    return %c0_i32, %c0_i32_0 : i32, i32
  }
  func.func @transform_3(%arg0: i32) -> (i32, i32) {
    %c0_i32 = arith.constant 0 : i32
    %c0_i32_0 = arith.constant 0 : i32
    %c0_i32_1 = arith.constant 0 : i32
    return %c0_i32, %c0_i32_0 : i32, i32
  }
  func.func @transform_4(%arg0: i32) -> (i32, i32) {
    %c0_i32 = arith.constant 0 : i32
    %c0_i32_0 = arith.constant 0 : i32
    return %arg0, %c0_i32 : i32, i32
  }
}

module attributes {stable_mosaic.version = 11 : i64} {
  func.func @conv_block_head_kernel(%arg0: i32, %arg1: memref<1x4x32x64xbf16, #tpu.memory_space<vmem>>, %arg2: memref<576x64xbf16, #tpu.memory_space<vmem>>, %arg3: memref<1x64xf32, #tpu.memory_space<vmem>>, %arg4: memref<1x64xf32, #tpu.memory_space<vmem>>, %arg5: memref<64x5xf32, #tpu.memory_space<vmem>>, %arg6: memref<1x5xf32, #tpu.memory_space<vmem>>, %arg7: memref<1x1x64xf32, #tpu.memory_space<vmem>>, %arg8: memref<1x1x5xf32, #tpu.memory_space<vmem>>) attributes {dimension_semantics = [#tpu.dimension_semantics<parallel>], iteration_bounds = array<i64: 2>, scalar_prefetch = 0 : i64, scratch_operands = 0 : i64, tpu.core_type = #tpu.core_type<tc>, window_params = [{transform_indices = @transform_0, window_bounds = array<i64: 1, 4, 32, 64>}, {pipeline_mode = #tpu.pipeline_mode<synchronous>, transform_indices = @transform_1, window_bounds = array<i64: 576, 64>}, {pipeline_mode = #tpu.pipeline_mode<synchronous>, transform_indices = @transform_2, window_bounds = array<i64: 1, 64>}, {pipeline_mode = #tpu.pipeline_mode<synchronous>, transform_indices = @transform_3, window_bounds = array<i64: 1, 64>}, {pipeline_mode = #tpu.pipeline_mode<synchronous>, transform_indices = @transform_4, window_bounds = array<i64: 64, 5>}, {pipeline_mode = #tpu.pipeline_mode<synchronous>, transform_indices = @transform_5, window_bounds = array<i64: 1, 5>}, {transform_indices = @transform_6, window_bounds = array<i64: 1, 1, 64>}, {transform_indices = @transform_7, window_bounds = array<i64: 1, 1, 5>}]} {
    %c0 = arith.constant 0 : index
    %c0_0 = arith.constant 0 : index
    %c0_1 = arith.constant 0 : index
    %c0_2 = arith.constant 0 : index
    %0 = vector.load %arg1[%c0, %c0_0, %c0_1, %c0_2] : memref<1x4x32x64xbf16, #tpu.memory_space<vmem>>, vector<1x1x16x64xbf16>
    %1 = vector.shape_cast %0 : vector<1x1x16x64xbf16> to vector<1x16x64xbf16>
    %c0_3 = arith.constant 0 : index
    %c1 = arith.constant 1 : index
    %c0_4 = arith.constant 0 : index
    %c0_5 = arith.constant 0 : index
    %2 = vector.load %arg1[%c0_3, %c1, %c0_4, %c0_5] : memref<1x4x32x64xbf16, #tpu.memory_space<vmem>>, vector<1x1x16x64xbf16>
    %3 = vector.shape_cast %2 : vector<1x1x16x64xbf16> to vector<1x16x64xbf16>
    %c0_6 = arith.constant 0 : index
    %c0_7 = arith.constant 0 : index
    %c1_8 = arith.constant 1 : index
    %c0_9 = arith.constant 0 : index
    %4 = vector.load %arg1[%c0_6, %c0_7, %c1_8, %c0_9] : memref<1x4x32x64xbf16, #tpu.memory_space<vmem>>, vector<1x1x16x64xbf16>
    %5 = vector.shape_cast %4 : vector<1x1x16x64xbf16> to vector<1x16x64xbf16>
    %c0_10 = arith.constant 0 : index
    %c2 = arith.constant 2 : index
    %c0_11 = arith.constant 0 : index
    %c0_12 = arith.constant 0 : index
    %6 = vector.load %arg1[%c0_10, %c2, %c0_11, %c0_12] : memref<1x4x32x64xbf16, #tpu.memory_space<vmem>>, vector<1x1x16x64xbf16>
    %7 = vector.shape_cast %6 : vector<1x1x16x64xbf16> to vector<1x16x64xbf16>
    %c0_13 = arith.constant 0 : index
    %c3 = arith.constant 3 : index
    %c0_14 = arith.constant 0 : index
    %c0_15 = arith.constant 0 : index
    %8 = vector.load %arg1[%c0_13, %c3, %c0_14, %c0_15] : memref<1x4x32x64xbf16, #tpu.memory_space<vmem>>, vector<1x1x16x64xbf16>
    %9 = vector.shape_cast %8 : vector<1x1x16x64xbf16> to vector<1x16x64xbf16>
    %c0_16 = arith.constant 0 : index
    %c2_17 = arith.constant 2 : index
    %c1_18 = arith.constant 1 : index
    %c0_19 = arith.constant 0 : index
    %10 = vector.load %arg1[%c0_16, %c2_17, %c1_18, %c0_19] : memref<1x4x32x64xbf16, #tpu.memory_space<vmem>>, vector<1x1x16x64xbf16>
    %11 = vector.shape_cast %10 : vector<1x1x16x64xbf16> to vector<1x16x64xbf16>
    %c0_20 = arith.constant 0 : index
    %c0_21 = arith.constant 0 : index
    %c8 = arith.constant 8 : index
    %c0_22 = arith.constant 0 : index
    %12 = vector.load %arg1[%c0_20, %c0_21, %c8, %c0_22] : memref<1x4x32x64xbf16, #tpu.memory_space<vmem>>, vector<1x1x16x64xbf16>
    %13 = vector.shape_cast %12 : vector<1x1x16x64xbf16> to vector<1x16x64xbf16>
    %c0_23 = arith.constant 0 : index
    %c1_24 = arith.constant 1 : index
    %c8_25 = arith.constant 8 : index
    %c0_26 = arith.constant 0 : index
    %14 = vector.load %arg1[%c0_23, %c1_24, %c8_25, %c0_26] : memref<1x4x32x64xbf16, #tpu.memory_space<vmem>>, vector<1x1x16x64xbf16>
    %15 = vector.shape_cast %14 : vector<1x1x16x64xbf16> to vector<1x16x64xbf16>
    %c0_27 = arith.constant 0 : index
    %c0_28 = arith.constant 0 : index
    %c9 = arith.constant 9 : index
    %c0_29 = arith.constant 0 : index
    %16 = vector.load %arg1[%c0_27, %c0_28, %c9, %c0_29] : memref<1x4x32x64xbf16, #tpu.memory_space<vmem>>, vector<1x1x16x64xbf16>
    %17 = vector.shape_cast %16 : vector<1x1x16x64xbf16> to vector<1x16x64xbf16>
    %18 = tpu.concatenate %1, %3, %5, %7, %9, %11, %13, %15, %17 in 2 : vector<1x16x64xbf16>, vector<1x16x64xbf16>, vector<1x16x64xbf16>, vector<1x16x64xbf16>, vector<1x16x64xbf16>, vector<1x16x64xbf16>, vector<1x16x64xbf16>, vector<1x16x64xbf16>, vector<1x16x64xbf16> -> vector<1x16x576xbf16>
    %19 = vector.shape_cast %18 : vector<1x16x576xbf16> to vector<16x576xbf16>
    %c0_30 = arith.constant 0 : index
    %c0_31 = arith.constant 0 : index
    %20 = vector.load %arg2[%c0_30, %c0_31] : memref<576x64xbf16, #tpu.memory_space<vmem>>, vector<576x64xbf16>
    %cst = arith.constant dense<0.000000e+00> : vector<16x64xf32>
    %21 = tpu.matmul %19, %20, %cst {dimension_numbers = #tpu.dot_dimension_numbers<[1], [0], [0], [1], [0, 0, 1, 1], [], []>} : vector<16x576xbf16>, vector<576x64xbf16>, vector<16x64xf32> -> vector<16x64xf32>
    %c0_32 = arith.constant 0 : index
    %c1_33 = arith.constant 1 : index
    %c0_34 = arith.constant 0 : index
    %c0_35 = arith.constant 0 : index
    %22 = vector.load %arg1[%c0_32, %c1_33, %c0_34, %c0_35] : memref<1x4x32x64xbf16, #tpu.memory_space<vmem>>, vector<1x1x16x64xbf16>
    %23 = vector.shape_cast %22 : vector<1x1x16x64xbf16> to vector<1x16x64xbf16>
    %c0_36 = arith.constant 0 : index
    %c0_37 = arith.constant 0 : index
    %c1_38 = arith.constant 1 : index
    %c0_39 = arith.constant 0 : index
    %24 = vector.load %arg1[%c0_36, %c0_37, %c1_38, %c0_39] : memref<1x4x32x64xbf16, #tpu.memory_space<vmem>>, vector<1x1x16x64xbf16>
    %25 = vector.shape_cast %24 : vector<1x1x16x64xbf16> to vector<1x16x64xbf16>
    %c0_40 = arith.constant 0 : index
    %c1_41 = arith.constant 1 : index
    %c1_42 = arith.constant 1 : index
    %c0_43 = arith.constant 0 : index
    %26 = vector.load %arg1[%c0_40, %c1_41, %c1_42, %c0_43] : memref<1x4x32x64xbf16, #tpu.memory_space<vmem>>, vector<1x1x16x64xbf16>
    %27 = vector.shape_cast %26 : vector<1x1x16x64xbf16> to vector<1x16x64xbf16>
    %c0_44 = arith.constant 0 : index
    %c3_45 = arith.constant 3 : index
    %c0_46 = arith.constant 0 : index
    %c0_47 = arith.constant 0 : index
    %28 = vector.load %arg1[%c0_44, %c3_45, %c0_46, %c0_47] : memref<1x4x32x64xbf16, #tpu.memory_space<vmem>>, vector<1x1x16x64xbf16>
    %29 = vector.shape_cast %28 : vector<1x1x16x64xbf16> to vector<1x16x64xbf16>
    %c0_48 = arith.constant 0 : index
    %c2_49 = arith.constant 2 : index
    %c1_50 = arith.constant 1 : index
    %c0_51 = arith.constant 0 : index
    %30 = vector.load %arg1[%c0_48, %c2_49, %c1_50, %c0_51] : memref<1x4x32x64xbf16, #tpu.memory_space<vmem>>, vector<1x1x16x64xbf16>
    %31 = vector.shape_cast %30 : vector<1x1x16x64xbf16> to vector<1x16x64xbf16>
    %c0_52 = arith.constant 0 : index
    %c3_53 = arith.constant 3 : index
    %c1_54 = arith.constant 1 : index
    %c0_55 = arith.constant 0 : index
    %32 = vector.load %arg1[%c0_52, %c3_53, %c1_54, %c0_55] : memref<1x4x32x64xbf16, #tpu.memory_space<vmem>>, vector<1x1x16x64xbf16>
    %33 = vector.shape_cast %32 : vector<1x1x16x64xbf16> to vector<1x16x64xbf16>
    %c0_56 = arith.constant 0 : index
    %c1_57 = arith.constant 1 : index
    %c8_58 = arith.constant 8 : index
    %c0_59 = arith.constant 0 : index
    %34 = vector.load %arg1[%c0_56, %c1_57, %c8_58, %c0_59] : memref<1x4x32x64xbf16, #tpu.memory_space<vmem>>, vector<1x1x16x64xbf16>
    %35 = vector.shape_cast %34 : vector<1x1x16x64xbf16> to vector<1x16x64xbf16>
    %c0_60 = arith.constant 0 : index
    %c0_61 = arith.constant 0 : index
    %c9_62 = arith.constant 9 : index
    %c0_63 = arith.constant 0 : index
    %36 = vector.load %arg1[%c0_60, %c0_61, %c9_62, %c0_63] : memref<1x4x32x64xbf16, #tpu.memory_space<vmem>>, vector<1x1x16x64xbf16>
    %37 = vector.shape_cast %36 : vector<1x1x16x64xbf16> to vector<1x16x64xbf16>
    %c0_64 = arith.constant 0 : index
    %c1_65 = arith.constant 1 : index
    %c9_66 = arith.constant 9 : index
    %c0_67 = arith.constant 0 : index
    %38 = vector.load %arg1[%c0_64, %c1_65, %c9_66, %c0_67] : memref<1x4x32x64xbf16, #tpu.memory_space<vmem>>, vector<1x1x16x64xbf16>
    %39 = vector.shape_cast %38 : vector<1x1x16x64xbf16> to vector<1x16x64xbf16>
    %40 = tpu.concatenate %23, %25, %27, %29, %31, %33, %35, %37, %39 in 2 : vector<1x16x64xbf16>, vector<1x16x64xbf16>, vector<1x16x64xbf16>, vector<1x16x64xbf16>, vector<1x16x64xbf16>, vector<1x16x64xbf16>, vector<1x16x64xbf16>, vector<1x16x64xbf16>, vector<1x16x64xbf16> -> vector<1x16x576xbf16>
    %41 = vector.shape_cast %40 : vector<1x16x576xbf16> to vector<16x576xbf16>
    %c0_68 = arith.constant 0 : index
    %c0_69 = arith.constant 0 : index
    %42 = vector.load %arg2[%c0_68, %c0_69] : memref<576x64xbf16, #tpu.memory_space<vmem>>, vector<576x64xbf16>
    %cst_70 = arith.constant dense<0.000000e+00> : vector<16x64xf32>
    %43 = tpu.matmul %41, %42, %cst_70 {dimension_numbers = #tpu.dot_dimension_numbers<[1], [0], [0], [1], [0, 0, 1, 1], [], []>} : vector<16x576xbf16>, vector<576x64xbf16>, vector<16x64xf32> -> vector<16x64xf32>
    %44 = arith.maximumf %21, %43 : vector<16x64xf32>
    %c0_71 = arith.constant 0 : index
    %c2_72 = arith.constant 2 : index
    %c0_73 = arith.constant 0 : index
    %c0_74 = arith.constant 0 : index
    %45 = vector.load %arg1[%c0_71, %c2_72, %c0_73, %c0_74] : memref<1x4x32x64xbf16, #tpu.memory_space<vmem>>, vector<1x1x16x64xbf16>
    %46 = vector.shape_cast %45 : vector<1x1x16x64xbf16> to vector<1x16x64xbf16>
    %c0_75 = arith.constant 0 : index
    %c3_76 = arith.constant 3 : index
    %c0_77 = arith.constant 0 : index
    %c0_78 = arith.constant 0 : index
    %47 = vector.load %arg1[%c0_75, %c3_76, %c0_77, %c0_78] : memref<1x4x32x64xbf16, #tpu.memory_space<vmem>>, vector<1x1x16x64xbf16>
    %48 = vector.shape_cast %47 : vector<1x1x16x64xbf16> to vector<1x16x64xbf16>
    %c0_79 = arith.constant 0 : index
    %c2_80 = arith.constant 2 : index
    %c1_81 = arith.constant 1 : index
    %c0_82 = arith.constant 0 : index
    %49 = vector.load %arg1[%c0_79, %c2_80, %c1_81, %c0_82] : memref<1x4x32x64xbf16, #tpu.memory_space<vmem>>, vector<1x1x16x64xbf16>
    %50 = vector.shape_cast %49 : vector<1x1x16x64xbf16> to vector<1x16x64xbf16>
    %c0_83 = arith.constant 0 : index
    %c0_84 = arith.constant 0 : index
    %c8_85 = arith.constant 8 : index
    %c0_86 = arith.constant 0 : index
    %51 = vector.load %arg1[%c0_83, %c0_84, %c8_85, %c0_86] : memref<1x4x32x64xbf16, #tpu.memory_space<vmem>>, vector<1x1x16x64xbf16>
    %52 = vector.shape_cast %51 : vector<1x1x16x64xbf16> to vector<1x16x64xbf16>
    %c0_87 = arith.constant 0 : index
    %c1_88 = arith.constant 1 : index
    %c8_89 = arith.constant 8 : index
    %c0_90 = arith.constant 0 : index
    %53 = vector.load %arg1[%c0_87, %c1_88, %c8_89, %c0_90] : memref<1x4x32x64xbf16, #tpu.memory_space<vmem>>, vector<1x1x16x64xbf16>
    %54 = vector.shape_cast %53 : vector<1x1x16x64xbf16> to vector<1x16x64xbf16>
    %c0_91 = arith.constant 0 : index
    %c0_92 = arith.constant 0 : index
    %c9_93 = arith.constant 9 : index
    %c0_94 = arith.constant 0 : index
    %55 = vector.load %arg1[%c0_91, %c0_92, %c9_93, %c0_94] : memref<1x4x32x64xbf16, #tpu.memory_space<vmem>>, vector<1x1x16x64xbf16>
    %56 = vector.shape_cast %55 : vector<1x1x16x64xbf16> to vector<1x16x64xbf16>
    %c0_95 = arith.constant 0 : index
    %c2_96 = arith.constant 2 : index
    %c8_97 = arith.constant 8 : index
    %c0_98 = arith.constant 0 : index
    %57 = vector.load %arg1[%c0_95, %c2_96, %c8_97, %c0_98] : memref<1x4x32x64xbf16, #tpu.memory_space<vmem>>, vector<1x1x16x64xbf16>
    %58 = vector.shape_cast %57 : vector<1x1x16x64xbf16> to vector<1x16x64xbf16>
    %c0_99 = arith.constant 0 : index
    %c3_100 = arith.constant 3 : index
    %c8_101 = arith.constant 8 : index
    %c0_102 = arith.constant 0 : index
    %59 = vector.load %arg1[%c0_99, %c3_100, %c8_101, %c0_102] : memref<1x4x32x64xbf16, #tpu.memory_space<vmem>>, vector<1x1x16x64xbf16>
    %60 = vector.shape_cast %59 : vector<1x1x16x64xbf16> to vector<1x16x64xbf16>
    %c0_103 = arith.constant 0 : index
    %c2_104 = arith.constant 2 : index
    %c9_105 = arith.constant 9 : index
    %c0_106 = arith.constant 0 : index
    %61 = vector.load %arg1[%c0_103, %c2_104, %c9_105, %c0_106] : memref<1x4x32x64xbf16, #tpu.memory_space<vmem>>, vector<1x1x16x64xbf16>
    %62 = vector.shape_cast %61 : vector<1x1x16x64xbf16> to vector<1x16x64xbf16>
    %63 = tpu.concatenate %46, %48, %50, %52, %54, %56, %58, %60, %62 in 2 : vector<1x16x64xbf16>, vector<1x16x64xbf16>, vector<1x16x64xbf16>, vector<1x16x64xbf16>, vector<1x16x64xbf16>, vector<1x16x64xbf16>, vector<1x16x64xbf16>, vector<1x16x64xbf16>, vector<1x16x64xbf16> -> vector<1x16x576xbf16>
    %64 = vector.shape_cast %63 : vector<1x16x576xbf16> to vector<16x576xbf16>
    %c0_107 = arith.constant 0 : index
    %c0_108 = arith.constant 0 : index
    %65 = vector.load %arg2[%c0_107, %c0_108] : memref<576x64xbf16, #tpu.memory_space<vmem>>, vector<576x64xbf16>
    %cst_109 = arith.constant dense<0.000000e+00> : vector<16x64xf32>
    %66 = tpu.matmul %64, %65, %cst_109 {dimension_numbers = #tpu.dot_dimension_numbers<[1], [0], [0], [1], [0, 0, 1, 1], [], []>} : vector<16x576xbf16>, vector<576x64xbf16>, vector<16x64xf32> -> vector<16x64xf32>
    %67 = arith.maximumf %44, %66 : vector<16x64xf32>
    %c0_110 = arith.constant 0 : index
    %c3_111 = arith.constant 3 : index
    %c0_112 = arith.constant 0 : index
    %c0_113 = arith.constant 0 : index
    %68 = vector.load %arg1[%c0_110, %c3_111, %c0_112, %c0_113] : memref<1x4x32x64xbf16, #tpu.memory_space<vmem>>, vector<1x1x16x64xbf16>
    %69 = vector.shape_cast %68 : vector<1x1x16x64xbf16> to vector<1x16x64xbf16>
    %c0_114 = arith.constant 0 : index
    %c2_115 = arith.constant 2 : index
    %c1_116 = arith.constant 1 : index
    %c0_117 = arith.constant 0 : index
    %70 = vector.load %arg1[%c0_114, %c2_115, %c1_116, %c0_117] : memref<1x4x32x64xbf16, #tpu.memory_space<vmem>>, vector<1x1x16x64xbf16>
    %71 = vector.shape_cast %70 : vector<1x1x16x64xbf16> to vector<1x16x64xbf16>
    %c0_118 = arith.constant 0 : index
    %c3_119 = arith.constant 3 : index
    %c1_120 = arith.constant 1 : index
    %c0_121 = arith.constant 0 : index
    %72 = vector.load %arg1[%c0_118, %c3_119, %c1_120, %c0_121] : memref<1x4x32x64xbf16, #tpu.memory_space<vmem>>, vector<1x1x16x64xbf16>
    %73 = vector.shape_cast %72 : vector<1x1x16x64xbf16> to vector<1x16x64xbf16>
    %c0_122 = arith.constant 0 : index
    %c1_123 = arith.constant 1 : index
    %c8_124 = arith.constant 8 : index
    %c0_125 = arith.constant 0 : index
    %74 = vector.load %arg1[%c0_122, %c1_123, %c8_124, %c0_125] : memref<1x4x32x64xbf16, #tpu.memory_space<vmem>>, vector<1x1x16x64xbf16>
    %75 = vector.shape_cast %74 : vector<1x1x16x64xbf16> to vector<1x16x64xbf16>
    %c0_126 = arith.constant 0 : index
    %c0_127 = arith.constant 0 : index
    %c9_128 = arith.constant 9 : index
    %c0_129 = arith.constant 0 : index
    %76 = vector.load %arg1[%c0_126, %c0_127, %c9_128, %c0_129] : memref<1x4x32x64xbf16, #tpu.memory_space<vmem>>, vector<1x1x16x64xbf16>
    %77 = vector.shape_cast %76 : vector<1x1x16x64xbf16> to vector<1x16x64xbf16>
    %c0_130 = arith.constant 0 : index
    %c1_131 = arith.constant 1 : index
    %c9_132 = arith.constant 9 : index
    %c0_133 = arith.constant 0 : index
    %78 = vector.load %arg1[%c0_130, %c1_131, %c9_132, %c0_133] : memref<1x4x32x64xbf16, #tpu.memory_space<vmem>>, vector<1x1x16x64xbf16>
    %79 = vector.shape_cast %78 : vector<1x1x16x64xbf16> to vector<1x16x64xbf16>
    %c0_134 = arith.constant 0 : index
    %c3_135 = arith.constant 3 : index
    %c8_136 = arith.constant 8 : index
    %c0_137 = arith.constant 0 : index
    %80 = vector.load %arg1[%c0_134, %c3_135, %c8_136, %c0_137] : memref<1x4x32x64xbf16, #tpu.memory_space<vmem>>, vector<1x1x16x64xbf16>
    %81 = vector.shape_cast %80 : vector<1x1x16x64xbf16> to vector<1x16x64xbf16>
    %c0_138 = arith.constant 0 : index
    %c2_139 = arith.constant 2 : index
    %c9_140 = arith.constant 9 : index
    %c0_141 = arith.constant 0 : index
    %82 = vector.load %arg1[%c0_138, %c2_139, %c9_140, %c0_141] : memref<1x4x32x64xbf16, #tpu.memory_space<vmem>>, vector<1x1x16x64xbf16>
    %83 = vector.shape_cast %82 : vector<1x1x16x64xbf16> to vector<1x16x64xbf16>
    %c0_142 = arith.constant 0 : index
    %c3_143 = arith.constant 3 : index
    %c9_144 = arith.constant 9 : index
    %c0_145 = arith.constant 0 : index
    %84 = vector.load %arg1[%c0_142, %c3_143, %c9_144, %c0_145] : memref<1x4x32x64xbf16, #tpu.memory_space<vmem>>, vector<1x1x16x64xbf16>
    %85 = vector.shape_cast %84 : vector<1x1x16x64xbf16> to vector<1x16x64xbf16>
    %86 = tpu.concatenate %69, %71, %73, %75, %77, %79, %81, %83, %85 in 2 : vector<1x16x64xbf16>, vector<1x16x64xbf16>, vector<1x16x64xbf16>, vector<1x16x64xbf16>, vector<1x16x64xbf16>, vector<1x16x64xbf16>, vector<1x16x64xbf16>, vector<1x16x64xbf16>, vector<1x16x64xbf16> -> vector<1x16x576xbf16>
    %87 = vector.shape_cast %86 : vector<1x16x576xbf16> to vector<16x576xbf16>
    %c0_146 = arith.constant 0 : index
    %c0_147 = arith.constant 0 : index
    %88 = vector.load %arg2[%c0_146, %c0_147] : memref<576x64xbf16, #tpu.memory_space<vmem>>, vector<576x64xbf16>
    %cst_148 = arith.constant dense<0.000000e+00> : vector<16x64xf32>
    %89 = tpu.matmul %87, %88, %cst_148 {dimension_numbers = #tpu.dot_dimension_numbers<[1], [0], [0], [1], [0, 0, 1, 1], [], []>} : vector<16x576xbf16>, vector<576x64xbf16>, vector<16x64xf32> -> vector<16x64xf32>
    %90 = arith.maximumf %67, %89 : vector<16x64xf32>
    %c0_149 = arith.constant 0 : index
    %c0_150 = arith.constant 0 : index
    %91 = vector.load %arg3[%c0_149, %c0_150] : memref<1x64xf32, #tpu.memory_space<vmem>>, vector<1x64xf32>
    %92 = vector.broadcast %91 : vector<1x64xf32> to vector<16x64xf32>
    %93 = arith.mulf %90, %92 : vector<16x64xf32>
    %c0_151 = arith.constant 0 : index
    %c0_152 = arith.constant 0 : index
    %94 = vector.load %arg4[%c0_151, %c0_152] : memref<1x64xf32, #tpu.memory_space<vmem>>, vector<1x64xf32>
    %95 = vector.broadcast %94 : vector<1x64xf32> to vector<16x64xf32>
    %96 = arith.addf %93, %95 : vector<16x64xf32>
    %cst_153 = arith.constant 0.000000e+00 : f32
    %97 = vector.broadcast %cst_153 : f32 to vector<16x64xf32>
    %98 = arith.maximumf %96, %97 : vector<16x64xf32>
    %99 = tpu.iota {dimensions = array<i32: 0>} : vector<16x1xi32>
    %c8_i32 = arith.constant 8 : i32
    %c0_i32 = arith.constant 0 : i32
    %100 = arith.cmpi eq, %c8_i32, %c0_i32 : i32
    %c1_i32 = arith.constant 1 : i32
    %101 = arith.select %100, %c1_i32, %c8_i32 : i32
    %102 = vector.broadcast %101 : i32 to vector<16x1xi32>
    %103 = arith.remsi %99, %102 : vector<16x1xi32>
    %c0_i32_154 = arith.constant 0 : i32
    %104 = vector.broadcast %c0_i32_154 : i32 to vector<16x1xi32>
    %105 = arith.cmpi ne, %103, %104 : vector<16x1xi32>
    %c0_i32_155 = arith.constant 0 : i32
    %106 = vector.broadcast %c0_i32_155 : i32 to vector<16x1xi32>
    %107 = arith.cmpi slt, %103, %106 : vector<16x1xi32>
    %c0_i32_156 = arith.constant 0 : i32
    %108 = arith.cmpi slt, %101, %c0_i32_156 : i32
    %109 = vector.broadcast %108 : i1 to vector<16x1xi1>
    %110 = vector.broadcast %109 : vector<16x1xi1> to vector<16x1xi1>
    %111 = arith.xori %107, %110 : vector<16x1xi1>
    %112 = arith.andi %111, %105 : vector<16x1xi1>
    %113 = vector.broadcast %101 : i32 to vector<16x1xi32>
    %114 = arith.addi %103, %113 : vector<16x1xi32>
    %115 = arith.select %112, %114, %103 : vector<16x1xi1>, vector<16x1xi32>
    %c2_i32 = arith.constant 2 : i32
    %116 = vector.broadcast %c2_i32 : i32 to vector<16x1xi32>
    %117 = arith.cmpi slt, %115, %116 : vector<16x1xi32>
    %cst_157 = arith.constant 0.000000e+00 : f32
    %118 = vector.shape_cast %117 : vector<16x1xi1> to vector<16x1xi1>
    %119 = vector.broadcast %118 : vector<16x1xi1> to vector<16x64xi1>
    %120 = vector.broadcast %cst_157 : f32 to vector<16x64xf32>
    %121 = arith.select %119, %98, %120 : vector<16x64xi1>, vector<16x64xf32>
    %122 = vector.shape_cast %121 : vector<16x64xf32> to vector<1x16x64xf32>
    %cst_158 = arith.constant dense<0xFF800000> : vector<1x64xf32>
    %123 = vector.multi_reduction <maximumf>, %122, %cst_158 [1] : vector<1x16x64xf32> to vector<1x64xf32>
    %c0_159 = arith.constant 0 : index
    %c0_160 = arith.constant 0 : index
    %c0_161 = arith.constant 0 : index
    %124 = vector.load %arg7[%c0_159, %c0_160, %c0_161] : memref<1x1x64xf32, #tpu.memory_space<vmem>>, vector<1x1x64xf32>
    %125 = vector.shape_cast %124 : vector<1x1x64xf32> to vector<1x64xf32>
    %126 = vector.shape_cast %123 : vector<1x64xf32> to vector<1x1x64xf32>
    tpu.vector_store %arg7[%c0_159, %c0_160, %c0_161], %126 {strides = array<i32>} : memref<1x1x64xf32, #tpu.memory_space<vmem>>, vector<1x1x64xf32>,
    %c0_162 = arith.constant 0 : index
    %c0_163 = arith.constant 0 : index
    %127 = vector.load %arg5[%c0_162, %c0_163] : memref<64x5xf32, #tpu.memory_space<vmem>>, vector<64x5xf32>
    %cst_164 = arith.constant dense<0.000000e+00> : vector<1x5xf32>
    %128 = tpu.matmul %123, %127, %cst_164 {dimension_numbers = #tpu.dot_dimension_numbers<[1], [0], [0], [1], [0, 0, 1, 1], [], []>} : vector<1x64xf32>, vector<64x5xf32>, vector<1x5xf32> -> vector<1x5xf32>
    %c0_165 = arith.constant 0 : index
    %c0_166 = arith.constant 0 : index
    %129 = vector.load %arg6[%c0_165, %c0_166] : memref<1x5xf32, #tpu.memory_space<vmem>>, vector<1x5xf32>
    %130 = arith.addf %128, %129 : vector<1x5xf32>
    %c0_167 = arith.constant 0 : index
    %c0_168 = arith.constant 0 : index
    %c0_169 = arith.constant 0 : index
    %131 = vector.load %arg8[%c0_167, %c0_168, %c0_169] : memref<1x1x5xf32, #tpu.memory_space<vmem>>, vector<1x1x5xf32>
    %132 = vector.shape_cast %131 : vector<1x1x5xf32> to vector<1x5xf32>
    %133 = vector.shape_cast %130 : vector<1x5xf32> to vector<1x1x5xf32>
    tpu.vector_store %arg8[%c0_167, %c0_168, %c0_169], %133 {strides = array<i32>} : memref<1x1x5xf32, #tpu.memory_space<vmem>>, vector<1x1x5xf32>,
    return
  }
  func.func @transform_0(%arg0: i32) -> (i32, i32, i32, i32) {
    %c0_i32 = arith.constant 0 : i32
    %c0_i32_0 = arith.constant 0 : i32
    %c0_i32_1 = arith.constant 0 : i32
    %c0_i32_2 = arith.constant 0 : i32
    return %arg0, %c0_i32, %c0_i32_0, %c0_i32_1 : i32, i32, i32, i32
  }
  func.func @transform_1(%arg0: i32) -> (i32, i32) {
    %c0_i32 = arith.constant 0 : i32
    %c0_i32_0 = arith.constant 0 : i32
    %c0_i32_1 = arith.constant 0 : i32
    return %c0_i32, %c0_i32_0 : i32, i32
  }
  func.func @transform_2(%arg0: i32) -> (i32, i32) {
    %c0_i32 = arith.constant 0 : i32
    %c0_i32_0 = arith.constant 0 : i32
    %c0_i32_1 = arith.constant 0 : i32
    return %c0_i32, %c0_i32_0 : i32, i32
  }
  func.func @transform_3(%arg0: i32) -> (i32, i32) {
    %c0_i32 = arith.constant 0 : i32
    %c0_i32_0 = arith.constant 0 : i32
    %c0_i32_1 = arith.constant 0 : i32
    return %c0_i32, %c0_i32_0 : i32, i32
  }
  func.func @transform_4(%arg0: i32) -> (i32, i32) {
    %c0_i32 = arith.constant 0 : i32
    %c0_i32_0 = arith.constant 0 : i32
    %c0_i32_1 = arith.constant 0 : i32
    return %c0_i32, %c0_i32_0 : i32, i32
  }
  func.func @transform_5(%arg0: i32) -> (i32, i32) {
    %c0_i32 = arith.constant 0 : i32
    %c0_i32_0 = arith.constant 0 : i32
    %c0_i32_1 = arith.constant 0 : i32
    return %c0_i32, %c0_i32_0 : i32, i32
  }
  func.func @transform_6(%arg0: i32) -> (i32, i32, i32) {
    %c0_i32 = arith.constant 0 : i32
    %c0_i32_0 = arith.constant 0 : i32
    %c0_i32_1 = arith.constant 0 : i32
    return %arg0, %c0_i32, %c0_i32_0 : i32, i32, i32
  }
  func.func @transform_7(%arg0: i32) -> (i32, i32, i32) {
    %c0_i32 = arith.constant 0 : i32
    %c0_i32_0 = arith.constant 0 : i32
    %c0_i32_1 = arith.constant 0 : i32
    return %arg0, %c0_i32, %c0_i32_0 : i32, i32, i32
  }
}

</mosaic_0001>

<bundles_post_ra>
// kernel: classifier_forward.4
= control target key start
LH: loop header
LB: loop body
LE: loop exit
PB: predicated region body
PF: predicated region fallthrough
CT: control target
= control target key end

     0   :  { %s3324_s15 = smov 0   ;;  %s4038_s0 = inlined_call_operand.vmem [shape: bf16[2,4,384,27], index: 0, kind: input, shape index: {}]   ;;  %s4039_s1 = inlined_call_operand.vmem [shape: bf16[27,64], index: 1, kind: input, shape index: {}]   ;;  %s4040_s2 = inlined_call_operand.vmem [shape: f32[1,64], index: 2, kind: input, shape index: {}]   ;;  %s4041_s3 = inlined_call_operand.vmem [shape: f32[1,64], index: 3, kind: input, shape index: {}]   ;;  %s4042_s4 = inlined_call_operand.vmem [shape: bf16[768,64], index: 4, kind: output, shape index: {}]  }
   0x1 LB: > { %s3330_s16 = sadd.s32 4294967295, %s3296_s15   ;;  %p2587_p0 = scmp.ge.s32.totalorder %s3296_s15, 1  ;;  %s3296_s15 = sphi %s3324_s15, %s14_s15  }
   0x2   : > { %p162_p1 = scmp.lt.s32.totalorder %s3296_s15, 3 }
   0x4   : > { %p163_p2 = pnand %p2587_p0, %p162_p1 }
   0x6   : > { %166 = sbr.rel (%p163_p2) target bundleno = 421 (0x1a5), region = 36 }
   0xb   : > { %v3192_v0 = vld [vmem:[%s4039_s1 + $0x8] sm:$0x3f]   ;;  %vm1176_vm0 = vcmask 1044480   ;;  %vm1177_vm1 = vcmask 1045504   ;;  %v3298_v1 = vmov 65535   ;;  %p188_p3 = scmp.lt.s32.totalorder %s3330_s16, 1 }
   0xc   : > { %v1178_v2 = vsel %vm1176_vm0, 4294967295, %v3298_v1  ;;  %v3193_v5 = vld [vmem:[%s4039_s1] sm:$0xff]   ;;  %vm887_vm2 = vcmask 220160   ;;  %s193_s26 = smul.u32 48, %s3330_s16  ;;  %vm2478_vm3 = vcmask 519168  }
   0xd   : > { %v1179_v3 = vsel %vm1177_vm1, %v1178_v2, 0  ;;  %s189_s21 = scalar_select %p188_p3, %s3330_s16, 1 }
   0xe   : > { %v1181_v4 = vand.u32 %v3192_v0, %v1179_v3  ;;  %p194_p4 = scmp.lt.s32.totalorder %s193_s26, 95 }
   0xf   : > { %s3182_s22 = smul.u32 768, %s189_s21 }
  0x10   : > { %2982 = vmatprep.subr.bf16.mxu0 %v1181_v4  ;;  %3178 = vmatprep.subr.bf16.mxu1 %v1181_v4  ;;  %s4140_s26 = smov (!%p194_p4, %s193_s26), 95 }
  0x11   : > { %2983 = vmatpush3.bf16.msra.mxu0 %v1181_v4  ;;  %3180 = vmatpush3.bf16.msra.mxu1 %v1181_v4  ;;  %s3345_s25 = scalar_lea.vmem %s4038_s0, %s3182_s22  ;;  %s2589_s5 = sshll.u32 %s4140_s26, 2 }
  0x12   : > { %2984 = vmatprep.subr.bf16.mxu0 %v3193_v5  ;;  %3179 = vmatprep.subr.bf16.mxu1 %v3193_v5  ;;  %v3194_v6 = vld [vmem:[%s3345_s25] sm:$0xff]   ;;  %v3196_v8 = vld [vmem:[%s3345_s25 + $0x8] sm:$0xff]   ;;  %v3198_v10 = vld [vmem:[%s3345_s25 + $0x10] sm:$0xff]   ;;  %s3759_s8 = scalar_lea.vmem %s4042_s4, %s2589_s5 }
  0x13   : > { %v3195_v7 = vld [vmem:[%s3345_s25 + $0x180] sm:$0xff]   ;;  %2986 = vmatprep.mubr.msk.bf16.mxu0 %vm887_vm2, %v3194_v6  ;;  %v3197_v9 = vld [vmem:[%s3345_s25 + $0x188] sm:$0xff]   ;;  %v3199_v11 = vld [vmem:[%s3345_s25 + $0x190] sm:$0xff]  }
  0x14   : > { %3082 = vmatprep.mubr.msk.bf16.mxu1 %vm887_vm2, %v3195_v7  ;;  %v3200_v12 = vld [vmem:[%s3345_s25 + $0x18] sm:$0xff]   ;;  %v3202_v14 = vld [vmem:[%s3345_s25 + $0x20] sm:$0xff]   ;;  %v3204_v16 = vld [vmem:[%s3345_s25 + $0x28] sm:$0xff]  }
  0x15   : > { %2985 = vmatpush3.bf16.msra.mxu0 %v3193_v5  ;;  %3181 = vmatpush3.bf16.msra.mxu1 %v3193_v5  ;;  %v3201_v13 = vld [vmem:[%s3345_s25 + $0x198] sm:$0xff]   ;;  %v3203_v15 = vld [vmem:[%s3345_s25 + $0x1a0] sm:$0xff]   ;;  %v3205_v17 = vld [vmem:[%s3345_s25 + $0x1a8] sm:$0xff]  }
  0x16   : > { %v3206_v18 = vld [vmem:[%s3345_s25 + $0x30] sm:$0xff]   ;;  %v3208_v20 = vld [vmem:[%s3345_s25 + $0x38] sm:$0xff]   ;;  %v3210_v22 = vld [vmem:[%s3345_s25 + $0x40] sm:$0xff]  }
  0x17   : > { %v3207_v19 = vld [vmem:[%s3345_s25 + $0x1b0] sm:$0xff]   ;;  %v3209_v21 = vld [vmem:[%s3345_s25 + $0x1b8] sm:$0xff]   ;;  %v3211_v23 = vld [vmem:[%s3345_s25 + $0x1c0] sm:$0xff]  }
  0x18   : > { %2987 = vmatmul.mubr.msk.bf16.vlgmr.msra.gmra.mxu0 %vm887_vm2, %v3196_v8  ;;  %3083 = vmatmul.mubr.msk.bf16.vlgmr.msra.gmra.mxu1 %vm887_vm2, %v3197_v9  ;;  %v3212_v24 = vld [vmem:[%s3345_s25 + $0x48] sm:$0xff]   ;;  %v3214_v26 = vld [vmem:[%s3345_s25 + $0x50] sm:$0xff]   ;;  %v3216_v28 = vld [vmem:[%s3345_s25 + $0x58] sm:$0xff]  }
  0x19   : > { %2990 = vmatprep.mubr.msk.bf16.mxu0 %vm887_vm2, %v3198_v10  ;;  %3086 = vmatprep.mubr.msk.bf16.mxu1 %vm887_vm2, %v3199_v11  ;;  %v3213_v25 = vld [vmem:[%s3345_s25 + $0x1c8] sm:$0xff]   ;;  %v3215_v27 = vld [vmem:[%s3345_s25 + $0x1d0] sm:$0xff]   ;;  %v3217_v29 = vld [vmem:[%s3345_s25 + $0x1d8] sm:$0xff]  }
  0x1a   : > { %v3218_v30 = vld [vmem:[%s3345_s25 + $0x60] sm:$0xff]   ;;  %v3220_v32 = vld [vmem:[%s3345_s25 + $0x68] sm:$0xff]   ;;  %v3222_v34 = vld [vmem:[%s3345_s25 + $0x70] sm:$0xff]  }
  0x1b   : > { %v3219_v31 = vld [vmem:[%s3345_s25 + $0x1e0] sm:$0xff]   ;;  %v3221_v33 = vld [vmem:[%s3345_s25 + $0x1e8] sm:$0xff]   ;;  %v3223_v35 = vld [vmem:[%s3345_s25 + $0x1f0] sm:$0xff]  }
  0x1c   : > { %v3224_v36 = vld [vmem:[%s3345_s25 + $0x78] sm:$0xff]   ;;  %v3226_v38 = vld [vmem:[%s3345_s25 + $0x80] sm:$0xff]   ;;  %v3228_v40 = vld [vmem:[%s3345_s25 + $0x88] sm:$0xff]  }
  0x1d   : > { %v3225_v37 = vld [vmem:[%s3345_s25 + $0x1f8] sm:$0xff]   ;;  %v3227_v39 = vld [vmem:[%s3345_s25 + $0x200] sm:$0xff]   ;;  %v3229_v41 = vld [vmem:[%s3345_s25 + $0x208] sm:$0xff]  }
  0x1e   : > { %v3230_v42 = vld [vmem:[%s3345_s25 + $0x90] sm:$0xff]   ;;  %v3232_v44 = vld [vmem:[%s3345_s25 + $0x98] sm:$0xff]   ;;  %v3234_v46 = vld [vmem:[%s3345_s25 + $0xa0] sm:$0xff]  }
  0x1f   : > { %v3231_v43 = vld [vmem:[%s3345_s25 + $0x210] sm:$0xff]   ;;  %v3233_v45 = vld [vmem:[%s3345_s25 + $0x218] sm:$0xff]   ;;  %v3235_v47 = vld [vmem:[%s3345_s25 + $0x220] sm:$0xff]  }
  0x20   : > { %2991 = vmatmul.mubr.msk.bf16.gmra.mxu0 %vm887_vm2, %v3200_v12  ;;  %3087 = vmatmul.mubr.msk.bf16.gmra.mxu1 %vm887_vm2, %v3201_v13  ;;  %v3236_v48 = vld [vmem:[%s3345_s25 + $0xa8] sm:$0xff]   ;;  %v3238_v50 = vld [vmem:[%s3345_s25 + $0xb0] sm:$0xff]   ;;  %v3240_v52 = vld [vmem:[%s3345_s25 + $0xb8] sm:$0xff]  }
  0x21   : > { %2994 = vmatprep.mubr.msk.bf16.mxu0 %vm887_vm2, %v3202_v14  ;;  %3090 = vmatprep.mubr.msk.bf16.mxu1 %vm887_vm2, %v3203_v15  ;;  %v3237_v49 = vld [vmem:[%s3345_s25 + $0x228] sm:$0xff]   ;;  %v3239_v51 = vld [vmem:[%s3345_s25 + $0x230] sm:$0xff]   ;;  %v3241_v53 = vld [vmem:[%s3345_s25 + $0x238] sm:$0xff]  }
  0x22   : > { %v3242_v54 = vld [vmem:[%s3345_s25 + $0xc0] sm:$0xff]   ;;  %v3244_v56 = vld [vmem:[%s3345_s25 + $0xc8] sm:$0xff]   ;;  %v3246_v58 = vld [vmem:[%s3345_s25 + $0xd0] sm:$0xff]  }
  0x23   : > { %v3243_v55 = vld [vmem:[%s3345_s25 + $0x240] sm:$0xff]   ;;  %v3245_v57 = vld [vmem:[%s3345_s25 + $0x248] sm:$0xff]   ;;  %v3247_v59 = vld [vmem:[%s3345_s25 + $0x250] sm:$0xff]  }
  0x24   : > { %v3248_v60 = vld [vmem:[%s3345_s25 + $0xd8] sm:$0xff]   ;;  %v3250_v62 = vld [vmem:[%s3345_s25 + $0xe0] sm:$0xff]   ;;  %v3252_v0 = vld [vmem:[%s3345_s25 + $0xe8] sm:$0xff]  }
  0x25   : > { %v3249_v61 = vld [vmem:[%s3345_s25 + $0x258] sm:$0xff]   ;;  %v3251_v63 = vld [vmem:[%s3345_s25 + $0x260] sm:$0xff]   ;;  %v3253_v1 = vld [vmem:[%s3345_s25 + $0x268] sm:$0xff]  }
  0x26   : > { %v3254_v2 = vld [vmem:[%s3345_s25 + $0xf0] sm:$0xff]   ;;  %v3256_v4 = vld [vmem:[%s3345_s25 + $0xf8] sm:$0xff]   ;;  %v3258_v6 = vld [vmem:[%s3345_s25 + $0x100] sm:$0xff]  }
  0x27   : > { %v3255_v3 = vld [vmem:[%s3345_s25 + $0x270] sm:$0xff]   ;;  %v3257_v5 = vld [vmem:[%s3345_s25 + $0x278] sm:$0xff]   ;;  %v3259_v7 = vld [vmem:[%s3345_s25 + $0x280] sm:$0xff]  }
  0x28   : > { %2995 = vmatmul.mubr.msk.bf16.gmra.mxu0 %vm887_vm2, %v3204_v16  ;;  %3091 = vmatmul.mubr.msk.bf16.gmra.mxu1 %vm887_vm2, %v3205_v17  ;;  %v3260_v8 = vld [vmem:[%s3345_s25 + $0x108] sm:$0xff]   ;;  %v3262_v10 = vld [vmem:[%s3345_s25 + $0x110] sm:$0xff]   ;;  %v3264_v12 = vld [vmem:[%s3345_s25 + $0x118] sm:$0xff]  }
  0x29   : > { %2998 = vmatprep.mubr.msk.bf16.mxu0 %vm887_vm2, %v3206_v18  ;;  %3094 = vmatprep.mubr.msk.bf16.mxu1 %vm887_vm2, %v3207_v19  ;;  %v3261_v9 = vld [vmem:[%s3345_s25 + $0x288] sm:$0xff]   ;;  %v3263_v11 = vld [vmem:[%s3345_s25 + $0x290] sm:$0xff]   ;;  %v3265_v13 = vld [vmem:[%s3345_s25 + $0x298] sm:$0xff]  }
  0x2a   : > { %v3266_v14 = vld [vmem:[%s3345_s25 + $0x120] sm:$0xff]   ;;  %v3268_v16 = vld [vmem:[%s3345_s25 + $0x128] sm:$0xff]   ;;  %v3270_v18 = vld [vmem:[%s3345_s25 + $0x130] sm:$0xff]  }
  0x2b   : > { %v3267_v15 = vld [vmem:[%s3345_s25 + $0x2a0] sm:$0xff]   ;;  %v3269_v17 = vld [vmem:[%s3345_s25 + $0x2a8] sm:$0xff]   ;;  %v3271_v19 = vld [vmem:[%s3345_s25 + $0x2b0] sm:$0xff]  }
  0x30   : > { %2999 = vmatmul.mubr.msk.bf16.gmra.mxu0 %vm887_vm2, %v3208_v20  ;;  %3095 = vmatmul.mubr.msk.bf16.gmra.mxu1 %vm887_vm2, %v3209_v21  ;;  %v3272_v20 = vld [vmem:[%s3345_s25 + $0x138] sm:$0xff]  }
  0x31   : > { %3002 = vmatprep.mubr.msk.bf16.mxu0 %vm887_vm2, %v3210_v22  ;;  %3098 = vmatprep.mubr.msk.bf16.mxu1 %vm887_vm2, %v3211_v23  ;;  %v3273_v21 = vld [vmem:[%s3345_s25 + $0x2b8] sm:$0xff]   ;;  %v3274_v22 = vld [vmem:[%s3345_s25 + $0x140] sm:$0xff]  }
  0x32   : > { %v3275_v23 = vld [vmem:[%s3345_s25 + $0x2c0] sm:$0xff]  }
  0x38   : > { %3003 = vmatmul.mubr.msk.bf16.gmra.mxu0 %vm887_vm2, %v3212_v24  ;;  %3099 = vmatmul.mubr.msk.bf16.gmra.mxu1 %vm887_vm2, %v3213_v25  ;;  %v3276_v24 = vld [vmem:[%s3345_s25 + $0x148] sm:$0xff]  }
  0x39   : > { %3006 = vmatprep.mubr.msk.bf16.mxu0 %vm887_vm2, %v3214_v26  ;;  %3102 = vmatprep.mubr.msk.bf16.mxu1 %vm887_vm2, %v3215_v27  ;;  %v3277_v25 = vld [vmem:[%s3345_s25 + $0x2c8] sm:$0xff]   ;;  %v3278_v26 = vld [vmem:[%s3345_s25 + $0x150] sm:$0xff]  }
  0x3a   : > { %v3279_v27 = vld [vmem:[%s3345_s25 + $0x2d0] sm:$0xff]  }
  0x40   : > { %3007 = vmatmul.mubr.msk.bf16.gmra.mxu0 %vm887_vm2, %v3216_v28  ;;  %3103 = vmatmul.mubr.msk.bf16.gmra.mxu1 %vm887_vm2, %v3217_v29  ;;  %v3280_v28 = vld [vmem:[%s3345_s25 + $0x158] sm:$0xff]  }
  0x41   : > { %3010 = vmatprep.mubr.msk.bf16.mxu0 %vm887_vm2, %v3218_v30  ;;  %3106 = vmatprep.mubr.msk.bf16.mxu1 %vm887_vm2, %v3219_v31  ;;  %v3281_v29 = vld [vmem:[%s3345_s25 + $0x2d8] sm:$0xff]   ;;  %v3282_v30 = vld [vmem:[%s3345_s25 + $0x160] sm:$0xff]  }
  0x42   : > { %v3283_v31 = vld [vmem:[%s3345_s25 + $0x2e0] sm:$0xff]  }
  0x48   : > { %3011 = vmatmul.mubr.msk.bf16.gmra.mxu0 %vm887_vm2, %v3220_v32  ;;  %3107 = vmatmul.mubr.msk.bf16.gmra.mxu1 %vm887_vm2, %v3221_v33  ;;  %v3284_v32 = vld [vmem:[%s3345_s25 + $0x168] sm:$0xff]  }
  0x49   : > { %3014 = vmatprep.mubr.msk.bf16.mxu0 %vm887_vm2, %v3222_v34  ;;  %3110 = vmatprep.mubr.msk.bf16.mxu1 %vm887_vm2, %v3223_v35  ;;  %v3285_v33 = vld [vmem:[%s3345_s25 + $0x2e8] sm:$0xff]   ;;  %v3286_v34 = vld [vmem:[%s3345_s25 + $0x170] sm:$0xff]  }
  0x4a   : > { %v3287_v35 = vld [vmem:[%s3345_s25 + $0x2f0] sm:$0xff]  }
  0x50   : > { %3015 = vmatmul.mubr.msk.bf16.gmra.mxu0 %vm887_vm2, %v3224_v36  ;;  %3111 = vmatmul.mubr.msk.bf16.gmra.mxu1 %vm887_vm2, %v3225_v37  ;;  %v3288_v36 = vld [vmem:[%s3345_s25 + $0x178] sm:$0xff]  }
  0x51   : > { %3018 = vmatprep.mubr.msk.bf16.mxu0 %vm887_vm2, %v3226_v38  ;;  %3114 = vmatprep.mubr.msk.bf16.mxu1 %vm887_vm2, %v3227_v39  ;;  %v3289_v37 = vld [vmem:[%s3345_s25 + $0x2f8] sm:$0xff]  }
  0x58   : > { %3019 = vmatmul.mubr.msk.bf16.gmra.mxu0 %vm887_vm2, %v3228_v40  ;;  %3115 = vmatmul.mubr.msk.bf16.gmra.mxu1 %vm887_vm2, %v3229_v41 }
  0x59   : > { %3022 = vmatprep.mubr.msk.bf16.mxu0 %vm887_vm2, %v3230_v42  ;;  %3118 = vmatprep.mubr.msk.bf16.mxu1 %vm887_vm2, %v3231_v43 }
  0x60   : > { %3023 = vmatmul.mubr.msk.bf16.gmra.mxu0 %vm887_vm2, %v3232_v44  ;;  %3119 = vmatmul.mubr.msk.bf16.gmra.mxu1 %vm887_vm2, %v3233_v45 }
  0x61   : > { %3026 = vmatprep.mubr.msk.bf16.mxu0 %vm887_vm2, %v3234_v46  ;;  %3122 = vmatprep.mubr.msk.bf16.mxu1 %vm887_vm2, %v3235_v47 }
  0x68   : > { %3027 = vmatmul.mubr.msk.bf16.gmra.mxu0 %vm887_vm2, %v3236_v48  ;;  %3123 = vmatmul.mubr.msk.bf16.gmra.mxu1 %vm887_vm2, %v3237_v49 }
  0x69   : > { %3030 = vmatprep.mubr.msk.bf16.mxu0 %vm887_vm2, %v3238_v50  ;;  %3126 = vmatprep.mubr.msk.bf16.mxu1 %vm887_vm2, %v3239_v51 }
  0x70   : > { %3031 = vmatmul.mubr.msk.bf16.gmra.mxu0 %vm887_vm2, %v3240_v52  ;;  %3127 = vmatmul.mubr.msk.bf16.gmra.mxu1 %vm887_vm2, %v3241_v53 }
  0x71   : > { %3034 = vmatprep.mubr.msk.bf16.mxu0 %vm887_vm2, %v3242_v54  ;;  %3130 = vmatprep.mubr.msk.bf16.mxu1 %vm887_vm2, %v3243_v55 }
  0x78   : > { %3035 = vmatmul.mubr.msk.bf16.gmra.mxu0 %vm887_vm2, %v3244_v56  ;;  %3131 = vmatmul.mubr.msk.bf16.gmra.mxu1 %vm887_vm2, %v3245_v57 }
  0x79   : > { %3038 = vmatprep.mubr.msk.bf16.mxu0 %vm887_vm2, %v3246_v58  ;;  %3134 = vmatprep.mubr.msk.bf16.mxu1 %vm887_vm2, %v3247_v59 }
  0x80   : > { %3039 = vmatmul.mubr.msk.bf16.gmra.mxu0 %vm887_vm2, %v3248_v60  ;;  %3135 = vmatmul.mubr.msk.bf16.gmra.mxu1 %vm887_vm2, %v3249_v61 }
  0x81   : > { %3042 = vmatprep.mubr.msk.bf16.mxu0 %vm887_vm2, %v3250_v62  ;;  %3138 = vmatprep.mubr.msk.bf16.mxu1 %vm887_vm2, %v3251_v63 }
  0x88   : > { %3043 = vmatmul.mubr.msk.bf16.gmra.mxu0 %vm887_vm2, %v3252_v0  ;;  %3139 = vmatmul.mubr.msk.bf16.gmra.mxu1 %vm887_vm2, %v3253_v1 }
  0x89   : > { %3046 = vmatprep.mubr.msk.bf16.mxu0 %vm887_vm2, %v3254_v2  ;;  %3142 = vmatprep.mubr.msk.bf16.mxu1 %vm887_vm2, %v3255_v3 }
  0x90   : > { %3047 = vmatmul.mubr.msk.bf16.gmra.mxu0 %vm887_vm2, %v3256_v4  ;;  %3143 = vmatmul.mubr.msk.bf16.gmra.mxu1 %vm887_vm2, %v3257_v5 }
  0x91   : > { %3050 = vmatprep.mubr.msk.bf16.mxu0 %vm887_vm2, %v3258_v6  ;;  %3146 = vmatprep.mubr.msk.bf16.mxu1 %vm887_vm2, %v3259_v7 }
  0x98   : > { %3051 = vmatmul.mubr.msk.bf16.gmra.mxu0 %vm887_vm2, %v3260_v8  ;;  %3147 = vmatmul.mubr.msk.bf16.gmra.mxu1 %vm887_vm2, %v3261_v9 }
  0x99   : > { %3054 = vmatprep.mubr.msk.bf16.mxu0 %vm887_vm2, %v3262_v10  ;;  %3150 = vmatprep.mubr.msk.bf16.mxu1 %vm887_vm2, %v3263_v11 }
  0xa0   : > { %3055 = vmatmul.mubr.msk.bf16.gmra.mxu0 %vm887_vm2, %v3264_v12  ;;  %3151 = vmatmul.mubr.msk.bf16.gmra.mxu1 %vm887_vm2, %v3265_v13 }
  0xa1   : > { %3058 = vmatprep.mubr.msk.bf16.mxu0 %vm887_vm2, %v3266_v14  ;;  %3154 = vmatprep.mubr.msk.bf16.mxu1 %vm887_vm2, %v3267_v15 }
  0xa8   : > { %3059 = vmatmul.mubr.msk.bf16.gmra.mxu0 %vm887_vm2, %v3268_v16  ;;  %3155 = vmatmul.mubr.msk.bf16.gmra.mxu1 %vm887_vm2, %v3269_v17 }
  0xa9   : > { %3062 = vmatprep.mubr.msk.bf16.mxu0 %vm887_vm2, %v3270_v18  ;;  %3158 = vmatprep.mubr.msk.bf16.mxu1 %vm887_vm2, %v3271_v19 }
  0xb0   : > { %3063 = vmatmul.mubr.msk.bf16.gmra.mxu0 %vm887_vm2, %v3272_v20  ;;  %3159 = vmatmul.mubr.msk.bf16.gmra.mxu1 %vm887_vm2, %v3273_v21 }
  0xb1   : > { %3066 = vmatprep.mubr.msk.bf16.mxu0 %vm887_vm2, %v3274_v22  ;;  %3162 = vmatprep.mubr.msk.bf16.mxu1 %vm887_vm2, %v3275_v23 }
  0xb8   : > { %3067 = vmatmul.mubr.msk.bf16.gmra.mxu0 %vm887_vm2, %v3276_v24  ;;  %3163 = vmatmul.mubr.msk.bf16.gmra.mxu1 %vm887_vm2, %v3277_v25 }
  0xb9   : > { %3070 = vmatprep.mubr.msk.bf16.mxu0 %vm887_vm2, %v3278_v26  ;;  %3166 = vmatprep.mubr.msk.bf16.mxu1 %vm887_vm2, %v3279_v27 }
  0xc0   : > { %3071 = vmatmul.mubr.msk.bf16.gmra.mxu0 %vm887_vm2, %v3280_v28  ;;  %3167 = vmatmul.mubr.msk.bf16.gmra.mxu1 %vm887_vm2, %v3281_v29 }
  0xc1   : > { %3074 = vmatprep.mubr.msk.bf16.mxu0 %vm887_vm2, %v3282_v30  ;;  %3170 = vmatprep.mubr.msk.bf16.mxu1 %vm887_vm2, %v3283_v31 }
  0xc8   : > { %3075 = vmatmul.mubr.msk.bf16.gmra.mxu0 %vm887_vm2, %v3284_v32  ;;  %3171 = vmatmul.mubr.msk.bf16.gmra.mxu1 %vm887_vm2, %v3285_v33 }
  0xc9   : > { %3078 = vmatprep.mubr.msk.bf16.mxu0 %vm887_vm2, %v3286_v34  ;;  %3174 = vmatprep.mubr.msk.bf16.mxu1 %vm887_vm2, %v3287_v35 }
  0xd0   : > { %3079 = vmatmul.mubr.msk.bf16.gmra.mxu0 %vm887_vm2, %v3288_v36  ;;  %3175 = vmatmul.mubr.msk.bf16.gmra.mxu1 %vm887_vm2, %v3289_v37 }
  0xd8   : > { %v3539_v38 = vpop.f32.mrf.mxu0  ;;  %v3541_v39 = vpop.f32.mrf.mxu1 }
  0xda   : > { %v3543_v40 = vpop.f32.mrf.mxu0  ;;  %v3545_v41 = vpop.f32.mrf.mxu1 }
  0xdc   : > { %v3547_v42 = vpop.f32.mrf.mxu0  ;;  %v3549_v43 = vpop.f32.mrf.mxu1 }
  0xde   : > { %v3551_v44 = vpop.f32.mrf.mxu0  ;;  %v3553_v45 = vpop.f32.mrf.mxu1 }
  0xe0   : > { %v3555_v46 = vpop.f32.mrf.mxu0  ;;  %v3557_v47 = vpop.f32.mrf.mxu1 }
  0xe2   : > { %v3559_v48 = vpop.f32.mrf.mxu0  ;;  %v3561_v49 = vpop.f32.mrf.mxu1 }
  0xe4   : > { %v3563_v50 = vpop.f32.mrf.mxu0  ;;  %v3565_v51 = vpop.f32.mrf.mxu1 }
  0xe6   : > { %v3567_v52 = vpop.f32.mrf.mxu0  ;;  %v3569_v53 = vpop.f32.mrf.mxu1 }
  0xe8   : > { %v3571_v54 = vpop.f32.mrf.mxu0  ;;  %v3573_v55 = vpop.f32.mrf.mxu1 }
  0xea   : > { %v3575_v56 = vpop.f32.mrf.mxu0  ;;  %v3577_v57 = vpop.f32.mrf.mxu1 }
  0xec   : > { %v3579_v58 = vpop.f32.mrf.mxu0  ;;  %v3581_v59 = vpop.f32.mrf.mxu1 }
  0xee   : > { %v3583_v60 = vpop.f32.mrf.mxu0  ;;  %v3585_v61 = vpop.f32.mrf.mxu1 }
  0xf0   : > { %v3587_v62 = vpop.f32.mrf.mxu0  ;;  %v3589_v63 = vpop.f32.mrf.mxu1 }
  0xf2   : > { %v3591_v0 = vpop.f32.mrf.mxu0  ;;  %v3593_v1 = vpop.f32.mrf.mxu1 }
  0xf4   : > { %v3595_v2 = vpop.f32.mrf.mxu0  ;;  %v3597_v3 = vpop.f32.mrf.mxu1 }
  0xf6   : > { %v3599_v4 = vpop.f32.mrf.mxu0  ;;  %v3601_v5 = vpop.f32.mrf.mxu1 }
  0xf8   : > { %v3603_v6 = vpop.f32.mrf.mxu0  ;;  %v3605_v7 = vpop.f32.mrf.mxu1 }
  0xfa   : > { %v3607_v8 = vpop.f32.mrf.mxu0  ;;  %v3609_v9 = vpop.f32.mrf.mxu1 }
  0xfc   : > { %v3611_v10 = vpop.f32.mrf.mxu0  ;;  %v3613_v11 = vpop.f32.mrf.mxu1 }
  0xfe   : > { %v3615_v12 = vpop.f32.mrf.mxu0  ;;  %v3617_v13 = vpop.f32.mrf.mxu1 }
 0x100   : > { %v3619_v14 = vpop.f32.mrf.mxu0  ;;  %v3621_v15 = vpop.f32.mrf.mxu1 }
 0x102   : > { %v3623_v16 = vpop.f32.mrf.mxu0  ;;  %v3625_v17 = vpop.f32.mrf.mxu1 }
 0x104   : > { %v3627_v18 = vpop.f32.mrf.mxu0  ;;  %v3629_v19 = vpop.f32.mrf.mxu1 }
 0x106   : > { %v3631_v20 = vpop.f32.mrf.mxu0  ;;  %v3633_v21 = vpop.f32.mrf.mxu1 }
 0x108   : > { %v3635_v22 = vpop.f32.mrf.mxu0  ;;  %v3637_v23 = vpop.f32.mrf.mxu1 }
 0x109   : > { %4043 = vst [vmem:[#allocation2_spill] sm:$0xff] %v3635_v22  ;;  %4044 = vst [vmem:[#allocation3_spill] sm:$0xff] %v3637_v23 }
 0x10a   : > { %v3639_v24 = vpop.f32.mrf.mxu0  ;;  %v3641_v25 = vpop.f32.mrf.mxu1 }
 0x10b   : > { %4045 = vst [vmem:[#allocation4_spill] sm:$0xff] %v3639_v24  ;;  %4046 = vst [vmem:[#allocation5_spill] sm:$0xff] %v3641_v25 }
 0x10c   : > { %v3643_v26 = vpop.f32.mrf.mxu0  ;;  %v3645_v27 = vpop.f32.mrf.mxu1 }
 0x10d   : > { %4047 = vst [vmem:[#allocation6_spill] sm:$0xff] %v3643_v26  ;;  %4048 = vst [vmem:[#allocation7_spill] sm:$0xff] %v3645_v27 }
 0x10e   : > { %v3647_v28 = vpop.f32.mrf.mxu0  ;;  %v3649_v29 = vpop.f32.mrf.mxu1 }
 0x10f   : > { %4049 = vst [vmem:[#allocation8_spill] sm:$0xff] %v3647_v28  ;;  %4050 = vst [vmem:[#allocation9_spill] sm:$0xff] %v3649_v29 }
 0x110   : > { %v3651_v30 = vpop.f32.mrf.mxu0  ;;  %v3653_v31 = vpop.f32.mrf.mxu1 }
 0x111   : > { %4051 = vst [vmem:[#allocation10_spill] sm:$0xff] %v3651_v30  ;;  %4052 = vst [vmem:[#allocation11_spill] sm:$0xff] %v3653_v31 }
 0x112   : > { %v3655_v32 = vpop.f32.mrf.mxu0  ;;  %v3657_v33 = vpop.f32.mrf.mxu1 }
 0x113   : > { %4053 = vst [vmem:[#allocation12_spill] sm:$0xff] %v3655_v32  ;;  %4054 = vst [vmem:[#allocation13_spill] sm:$0xff] %v3657_v33 }
 0x114   : > { %v3659_v34 = vpop.f32.mrf.mxu0  ;;  %v3661_v35 = vpop.f32.mrf.mxu1 }
 0x115   : > { %4055 = vst [vmem:[#allocation14_spill] sm:$0xff] %v3659_v34  ;;  %4056 = vst [vmem:[#allocation15_spill] sm:$0xff] %v3661_v35 }
 0x116   : > { %v3663_v36 = vpop.f32.mrf.mxu0  ;;  %v3665_v37 = vpop.f32.mrf.mxu1 }
 0x117   : > { %4057 = vst [vmem:[#allocation16_spill] sm:$0xff] %v3663_v36  ;;  %4058 = vst [vmem:[#allocation17_spill] sm:$0xff] %v3665_v37 }
 0x118   : > { %v3667_v27 = vpop.f32.mrf.mxu0  ;;  %v3669_v28 = vpop.f32.mrf.mxu1 }
 0x119   : > { %4059 = vst [vmem:[#allocation18_spill] sm:$0xff] %v3667_v27  ;;  %4060 = vst [vmem:[#allocation19_spill] sm:$0xff] %v3669_v28 }
 0x11a   : > { %v3671_v29 = vpop.f32.mrf.mxu0  ;;  %v3673_v30 = vpop.f32.mrf.mxu1 }
 0x11b   : > { %4061 = vst [vmem:[#allocation20_spill] sm:$0xff] %v3671_v29  ;;  %4062 = vst [vmem:[#allocation21_spill] sm:$0xff] %v3673_v30 }
 0x11c   : > { %v3675_v31 = vpop.f32.mrf.mxu0  ;;  %v3677_v32 = vpop.f32.mrf.mxu1 }
 0x11d   : > { %4063 = vst [vmem:[#allocation22_spill] sm:$0xff] %v3675_v31  ;;  %4064 = vst [vmem:[#allocation23_spill] sm:$0xff] %v3677_v32 }
 0x11e   : > { %v3679_v33 = vpop.f32.mrf.mxu0  ;;  %v3681_v34 = vpop.f32.mrf.mxu1 }
 0x11f   : > { %4065 = vst [vmem:[#allocation24_spill] sm:$0xff] %v3679_v33  ;;  %4066 = vst [vmem:[#allocation25_spill] sm:$0xff] %v3681_v34 }
 0x120   : > { %v3683_v35 = vpop.f32.mrf.mxu0  ;;  %v3685_v36 = vpop.f32.mrf.mxu1 }
 0x121   : > { %4067 = vst [vmem:[#allocation26_spill] sm:$0xff] %v3683_v35  ;;  %4068 = vst [vmem:[#allocation27_spill] sm:$0xff] %v3685_v36 }
 0x122   : > { %v3687_v37 = vpop.f32.mrf.mxu0  ;;  %v3689_v27 = vpop.f32.mrf.mxu1 }
 0x123   : > { %4069 = vst [vmem:[#allocation28_spill] sm:$0xff] %v3687_v37  ;;  %4070 = vst [vmem:[#allocation29_spill] sm:$0xff] %v3689_v27 }
 0x124   : > { %v3691_v28 = vpop.f32.mrf.mxu0  ;;  %v3693_v30 = vpop.f32.mrf.mxu1 }
 0x125   : > { %4071 = vst [vmem:[#allocation30_spill] sm:$0xff] %v3691_v28  ;;  %4072 = vst [vmem:[#allocation31_spill] sm:$0xff] %v3693_v30 }
 0x126   : > { %v3695_v31 = vpop.f32.mrf.mxu0  ;;  %v3697_v32 = vpop.f32.mrf.mxu1 }
 0x127   : > { %4073 = vst [vmem:[#allocation32_spill] sm:$0xff] %v3695_v31  ;;  %4074 = vst [vmem:[#allocation33_spill] sm:$0xff] %v3697_v32 }
 0x128   : > { %v3699_v33 = vpop.f32.mrf.mxu0  ;;  %v3701_v34 = vpop.f32.mrf.mxu1 }
 0x129   : > { %4075 = vst [vmem:[#allocation34_spill] sm:$0xff] %v3699_v33  ;;  %4076 = vst [vmem:[#allocation35_spill] sm:$0xff] %v3701_v34  ;;  %v3744_v34 = vld [vmem:[%s4041_s3] ss:$0 sm:$0xff] }
 0x12a   : > { %v3703_v35 = vpop.f32.mrf.mxu0  ;;  %v3705_v36 = vpop.f32.mrf.mxu1 }
 0x12b   : > { %4077 = vst [vmem:[#allocation36_spill] sm:$0xff] %v3703_v35  ;;  %4078 = vst [vmem:[#allocation37_spill] sm:$0xff] %v3705_v36 }
 0x12c   : > { %v3707_v37 = vpop.f32.mrf.mxu0  ;;  %v3709_v27 = vpop.f32.mrf.mxu1 }
 0x12d   : > { %4079 = vst [vmem:[#allocation38_spill] sm:$0xff] %v3707_v37  ;;  %4080 = vst [vmem:[#allocation39_spill] sm:$0xff] %v3709_v27 }
 0x12e   : > { %v3711_v28 = vpop.f32.mrf.mxu0  ;;  %v3713_v29 = vpop.f32.mrf.mxu1 }
 0x12f   : > { %4081 = vst [vmem:[#allocation40_spill] sm:$0xff] %v3711_v28  ;;  %4082 = vst [vmem:[#allocation41_spill] sm:$0xff] %v3713_v29 }
 0x130   : > { %v3715_v30 = vpop.f32.mrf.mxu0  ;;  %v3717_v31 = vpop.f32.mrf.mxu1 }
 0x131   : > { %4083 = vst [vmem:[#allocation42_spill] sm:$0xff] %v3715_v30  ;;  %4084 = vst [vmem:[#allocation43_spill] sm:$0xff] %v3717_v31 }
 0x132   : > { %v3719_v32 = vpop.f32.mrf.mxu0  ;;  %v3721_v33 = vpop.f32.mrf.mxu1 }
 0x133   : > { %4085 = vst [vmem:[#allocation44_spill] sm:$0xff] %v3719_v32  ;;  %4086 = vst [vmem:[#allocation45_spill] sm:$0xff] %v3721_v33  ;;  %v3737_v33 = vld [vmem:[%s4040_s2] ss:$0 sm:$0xff] }
 0x134   : > { %v3724_v35 = vpop.f32.mrf.mxu0  ;;  %v3726_v36 = vpop.f32.mrf.mxu1 }
 0x135   : > { %4087 = vst [vmem:[#allocation46_spill] sm:$0xff] %v3724_v35  ;;  %4088 = vst [vmem:[#allocation47_spill] sm:$0xff] %v3726_v36 }
 0x136   : > { %v3728_v37 = vpop.f32.mrf.mxu0  ;;  %v3730_v27 = vpop.f32.mrf.mxu1 }
 0x137   : > { %4089 = vst [vmem:[#allocation48_spill] sm:$0xff] %v3728_v37  ;;  %4090 = vst [vmem:[#allocation49_spill] sm:$0xff] %v3730_v27 }
 0x138   : > { %v3036_v28 = vpop.f32.mrf.mxu0  ;;  %v3132_v29 = vpop.f32.mrf.mxu1 }
 0x139   : > { %v1986_v30 = vmax.f32 %v3539_v38, %v3036_v28  ;;  %v2034_v31 = vmax.f32 %v3541_v39, %v3132_v29 }
 0x13a   : > { %v1409_v32 = vpop.f32.mrf.mxu0  ;;  %v1793_v35 = vpop.f32.mrf.mxu1 }
 0x13b   : > { %v2082_v36 = vmax.f32 %v1986_v30, %v2034_v31  ;;  %v1984_v37 = vmax.f32 %v3543_v40, %v1409_v32  ;;  %v2032_v27 = vmax.f32 %v3545_v41, %v1793_v35 }
 0x13c   : > { %v3037_v38 = vpop.f32.mrf.mxu0  ;;  %v3133_v39 = vpop.f32.mrf.mxu1 }
 0x13d   : > { %v2137_v28 = vmul.f32 %v3737_v33, %v2082_v36  ;;  %v2080_v29 = vmax.f32 %v1984_v37, %v2032_v27  ;;  %v1987_v26 = vmax.f32 %v3547_v42, %v3037_v38  ;;  %v2035_v25 = vmax.f32 %v3549_v43, %v3133_v39 }
 0x13e   : > { %v1412_v24 = vpop.f32.mrf.mxu0  ;;  %v1796_v30 = vpop.f32.mrf.mxu1 }
 0x13f   : > { %v2192_v40 = vadd.f32 %v3744_v34, %v2137_v28  ;;  %v2135_v41 = vmul.f32 %v3737_v33, %v2080_v29  ;;  %v2083_v31 = vmax.f32 %v1987_v26, %v2035_v25  ;;  %v1985_v32 = vmax.f32 %v3551_v44, %v1412_v24 }
 0x140   : > { %v2033_v35 = vmax.f32 %v3553_v45, %v1796_v30  ;;  %v3040_v23 = vpop.f32.mrf.mxu0  ;;  %v3136_v22 = vpop.f32.mrf.mxu1 }
 0x141   : > { %v2240_v36 = vmax.f32 %v2192_v40, 0.0  ;;  %v2190_v27 = vadd.f32 %v3744_v34, %v2135_v41  ;;  %v2138_v42 = vmul.f32 %v3737_v33, %v2083_v31  ;;  %v1990_v43 = vmax.f32 %v3555_v46, %v3040_v23 }
 0x142   : > { %v2081_v25 = vmax.f32 %v1985_v32, %v2033_v35  ;;  %v2038_v44 = vmax.f32 %v3557_v47, %v3136_v22  ;;  %v1425_v45 = vpop.f32.mrf.mxu0  ;;  %v1809_v24 = vpop.f32.mrf.mxu1 }
 0x143   : > { %v2838_v26 = vpack.c.bf16 %v2240_v36, %v2240_v36  ;;  %v2238_v37 = vmax.f32 %v2190_v27, 0.0  ;;  %v2193_v38 = vadd.f32 %v3744_v34, %v2138_v42  ;;  %v1988_v39 = vmax.f32 %v3559_v48, %v1425_v45 }
 0x144   : > { %v2136_v46 = vmul.f32 %v3737_v33, %v2081_v25  ;;  %v2086_v23 = vmax.f32 %v1990_v43, %v2038_v44  ;;  %v2036_v28 = vmax.f32 %v3561_v49, %v1809_v24  ;;  %v3041_v29 = vpop.f32.mrf.mxu0  ;;  %v3137_v30 = vpop.f32.mrf.mxu1 }
 0x145   : > { %2481 = vst.msk [vmem:[%s3759_s8 + $0x8] sm:$0xf] %vm2478_vm3, %v2838_v26  ;;  %v2836_v40 = vpack.c.bf16 %v2238_v37, %v2238_v37  ;;  %v2241_v47 = vmax.f32 %v2193_v38, 0.0  ;;  %v1991_v22 = vmax.f32 %v3563_v50, %v3041_v29  ;;  %v2039_v41 = vmax.f32 %v3565_v51, %v3137_v30 }
 0x146   : > { %v2191_v31 = vadd.f32 %v3744_v34, %v2136_v46  ;;  %v2141_v48 = vmul.f32 %v3737_v33, %v2086_v23  ;;  %v2084_v32 = vmax.f32 %v1988_v39, %v2036_v28  ;;  %v1428_v35 = vpop.f32.mrf.mxu0  ;;  %v1812_v36 = vpop.f32.mrf.mxu1 }
 0x147   : > { %2479 = vst.msk [vmem:[%s3759_s8] sm:$0xf] %vm2478_vm3, %v2836_v40  ;;  %v2839_v49 = vpack.c.bf16 %v2241_v47, %v2241_v47  ;;  %v2087_v27 = vmax.f32 %v1991_v22, %v2039_v41  ;;  %v1989_v42 = vmax.f32 %v3567_v52, %v1428_v35  ;;  %v2037_v43 = vmax.f32 %v3569_v53, %v1812_v36 }
 0x148   : > { %v2239_v25 = vmax.f32 %v2191_v31, 0.0  ;;  %v2196_v50 = vadd.f32 %v3744_v34, %v2141_v48  ;;  %v2139_v51 = vmul.f32 %v3737_v33, %v2084_v32  ;;  %v3044_v44 = vpop.f32.mrf.mxu0  ;;  %v3140_v45 = vpop.f32.mrf.mxu1 }
 0x149   : > { %2482 = vst.msk [vmem:[%s3759_s8 + $0xc] sm:$0xf] %vm2478_vm3, %v2839_v49  ;;  %v2142_v24 = vmul.f32 %v3737_v33, %v2087_v27  ;;  %v2085_v26 = vmax.f32 %v1989_v42, %v2037_v43  ;;  %v1994_v37 = vmax.f32 %v3571_v54, %v3044_v44  ;;  %v2042_v38 = vmax.f32 %v3573_v55, %v3140_v45 }
 0x14a   : > { %v2837_v52 = vpack.c.bf16 %v2239_v25, %v2239_v25  ;;  %v2244_v39 = vmax.f32 %v2196_v50, 0.0  ;;  %v2194_v53 = vadd.f32 %v3744_v34, %v2139_v51  ;;  %v1441_v46 = vpop.f32.mrf.mxu0  ;;  %v1825_v23 = vpop.f32.mrf.mxu1 }
 0x14b   : > { %v2197_v28 = vadd.f32 %v3744_v34, %v2142_v24  ;;  %v2140_v29 = vmul.f32 %v3737_v33, %v2085_v26  ;;  %v2090_v30 = vmax.f32 %v1994_v37, %v2042_v38  ;;  %v1992_v40 = vmax.f32 %v3575_v56, %v1441_v46 }
 0x14c   : > { %2480 = vst.msk [vmem:[%s3759_s8 + $0x4] sm:$0xf] %vm2478_vm3, %v2837_v52  ;;  %v2842_v47 = vpack.c.bf16 %v2244_v39, %v2244_v39  ;;  %v2242_v54 = vmax.f32 %v2194_v53, 0.0  ;;  %v2040_v55 = vmax.f32 %v3577_v57, %v1825_v23  ;;  %v3045_v22 = vpop.f32.mrf.mxu0  ;;  %v3141_v41 = vpop.f32.mrf.mxu1 }
 0x14d   : > { %v2245_v31 = vmax.f32 %v2197_v28, 0.0  ;;  %v2195_v48 = vadd.f32 %v3744_v34, %v2140_v29  ;;  %v2145_v32 = vmul.f32 %v3737_v33, %v2090_v30  ;;  %v1995_v35 = vmax.f32 %v3579_v58, %v3045_v22 }
 0x14e   : > { %2485 = vst.msk [vmem:[%s3759_s8 + $0x18] sm:$0xf] %vm2478_vm3, %v2842_v47  ;;  %v2840_v56 = vpack.c.bf16 %v2242_v54, %v2242_v54  ;;  %v2088_v36 = vmax.f32 %v1992_v40, %v2040_v55  ;;  %v2043_v49 = vmax.f32 %v3581_v59, %v3141_v41  ;;  %v1444_v27 = vpop.f32.mrf.mxu0  ;;  %v1828_v42 = vpop.f32.mrf.mxu1 }
 0x14f   : > { %v2843_v57 = vpack.c.bf16 %v2245_v31, %v2245_v31  ;;  %v2243_v43 = vmax.f32 %v2195_v48, 0.0  ;;  %v2200_v25 = vadd.f32 %v3744_v34, %v2145_v32  ;;  %v1993_v50 = vmax.f32 %v3583_v60, %v1444_v27 }
 0x150   : > { %2483 = vst.msk [vmem:[%s3759_s8 + $0x10] sm:$0xf] %vm2478_vm3, %v2840_v56  ;;  %v2143_v58 = vmul.f32 %v3737_v33, %v2088_v36  ;;  %v2091_v51 = vmax.f32 %v1995_v35, %v2043_v49  ;;  %v2041_v44 = vmax.f32 %v3585_v61, %v1828_v42  ;;  %v3048_v45 = vpop.f32.mrf.mxu0  ;;  %v3144_v24 = vpop.f32.mrf.mxu1 }
 0x151   : > { %2486 = vst.msk [vmem:[%s3759_s8 + $0x1c] sm:$0xf] %vm2478_vm3, %v2843_v57  ;;  %v2841_v59 = vpack.c.bf16 %v2243_v43, %v2243_v43  ;;  %v2248_v26 = vmax.f32 %v2200_v25, 0.0  ;;  %v1998_v37 = vmax.f32 %v3587_v62, %v3048_v45  ;;  %v2046_v38 = vmax.f32 %v3589_v63, %v3144_v24 }
 0x152   : > { %v2198_v60 = vadd.f32 %v3744_v34, %v2143_v58  ;;  %v2146_v52 = vmul.f32 %v3737_v33, %v2091_v51  ;;  %v2089_v39 = vmax.f32 %v1993_v50, %v2041_v44  ;;  %v1457_v53 = vpop.f32.mrf.mxu0  ;;  %v1841_v46 = vpop.f32.mrf.mxu1 }
 0x153   : > { %2484 = vst.msk [vmem:[%s3759_s8 + $0x14] sm:$0xf] %vm2478_vm3, %v2841_v59  ;;  %v2846_v61 = vpack.c.bf16 %v2248_v26, %v2248_v26  ;;  %v2094_v23 = vmax.f32 %v1998_v37, %v2046_v38  ;;  %v1996_v28 = vmax.f32 %v3591_v0, %v1457_v53  ;;  %v2044_v29 = vmax.f32 %v3593_v1, %v1841_v46 }
 0x154   : > { %v2246_v30 = vmax.f32 %v2198_v60, 0.0  ;;  %v2201_v62 = vadd.f32 %v3744_v34, %v2146_v52  ;;  %v2144_v63 = vmul.f32 %v3737_v33, %v2089_v39  ;;  %v3049_v40 = vpop.f32.mrf.mxu0  ;;  %v3145_v47 = vpop.f32.mrf.mxu1 }
 0x155   : > { %2489 = vst.msk [vmem:[%s3759_s8 + $0x28] sm:$0xf] %vm2478_vm3, %v2846_v61  ;;  %v2149_v54 = vmul.f32 %v3737_v33, %v2094_v23  ;;  %v2092_v55 = vmax.f32 %v1996_v28, %v2044_v29  ;;  %v1999_v22 = vmax.f32 %v3595_v2, %v3049_v40  ;;  %v2047_v41 = vmax.f32 %v3597_v3, %v3145_v47 }
 0x156   : > { %v2844_v0 = vpack.c.bf16 %v2246_v30, %v2246_v30  ;;  %v2249_v31 = vmax.f32 %v2201_v62, 0.0  ;;  %v2199_v1 = vadd.f32 %v3744_v34, %v2144_v63  ;;  %v1460_v48 = vpop.f32.mrf.mxu0  ;;  %v1844_v32 = vpop.f32.mrf.mxu1 }
 0x157   : > { %v2204_v35 = vadd.f32 %v3744_v34, %v2149_v54  ;;  %v2147_v56 = vmul.f32 %v3737_v33, %v2092_v55  ;;  %v2095_v36 = vmax.f32 %v1999_v22, %v2047_v41  ;;  %v1997_v49 = vmax.f32 %v3599_v4, %v1460_v48 }
 0x158   : > { %2487 = vst.msk [vmem:[%s3759_s8 + $0x20] sm:$0xf] %vm2478_vm3, %v2844_v0  ;;  %v2847_v27 = vpack.c.bf16 %v2249_v31, %v2249_v31  ;;  %v2247_v2 = vmax.f32 %v2199_v1, 0.0  ;;  %v2045_v3 = vmax.f32 %v3601_v5, %v1844_v32  ;;  %v3052_v42 = vpop.f32.mrf.mxu0  ;;  %v3148_v57 = vpop.f32.mrf.mxu1 }
 0x159   : > { %v2252_v43 = vmax.f32 %v2204_v35, 0.0  ;;  %v2202_v25 = vadd.f32 %v3744_v34, %v2147_v56  ;;  %v2150_v50 = vmul.f32 %v3737_v33, %v2095_v36  ;;  %v2002_v58 = vmax.f32 %v3603_v6, %v3052_v42 }
 0x15a   : > { %2490 = vst.msk [vmem:[%s3759_s8 + $0x2c] sm:$0xf] %vm2478_vm3, %v2847_v27  ;;  %v2845_v4 = vpack.c.bf16 %v2247_v2, %v2247_v2  ;;  %v2093_v51 = vmax.f32 %v1997_v49, %v2045_v3  ;;  %v2050_v44 = vmax.f32 %v3605_v7, %v3148_v57  ;;  %v1473_v45 = vpop.f32.mrf.mxu0  ;;  %v1857_v24 = vpop.f32.mrf.mxu1 }
 0x15b   : > { %v2850_v5 = vpack.c.bf16 %v2252_v43, %v2252_v43  ;;  %v2250_v59 = vmax.f32 %v2202_v25, 0.0  ;;  %v2205_v26 = vadd.f32 %v3744_v34, %v2150_v50  ;;  %v2000_v37 = vmax.f32 %v3607_v8, %v1473_v45 }
 0x15c   : > { %2488 = vst.msk [vmem:[%s3759_s8 + $0x24] sm:$0xf] %vm2478_vm3, %v2845_v4  ;;  %v2148_v6 = vmul.f32 %v3737_v33, %v2093_v51  ;;  %v2098_v38 = vmax.f32 %v2002_v58, %v2050_v44  ;;  %v2048_v60 = vmax.f32 %v3609_v9, %v1857_v24  ;;  %v3053_v52 = vpop.f32.mrf.mxu0  ;;  %v3149_v39 = vpop.f32.mrf.mxu1 }
 0x15d   : > { %2493 = vst.msk [vmem:[%s3759_s8 + $0x38] sm:$0xf] %vm2478_vm3, %v2850_v5  ;;  %v2848_v7 = vpack.c.bf16 %v2250_v59, %v2250_v59  ;;  %v2253_v53 = vmax.f32 %v2205_v26, 0.0  ;;  %v2003_v46 = vmax.f32 %v3611_v10, %v3053_v52  ;;  %v2051_v61 = vmax.f32 %v3613_v11, %v3149_v39  ;;  %v4092_v52 = vld [vmem:[#allocation3_spill] sm:$0xff] }
 0x15e   : > { %v2203_v8 = vadd.f32 %v3744_v34, %v2148_v6  ;;  %v2153_v23 = vmul.f32 %v3737_v33, %v2098_v38  ;;  %v2096_v28 = vmax.f32 %v2000_v37, %v2048_v60  ;;  %v1476_v29 = vpop.f32.mrf.mxu0  ;;  %v1860_v30 = vpop.f32.mrf.mxu1  ;;  %v4091_v38 = vld [vmem:[#allocation2_spill] sm:$0xff] }
 0x15f   : > { %2491 = vst.msk [vmem:[%s3759_s8 + $0x30] sm:$0xf] %vm2478_vm3, %v2848_v7  ;;  %v2851_v9 = vpack.c.bf16 %v2253_v53, %v2253_v53  ;;  %v2099_v62 = vmax.f32 %v2003_v46, %v2051_v61  ;;  %v2001_v63 = vmax.f32 %v3615_v12, %v1476_v29  ;;  %v2049_v40 = vmax.f32 %v3617_v13, %v1860_v30  ;;  %v4094_v29 = vld [vmem:[#allocation5_spill] sm:$0xff] }
 0x160   : > { %v2251_v47 = vmax.f32 %v2203_v8, 0.0  ;;  %v2208_v10 = vadd.f32 %v3744_v34, %v2153_v23  ;;  %v2151_v11 = vmul.f32 %v3737_v33, %v2096_v28  ;;  %v3056_v54 = vpop.f32.mrf.mxu0  ;;  %v3152_v55 = vpop.f32.mrf.mxu1  ;;  %v4093_v23 = vld [vmem:[#allocation4_spill] sm:$0xff] }
 0x161   : > { %2494 = vst.msk [vmem:[%s3759_s8 + $0x3c] sm:$0xf] %vm2478_vm3, %v2851_v9  ;;  %v2154_v22 = vmul.f32 %v3737_v33, %v2099_v62  ;;  %v2097_v41 = vmax.f32 %v2001_v63, %v2049_v40  ;;  %v2006_v0 = vmax.f32 %v3619_v14, %v3056_v54  ;;  %v2054_v31 = vmax.f32 %v3621_v15, %v3152_v55  ;;  %v4095_v54 = vld [vmem:[#allocation6_spill] sm:$0xff] }
 0x162   : > { %v2849_v12 = vpack.c.bf16 %v2251_v47, %v2251_v47  ;;  %v2256_v1 = vmax.f32 %v2208_v10, 0.0  ;;  %v2206_v13 = vadd.f32 %v3744_v34, %v2151_v11  ;;  %v1489_v48 = vpop.f32.mrf.mxu0  ;;  %v1873_v32 = vpop.f32.mrf.mxu1 }
 0x163   : > { %v2209_v35 = vadd.f32 %v3744_v34, %v2154_v22  ;;  %v2152_v56 = vmul.f32 %v3737_v33, %v2097_v41  ;;  %v2102_v36 = vmax.f32 %v2006_v0, %v2054_v31  ;;  %v2004_v49 = vmax.f32 %v3623_v16, %v1489_v48  ;;  %v4096_v22 = vld [vmem:[#allocation7_spill] sm:$0xff] }
 0x164   : > { %2492 = vst.msk [vmem:[%s3759_s8 + $0x34] sm:$0xf] %vm2478_vm3, %v2849_v12  ;;  %v2854_v27 = vpack.c.bf16 %v2256_v1, %v2256_v1  ;;  %v2254_v14 = vmax.f32 %v2206_v13, 0.0  ;;  %v2052_v15 = vmax.f32 %v3625_v17, %v1873_v32  ;;  %v3057_v2 = vpop.f32.mrf.mxu0  ;;  %v3153_v3 = vpop.f32.mrf.mxu1 }
 0x165   : > { %v2257_v42 = vmax.f32 %v2209_v35, 0.0  ;;  %v2207_v57 = vadd.f32 %v3744_v34, %v2152_v56  ;;  %v2157_v43 = vmul.f32 %v3737_v33, %v2102_v36  ;;  %v2007_v25 = vmax.f32 %v3627_v18, %v3057_v2  ;;  %v4097_v56 = vld [vmem:[#allocation8_spill] sm:$0xff] }
 0x166   : > { %2497 = vst.msk [vmem:[%s3759_s8 + $0x48] sm:$0xf] %vm2478_vm3, %v2854_v27  ;;  %v2852_v16 = vpack.c.bf16 %v2254_v14, %v2254_v14  ;;  %v2100_v50 = vmax.f32 %v2004_v49, %v2052_v15  ;;  %v2055_v58 = vmax.f32 %v3629_v19, %v3153_v3  ;;  %v1492_v4 = vpop.f32.mrf.mxu0  ;;  %v1876_v51 = vpop.f32.mrf.mxu1  ;;  %v4098_v14 = vld [vmem:[#allocation9_spill] sm:$0xff] }
 0x167   : > { %v2855_v17 = vpack.c.bf16 %v2257_v42, %v2257_v42  ;;  %v2255_v44 = vmax.f32 %v2207_v57, 0.0  ;;  %v2212_v45 = vadd.f32 %v3744_v34, %v2157_v43  ;;  %v2005_v24 = vmax.f32 %v3631_v20, %v1492_v4  ;;  %v4100_v4 = vld [vmem:[#allocation11_spill] sm:$0xff] }
 0x168   : > { %2495 = vst.msk [vmem:[%s3759_s8 + $0x40] sm:$0xf] %vm2478_vm3, %v2852_v16  ;;  %v2155_v18 = vmul.f32 %v3737_v33, %v2100_v50  ;;  %v2103_v5 = vmax.f32 %v2007_v25, %v2055_v58  ;;  %v2053_v59 = vmax.f32 %v3633_v21, %v1876_v51  ;;  %v3060_v26 = vpop.f32.mrf.mxu0  ;;  %v3156_v37 = vpop.f32.mrf.mxu1  ;;  %v4099_v25 = vld [vmem:[#allocation10_spill] sm:$0xff] }
 0x169   : > { %2498 = vst.msk [vmem:[%s3759_s8 + $0x4c] sm:$0xf] %vm2478_vm3, %v2855_v17  ;;  %v2853_v19 = vpack.c.bf16 %v2255_v44, %v2255_v44  ;;  %v2260_v6 = vmax.f32 %v2212_v45, 0.0  ;;  %v2010_v60 = vmax.f32 %v4091_v38, %v3060_v26  ;;  %v2058_v39 = vmax.f32 %v4092_v52, %v3156_v37 }
 0x16a   : > { %v2210_v20 = vadd.f32 %v3744_v34, %v2155_v18  ;;  %v2158_v7 = vmul.f32 %v3737_v33, %v2103_v5  ;;  %v2101_v53 = vmax.f32 %v2005_v24, %v2053_v59  ;;  %v1505_v46 = vpop.f32.mrf.mxu0  ;;  %v1889_v61 = vpop.f32.mrf.mxu1  ;;  %v4101_v5 = vld [vmem:[#allocation12_spill] sm:$0xff] }
 0x16b   : > { %2496 = vst.msk [vmem:[%s3759_s8 + $0x44] sm:$0xf] %vm2478_vm3, %v2853_v19  ;;  %v2858_v21 = vpack.c.bf16 %v2260_v6, %v2260_v6  ;;  %v2106_v8 = vmax.f32 %v2010_v60, %v2058_v39  ;;  %v2008_v28 = vmax.f32 %v4093_v23, %v1505_v46  ;;  %v2056_v30 = vmax.f32 %v4094_v29, %v1889_v61  ;;  %v4102_v19 = vld [vmem:[#allocation13_spill] sm:$0xff] }
 0x16c   : > { %v2258_v9 = vmax.f32 %v2210_v20, 0.0  ;;  %v2213_v62 = vadd.f32 %v3744_v34, %v2158_v7  ;;  %v2156_v63 = vmul.f32 %v3737_v33, %v2101_v53  ;;  %v3061_v40 = vpop.f32.mrf.mxu0  ;;  %v3157_v47 = vpop.f32.mrf.mxu1  ;;  %v4103_v20 = vld [vmem:[#allocation14_spill] sm:$0xff]  ;;  %v4104_v53 = vld [vmem:[#allocation15_spill] sm:$0xff] }
 0x16d   : > { %2501 = vst.msk [vmem:[%s3759_s8 + $0x58] sm:$0xf] %vm2478_vm3, %v2858_v21  ;;  %v2161_v10 = vmul.f32 %v3737_v33, %v2106_v8  ;;  %v2104_v11 = vmax.f32 %v2008_v28, %v2056_v30  ;;  %v2011_v55 = vmax.f32 %v4095_v54, %v3061_v40  ;;  %v2059_v41 = vmax.f32 %v4096_v22, %v3157_v47 }
 0x16e   : > { %v2856_v0 = vpack.c.bf16 %v2258_v9, %v2258_v9  ;;  %v2261_v31 = vmax.f32 %v2213_v62, 0.0  ;;  %v2211_v12 = vadd.f32 %v3744_v34, %v2156_v63  ;;  %v1508_v1 = vpop.f32.mrf.mxu0  ;;  %v1892_v13 = vpop.f32.mrf.mxu1  ;;  %v4105_v9 = vld [vmem:[#allocation16_spill] sm:$0xff]  ;;  %v4106_v63 = vld [vmem:[#allocation17_spill] sm:$0xff] }
 0x16f   : > { %v2216_v48 = vadd.f32 %v3744_v34, %v2161_v10  ;;  %v2159_v32 = vmul.f32 %v3737_v33, %v2104_v11  ;;  %v2107_v35 = vmax.f32 %v2011_v55, %v2059_v41  ;;  %v2009_v36 = vmax.f32 %v4097_v56, %v1508_v1 }
 0x170   : > { %2499 = vst.msk [vmem:[%s3759_s8 + $0x50] sm:$0xf] %vm2478_vm3, %v2856_v0  ;;  %v2859_v49 = vpack.c.bf16 %v2261_v31, %v2261_v31  ;;  %v2259_v27 = vmax.f32 %v2211_v12, 0.0  ;;  %v2057_v15 = vmax.f32 %v4098_v14, %v1892_v13  ;;  %v3064_v2 = vpop.f32.mrf.mxu0  ;;  %v3160_v3 = vpop.f32.mrf.mxu1  ;;  %v4107_v0 = vld [vmem:[#allocation18_spill] sm:$0xff]  ;;  %v4108_v12 = vld [vmem:[#allocation19_spill] sm:$0xff]  ;;  %v4109_v14 = vld [vmem:[#allocation20_spill] sm:$0xff] }
 0x171   : > { %v2264_v42 = vmax.f32 %v2216_v48, 0.0  ;;  %v2214_v57 = vadd.f32 %v3744_v34, %v2159_v32  ;;  %v2162_v43 = vmul.f32 %v3737_v33, %v2107_v35  ;;  %v2014_v16 = vmax.f32 %v4099_v25, %v3064_v2 }
 0x172   : > { %2502 = vst.msk [vmem:[%s3759_s8 + $0x5c] sm:$0xf] %vm2478_vm3, %v2859_v49  ;;  %v2857_v50 = vpack.c.bf16 %v2259_v27, %v2259_v27  ;;  %v2105_v58 = vmax.f32 %v2009_v36, %v2057_v15  ;;  %v2062_v51 = vmax.f32 %v4100_v4, %v3160_v3  ;;  %v1521_v17 = vpop.f32.mrf.mxu0  ;;  %v1905_v44 = vpop.f32.mrf.mxu1  ;;  %v4111_v4 = vld [vmem:[#allocation22_spill] sm:$0xff] }
 0x173   : > { %v2862_v45 = vpack.c.bf16 %v2264_v42, %v2264_v42  ;;  %v2262_v24 = vmax.f32 %v2214_v57, 0.0  ;;  %v2217_v18 = vadd.f32 %v3744_v34, %v2162_v43  ;;  %v2012_v59 = vmax.f32 %v4101_v5, %v1521_v17  ;;  %v4110_v42 = vld [vmem:[#allocation21_spill] sm:$0xff] }
 0x174   : > { %2500 = vst.msk [vmem:[%s3759_s8 + $0x54] sm:$0xf] %vm2478_vm3, %v2857_v50  ;;  %v2160_v26 = vmul.f32 %v3737_v33, %v2105_v58  ;;  %v2110_v37 = vmax.f32 %v2014_v16, %v2062_v51  ;;  %v2060_v6 = vmax.f32 %v4102_v19, %v1905_v44  ;;  %v3065_v38 = vpop.f32.mrf.mxu0  ;;  %v3161_v60 = vpop.f32.mrf.mxu1  ;;  %v4113_v19 = vld [vmem:[#allocation24_spill] sm:$0xff] }
 0x175   : > { %2505 = vst.msk [vmem:[%s3759_s8 + $0x68] sm:$0xf] %vm2478_vm3, %v2862_v45  ;;  %v2860_v52 = vpack.c.bf16 %v2262_v24, %v2262_v24  ;;  %v2265_v39 = vmax.f32 %v2217_v18, 0.0  ;;  %v2015_v7 = vmax.f32 %v4103_v20, %v3065_v38  ;;  %v2063_v46 = vmax.f32 %v4104_v53, %v3161_v60  ;;  %v4112_v45 = vld [vmem:[#allocation23_spill] sm:$0xff] }
 0x176   : > { %v2215_v61 = vadd.f32 %v3744_v34, %v2160_v26  ;;  %v2165_v21 = vmul.f32 %v3737_v33, %v2110_v37  ;;  %v2108_v8 = vmax.f32 %v2012_v59, %v2060_v6  ;;  %v1524_v23 = vpop.f32.mrf.mxu0  ;;  %v1908_v28 = vpop.f32.mrf.mxu1 }
 0x177   : > { %2503 = vst.msk [vmem:[%s3759_s8 + $0x60] sm:$0xf] %vm2478_vm3, %v2860_v52  ;;  %v2863_v29 = vpack.c.bf16 %v2265_v39, %v2265_v39  ;;  %v2111_v30 = vmax.f32 %v2015_v7, %v2063_v46  ;;  %v2013_v62 = vmax.f32 %v4105_v9, %v1524_v23  ;;  %v2061_v40 = vmax.f32 %v4106_v63, %v1908_v28  ;;  %v4114_v52 = vld [vmem:[#allocation25_spill] sm:$0xff] }
 0x178   : > { %v2263_v47 = vmax.f32 %v2215_v61, 0.0  ;;  %v2220_v10 = vadd.f32 %v3744_v34, %v2165_v21  ;;  %v2163_v11 = vmul.f32 %v3737_v33, %v2108_v8  ;;  %v3068_v54 = vpop.f32.mrf.mxu0  ;;  %v3164_v55 = vpop.f32.mrf.mxu1  ;;  %v4115_v61 = vld [vmem:[#allocation26_spill] sm:$0xff]  ;;  %v4116_v8 = vld [vmem:[#allocation27_spill] sm:$0xff] }
 0x179   : > { %2506 = vst.msk [vmem:[%s3759_s8 + $0x6c] sm:$0xf] %vm2478_vm3, %v2863_v29  ;;  %v2166_v22 = vmul.f32 %v3737_v33, %v2111_v30  ;;  %v2109_v41 = vmax.f32 %v2013_v62, %v2061_v40  ;;  %v2018_v31 = vmax.f32 %v4107_v0, %v3068_v54  ;;  %v2066_v1 = vmax.f32 %v4108_v12, %v3164_v55 }
 0x17a   : > { %v2861_v13 = vpack.c.bf16 %v2263_v47, %v2263_v47  ;;  %v2268_v48 = vmax.f32 %v2220_v10, 0.0  ;;  %v2218_v32 = vadd.f32 %v3744_v34, %v2163_v11  ;;  %v1537_v35 = vpop.f32.mrf.mxu0  ;;  %v1921_v56 = vpop.f32.mrf.mxu1  ;;  %v4117_v47 = vld [vmem:[#allocation28_spill] sm:$0xff]  ;;  %v4118_v11 = vld [vmem:[#allocation29_spill] sm:$0xff] }
 0x17b   : > { %v2221_v36 = vadd.f32 %v3744_v34, %v2166_v22  ;;  %v2164_v49 = vmul.f32 %v3737_v33, %v2109_v41  ;;  %v2114_v27 = vmax.f32 %v2018_v31, %v2066_v1  ;;  %v2016_v15 = vmax.f32 %v4109_v14, %v1537_v35 }
 0x17c   : > { %2504 = vst.msk [vmem:[%s3759_s8 + $0x64] sm:$0xf] %vm2478_vm3, %v2861_v13  ;;  %v2866_v2 = vpack.c.bf16 %v2268_v48, %v2268_v48  ;;  %v2266_v3 = vmax.f32 %v2218_v32, 0.0  ;;  %v2064_v57 = vmax.f32 %v4110_v42, %v1921_v56  ;;  %v3069_v43 = vpop.f32.mrf.mxu0  ;;  %v3165_v25 = vpop.f32.mrf.mxu1  ;;  %v4119_v13 = vld [vmem:[#allocation30_spill] sm:$0xff]  ;;  %v4120_v32 = vld [vmem:[#allocation31_spill] sm:$0xff]  ;;  %v4121_v42 = vld [vmem:[#allocation32_spill] sm:$0xff] }
 0x17d   : > { %v2269_v16 = vmax.f32 %v2221_v36, 0.0  ;;  %v2219_v50 = vadd.f32 %v3744_v34, %v2164_v49  ;;  %v2169_v58 = vmul.f32 %v3737_v33, %v2114_v27  ;;  %v2019_v51 = vmax.f32 %v4111_v4, %v3069_v43 }
 0x17e   : > { %2509 = vst.msk [vmem:[%s3759_s8 + $0x78] sm:$0xf] %vm2478_vm3, %v2866_v2  ;;  %v2864_v17 = vpack.c.bf16 %v2266_v3, %v2266_v3  ;;  %v2112_v44 = vmax.f32 %v2016_v15, %v2064_v57  ;;  %v2067_v24 = vmax.f32 %v4112_v45, %v3165_v25  ;;  %v1540_v18 = vpop.f32.mrf.mxu0  ;;  %v1924_v5 = vpop.f32.mrf.mxu1  ;;  %v4123_v45 = vld [vmem:[#allocation34_spill] sm:$0xff] }
 0x17f   : > { %v2867_v59 = vpack.c.bf16 %v2269_v16, %v2269_v16  ;;  %v2267_v26 = vmax.f32 %v2219_v50, 0.0  ;;  %v2224_v37 = vadd.f32 %v3744_v34, %v2169_v58  ;;  %v2017_v6 = vmax.f32 %v4113_v19, %v1540_v18  ;;  %v4122_v16 = vld [vmem:[#allocation33_spill] sm:$0xff] }
 0x180   : > { %2507 = vst.msk [vmem:[%s3759_s8 + $0x70] sm:$0xf] %vm2478_vm3, %v2864_v17  ;;  %v2167_v38 = vmul.f32 %v3737_v33, %v2112_v44  ;;  %v2115_v60 = vmax.f32 %v2019_v51, %v2067_v24  ;;  %v2065_v39 = vmax.f32 %v4114_v52, %v1924_v5  ;;  %v3072_v20 = vpop.f32.mrf.mxu0  ;;  %v3168_v7 = vpop.f32.mrf.mxu1  ;;  %v4125_v52 = vld [vmem:[#allocation36_spill] sm:$0xff] }
 0x181   : > { %2510 = vst.msk [vmem:[%s3759_s8 + $0x7c] sm:$0xf] %vm2478_vm3, %v2867_v59  ;;  %v2865_v53 = vpack.c.bf16 %v2267_v26, %v2267_v26  ;;  %v2272_v46 = vmax.f32 %v2224_v37, 0.0  ;;  %v2022_v21 = vmax.f32 %v4115_v61, %v3072_v20  ;;  %v2070_v23 = vmax.f32 %v4116_v8, %v3168_v7  ;;  %v4124_v59 = vld [vmem:[#allocation35_spill] sm:$0xff] }
 0x182   : > { %v2222_v28 = vadd.f32 %v3744_v34, %v2167_v38  ;;  %v2170_v29 = vmul.f32 %v3737_v33, %v2115_v60  ;;  %v2113_v30 = vmax.f32 %v2017_v6, %v2065_v39  ;;  %v1553_v9 = vpop.f32.mrf.mxu0  ;;  %v1937_v62 = vpop.f32.mrf.mxu1 }
 0x183   : > { %2508 = vst.msk [vmem:[%s3759_s8 + $0x74] sm:$0xf] %vm2478_vm3, %v2865_v53  ;;  %v2870_v63 = vpack.c.bf16 %v2272_v46, %v2272_v46  ;;  %v2118_v40 = vmax.f32 %v2022_v21, %v2070_v23  ;;  %v2020_v10 = vmax.f32 %v4117_v47, %v1553_v9  ;;  %v2068_v54 = vmax.f32 %v4118_v11, %v1937_v62  ;;  %v4126_v53 = vld [vmem:[#allocation37_spill] sm:$0xff] }
 0x184   : > { %v2270_v55 = vmax.f32 %v2222_v28, 0.0  ;;  %v2225_v22 = vadd.f32 %v3744_v34, %v2170_v29  ;;  %v2168_v41 = vmul.f32 %v3737_v33, %v2113_v30  ;;  %v3073_v0 = vpop.f32.mrf.mxu0  ;;  %v3169_v31 = vpop.f32.mrf.mxu1  ;;  %v4127_v28 = vld [vmem:[#allocation38_spill] sm:$0xff]  ;;  %v4128_v30 = vld [vmem:[#allocation39_spill] sm:$0xff] }
 0x185   : > { %2513 = vst.msk [vmem:[%s3759_s8 + $0x88] sm:$0xf] %vm2478_vm3, %v2870_v63  ;;  %v2173_v12 = vmul.f32 %v3737_v33, %v2118_v40  ;;  %v2116_v1 = vmax.f32 %v2020_v10, %v2068_v54  ;;  %v2023_v48 = vmax.f32 %v4119_v13, %v3073_v0  ;;  %v2071_v35 = vmax.f32 %v4120_v32, %v3169_v31 }
 0x186   : > { %v2868_v56 = vpack.c.bf16 %v2270_v55, %v2270_v55  ;;  %v2273_v36 = vmax.f32 %v2225_v22, 0.0  ;;  %v2223_v49 = vadd.f32 %v3744_v34, %v2168_v41  ;;  %v1556_v27 = vpop.f32.mrf.mxu0  ;;  %v1940_v14 = vpop.f32.mrf.mxu1  ;;  %v4129_v55 = vld [vmem:[#allocation40_spill] sm:$0xff]  ;;  %v4130_v41 = vld [vmem:[#allocation41_spill] sm:$0xff] }
 0x187   : > { %v2228_v15 = vadd.f32 %v3744_v34, %v2173_v12  ;;  %v2171_v2 = vmul.f32 %v3737_v33, %v2116_v1  ;;  %v2119_v3 = vmax.f32 %v2023_v48, %v2071_v35  ;;  %v2021_v57 = vmax.f32 %v4121_v42, %v1556_v27 }
 0x188   : > { %2511 = vst.msk [vmem:[%s3759_s8 + $0x80] sm:$0xf] %vm2478_vm3, %v2868_v56  ;;  %v2871_v43 = vpack.c.bf16 %v2273_v36, %v2273_v36  ;;  %v2271_v25 = vmax.f32 %v2223_v49, 0.0  ;;  %v2069_v50 = vmax.f32 %v4122_v16, %v1940_v14  ;;  %v3076_v58 = vpop.f32.mrf.mxu0  ;;  %v3172_v4 = vpop.f32.mrf.mxu1  ;;  %v4131_v56 = vld [vmem:[#allocation42_spill] sm:$0xff]  ;;  %v4132_v49 = vld [vmem:[#allocation43_spill] sm:$0xff]  ;;  %v4133_v16 = vld [vmem:[#allocation44_spill] sm:$0xff] }
 0x189   : > { %v2276_v51 = vmax.f32 %v2228_v15, 0.0  ;;  %v2226_v17 = vadd.f32 %v3744_v34, %v2171_v2  ;;  %v2174_v44 = vmul.f32 %v3737_v33, %v2119_v3  ;;  %v2026_v24 = vmax.f32 %v4123_v45, %v3076_v58 }
 0x18a   : > { %2514 = vst.msk [vmem:[%s3759_s8 + $0x8c] sm:$0xf] %vm2478_vm3, %v2871_v43  ;;  %v2869_v18 = vpack.c.bf16 %v2271_v25, %v2271_v25  ;;  %v2117_v5 = vmax.f32 %v2021_v57, %v2069_v50  ;;  %v2074_v26 = vmax.f32 %v4124_v59, %v3172_v4  ;;  %v1569_v37 = vpop.f32.mrf.mxu0  ;;  %v1953_v19 = vpop.f32.mrf.mxu1  ;;  %v4135_v59 = vld [vmem:[#allocation46_spill] sm:$0xff] }
 0x18b   : > { %v2874_v6 = vpack.c.bf16 %v2276_v51, %v2276_v51  ;;  %v2274_v38 = vmax.f32 %v2226_v17, 0.0  ;;  %v2229_v60 = vadd.f32 %v3744_v34, %v2174_v44  ;;  %v2024_v39 = vmax.f32 %v4125_v52, %v1569_v37  ;;  %v4134_v51 = vld [vmem:[#allocation45_spill] sm:$0xff] }
 0x18c   : > { %2512 = vst.msk [vmem:[%s3759_s8 + $0x84] sm:$0xf] %vm2478_vm3, %v2869_v18  ;;  %v2172_v20 = vmul.f32 %v3737_v33, %v2117_v5  ;;  %v2122_v7 = vmax.f32 %v2026_v24, %v2074_v26  ;;  %v2072_v46 = vmax.f32 %v4126_v53, %v1953_v19  ;;  %v3077_v61 = vpop.f32.mrf.mxu0  ;;  %v3173_v21 = vpop.f32.mrf.mxu1  ;;  %v4137_v53 = vld [vmem:[#allocation48_spill] sm:$0xff] }
 0x18d   : > { %2517 = vst.msk [vmem:[%s3759_s8 + $0x98] sm:$0xf] %vm2478_vm3, %v2874_v6  ;;  %v2872_v8 = vpack.c.bf16 %v2274_v38, %v2274_v38  ;;  %v2277_v23 = vmax.f32 %v2229_v60, 0.0  ;;  %v2027_v29 = vmax.f32 %v4127_v28, %v3077_v61  ;;  %v2075_v9 = vmax.f32 %v4128_v30, %v3173_v21  ;;  %v4136_v6 = vld [vmem:[#allocation47_spill] sm:$0xff] }
 0x18e   : > { %v2227_v62 = vadd.f32 %v3744_v34, %v2172_v20  ;;  %v2177_v63 = vmul.f32 %v3737_v33, %v2122_v7  ;;  %v2120_v40 = vmax.f32 %v2024_v39, %v2072_v46  ;;  %v1572_v47 = vpop.f32.mrf.mxu0  ;;  %v1956_v10 = vpop.f32.mrf.mxu1 }
 0x18f   : > { %2515 = vst.msk [vmem:[%s3759_s8 + $0x90] sm:$0xf] %vm2478_vm3, %v2872_v8  ;;  %v2875_v11 = vpack.c.bf16 %v2277_v23, %v2277_v23  ;;  %v2123_v54 = vmax.f32 %v2027_v29, %v2075_v9  ;;  %v2025_v22 = vmax.f32 %v4129_v55, %v1572_v47  ;;  %v2073_v0 = vmax.f32 %v4130_v41, %v1956_v10  ;;  %v4138_v8 = vld [vmem:[#allocation49_spill] sm:$0xff] }
 0x190   : > { %v2275_v31 = vmax.f32 %v2227_v62, 0.0  ;;  %v2232_v12 = vadd.f32 %v3744_v34, %v2177_v63  ;;  %v2175_v1 = vmul.f32 %v3737_v33, %v2120_v40  ;;  %v3080_v13 = vpop.f32.mrf.mxu0  ;;  %v3176_v48 = vpop.f32.mrf.mxu1 }
 0x191   : > { %2518 = vst.msk [vmem:[%s3759_s8 + $0x9c] sm:$0xf] %vm2478_vm3, %v2875_v11  ;;  %v2178_v32 = vmul.f32 %v3737_v33, %v2123_v54  ;;  %v2121_v35 = vmax.f32 %v2025_v22, %v2073_v0  ;;  %v2030_v36 = vmax.f32 %v4131_v56, %v3080_v13  ;;  %v2078_v27 = vmax.f32 %v4132_v49, %v3176_v48 }
 0x192   : > { %v2873_v14 = vpack.c.bf16 %v2275_v31, %v2275_v31  ;;  %v2280_v15 = vmax.f32 %v2232_v12, 0.0  ;;  %v2230_v2 = vadd.f32 %v3744_v34, %v2175_v1  ;;  %v1585_v3 = vpop.f32.mrf.mxu0  ;;  %v1969_v42 = vpop.f32.mrf.mxu1 }
 0x193   : > { %v2233_v57 = vadd.f32 %v3744_v34, %v2178_v32  ;;  %v2176_v43 = vmul.f32 %v3737_v33, %v2121_v35  ;;  %v2126_v25 = vmax.f32 %v2030_v36, %v2078_v27  ;;  %v2028_v50 = vmax.f32 %v4133_v16, %v1585_v3 }
 0x194   : > { %2516 = vst.msk [vmem:[%s3759_s8 + $0x94] sm:$0xf] %vm2478_vm3, %v2873_v14  ;;  %v2878_v58 = vpack.c.bf16 %v2280_v15, %v2280_v15  ;;  %v2278_v4 = vmax.f32 %v2230_v2, 0.0  ;;  %v2076_v17 = vmax.f32 %v4134_v51, %v1969_v42  ;;  %v3081_v44 = vpop.f32.mrf.mxu0  ;;  %v3177_v45 = vpop.f32.mrf.mxu1 }
 0x195   : > { %v2281_v24 = vmax.f32 %v2233_v57, 0.0  ;;  %v2231_v18 = vadd.f32 %v3744_v34, %v2176_v43  ;;  %v2181_v5 = vmul.f32 %v3737_v33, %v2126_v25  ;;  %v2031_v26 = vmax.f32 %v4135_v59, %v3081_v44 }
 0x196   : > { %2521 = vst.msk [vmem:[%s3759_s8 + $0xa8] sm:$0xf] %vm2478_vm3, %v2878_v58  ;;  %v2876_v37 = vpack.c.bf16 %v2278_v4, %v2278_v4  ;;  %v2124_v19 = vmax.f32 %v2028_v50, %v2076_v17  ;;  %v2079_v38 = vmax.f32 %v4136_v6, %v3177_v45  ;;  %v1588_v60 = vpop.f32.mrf.mxu0  ;;  %v1972_v52 = vpop.f32.mrf.mxu1 }
 0x197   : > { %v2879_v39 = vpack.c.bf16 %v2281_v24, %v2281_v24  ;;  %v2279_v20 = vmax.f32 %v2231_v18, 0.0  ;;  %v2236_v7 = vadd.f32 %v3744_v34, %v2181_v5  ;;  %v2029_v46 = vmax.f32 %v4137_v53, %v1588_v60 }
 0x198   : > { %2519 = vst.msk [vmem:[%s3759_s8 + $0xa0] sm:$0xf] %vm2478_vm3, %v2876_v37  ;;  %v2179_v61 = vmul.f32 %v3737_v33, %v2124_v19  ;;  %v2127_v21 = vmax.f32 %v2031_v26, %v2079_v38  ;;  %v2077_v23 = vmax.f32 %v4138_v8, %v1972_v52 }
 0x199   : > { %2522 = vst.msk [vmem:[%s3759_s8 + $0xac] sm:$0xf] %vm2478_vm3, %v2879_v39  ;;  %v2877_v28 = vpack.c.bf16 %v2279_v20, %v2279_v20  ;;  %v2284_v29 = vmax.f32 %v2236_v7, 0.0 }
 0x19a   : > { %v2234_v30 = vadd.f32 %v3744_v34, %v2179_v61  ;;  %v2182_v9 = vmul.f32 %v3737_v33, %v2127_v21  ;;  %v2125_v62 = vmax.f32 %v2029_v46, %v2077_v23 }
 0x19b   : > { %2520 = vst.msk [vmem:[%s3759_s8 + $0xa4] sm:$0xf] %vm2478_vm3, %v2877_v28  ;;  %v2882_v63 = vpack.c.bf16 %v2284_v29, %v2284_v29 }
 0x19c   : > { %v2282_v40 = vmax.f32 %v2234_v30, 0.0  ;;  %v2237_v47 = vadd.f32 %v3744_v34, %v2182_v9  ;;  %v2180_v10 = vmul.f32 %v3737_v33, %v2125_v62 }
 0x19d   : > { %2525 = vst.msk [vmem:[%s3759_s8 + $0xb8] sm:$0xf] %vm2478_vm3, %v2882_v63 }
 0x19e   : > { %v2880_v11 = vpack.c.bf16 %v2282_v40, %v2282_v40  ;;  %v2285_v54 = vmax.f32 %v2237_v47, 0.0  ;;  %v2235_v55 = vadd.f32 %v3744_v34, %v2180_v10 }
 0x1a0   : > { %2523 = vst.msk [vmem:[%s3759_s8 + $0xb0] sm:$0xf] %vm2478_vm3, %v2880_v11  ;;  %v2883_v22 = vpack.c.bf16 %v2285_v54, %v2285_v54  ;;  %v2283_v41 = vmax.f32 %v2235_v55, 0.0 }
 0x1a2   : > { %2526 = vst.msk [vmem:[%s3759_s8 + $0xbc] sm:$0xf] %vm2478_vm3, %v2883_v22  ;;  %v2881_v0 = vpack.c.bf16 %v2283_v41, %v2283_v41 }
 0x1a4   : > { %2524 = vst.msk [vmem:[%s3759_s8 + $0xb4] sm:$0xf] %vm2478_vm3, %v2881_v0 }
 0x1a5 PF: > { %s14_s15 = sadd.s32 1, %s3296_s15  }
 0x1a6   : > { %p11_p5 = scmp.ge.s32.totalorder %s14_s15, 4  }
 0x1a8   :  { %13 = sbr.rel (!%p11_p5) target bundleno = 1 (0x1), region = 66 }

// kernel: classifier_forward.6
= control target key start
LH: loop header
LB: loop body
LE: loop exit
PB: predicated region body
PF: predicated region fallthrough
CT: control target
= control target key end

     0   :  { %s2233_s15 = smov 0   ;;  %s3002_s0 = inlined_call_operand.vmem [shape: bf16[2,4,48,64], index: 0, kind: input, shape index: {}]   ;;  %s3003_s1 = inlined_call_operand.vmem [shape: bf16[576,64], index: 1, kind: input, shape index: {}]   ;;  %s3004_s2 = inlined_call_operand.vmem [shape: f32[1,64], index: 2, kind: input, shape index: {}]   ;;  %s3005_s3 = inlined_call_operand.vmem [shape: f32[1,64], index: 3, kind: input, shape index: {}]   ;;  %s3006_s4 = inlined_call_operand.vmem [shape: bf16[64,64], index: 4, kind: output, shape index: {}]  }
   0x1 LB: > { %s2239_s16 = sadd.s32 4294967295, %s2205_s15   ;;  %p1694_p0 = scmp.ge.s32.totalorder %s2205_s15, 1  ;;  %s2205_s15 = sphi %s2233_s15, %s14_s15  }
   0x2   : > { %p162_p1 = scmp.lt.s32.totalorder %s2205_s15, 3 }
   0x4   : > { %p163_p2 = pnand %p1694_p0, %p162_p1 }
   0x6   : > { %166 = sbr.rel (%p163_p2) target bundleno = 493 (0x1ed), region = 36 }
   0xb   : > { %p188_p3 = scmp.lt.s32.totalorder %s2239_s16, 1  ;;  %v2247_v0 = vld [vmem:[%s3003_s1 + $0x78] sm:$0xff]   ;;  %v2259_v2 = vld [vmem:[%s3003_s1 + $0x70] sm:$0xff]   ;;  %s2207_s8 = smov 64   ;;  %vm251_vm0 = vsmask.f32 7424 }
   0xc   : > { %3036 = vst [vmem:[#allocation2_spill] sm:$0xff] %v2247_v0  ;;  %v2253_v1 = vld [vmem:[%s3003_s1 + $0x38] sm:$0xff]   ;;  %1824 = vmatprep.subr.bf16.mxu0 %v2247_v0  ;;  %v2265_v3 = vld [vmem:[%s3003_s1 + $0x30] sm:$0xff]   ;;  %v2328_v28 = vld [vmem:[%s3003_s1 + $0x68] sm:$0xff]   ;;  %vm358_vm1 = vcmask 523264   ;;  %vm1629_vm2 = vcmask 519168  }
   0xd   : > { %s189_s19 = scalar_select %p188_p3, %s2239_s16, 1  ;;  %1825 = vmatpush3.bf16.msra.mxu0 %v2253_v1  ;;  %v2271_v4 = vld [vmem:[%s3003_s1 + $0xf8] sm:$0xff]   ;;  %v2348_v38 = vld [vmem:[%s3003_s1 + $0x28] sm:$0xff]   ;;  %v2388_v58 = vld [vmem:[%s3003_s1 + $0xf0] sm:$0xff]  }
   0xe   : > { %1826 = vmatprep.subr.bf16.mxu0 %v2259_v2  ;;  %v2281_v5 = vld [vmem:[%s3003_s1 + $0xb8] sm:$0xff]   ;;  %1852 = vmatprep.subr.bf16.mxu1 %v2271_v4 }
   0xf   : > { %s2120_s24 = smul.u32 96, %s189_s19  ;;  %1853 = vmatpush3.bf16.msra.mxu1 %v2281_v5 }
  0x10   : > { %1854 = vmatprep.subr.bf16.mxu1 %v2388_v58 }
  0x11   : > { %s2276_s5 = scalar_lea.vmem %s3002_s0, %s2120_s24  ;;  %1827 = vmatpush3.bf16.msra.mxu0 %v2265_v3 }
  0x12   : > { %v1702_v6 = vld [vmem:[%s2276_s5 + $0x30] sm:$0xf]  ;;  %v2285_v7 = vld [vmem:[%s2276_s5 + $0x34] sm:$0xf]  ;;  %v2288_v8 = vld [vmem:[%s2276_s5 + $0x38] sm:$0xf]  ;;  %1828 = vmatprep.subr.bf16.mxu0 %v2328_v28 }
  0x13   : > { %3037 = vst [vmem:[#allocation3_spill] sm:$0xff] %v2285_v7  ;;  %3038 = vst [vmem:[#allocation4_spill] sm:$0xff] %v2288_v8  ;;  %v2292_v9 = vcombine.low %v1702_v6, %v2285_v7  ;;  %v2295_v10 = vld [vmem:[%s2276_s5 + $0x3c] sm:$0xf]  ;;  %v1698_v11 = vld [vmem:[%s2276_s5 + $0x18] sm:$0xf] }
  0x14   : > { %3040 = vst [vmem:[#allocation6_spill] sm:$0xff] %v2295_v10  ;;  %v2299_v12 = vld [vmem:[%s2276_s5 + $0x1c] sm:$0xf]  ;;  %v2305_v13 = vcombine.low %v2288_v8, %v2295_v10  ;;  %v1700_v14 = vld [vmem:[%s2276_s5 + $0x20] sm:$0xf]  ;;  %v2394_v60 = vld [vmem:[%s2276_s5 + $0x48] sm:$0xff]  }
  0x15   : > { %3039 = vst [vmem:[#allocation5_spill] sm:$0xff] %v2292_v9  ;;  %v1701_v15 = vld [vmem:[%s2276_s5 + $0x24] sm:$0xf]  ;;  %282 = vrot.lane.b32.xlu0 %v2292_v9, %s2207_s8  ;;  %v2312_v16 = vcombine.low %v1698_v11, %v2299_v12  ;;  %v300_v18 = vshrl.u32 %v2292_v9, 16  ;;  %v302_v19 = vshll.u32 %v2292_v9, 16  ;;  %v2333_v29 = vcombine.low %v2299_v12, %v1700_v14  ;;  %1829 = vmatpush3.bf16.msra.mxu0 %v2348_v38 }
  0x16   : > { %3041 = vst [vmem:[#allocation7_spill] sm:$0xff] %v2305_v13  ;;  %284 = vrot.lane.b32.xlu1 %v2305_v13, %s2207_s8  ;;  %v2316_v17 = vcombine.low %v1700_v14, %v1701_v15  ;;  %v307_v20 = vshll.u32 %v2305_v13, 16  ;;  %v2137_v21 = vld [vmem:[%s2276_s5 + $0x40] ss:$0 sps:$4 sm:$0x11]   ;;  %v311_v22 = vshrl.u32 %v2305_v13, 16 }
  0x17   : > { %v304_v23 = vrot.slane %v302_v19, 1  ;;  %v1711_v25 = vld [vmem:[%s2276_s5 + $0x28] sm:$0xf]  ;;  %v315_v26 = vshll.u32 %v2137_v21, 16  ;;  %v200_v27 = vld [vmem:[%s2276_s5] sm:$0xf] }
  0x18   : > { %v309_v24 = vrot.slane %v307_v20, 1  ;;  %v201_v30 = vld [vmem:[%s2276_s5 + $0x4] sm:$0xf]  ;;  %v202_v31 = vld [vmem:[%s2276_s5 + $0x8] sm:$0xf]  ;;  %v2373_v49 = vcombine.low %v1701_v15, %v1711_v25  ;;  %v2408_v25 = vld [vmem:[%s3003_s1 + $0xb0] sm:$0xff]  }
  0x19   : > { %244 = vrot.lane.b32.xlu0 %v2312_v16, %s2207_s8  ;;  %v203_v32 = vld [vmem:[%s2276_s5 + $0xc] sm:$0xf]  ;;  %v305_v33 = vor.u32 %v304_v23, %v300_v18  ;;  %v317_v34 = vrot.slane %v315_v26, 1  ;;  %v221_v35 = vld [vmem:[%s2276_s5 + $0x10] sm:$0xf]  ;;  %v2341_v36 = vcombine.low %v200_v27, %v201_v30  ;;  %v2352_v41 = vcombine.low %v201_v30, %v202_v31  ;;  %1855 = vmatpush3.bf16.msra.mxu1 %v2408_v25 }
  0x1a   : > { %246 = vrot.lane.b32.xlu1 %v2316_v17, %s2207_s8  ;;  %v1767_v37 = vld [vmem:[%s2276_s5 + $0x48] sm:$0xf]  ;;  %v313_v39 = vor.u32 %v311_v22, %v309_v24  ;;  %v2350_v40 = vcombine.low %v202_v31, %v203_v32  ;;  %v2354_v42 = vcombine.low %v203_v32, %v221_v35  ;;  %v2357_v43 = vld [vmem:[%s2276_s5 + $0x4c] sm:$0xf]  ;;  %v2360_v44 = vld [vmem:[%s2276_s5 + $0x50] sm:$0xf] }
  0x1b   : > { %v2363_v45 = vld [vmem:[%s2276_s5 + $0x54] sm:$0xf]  ;;  %v2366_v46 = vsel %vm251_vm0, %v305_v33, %v309_v24  ;;  %v253_v47 = vshrl.u32 %v2341_v36, 16  ;;  %v255_v48 = vshll.u32 %v2341_v36, 16  ;;  %3043 = vst [vmem:[#allocation9_spill] sm:$0xff] %v2373_v49  ;;  %v339_v51 = vshrl.u32 %v2352_v41, 16 }
  0x1c   : > { %3042 = vst [vmem:[#allocation8_spill] sm:$0xff] %v2366_v46  ;;  %v260_v50 = vshll.u32 %v2350_v40, 16  ;;  %v341_v52 = vshll.u32 %v2352_v41, 16  ;;  %v346_v54 = vshll.u32 %v2354_v42, 16  ;;  %v1779_v55 = vcombine.low %v1767_v37, %v2357_v43  ;;  %v2416_v32 = vld [vmem:[%s3003_s1 + $0x60] sm:$0xff]  }
  0x1d   : > { %331 = vrot.lane.b32.xlu0 %v2333_v29, %s2207_s8  ;;  %v257_v53 = vrot.slane %v255_v48, 1  ;;  %v1780_v56 = vcombine.low %v2360_v44, %v2363_v45  ;;  %v2146_v57 = vld [vmem:[%s2276_s5 + $0x10] ss:$0 sps:$4 sm:$0x11]   ;;  %v2391_v59 = vsel %vm251_vm0, %v313_v39, %v317_v34  ;;  %v264_v63 = vshrl.u32 %v2350_v40, 16  ;;  %v2422_v35 = vld [vmem:[%s3003_s1 + $0x20] sm:$0xff]   ;;  %1830 = vmatprep.subr.bf16.mxu0 %v2416_v32 }
  0x1e   : > { %319 = vrot.lane.b32.xlu1 %v2366_v46, %s2207_s8  ;;  %3044 = vst [vmem:[#allocation10_spill] sm:$0xff] %v2391_v59  ;;  %v262_v61 = vrot.slane %v260_v50, 1  ;;  %v343_v62 = vrot.slane %v341_v52, 1  ;;  %v888_v11 = vshrl.u32 %v1779_v55, 16  ;;  %v890_v14 = vshll.u32 %v1779_v55, 16  ;;  %v2430_v39 = vld [vmem:[%s3003_s1 + $0xe8] sm:$0xff]   ;;  %1831 = vmatpush3.bf16.msra.mxu0 %v2422_v35 }
  0x1f   : > { %v258_v6 = vor.u32 %v257_v53, %v253_v47  ;;  %v895_v15 = vshll.u32 %v1780_v56, 16  ;;  %v2147_v18 = vld [vmem:[%s2276_s5 + $0x14] ss:$0 sps:$4 sm:$0x11]   ;;  %v268_v19 = vshll.u32 %v2146_v57, 16  ;;  %v348_v22 = vrot.slane %v346_v54, 1  ;;  %1856 = vmatprep.subr.bf16.mxu1 %v2430_v39 }
  0x20   : > { %v2148_v20 = vld [vmem:[%s2276_s5 + $0x58] ss:$0 sps:$4 sm:$0x11]   ;;  %v344_v21 = vor.u32 %v343_v62, %v339_v51  ;;  %v892_v23 = vrot.slane %v890_v14, 1  ;;  %v350_v24 = vshrl.u32 %v2354_v42, 16  ;;  %v354_v31 = vshll.u32 %v2147_v18, 16 }
  0x21   : > { %333 = vrot.lane.b32.xlu0 %v2373_v49, %s2207_s8  ;;  %v2411_v26 = vsel %vm251_vm0, %v258_v6, %v262_v61  ;;  %v897_v27 = vrot.slane %v895_v15, 1  ;;  %v270_v30 = vrot.slane %v268_v19, 1  ;;  %v899_v34 = vshrl.u32 %v1780_v56, 16  ;;  %v2442_v50 = vld [vmem:[%s2276_s5 + $0x50] sm:$0xff]   ;;  %v2450_v52 = vld [vmem:[%s3003_s1 + $0xa8] sm:$0xff]   ;;  %v2457_v55 = vld [vmem:[%s3003_s1 + $0x58] sm:$0xff]  }
  0x22   : > { %321 = vrot.lane.b32.xlu1 %v2391_v59, %s2207_s8  ;;  %v893_v33 = vor.u32 %v892_v23, %v888_v11  ;;  %v903_v37 = vshll.u32 %v2148_v20, 16  ;;  %v2435_v47 = vsel %vm251_vm0, %v344_v21, %v348_v22  ;;  %v266_v51 = vor.u32 %v264_v63, %v262_v61  ;;  %1857 = vmatpush3.bf16.msra.mxu1 %v2450_v52  ;;  %v2466_v62 = vld [vmem:[%s3003_s1 + $0x18] sm:$0xff]   ;;  %v2472_v63 = vld [vmem:[%s3003_s1 + $0xe0] sm:$0xff]   ;;  %v2491_v14 = vld [vmem:[%s3003_s1 + $0x50] sm:$0xff]  }
  0x23   : > { %v352_v53 = vor.u32 %v350_v24, %v348_v22  ;;  %v356_v54 = vrot.slane %v354_v31, 1  ;;  %v901_v57 = vor.u32 %v899_v34, %v897_v27  ;;  %1832 = vmatprep.subr.bf16.mxu0 %v2457_v55  ;;  %v2480_v6 = vld [vmem:[%s3003_s1 + $0xa0] sm:$0xff]   ;;  %1858 = vmatprep.subr.bf16.mxu1 %v2472_v63  ;;  %v2500_v18 = vld [vmem:[%s3003_s1 + $0x10] sm:$0xff]   ;;  %v2506_v19 = vld [vmem:[%s3003_s1 + $0xd8] sm:$0xff]  }
  0x24   : > { %v2439_v48 = vsel %vm251_vm0, %v893_v33, %v897_v27  ;;  %v2460_v56 = vsel %vm251_vm0, %v266_v51, %v270_v30  ;;  %v905_v61 = vrot.slane %v903_v37, 1  ;;  %1833 = vmatpush3.bf16.msra.mxu0 %v2466_v62  ;;  %v1788_v20 = vld [vmem:[%s2276_s5 + $0x58] sm:$0xf]  ;;  %v2523_v22 = vld [vmem:[%s3003_s1 + $0x48] sm:$0xff]   ;;  %v2535_v24 = vld [vmem:[%s3003_s1 + $0xd0] sm:$0xff]   ;;  %v2541_v27 = vcombine.low %v2357_v43, %v2360_v44 }
  0x25   : > { %870 = vrot.lane.b32.xlu0 %v2394_v60, %s2207_s8  ;;  %3045 = vst [vmem:[#allocation11_spill] sm:$0xff] %v2439_v48  ;;  %v2485_v11 = vsel %vm251_vm0, %v352_v53, %v356_v54  ;;  %1834 = vmatprep.subr.bf16.mxu0 %v2491_v14  ;;  %v2515_v21 = vld [vmem:[%s3003_s1 + $0x98] sm:$0xff]   ;;  %v2529_v23 = vld [vmem:[%s3003_s1 + $0x8] sm:$0xff]   ;;  %3047 = vst [vmem:[#allocation13_spill] sm:$0xff] %v2535_v24  ;;  %v2552_v31 = vcombine.low %v2363_v45, %v1788_v20 }
  0x26   : > { %840 = vrot.lane.b32.xlu1 %v2411_v26, %s2207_s8  ;;  %v2494_v15 = vsel %vm251_vm0, %v901_v57, %v905_v61  ;;  %1859 = vmatpush3.bf16.msra.mxu1 %v2480_v6  ;;  %3048 = vst [vmem:[#allocation14_spill] sm:$0xff] %v2541_v27  ;;  %v2547_v30 = vld [vmem:[%s3003_s1 + $0x90] sm:$0xff]   ;;  %v2558_v43 = vld [vmem:[%s3003_s1 + $0x40] sm:$0xff]   ;;  %v2570_v45 = vld [vmem:[%s3003_s1 + $0xc8] sm:$0xff]  }
  0x27   : > { %3046 = vst [vmem:[#allocation12_spill] sm:$0xff] %v2494_v15  ;;  %1860 = vmatprep.subr.bf16.mxu1 %v2506_v19  ;;  %3049 = vst [vmem:[#allocation15_spill] sm:$0xff] %v2547_v30  ;;  %v2564_v44 = vld [vmem:[%s3003_s1] sm:$0xff]   ;;  %v2578_v33 = vld [vmem:[%s3003_s1 + $0x88] sm:$0xff]  }
  0x28   : > { %1835 = vmatpush3.bf16.msra.mxu0 %v2500_v18  ;;  %3050 = vst [vmem:[#allocation16_spill] sm:$0xff] %v2552_v31  ;;  %3051 = vst [vmem:[#allocation17_spill] sm:$0xff] %v2570_v45  ;;  %v2586_v34 = vld [vmem:[%s3003_s1 + $0x118] sm:$0xff]   ;;  %v2592_v37 = vld [vmem:[%s3003_s1 + $0xc0] sm:$0xff]  }
  0x29   : > { %911 = vrot.lane.b32.xlu0 %v2435_v47, %s2207_s8  ;;  %1836 = vmatprep.subr.bf16.mxu0 %v2523_v22  ;;  %3052 = vst [vmem:[#allocation18_spill] sm:$0xff] %v2578_v33  ;;  %3053 = vst [vmem:[#allocation19_spill] sm:$0xff] %v2592_v37  ;;  %v2598_v51 = vld [vmem:[%s3003_s1 + $0x80] sm:$0xff]   ;;  %v1791_v54 = vld [vmem:[%s2276_s5 + $0x3c] sm:$0xf] }
  0x2a   : > { %907 = vrot.lane.b32.xlu1 %v2439_v48, %s2207_s8  ;;  %1861 = vmatpush3.bf16.msra.mxu1 %v2515_v21  ;;  %3054 = vst [vmem:[#allocation20_spill] sm:$0xff] %v2598_v51  ;;  %v2602_v53 = vld [vmem:[%s2276_s5 + $0x40] sm:$0xf]  ;;  %v2186_v57 = vld [vmem:[%s2276_s5 + $0x34] sm:$0xff]   ;;  %v2189_v48 = vld [vmem:[%s2276_s5 + $0x24] sm:$0xff]  }
  0x2b   : > { %1862 = vmatprep.subr.bf16.mxu1 %v2535_v24  ;;  %3055 = vst [vmem:[#allocation21_spill] sm:$0xff] %v2602_v53  ;;  %v1798_v61 = vcombine.low %v1791_v54, %v2602_v53  ;;  %v2188_v20 = vld [vmem:[%s2276_s5 + $0x1c] sm:$0xff]   ;;  %v936_v8 = vshll.u32 %v2189_v48, 16  ;;  %v940_v49 = vshrl.u32 %v2189_v48, 16 }
  0x2c   : > { %1837 = vmatpush3.bf16.msra.mxu0 %v2529_v23  ;;  %v929_v13 = vshrl.u32 %v2188_v20, 16  ;;  %v931_v10 = vshll.u32 %v2188_v20, 16  ;;  %v2191_v46 = vld [vmem:[%s2276_s5 + $0x44] ss:$0 sps:$4 sm:$0x11]  }
  0x2d   : > { %872 = vrot.lane.b32.xlu0 %v2442_v50, %s2207_s8  ;;  %1838 = vmatprep.subr.bf16.mxu0 %v2558_v43  ;;  %v1181_v9 = vshrl.u32 %v1798_v61, 16 }
  0x2e   : > { %842 = vrot.lane.b32.xlu1 %v2460_v56, %s2207_s8  ;;  %1863 = vmatpush3.bf16.msra.mxu1 %v2547_v30 }
  0x2f   : > { %1864 = vmatprep.subr.bf16.mxu1 %v2570_v45  ;;  %v1185_v45 = vshll.u32 %v2191_v46, 16 }
  0x30   : > { %1839 = vmatpush3.bf16.msra.mxu0 %v2564_v44 }
  0x31   : > { %913 = vrot.lane.b32.xlu0 %v2485_v11, %s2207_s8  ;;  %2072 = vmatprep.subr.bf16.mxu0 %v2586_v34 }
  0x32   : > { %909 = vrot.lane.b32.xlu1 %v2494_v15, %s2207_s8  ;;  %1865 = vmatpush3.bf16.msra.mxu1 %v2578_v33  ;;  %v1172_v15 = vshll.u32 %v2186_v57, 16  ;;  %v2192_v33 = vld [vmem:[%s2276_s5 + $0x2c] ss:$0 sps:$4 sm:$0x11]  }
  0x33   : > { %1866 = vmatprep.subr.bf16.mxu1 %v2592_v37  ;;  %v938_v37 = vrot.slane %v936_v8, 1  ;;  %v944_v24 = vshll.u32 %v2192_v33, 16  ;;  %v858_v33 = vshll.u32 %v2316_v17, 16 }
  0x34   : > { %v1174_v59 = vrot.slane %v1172_v15, 1 }
  0x35   : > { %1142 = vrot.lane.b32.xlu0 %v2352_v41, %s2207_s8  ;;  %v942_v30 = vor.u32 %v940_v49, %v938_v37  ;;  %v946_v8 = vrot.slane %v944_v24, 1  ;;  %v860_v20 = vrot.slane %v858_v33, 1  ;;  %v3056_v33 = vld [vmem:[#allocation13_spill] sm:$0xff] }
  0x36   : > { %1144 = vrot.lane.b32.xlu1 %v2354_v42, %s2207_s8  ;;  %1867 = vmatpush3.bf16.msra.mxu1 %v2598_v51  ;;  %v933_v51 = vrot.slane %v931_v10, 1  ;;  %v1187_v10 = vrot.slane %v1185_v45, 1 }
  0x37   : > { %1886 = vmatprep.subr.bf16.mxu1 %v2247_v0 }
  0x38   : > { %v934_v54 = vor.u32 %v933_v51, %v929_v13 }
  0x39   : > { %1154 = vrot.lane.b32.xlu0 %v2541_v27, %s2207_s8  ;;  %v1177_v27 = vshll.u32 %v1798_v61, 16 }
  0x3a   : > { %1156 = vrot.lane.b32.xlu1 %v2552_v31, %s2207_s8  ;;  %v1170_v31 = vshrl.u32 %v2186_v57, 16  ;;  %v2619_v15 = vsel %vm251_vm0, %v934_v54, %v938_v37 }
  0x3b   : > { %v1179_v7 = vrot.slane %v1177_v27, 1 }
  0x3c   : > { %v1175_v0 = vor.u32 %v1174_v59, %v1170_v31 }
  0x3d   : > { %v1183_v53 = vor.u32 %v1181_v9, %v1179_v7  ;;  %v2627_v9 = vsel %vm251_vm0, %v942_v30, %v946_v8  ;;  %v2642_v30 = vld [vmem:[%s3003_s1 + $0x110] sm:$0xff]  }
  0x3e   : > { %v2614_v57 = vsel %vm251_vm0, %v1175_v0, %v1179_v7  ;;  %1369 = vrot.lane.b32.xlu1 %v2619_v15, %s2207_s8  ;;  %v1765_v0 = vld [vmem:[%s2276_s5 + $0x18] sm:$0xf] }
  0x3f   : > { %1373 = vrot.lane.b32.xlu0 %v2614_v57, %s2207_s8  ;;  %v2624_v13 = vsel %vm251_vm0, %v1183_v53, %v1187_v10  ;;  %v1777_v7 = vcombine.low %v1765_v0, %v2299_v12 }
  0x41   : > { %v853_v48 = vshll.u32 %v1777_v7, 16 }
  0x42   : > { %1371 = vrot.lane.b32.xlu1 %v2627_v9, %s2207_s8 }
  0x43   : > { %1375 = vrot.lane.b32.xlu0 %v2624_v13, %s2207_s8  ;;  %v855_v45 = vrot.slane %v853_v48, 1 }
  0x87   : > { %v283_v46 = vpop.permute.xlu0 %282 }
  0x88   : > { %v285_v49 = vpop.permute.xlu1 %284  ;;  %v367_v59 = vsel %vm358_vm1, %v2411_v26, %v283_v46  ;;  %v851_v26 = vshrl.u32 %v1777_v7, 16 }
  0x89   : > { %713 = vmatprep.mubr.bf16.mxu0 %v367_v59  ;;  %v371_v27 = vsel %vm358_vm1, %v2460_v56, %v285_v49  ;;  %v2654_v56 = vld [vmem:[%s3003_s1 + $0x108] sm:$0xff]  }
  0x8a   : > { %v856_v61 = vor.u32 %v855_v45, %v851_v26  ;;  %v2193_v49 = vld [vmem:[%s2276_s5 + $0x28] ss:$0 sps:$4 sm:$0x11]  }
  0x8b   : > { %v245_v24 = vpop.permute.xlu0 %244  ;;  %v866_v59 = vshll.u32 %v2193_v49, 16  ;;  %v3062_v49 = vld [vmem:[#allocation20_spill] sm:$0xff] }
  0x8c   : > { %v247_v31 = vpop.permute.xlu1 %246  ;;  %v360_v12 = vsel %vm358_vm1, %v2341_v36, %v245_v24  ;;  %v861_v0 = vsel %vm251_vm0, %v856_v61, %v860_v20  ;;  %v3058_v61 = vld [vmem:[#allocation17_spill] sm:$0xff] }
  0x8d   : > { %714 = vmatmul.mubr.bf16.vlgmr.msra.gmra.mxu0 %v360_v12 }
  0x8e   : > { %2073 = vmatpush3.bf16.msra.mxu0 %v2586_v34  ;;  %721 = vmatprep.mubr.bf16.mxu0 %v371_v27  ;;  %v868_v27 = vrot.slane %v866_v59, 1  ;;  %v3064_v59 = vld [vmem:[#allocation9_spill] sm:$0xff] }
  0x8f   : > { %v2648_v37 = vpop.permute.xlu0 %331  ;;  %2074 = vmatprep.subr.bf16.mxu0 %v2642_v30 }
  0x90   : > { %v320_v51 = vpop.permute.xlu1 %319  ;;  %v382_v36 = vsel %vm358_vm1, %v2352_v41, %v2648_v37  ;;  %v2672_v41 = vld [vmem:[%s3003_s1 + $0x100] sm:$0xff]  }
  0x91   : > { %762 = vmatprep.mubr.bf16.mxu1 %v382_v36  ;;  %v2661_v53 = vsel %vm358_vm1, %v2394_v60, %v320_v51  ;;  %v363_v60 = vsel %vm358_vm1, %v2350_v40, %v247_v31  ;;  %v3057_v36 = vld [vmem:[#allocation15_spill] sm:$0xff] }
  0x92   : > { %2075 = vmatpush3.bf16.msra.mxu0 %v2642_v30  ;;  %763 = vmatmul.mubr.bf16.vlgmr.msra.gmra.mxu1 %v2661_v53 }
  0x93   : > { %1887 = vmatpush3.bf16.msra.mxu1 %v2253_v1  ;;  %2076 = vmatprep.subr.bf16.mxu0 %v2654_v56  ;;  %v2667_v54 = vpop.permute.xlu0 %333 }
  0x94   : > { %1888 = vmatprep.subr.bf16.mxu1 %v2259_v2  ;;  %v322_v10 = vpop.permute.xlu1 %321  ;;  %v385_v8 = vsel %vm358_vm1, %v2354_v42, %v2667_v54 }
  0x95   : > { %722 = vmatmul.mubr.bf16.gmra.mxu0 %v363_v60  ;;  %770 = vmatprep.mubr.bf16.mxu1 %v385_v8  ;;  %v2688_v40 = vsel %vm358_vm1, %v2442_v50, %v322_v10  ;;  %v3060_v10 = vld [vmem:[#allocation19_spill] sm:$0xff] }
  0x96   : > { %2077 = vmatpush3.bf16.msra.mxu0 %v2654_v56  ;;  %2080 = vmatprep.mubr.msk.bf16.mxu0 %vm358_vm1, %v2435_v47 }
  0x97   : > { %1889 = vmatpush3.bf16.msra.mxu1 %v2265_v3  ;;  %2078 = vmatprep.subr.bf16.mxu0 %v2672_v41  ;;  %v2690_v7 = vpop.permute.xlu0 %870 }
  0x98   : > { %1890 = vmatprep.subr.bf16.mxu1 %v2328_v28  ;;  %v957_v42 = vsel %vm358_vm1, %v861_v0, %v2690_v7  ;;  %v841_v48 = vpop.permute.xlu1 %840 }
  0x99   : > { %v950_v45 = vsel %vm358_vm1, %v2312_v16, %v841_v48  ;;  %v3059_v16 = vld [vmem:[#allocation18_spill] sm:$0xff] }
  0x9a   : > { %2079 = vmatpush3.bf16.msra.mxu0 %v2672_v41  ;;  %771 = vmatmul.mubr.bf16.gmra.mxu1 %v2688_v40 }
  0x9b   : > { %1891 = vmatpush3.bf16.msra.mxu1 %v2348_v38  ;;  %1914 = vmatprep.subr.bf16.mxu0 %v2271_v4  ;;  %v912_v46 = vpop.permute.xlu0 %911 }
  0x9c   : > { %1892 = vmatprep.subr.bf16.mxu1 %v2416_v32  ;;  %1017 = vmatprep.mubr.bf16.mxu1 %v957_v42  ;;  %v2702_v50 = vsel %vm358_vm1, %v2333_v29, %v912_v46  ;;  %v862_v29 = vshrl.u32 %v2316_v17, 16  ;;  %v908_v31 = vpop.permute.xlu1 %907  ;;  %v3061_v42 = vld [vmem:[#allocation8_spill] sm:$0xff] }
  0x9d   : > { %2081 = vmatmul.mubr.msk.bf16.vlgmr.msra.gmra.mxu0 %vm358_vm1, %v2485_v11  ;;  %v965_v46 = vsel %vm358_vm1, %v3061_v42, %v908_v31 }
  0x9e   : > { %1915 = vmatpush3.bf16.msra.mxu0 %v2281_v5  ;;  %1066 = vmatprep.mubr.bf16.mxu0 %v2702_v50  ;;  %v864_v24 = vor.u32 %v862_v29, %v860_v20  ;;  %v3063_v29 = vld [vmem:[#allocation2_spill] sm:$0xff] }
  0x9f   : > { %1893 = vmatpush3.bf16.msra.mxu1 %v2422_v35  ;;  %1916 = vmatprep.subr.bf16.mxu0 %v2388_v58  ;;  %v2726_v12 = vpop.permute.xlu0 %872 }
  0xa0   : > { %1894 = vmatprep.subr.bf16.mxu1 %v2457_v55  ;;  %v869_v26 = vsel %vm251_vm0, %v864_v24, %v868_v27  ;;  %v843_v20 = vpop.permute.xlu1 %842  ;;  %v3066_v24 = vld [vmem:[#allocation3_spill] sm:$0xff] }
  0xa1   : > { %v961_v51 = vsel %vm358_vm1, %v869_v26, %v2726_v12  ;;  %v953_v8 = vsel %vm358_vm1, %v2316_v17, %v843_v20  ;;  %v3065_v17 = vld [vmem:[#allocation4_spill] sm:$0xff] }
  0xa2   : > { %1917 = vmatpush3.bf16.msra.mxu0 %v2408_v25  ;;  %v1793_v27 = vcombine.low %v3066_v24, %v3065_v17 }
  0xa3   : > { %1895 = vmatpush3.bf16.msra.mxu1 %v2466_v62  ;;  %1918 = vmatprep.subr.bf16.mxu0 %v2430_v39  ;;  %v914_v60 = vpop.permute.xlu0 %913 }
  0xa4   : > { %1896 = vmatprep.subr.bf16.mxu1 %v2491_v14  ;;  %v2753_v48 = vsel %vm358_vm1, %v3064_v59, %v914_v60  ;;  %v910_v26 = vpop.permute.xlu1 %909 }
  0xa6   : > { %1919 = vmatpush3.bf16.msra.mxu0 %v2450_v52 }
  0xa7   : > { %1897 = vmatpush3.bf16.msra.mxu1 %v2500_v18  ;;  %1920 = vmatprep.subr.bf16.mxu0 %v2472_v63  ;;  %v1143_v0 = vpop.permute.xlu0 %1142 }
  0xa8   : > { %1898 = vmatprep.subr.bf16.mxu1 %v2523_v22  ;;  %v1194_v20 = vsel %vm358_vm1, %v3061_v42, %v1143_v0  ;;  %v3069_v42 = vld [vmem:[#allocation21_spill] sm:$0xff] }
  0xaa   : > { %1921 = vmatpush3.bf16.msra.mxu0 %v2480_v6 }
  0xab   : > { %1899 = vmatpush3.bf16.msra.mxu1 %v2529_v23  ;;  %1922 = vmatprep.subr.bf16.mxu0 %v2506_v19  ;;  %v1155_v31 = vpop.permute.xlu0 %1154 }
  0xac   : > { %1900 = vmatprep.subr.bf16.mxu1 %v2558_v43 }
  0xae   : > { %1923 = vmatpush3.bf16.msra.mxu0 %v2515_v21 }
  0xaf   : > { %1901 = vmatpush3.bf16.msra.mxu1 %v2564_v44  ;;  %1924 = vmatprep.subr.bf16.mxu0 %v3056_v33 }
  0xb0   : > { %2084 = vmatprep.subr.bf16.mxu1 %v2586_v34 }
  0xb2   : > { %1018 = vmatmul.mubr.bf16.vlgmr.msra.gmra.mxu1 %v950_v45  ;;  %1925 = vmatpush3.bf16.msra.mxu0 %v3057_v36  ;;  %v1201_v45 = vsel %vm358_vm1, %v1793_v27, %v1155_v31 }
  0xb3   : > { %2085 = vmatpush3.bf16.msra.mxu1 %v2586_v34  ;;  %1926 = vmatprep.subr.bf16.mxu0 %v3058_v61 }
  0xb4   : > { %2086 = vmatprep.subr.bf16.mxu1 %v2642_v30  ;;  %1025 = vmatprep.mubr.bf16.mxu1 %v961_v51 }
  0xb6   : > { %1927 = vmatpush3.bf16.msra.mxu0 %v3059_v16 }
  0xb7   : > { %2087 = vmatpush3.bf16.msra.mxu1 %v2642_v30  ;;  %1928 = vmatprep.subr.bf16.mxu0 %v3060_v10 }
  0xb8   : > { %2088 = vmatprep.subr.bf16.mxu1 %v2654_v56 }
  0xba   : > { %1026 = vmatmul.mubr.bf16.gmra.mxu1 %v953_v8  ;;  %1929 = vmatpush3.bf16.msra.mxu0 %v3062_v49  ;;  %v3068_v8 = vld [vmem:[#allocation5_spill] sm:$0xff] }
  0xbb   : > { %2089 = vmatpush3.bf16.msra.mxu1 %v2654_v56  ;;  %1948 = vmatprep.subr.bf16.mxu0 %v3063_v29  ;;  %v1189_v0 = vsel %vm358_vm1, %v3068_v8, %v2690_v7  ;;  %v3071_v7 = vld [vmem:[#allocation7_spill] sm:$0xff] }
  0xbc   : > { %2090 = vmatprep.subr.bf16.mxu1 %v2672_v41  ;;  %2092 = vmatprep.mubr.msk.bf16.mxu1 %vm358_vm1, %v2619_v15  ;;  %v3067_v15 = vld [vmem:[#allocation10_spill] sm:$0xff]  ;;  %v1191_v27 = vsel %vm358_vm1, %v3071_v7, %v2726_v12 }
  0xbd   : > { %1067 = vmatmul.mubr.bf16.vlgmr.msra.gmra.mxu0 %v965_v46  ;;  %v969_v51 = vsel %vm358_vm1, %v3067_v15, %v910_v26  ;;  %v3070_v46 = vld [vmem:[#allocation6_spill] sm:$0xff] }
  0xbe   : > { %1949 = vmatpush3.bf16.msra.mxu0 %v2253_v1  ;;  %1074 = vmatprep.mubr.bf16.mxu0 %v2753_v48  ;;  %v1794_v59 = vcombine.low %v3070_v46, %v3069_v42  ;;  %v3073_v12 = vld [vmem:[#allocation14_spill] sm:$0xff] }
  0xbf   : > { %2091 = vmatpush3.bf16.msra.mxu1 %v2672_v41  ;;  %1950 = vmatprep.subr.bf16.mxu0 %v2259_v2 }
  0xc0   : > { %1976 = vmatprep.subr.bf16.mxu1 %v2271_v4 }
  0xc2   : > { %2093 = vmatmul.mubr.msk.bf16.vlgmr.msra.gmra.mxu1 %vm358_vm1, %v2627_v9  ;;  %1951 = vmatpush3.bf16.msra.mxu0 %v2265_v3  ;;  %v1145_v9 = vpop.permute.xlu1 %1144 }
  0xc3   : > { %1977 = vmatpush3.bf16.msra.mxu1 %v2281_v5  ;;  %1952 = vmatprep.subr.bf16.mxu0 %v2328_v28  ;;  %v1197_v60 = vsel %vm358_vm1, %v3067_v15, %v1145_v9 }
  0xc4   : > { %1978 = vmatprep.subr.bf16.mxu1 %v2388_v58  ;;  %1294 = vmatprep.mubr.bf16.mxu1 %v1201_v45 }
  0xc5   : > { %1075 = vmatmul.mubr.bf16.gmra.mxu0 %v969_v51 }
  0xc6   : > { %1953 = vmatpush3.bf16.msra.mxu0 %v2348_v38  ;;  %1245 = vmatprep.mubr.bf16.mxu0 %v1194_v20  ;;  %v1157_v17 = vpop.permute.xlu1 %1156 }
  0xc7   : > { %1979 = vmatpush3.bf16.msra.mxu1 %v2408_v25  ;;  %1954 = vmatprep.subr.bf16.mxu0 %v2416_v32  ;;  %v1205_v24 = vsel %vm358_vm1, %v1794_v59, %v1157_v17 }
  0xc8   : > { %1980 = vmatprep.subr.bf16.mxu1 %v2430_v39 }
  0xca   : > { %1955 = vmatpush3.bf16.msra.mxu0 %v2422_v35 }
  0xcb   : > { %1981 = vmatpush3.bf16.msra.mxu1 %v2450_v52  ;;  %1956 = vmatprep.subr.bf16.mxu0 %v2457_v55 }
  0xcc   : > { %1982 = vmatprep.subr.bf16.mxu1 %v2472_v63 }
  0xce   : > { %1957 = vmatpush3.bf16.msra.mxu0 %v2466_v62 }
  0xcf   : > { %1983 = vmatpush3.bf16.msra.mxu1 %v2480_v6  ;;  %1958 = vmatprep.subr.bf16.mxu0 %v2491_v14 }
  0xd0   : > { %1984 = vmatprep.subr.bf16.mxu1 %v2506_v19 }
  0xd2   : > { %1959 = vmatpush3.bf16.msra.mxu0 %v2500_v18 }
  0xd3   : > { %1985 = vmatpush3.bf16.msra.mxu1 %v2515_v21  ;;  %1960 = vmatprep.subr.bf16.mxu0 %v2523_v22 }
  0xd4   : > { %1986 = vmatprep.subr.bf16.mxu1 %v3056_v33 }
  0xd6   : > { %1961 = vmatpush3.bf16.msra.mxu0 %v2529_v23 }
  0xd7   : > { %1987 = vmatpush3.bf16.msra.mxu1 %v3057_v36  ;;  %1962 = vmatprep.subr.bf16.mxu0 %v2558_v43 }
  0xd8   : > { %1988 = vmatprep.subr.bf16.mxu1 %v3058_v61 }
  0xda   : > { %1963 = vmatpush3.bf16.msra.mxu0 %v2564_v44 }
  0xdb   : > { %1989 = vmatpush3.bf16.msra.mxu1 %v3059_v16  ;;  %2096 = vmatprep.subr.bf16.mxu0 %v2586_v34 }
  0xdc   : > { %1990 = vmatprep.subr.bf16.mxu1 %v3060_v10 }
  0xdd   : > { %1246 = vmatmul.mubr.bf16.vlgmr.msra.gmra.mxu0 %v1189_v0 }
  0xde   : > { %2097 = vmatpush3.bf16.msra.mxu0 %v2586_v34  ;;  %1253 = vmatprep.mubr.bf16.mxu0 %v1197_v60 }
  0xdf   : > { %1991 = vmatpush3.bf16.msra.mxu1 %v3062_v49  ;;  %2098 = vmatprep.subr.bf16.mxu0 %v2642_v30 }
  0xe0   : > { %2010 = vmatprep.subr.bf16.mxu1 %v3063_v29 }
  0xe2   : > { %1295 = vmatmul.mubr.bf16.vlgmr.msra.gmra.mxu1 %v2702_v50  ;;  %2099 = vmatpush3.bf16.msra.mxu0 %v2642_v30 }
  0xe3   : > { %2011 = vmatpush3.bf16.msra.mxu1 %v2253_v1  ;;  %2100 = vmatprep.subr.bf16.mxu0 %v2654_v56  ;;  %v1374_v1 = vpop.permute.xlu0 %1373 }
  0xe4   : > { %2012 = vmatprep.subr.bf16.mxu1 %v2259_v2  ;;  %1302 = vmatprep.mubr.bf16.mxu1 %v1205_v24  ;;  %v3072_v2 = vld [vmem:[#allocation11_spill] sm:$0xff] }
  0xe5   : > { %1254 = vmatmul.mubr.bf16.gmra.mxu0 %v1191_v27  ;;  %v1411_v50 = vsel %vm358_vm1, %v3072_v2, %v2648_v37 }
  0xe6   : > { %2101 = vmatpush3.bf16.msra.mxu0 %v2654_v56  ;;  %2104 = vmatprep.mubr.msk.bf16.mxu0 %vm358_vm1, %v2614_v57  ;;  %v1424_v57 = vsel %vm358_vm1, %v3073_v12, %v1374_v1 }
  0xe7   : > { %2013 = vmatpush3.bf16.msra.mxu1 %v2265_v3  ;;  %2102 = vmatprep.subr.bf16.mxu0 %v2672_v41  ;;  %v2196_v3 = vld [vmem:[%s2276_s5 + $0x4c] sm:$0xff]  }
  0xe8   : > { %2014 = vmatprep.subr.bf16.mxu1 %v2328_v28  ;;  %v1391_v28 = vshrl.u32 %v2196_v3, 16 }
  0xea   : > { %1303 = vmatmul.mubr.bf16.gmra.mxu1 %v2753_v48  ;;  %2103 = vmatpush3.bf16.msra.mxu0 %v2672_v41 }
  0xeb   : > { %2015 = vmatpush3.bf16.msra.mxu1 %v2348_v38  ;;  %1468 = vmatprep.mubr.bf16.mxu1 %v1411_v50 }
  0xec   : > { %2038 = vmatprep.subr.bf16.mxu0 %v2271_v4  ;;  %2016 = vmatprep.subr.bf16.mxu1 %v2416_v32  ;;  %v2197_v4 = vld [vmem:[%s2276_s5 + $0x54] sm:$0xff]  }
  0xed   : > { %2105 = vmatmul.mubr.msk.bf16.vlgmr.msra.gmra.mxu0 %vm358_vm1, %v2624_v13 }
  0xee   : > { %2039 = vmatpush3.bf16.msra.mxu0 %v2281_v5  ;;  %1517 = vmatprep.mubr.bf16.mxu0 %v1424_v57  ;;  %v1393_v5 = vshll.u32 %v2196_v3, 16 }
  0xef   : > { %2017 = vmatpush3.bf16.msra.mxu1 %v2422_v35  ;;  %2040 = vmatprep.subr.bf16.mxu0 %v2388_v58  ;;  %v1398_v58 = vshll.u32 %v2197_v4, 16  ;;  %v2198_v35 = vld [vmem:[%s2276_s5 + $0x5c] ss:$0 sps:$4 sm:$0x11]   ;;  %s1696_s5 = sshll.u32 %s2239_s16, 2 }
  0xf0   : > { %2018 = vmatprep.subr.bf16.mxu1 %v2457_v55  ;;  %v1395_v38 = vrot.slane %v1393_v5, 1  ;;  %v1370_v55 = vpop.permute.xlu1 %1369  ;;  %p2963_p4 = scmp.lt.s32.totalorder %s1696_s5, 7 }
  0xf2   : > { %2041 = vmatpush3.bf16.msra.mxu0 %v2408_v25  ;;  %v3074_v25 = vld [vmem:[#allocation12_spill] sm:$0xff]  ;;  %s3096_s5 = smov (!%p2963_p4, %s1696_s5), 7 }
  0xf3   : > { %2019 = vmatpush3.bf16.msra.mxu1 %v2466_v62  ;;  %2042 = vmatprep.subr.bf16.mxu0 %v2430_v39  ;;  %v1414_v32 = vsel %vm358_vm1, %v3074_v25, %v2667_v54  ;;  %v1396_v39 = vor.u32 %v1395_v38, %v1391_v28  ;;  %v1402_v62 = vshrl.u32 %v2197_v4, 16  ;;  %s1697_s16 = sshll.u32 %s3096_s5, 2 }
  0xf4   : > { %2020 = vmatprep.subr.bf16.mxu1 %v2491_v14  ;;  %v1376_v14 = vpop.permute.xlu0 %1375  ;;  %s197_s9 = scalar_lea.vmem %s3006_s4, %s1697_s16 }
  0xf6   : > { %2043 = vmatpush3.bf16.msra.mxu0 %v2450_v52  ;;  %v1400_v52 = vrot.slane %v1398_v58, 1 }
  0xf7   : > { %2021 = vmatpush3.bf16.msra.mxu1 %v2500_v18  ;;  %2044 = vmatprep.subr.bf16.mxu0 %v2472_v63  ;;  %v1406_v63 = vshll.u32 %v2198_v35, 16  ;;  %v1417_v18 = vsel %vm358_vm1, %v2435_v47, %v1370_v55 }
  0xf8   : > { %2022 = vmatprep.subr.bf16.mxu1 %v2523_v22  ;;  %v3075_v22 = vld [vmem:[#allocation16_spill] sm:$0xff] }
  0xfa   : > { %2045 = vmatpush3.bf16.msra.mxu0 %v2480_v6  ;;  %v1401_v6 = vsel %vm251_vm0, %v1396_v39, %v1400_v52 }
  0xfb   : > { %2023 = vmatpush3.bf16.msra.mxu1 %v2529_v23  ;;  %2046 = vmatprep.subr.bf16.mxu0 %v2506_v19  ;;  %v1404_v19 = vor.u32 %v1402_v62, %v1400_v52  ;;  %v1428_v23 = vsel %vm358_vm1, %v3075_v22, %v1376_v14 }
  0xfc   : > { %2024 = vmatprep.subr.bf16.mxu1 %v2558_v43 }
  0xfe   : > { %2047 = vmatpush3.bf16.msra.mxu0 %v2515_v21  ;;  %v1408_v21 = vrot.slane %v1406_v63, 1 }
  0xff   : > { %2025 = vmatpush3.bf16.msra.mxu1 %v2564_v44  ;;  %2048 = vmatprep.subr.bf16.mxu0 %v3056_v33  ;;  %v1372_v44 = vpop.permute.xlu1 %1371 }
 0x100   : > { %2108 = vmatprep.subr.bf16.mxu1 %v2586_v34  ;;  %v1409_v43 = vsel %vm251_vm0, %v1404_v19, %v1408_v21  ;;  %v1420_v47 = vsel %vm358_vm1, %v2485_v11, %v1372_v44 }
 0x102   : > { %1469 = vmatmul.mubr.bf16.vlgmr.msra.gmra.mxu1 %v2661_v53  ;;  %2049 = vmatpush3.bf16.msra.mxu0 %v3057_v36 }
 0x103   : > { %1476 = vmatprep.mubr.bf16.mxu1 %v1414_v32  ;;  %2109 = vmatpush3.bf16.msra.mxu1 %v2586_v34 }
 0x104   : > { %2050 = vmatprep.subr.bf16.mxu0 %v3058_v61  ;;  %2110 = vmatprep.subr.bf16.mxu1 %v2642_v30 }
 0x106   : > { %2051 = vmatpush3.bf16.msra.mxu0 %v3059_v16 }
 0x107   : > { %2111 = vmatpush3.bf16.msra.mxu1 %v2642_v30  ;;  %2052 = vmatprep.subr.bf16.mxu0 %v3060_v10 }
 0x108   : > { %2112 = vmatprep.subr.bf16.mxu1 %v2654_v56 }
 0x10a   : > { %1477 = vmatmul.mubr.bf16.gmra.mxu1 %v2688_v40  ;;  %2053 = vmatpush3.bf16.msra.mxu0 %v3062_v49 }
 0x10b   : > { %2113 = vmatpush3.bf16.msra.mxu1 %v2654_v56  ;;  %2116 = vmatprep.mubr.msk.bf16.mxu1 %vm358_vm1, %v1401_v6 }
 0x10c   : > { %2114 = vmatprep.subr.bf16.mxu1 %v2672_v41 }
 0x10d   : > { %1518 = vmatmul.mubr.bf16.vlgmr.msra.gmra.mxu0 %v1417_v18 }
 0x10e   : > { %1525 = vmatprep.mubr.bf16.mxu0 %v1428_v23 }
 0x10f   : > { %2115 = vmatpush3.bf16.msra.mxu1 %v2672_v41 }
 0x112   : > { %2117 = vmatmul.mubr.msk.bf16.vlgmr.msra.gmra.mxu1 %vm358_vm1, %v1409_v43 }
 0x115   : > { %1526 = vmatmul.mubr.bf16.gmra.mxu0 %v1420_v47 }
 0x14d   : > { %v2888_v13 = vpop.f32.mrf.mxu0 }
 0x14f   : > { %v1841_v53 = vpop.f32.mrf.mxu0 }
 0x151   : > { %v2894_v41 = vpop.f32.mrf.mxu0 }
 0x152   : > { %v1868_v34 = vpop.f32.mrf.mxu1 }
 0x153   : > { %v2896_v33 = vpop.f32.mrf.mxu0 }
 0x154   : > { %v1869_v30 = vpop.f32.mrf.mxu1 }
 0x155   : > { %v2890_v37 = vadd.f32 %v1869_v30, %v1868_v34  ;;  %v2898_v36 = vpop.f32.mrf.mxu0 }
 0x156   : > { %v1871_v56 = vpop.f32.mrf.mxu1 }
 0x157   : > { %v2900_v61 = vpop.f32.mrf.mxu0 }
 0x158   : > { %v1872_v54 = vpop.f32.mrf.mxu1 }
 0x159   : > { %v2892_v40 = vadd.f32 %v1872_v54, %v1871_v56  ;;  %v2902_v16 = vpop.f32.mrf.mxu0  ;;  %v1842_v54 = vadd.f32 %v1841_v53, %v2888_v13 }
 0x15a   : > { %v1874_v11 = vpop.f32.mrf.mxu1 }
 0x15b   : > { %v2904_v49 = vpop.f32.mrf.mxu0 }
 0x15c   : > { %v1875_v10 = vpop.f32.mrf.mxu1  ;;  %v1851_v53 = vadd.f32 %v2904_v49, %v2902_v16 }
 0x15d   : > { %v2908_v48 = vpop.f32.mrf.mxu0 }
 0x15e   : > { %v2906_v29 = vpop.f32.mrf.mxu1  ;;  %3076 = vst [vmem:[#allocation13_spill] sm:$0xff] %v2908_v48 }
 0x15f   : > { %v2912_v45 = vpop.f32.mrf.mxu0 }
 0x160   : > { %v2910_v31 = vpop.f32.mrf.mxu1 }
 0x161   : > { %v2914_v51 = vpop.f32.mrf.mxu0 }
 0x162   : > { %3077 = vst [vmem:[#allocation15_spill] sm:$0xff] %v2914_v51 }
 0x163   : > { %v2916_v9 = vpop.f32.mrf.mxu0 }
 0x172   : > { %v1902_v26 = vpop.f32.mrf.mxu1 }
 0x174   : > { %v1903_v15 = vpop.f32.mrf.mxu1 }
 0x175   : > { %v1904_v30 = vadd.f32 %v1903_v15, %v1902_v26 }
 0x176   : > { %v1905_v20 = vpop.f32.mrf.mxu1 }
 0x178   : > { %v1906_v8 = vpop.f32.mrf.mxu1 }
 0x179   : > { %v1907_v26 = vadd.f32 %v1906_v8, %v1905_v20 }
 0x17a   : > { %v1908_v42 = vpop.f32.mrf.mxu1 }
 0x17c   : > { %v1909_v59 = vpop.f32.mrf.mxu1 }
 0x17d   : > { %v1930_v60 = vpop.f32.mrf.mxu0 }
 0x17e   : > { %v2918_v24 = vpop.f32.mrf.mxu1 }
 0x17f   : > { %v1931_v0 = vpop.f32.mrf.mxu0 }
 0x180   : > { %v2920_v27 = vpop.f32.mrf.mxu1  ;;  %v1932_v44 = vadd.f32 %v1931_v0, %v1930_v60  ;;  %v1848_v0 = vadd.f32 %v2900_v61, %v2898_v36 }
 0x181   : > { %v1933_v46 = vpop.f32.mrf.mxu0  ;;  %3078 = vst [vmem:[#allocation17_spill] sm:$0xff] %v2920_v27  ;;  %v765_v27 = vadd.f32 %v2890_v37, %v1842_v54 }
 0x182   : > { %v2922_v2 = vpop.f32.mrf.mxu1  ;;  %v1069_v51 = vadd.f32 %v1932_v44, %v1904_v30 }
 0x183   : > { %v1934_v17 = vpop.f32.mrf.mxu0  ;;  %3079 = vst [vmem:[#allocation18_spill] sm:$0xff] %v2922_v2  ;;  %v1876_v2 = vadd.f32 %v1875_v10, %v1874_v11  ;;  %v814_v61 = vadd.f32 %v2912_v45, %v765_v27 }
 0x184   : > { %v1117_v12 = vpop.f32.mrf.mxu1 }
 0x185   : > { %v1936_v7 = vpop.f32.mrf.mxu0  ;;  %v773_v36 = vadd.f32 %v1876_v2, %v1848_v0 }
 0x186   : > { %v2928_v3 = vpop.f32.mrf.mxu1 }
 0x187   : > { %v1937_v1 = vpop.f32.mrf.mxu0  ;;  %3080 = vst [vmem:[#allocation19_spill] sm:$0xff] %v2928_v3 }
 0x188   : > { %v2930_v5 = vpop.f32.mrf.mxu1  ;;  %v1938_v15 = vadd.f32 %v1937_v1, %v1936_v7 }
 0x189   : > { %v2924_v50 = vpop.f32.mrf.mxu0 }
 0x18b   : > { %v2926_v57 = vpop.f32.mrf.mxu0 }
 0x18c   : > { %v1941_v2 = vadd.f32 %v2926_v57, %v2924_v50  ;;  %v3087_v57 = vld [vmem:[#allocation18_spill] sm:$0xff] }
 0x19d   : > { %v1964_v4 = vpop.f32.mrf.mxu0 }
 0x19f   : > { %v1965_v28 = vpop.f32.mrf.mxu0 }
 0x1a1   : > { %v1967_v58 = vpop.f32.mrf.mxu0 }
 0x1a2   : > { %v1992_v38 = vpop.f32.mrf.mxu1 }
 0x1a3   : > { %v1968_v32 = vpop.f32.mrf.mxu0 }
 0x1a4   : > { %v1993_v25 = vpop.f32.mrf.mxu1  ;;  %v1969_v49 = vadd.f32 %v1968_v32, %v1967_v58 }
 0x1a5   : > { %v1970_v39 = vpop.f32.mrf.mxu0 }
 0x1a6   : > { %v1995_v35 = vpop.f32.mrf.mxu1 }
 0x1a7   : > { %v1971_v55 = vpop.f32.mrf.mxu0 }
 0x1a8   : > { %v1996_v52 = vpop.f32.mrf.mxu1 }
 0x1a9   : > { %v2932_v63 = vpop.f32.mrf.mxu0  ;;  %v1997_v37 = vadd.f32 %v1996_v52, %v1995_v35 }
 0x1aa   : > { %v1998_v62 = vpop.f32.mrf.mxu1  ;;  %3081 = vst [vmem:[#allocation8_spill] sm:$0xff] %v2932_v63  ;;  %v1935_v63 = vadd.f32 %v1934_v17, %v1933_v46  ;;  %v1910_v17 = vadd.f32 %v1909_v59, %v1908_v42  ;;  %v1879_v59 = vadd.f32 %v2910_v31, %v2906_v29  ;;  %v3086_v29 = vld [vmem:[#allocation17_spill] sm:$0xff] }
 0x1ab   : > { %v2934_v14 = vpop.f32.mrf.mxu0  ;;  %v1300_v35 = vadd.f32 %v1997_v37, %v1969_v49  ;;  %v1913_v31 = vadd.f32 %v3086_v29, %v2918_v24  ;;  %v1812_v24 = vld [vmem:[%s3004_s2] ss:$0 sm:$0xff]  ;;  %v3092_v37 = vld [vmem:[#allocation19_spill] sm:$0xff] }
 0x1ac   : > { %v1999_v6 = vpop.f32.mrf.mxu1  ;;  %3082 = vst [vmem:[#allocation20_spill] sm:$0xff] %v2934_v14  ;;  %v1994_v14 = vadd.f32 %v1993_v25, %v1992_v38  ;;  %v1118_v38 = vadd.f32 %v1117_v12, %v1069_v51  ;;  %v1077_v16 = vadd.f32 %v1938_v15, %v1910_v17  ;;  %v776_v44 = vadd.f32 %v1879_v59, %v1851_v53 }
 0x1ad   : > { %v2936_v19 = vpop.f32.mrf.mxu0  ;;  %v2000_v11 = vadd.f32 %v1999_v6, %v1998_v62  ;;  %v3088_v6 = vld [vmem:[#allocation13_spill] sm:$0xff] }
 0x1ae   : > { %v2001_v18 = vpop.f32.mrf.mxu1  ;;  %3083 = vst [vmem:[#allocation2_spill] sm:$0xff] %v2936_v19  ;;  %v1845_v19 = vadd.f32 %v2896_v33, %v2894_v41  ;;  %v1072_v33 = vadd.f32 %v1935_v63, %v1907_v26  ;;  %v1132_v27 = vmax.f32 %v814_v61, %v1118_v38  ;;  %v1813_v26 = vld [vmem:[%s3005_s3] ss:$0 sm:$0xff] }
 0x1af   : > { %v1345_v23 = vpop.f32.mrf.mxu0 }
 0x1b0   : > { %v2002_v21 = vpop.f32.mrf.mxu1  ;;  %v768_v46 = vadd.f32 %v2892_v40, %v1845_v19  ;;  %v1972_v40 = vadd.f32 %v1971_v55, %v1970_v39  ;;  %v1126_v39 = vadd.f32 %v3087_v57, %v1077_v16  ;;  %v1080_v19 = vadd.f32 %v1941_v2, %v1913_v31 }
 0x1b1   : > { %v2938_v34 = vpop.f32.mrf.mxu0 }
 0x1b2   : > { %3084 = vst [vmem:[#allocation9_spill] sm:$0xff] %v2938_v34  ;;  %v1966_v34 = vadd.f32 %v1965_v28, %v1964_v4  ;;  %v817_v1 = vadd.f32 %v2916_v9, %v768_v46  ;;  %v1121_v4 = vadd.f32 %v2930_v5, %v1072_v33  ;;  %v1305_v28 = vadd.f32 %v2000_v11, %v1972_v40 }
 0x1b3   : > { %v1348_v48 = vpop.f32.mrf.mxu0  ;;  %v2003_v9 = vadd.f32 %v2002_v21, %v2001_v18  ;;  %v1129_v11 = vadd.f32 %v3092_v37, %v1080_v19 }
 0x1b4   : > { %v1297_v10 = vadd.f32 %v1994_v14, %v1966_v34  ;;  %v1349_v55 = vadd.f32 %v1348_v48, %v1300_v35  ;;  %v822_v14 = vadd.f32 %v3088_v6, %v773_v36 }
 0x1b5   : > { %v3091_v34 = vld [vmem:[#allocation2_spill] sm:$0xff] }
 0x1b6   : > { %v1346_v42 = vadd.f32 %v1345_v23, %v1297_v10  ;;  %v3090_v23 = vld [vmem:[#allocation20_spill] sm:$0xff]  ;;  %v1354_v30 = vadd.f32 %v3091_v34, %v1305_v28  ;;  %v1134_v53 = vmax.f32 %v822_v14, %v1126_v39 }
 0x1b8   : > { %v1360_v5 = vmax.f32 %v1132_v27, %v1346_v42  ;;  %v1362_v61 = vmax.f32 %v1134_v53, %v1354_v30 }
 0x1c2   : > { %v2026_v22 = vpop.f32.mrf.mxu1 }
 0x1c4   : > { %v2027_v43 = vpop.f32.mrf.mxu1 }
 0x1c5   : > { %v2028_v20 = vadd.f32 %v2027_v43, %v2026_v22  ;;  %v3089_v22 = vld [vmem:[#allocation8_spill] sm:$0xff] }
 0x1c6   : > { %v2029_v47 = vpop.f32.mrf.mxu1  ;;  %v1975_v43 = vadd.f32 %v3090_v23, %v3089_v22 }
 0x1c8   : > { %v2030_v56 = vpop.f32.mrf.mxu1  ;;  %v1308_v54 = vadd.f32 %v2003_v9, %v1975_v43 }
 0x1c9   : > { %v2031_v58 = vadd.f32 %v2030_v56, %v2029_v47  ;;  %v1133_v47 = vmax.f32 %v817_v1, %v1121_v4 }
 0x1ca   : > { %v2941_v3 = vpop.f32.mrf.mxu1 }
 0x1cb   : > { %v1361_v46 = vmax.f32 %v1133_v47, %v1349_v55 }
 0x1cc   : > { %v2033_v60 = vpop.f32.mrf.mxu1 }
 0x1cd   : > { %v2054_v13 = vpop.f32.mrf.mxu0  ;;  %v2034_v0 = vadd.f32 %v2033_v60, %v2941_v3 }
 0x1ce   : > { %v2951_v41 = vpop.f32.mrf.mxu1 }
 0x1cf   : > { %v2055_v25 = vpop.f32.mrf.mxu0 }
 0x1d0   : > { %v2056_v8 = vadd.f32 %v2055_v25, %v2054_v13  ;;  %v2036_v7 = vpop.f32.mrf.mxu1  ;;  %v3093_v25 = vld [vmem:[#allocation15_spill] sm:$0xff] }
 0x1d1   : > { %v2057_v51 = vpop.f32.mrf.mxu0  ;;  %v825_v36 = vadd.f32 %v3093_v25, %v776_v44  ;;  %v2037_v49 = vadd.f32 %v2036_v7, %v2951_v41 }
 0x1d2   : > { %v2118_v12 = vpop.f32.mrf.mxu1  ;;  %v1520_v45 = vadd.f32 %v2056_v8, %v2028_v20  ;;  %v3094_v8 = vld [vmem:[#allocation9_spill] sm:$0xff] }
 0x1d3   : > { %v2058_v52 = vpop.f32.mrf.mxu0  ;;  %v1357_v16 = vadd.f32 %v3094_v8, %v1308_v54  ;;  %v1135_v1 = vmax.f32 %v825_v36, %v1129_v11 }
 0x1d4   : > { %v2059_v32 = vadd.f32 %v2058_v52, %v2057_v51  ;;  %v1568_v50 = vpop.f32.mrf.mxu1 }
 0x1d5   : > { %v1569_v62 = vadd.f32 %v1568_v50, %v1520_v45  ;;  %v2060_v63 = vpop.f32.mrf.mxu0  ;;  %v1363_v28 = vmax.f32 %v1135_v1, %v1357_v16 }
 0x1d6   : > { %v2119_v18 = vpop.f32.mrf.mxu1  ;;  %v1523_v21 = vadd.f32 %v2059_v32, %v2031_v58 }
 0x1d7   : > { %v1583_v48 = vmax.f32 %v1360_v5, %v1569_v62  ;;  %v2061_v56 = vpop.f32.mrf.mxu0 }
 0x1d8   : > { %v2062_v15 = vadd.f32 %v2061_v56, %v2060_v63  ;;  %v1571_v13 = vpop.f32.mrf.mxu1 }
 0x1d9   : > { %v1594_v17 = vmul.f32 %v1812_v24, %v1583_v48  ;;  %v1572_v38 = vadd.f32 %v1571_v13, %v1523_v21  ;;  %v2063_v33 = vpop.f32.mrf.mxu0 }
 0x1da   : > { %v1528_v10 = vadd.f32 %v2062_v15, %v2034_v0 }
 0x1db   : > { %v1605_v20 = vadd.f32 %v1813_v26, %v1594_v17  ;;  %v1584_v3 = vmax.f32 %v1361_v46, %v1572_v38  ;;  %v2064_v60 = vpop.f32.mrf.mxu0 }
 0x1dc   : > { %v1577_v40 = vadd.f32 %v2118_v12, %v1528_v10  ;;  %v2065_v42 = vadd.f32 %v2064_v60, %v2063_v33 }
 0x1dd   : > { %v1609_v51 = vmax.f32 %v1605_v20, 0.0  ;;  %v1595_v59 = vmul.f32 %v1812_v24, %v1584_v3 }
 0x1de   : > { %v1585_v2 = vmax.f32 %v1362_v61, %v1577_v40  ;;  %v1531_v45 = vadd.f32 %v2065_v42, %v2037_v49 }
 0x1df   : > { %v1820_v27 = vpack.c.bf16 %v1609_v51, %v1609_v51  ;;  %v1606_v4 = vadd.f32 %v1813_v26, %v1595_v59 }
 0x1e0   : > { %v1596_v35 = vmul.f32 %v1812_v24, %v1585_v2  ;;  %v1580_v52 = vadd.f32 %v2119_v18, %v1531_v45 }
 0x1e1   : > { %1630 = vst.msk [vmem:[%s197_s9] sm:$0xf] %vm1629_vm2, %v1820_v27  ;;  %v1610_v41 = vmax.f32 %v1606_v4, 0.0 }
 0x1e2   : > { %v1607_v7 = vadd.f32 %v1813_v26, %v1596_v35  ;;  %v1586_v12 = vmax.f32 %v1363_v28, %v1580_v52 }
 0x1e3   : > { %v1821_v29 = vpack.c.bf16 %v1610_v41, %v1610_v41 }
 0x1e4   : > { %v1611_v31 = vmax.f32 %v1607_v7, 0.0  ;;  %v1597_v9 = vmul.f32 %v1812_v24, %v1586_v12 }
 0x1e5   : > { %1631 = vst.msk [vmem:[%s197_s9 + $0x4] sm:$0xf] %vm1629_vm2, %v1821_v29 }
 0x1e6   : > { %v1822_v58 = vpack.c.bf16 %v1611_v31, %v1611_v31  ;;  %v1608_v32 = vadd.f32 %v1813_v26, %v1597_v9 }
 0x1e8   : > { %1632 = vst.msk [vmem:[%s197_s9 + $0x8] sm:$0xf] %vm1629_vm2, %v1822_v58  ;;  %v1612_v50 = vmax.f32 %v1608_v32, 0.0 }
 0x1ea   : > { %v1823_v57 = vpack.c.bf16 %v1612_v50, %v1612_v50 }
 0x1ec   : > { %1633 = vst.msk [vmem:[%s197_s9 + $0xc] sm:$0xf] %vm1629_vm2, %v1823_v57 }
 0x1ed PF: > { %s14_s15 = sadd.s32 1, %s2205_s15  }
 0x1ee   : > { %p11_p5 = scmp.ge.s32.totalorder %s14_s15, 4  }
 0x1f0   :  { %13 = sbr.rel (!%p11_p5) target bundleno = 1 (0x1), region = 69 }

// kernel: classifier_forward.5
= control target key start
LH: loop header
LB: loop body
LE: loop exit
PB: predicated region body
PF: predicated region fallthrough
CT: control target
= control target key end

     0   :  { %s4696_s15 = smov 0   ;;  %s6546_s0 = inlined_call_operand.vmem [shape: bf16[2,4,160,64], index: 0, kind: input, shape index: {}]   ;;  %s6547_s1 = inlined_call_operand.vmem [shape: bf16[576,64], index: 1, kind: input, shape index: {}]   ;;  %s6548_s2 = inlined_call_operand.vmem [shape: f32[1,64], index: 2, kind: input, shape index: {}]   ;;  %s6549_s3 = inlined_call_operand.vmem [shape: f32[1,64], index: 3, kind: input, shape index: {}]   ;;  %s6550_s4 = inlined_call_operand.vmem [shape: bf16[256,64], index: 4, kind: output, shape index: {}]  }
   0x1 LB: > { %s4702_s16 = sadd.s32 4294967295, %s4668_s15   ;;  %p3487_p0 = scmp.ge.s32.totalorder %s4668_s15, 1  ;;  %s4668_s15 = sphi %s4696_s15, %s14_s15  }
   0x2   : > { %p162_p1 = scmp.lt.s32.totalorder %s4668_s15, 3 }
   0x4   : > { %p163_p2 = pnand %p3487_p0, %p162_p1 }
   0x6   : > { %166 = sbr.rel (%p163_p2) target bundleno = 667 (0x29b), region = 36 }
   0xb   : > { %p188_p3 = scmp.lt.s32.totalorder %s4702_s16, 1  ;;  %v4710_v0 = vld [vmem:[%s6547_s1 + $0x78] sm:$0xff]   ;;  %v4509_v2 = vld [vmem:[%s6547_s1 + $0x70] sm:$0xff]   ;;  %s4670_s8 = smov 64   ;;  %vm373_vm0 = vsmask.f32 7424 }
   0xc   : > { %v4508_v1 = vld [vmem:[%s6547_s1 + $0x38] sm:$0xff]   ;;  %3816 = vmatprep.subr.bf16.mxu0 %v4710_v0  ;;  %v4511_v4 = vld [vmem:[%s6547_s1 + $0x30] sm:$0xff]   ;;  %v4779_v47 = vld [vmem:[%s6547_s1 + $0x68] sm:$0xff]   ;;  %vm653_vm1 = vcmask 523264   ;;  %vm3410_vm2 = vcmask 519168  }
   0xd   : > { %s189_s19 = scalar_select %p188_p3, %s4702_s16, 1  ;;  %3817 = vmatpush3.bf16.msra.mxu0 %v4508_v1  ;;  %v4510_v3 = vld [vmem:[%s6547_s1 + $0xf8] sm:$0xff]   ;;  %v4515_v48 = vld [vmem:[%s6547_s1 + $0xf0] sm:$0xff]   ;;  %v4796_v55 = vld [vmem:[%s6547_s1 + $0x28] sm:$0xff]  }
   0xe   : > { %3818 = vmatprep.subr.bf16.mxu0 %v4509_v2  ;;  %3880 = vmatprep.subr.bf16.mxu1 %v4510_v3  ;;  %v4512_v5 = vld [vmem:[%s6547_s1 + $0xb8] sm:$0xff]   ;;  %v4518_v57 = vld [vmem:[%s6547_s1 + $0xb0] sm:$0xff]   ;;  %v4814_v61 = vld [vmem:[%s6547_s1 + $0x60] sm:$0xff]  }
   0xf   : > { %s4472_s24 = smul.u32 320, %s189_s19  ;;  %3881 = vmatpush3.bf16.msra.mxu1 %v4512_v5  ;;  %v4520_v62 = vld [vmem:[%s6547_s1 + $0xe8] sm:$0xff]  }
  0x10   : > { %3882 = vmatprep.subr.bf16.mxu1 %v4515_v48 }
  0x11   : > { %s4729_s5 = scalar_lea.vmem %s6546_s0, %s4472_s24  ;;  %3819 = vmatpush3.bf16.msra.mxu0 %v4511_v4 }
  0x12   : > { %v4482_v6 = vld [vmem:[%s4729_s5 + $0xa0] sm:$0xff]   ;;  %v4483_v7 = vld [vmem:[%s4729_s5 + $0x58] sm:$0xff]   ;;  %v4484_v8 = vld [vmem:[%s4729_s5 + $0x50] sm:$0xff]   ;;  %3820 = vmatprep.subr.bf16.mxu0 %v4779_v47 }
  0x13   : > { %482 = vrot.lane.b32.xlu0 %v4482_v6, %s4670_s8  ;;  %v542_v9 = vshrl.u32 %v4482_v6, 16  ;;  %356 = vrot.lane.b32.xlu1 %v4483_v7, %s4670_s8  ;;  %v4485_v10 = vld [vmem:[%s4729_s5 + $0xa8] sm:$0xff]   ;;  %v544_v11 = vshll.u32 %v4482_v6, 16  ;;  %v4487_v14 = vld [vmem:[%s4729_s5 + $0xb0] sm:$0xff]  }
  0x14   : > { %v549_v13 = vshll.u32 %v4485_v10, 16  ;;  %v553_v15 = vshrl.u32 %v4485_v10, 16  ;;  %v557_v18 = vshll.u32 %v4487_v14, 16  ;;  %v4489_v19 = vld [vmem:[%s4729_s5 + $0xb8] sm:$0xff]   ;;  %v4486_v22 = vld [vmem:[%s4729_s5 + $0x60] sm:$0xff]   ;;  %v561_v24 = vshrl.u32 %v4487_v14, 16  ;;  %3883 = vmatpush3.bf16.msra.mxu1 %v4518_v57 }
  0x15   : > { %v546_v12 = vrot.slane %v544_v11, 1  ;;  %v565_v25 = vshll.u32 %v4489_v19, 16  ;;  %v4491_v26 = vld [vmem:[%s4729_s5 + $0xc0] sm:$0xff]   ;;  %v4488_v28 = vld [vmem:[%s4729_s5 + $0x68] sm:$0xff]   ;;  %v569_v29 = vshrl.u32 %v4489_v19, 16  ;;  %v4490_v37 = vld [vmem:[%s4729_s5 + $0x70] sm:$0xff]   ;;  %3821 = vmatpush3.bf16.msra.mxu0 %v4796_v55  ;;  %3884 = vmatprep.subr.bf16.mxu1 %v4520_v62 }
  0x16   : > { %v551_v17 = vrot.slane %v549_v13, 1  ;;  %v559_v23 = vrot.slane %v557_v18, 1  ;;  %v573_v32 = vshll.u32 %v4491_v26, 16  ;;  %v4493_v36 = vld [vmem:[%s4729_s5 + $0xc8] sm:$0xff]   ;;  %v577_v38 = vshrl.u32 %v4491_v26, 16  ;;  %v4495_v41 = vld [vmem:[%s4729_s5 + $0xd0] sm:$0xff]   ;;  %3822 = vmatprep.subr.bf16.mxu0 %v4814_v61 }
  0x17   : > { %354 = vrot.lane.b32.xlu0 %v4484_v8, %s4670_s8  ;;  %v547_v16 = vor.u32 %v546_v12, %v542_v9  ;;  %v567_v31 = vrot.slane %v565_v25, 1  ;;  %v581_v40 = vshll.u32 %v4493_v36, 16  ;;  %v4492_v42 = vld [vmem:[%s4729_s5 + $0x78] sm:$0xff]   ;;  %v585_v43 = vshrl.u32 %v4493_v36, 16  ;;  %v4494_v54 = vld [vmem:[%s4729_s5 + $0x80] sm:$0xff]   ;;  %v4496_v63 = vld [vmem:[%s4729_s5 + $0x88] sm:$0xff]  }
  0x18   : > { %v555_v21 = vor.u32 %v553_v15, %v551_v17  ;;  %v563_v30 = vor.u32 %v561_v24, %v559_v23  ;;  %v575_v35 = vrot.slane %v573_v32, 1  ;;  %v589_v46 = vshll.u32 %v4495_v41, 16  ;;  %v4497_v52 = vld [vmem:[%s4729_s5 + $0xd8] sm:$0xff]   ;;  %v4499_v53 = vld [vmem:[%s4729_s5 + $0xe0] ss:$0 sps:$4 sm:$0x11]  }
  0x19   : > { %v4744_v20 = vsel %vm373_vm0, %v547_v16, %v551_v17  ;;  %v571_v34 = vor.u32 %v569_v29, %v567_v31  ;;  %v583_v45 = vrot.slane %v581_v40, 1  ;;  %v4799_v56 = vld [vmem:[%s4729_s5] sm:$0xff]   ;;  %v593_v58 = vshrl.u32 %v4495_v41, 16  ;;  %v4825_v3 = vld [vmem:[%s4729_s5 + $0x8] sm:$0xff]   ;;  %v4837_v9 = vld [vmem:[%s4729_s5 + $0x10] sm:$0xff]  }
  0x1a   : > { %6613 = vst [vmem:[#allocation2_spill] sm:$0xff] %v4744_v20  ;;  %609 = vrot.lane.b32.xlu1 %v4744_v20, %s4670_s8  ;;  %v4752_v27 = vsel %vm373_vm0, %v555_v21, %v559_v23  ;;  %v4761_v33 = vsel %vm373_vm0, %v563_v30, %v567_v31  ;;  %v579_v44 = vor.u32 %v577_v38, %v575_v35  ;;  %v591_v51 = vrot.slane %v589_v46, 1  ;;  %v4831_v7 = vld [vmem:[%s6547_s1 + $0x20] sm:$0xff]   ;;  %v4524_v8 = vld [vmem:[%s6547_s1 + $0xa8] sm:$0xff]   ;;  %v4843_v11 = vld [vmem:[%s6547_s1 + $0x58] sm:$0xff]  }
  0x1b   : > { %484 = vrot.lane.b32.xlu0 %v4485_v10, %s4670_s8  ;;  %6614 = vst [vmem:[#allocation3_spill] sm:$0xff] %v4752_v27  ;;  %6615 = vst [vmem:[#allocation4_spill] sm:$0xff] %v4761_v33  ;;  %v4769_v39 = vsel %vm373_vm0, %v571_v34, %v575_v35  ;;  %v587_v50 = vor.u32 %v585_v43, %v583_v45  ;;  %v597_v60 = vshll.u32 %v4497_v52, 16  ;;  %v605_v1 = vshll.u32 %v4499_v53, 16  ;;  %v4527_v17 = vld [vmem:[%s6547_s1 + $0xe0] sm:$0xff]   ;;  %v4498_v18 = vld [vmem:[%s4729_s5 + $0x90] sm:$0xff]  }
  0x1c   : > { %6616 = vst [vmem:[#allocation5_spill] sm:$0xff] %v4769_v39  ;;  %v4787_v49 = vsel %vm373_vm0, %v579_v44, %v583_v45  ;;  %v601_v2 = vshrl.u32 %v4497_v52, 16  ;;  %v595_v4 = vor.u32 %v593_v58, %v591_v51  ;;  %v377_v6 = vshll.u32 %v4799_v56, 16  ;;  %3823 = vmatpush3.bf16.msra.mxu0 %v4831_v7  ;;  %3885 = vmatpush3.bf16.msra.mxu1 %v4524_v8  ;;  %v4863_v21 = vld [vmem:[%s6547_s1 + $0x18] sm:$0xff]   ;;  %v4530_v29 = vld [vmem:[%s6547_s1 + $0xa0] sm:$0xff]   ;;  %v4881_v30 = vld [vmem:[%s4729_s5 + $0xf0] sm:$0xff]  }
  0x1d   : > { %6617 = vst [vmem:[#allocation6_spill] sm:$0xff] %v4787_v49  ;;  %v4808_v59 = vsel %vm373_vm0, %v587_v50, %v591_v51  ;;  %v599_v5 = vrot.slane %v597_v60, 1  ;;  %v607_v10 = vrot.slane %v605_v1, 1  ;;  %v375_v12 = vshrl.u32 %v4799_v56, 16  ;;  %3824 = vmatprep.subr.bf16.mxu0 %v4843_v11  ;;  %3886 = vmatprep.subr.bf16.mxu1 %v4527_v17  ;;  %v4886_v31 = vld [vmem:[%s6547_s1 + $0x50] sm:$0xff]   ;;  %v4532_v32 = vld [vmem:[%s6547_s1 + $0xd8] sm:$0xff]  }
  0x1e   : > { %358 = vrot.lane.b32.xlu1 %v4486_v22, %s4670_s8  ;;  %6618 = vst [vmem:[#allocation7_spill] sm:$0xff] %v4808_v59  ;;  %v382_v13 = vshll.u32 %v4825_v3, 16  ;;  %v379_v16 = vrot.slane %v377_v6, 1  ;;  %v386_v22 = vshrl.u32 %v4825_v3, 16  ;;  %v390_v23 = vshll.u32 %v4837_v9, 16  ;;  %v4535_v43 = vld [vmem:[%s6547_s1 + $0x98] sm:$0xff]  }
  0x1f   : > { %611 = vrot.lane.b32.xlu0 %v4752_v27, %s4670_s8  ;;  %v603_v15 = vor.u32 %v601_v2, %v599_v5  ;;  %v394_v34 = vshrl.u32 %v4837_v9, 16  ;;  %v4522_v45 = vld [vmem:[%s4729_s5 + $0xf8] sm:$0xff]   ;;  %v4923_v50 = vld [vmem:[%s6547_s1 + $0x48] sm:$0xff]   ;;  %v4932_v57 = vld [vmem:[%s4729_s5 + $0x100] sm:$0xff]  }
  0x20   : > { %v380_v25 = vor.u32 %v379_v16, %v375_v12  ;;  %3825 = vmatpush3.bf16.msra.mxu0 %v4863_v21  ;;  %3887 = vmatpush3.bf16.msra.mxu1 %v4530_v29  ;;  %v392_v40 = vrot.slane %v390_v23, 1  ;;  %v4935_v58 = vld [vmem:[%s4729_s5 + $0x28] sm:$0xff]   ;;  %v4939_v62 = vld [vmem:[%s4729_s5 + $0x100] sm:$0xff]   ;;  %v1573_v2 = vshll.u32 %v4522_v45, 16  ;;  %v4541_v8 = vld [vmem:[%s6547_s1 + $0x90] sm:$0xff]  }
  0x21   : > { %v4871_v24 = vsel %vm373_vm0, %v603_v15, %v607_v10  ;;  %3826 = vmatprep.subr.bf16.mxu0 %v4886_v31  ;;  %3888 = vmatprep.subr.bf16.mxu1 %v4532_v32  ;;  %v4958_v10 = vld [vmem:[%s4729_s5 + $0x108] sm:$0xff]   ;;  %v4963_v12 = vld [vmem:[%s6547_s1 + $0x40] sm:$0xff]   ;;  %v414_v17 = vshll.u32 %v4935_v58, 16  ;;  %v4988_v32 = vld [vmem:[%s4729_s5 + $0x110] sm:$0xff]  }
  0x22   : > { %486 = vrot.lane.b32.xlu1 %v4487_v14, %s4670_s8  ;;  %v4850_v14 = vsel %vm373_vm0, %v595_v4, %v599_v5  ;;  %6620 = vst [vmem:[#allocation9_spill] sm:$0xff] %v4871_v24  ;;  %v4543_v15 = vld [vmem:[%s6547_s1 + $0xc8] sm:$0xff]   ;;  %v1575_v16 = vrot.slane %v1573_v2, 1  ;;  %v4985_v29 = vld [vmem:[%s6547_s1] sm:$0xff]  }
  0x23   : > { %360 = vrot.lane.b32.xlu0 %v4488_v28, %s4670_s8  ;;  %6619 = vst [vmem:[#allocation8_spill] sm:$0xff] %v4850_v14  ;;  %v4874_v28 = vld [vmem:[%s4729_s5 + $0x20] sm:$0xff]  }
  0x24   : > { %v406_v44 = vshll.u32 %v4874_v28, 16  ;;  %3889 = vmatpush3.bf16.msra.mxu1 %v4535_v43  ;;  %v4548_v43 = vld [vmem:[%s6547_s1 + $0xc0] sm:$0xff]  }
  0x26   : > { %613 = vrot.lane.b32.xlu1 %v4761_v33, %s4670_s8  ;;  %v408_v60 = vrot.slane %v406_v44, 1 }
  0x27   : > { %488 = vrot.lane.b32.xlu0 %v4489_v19, %s4670_s8  ;;  %v4858_v19 = vld [vmem:[%s4729_s5 + $0x18] sm:$0xff]  }
  0x28   : > { %v398_v35 = vshll.u32 %v4858_v19, 16  ;;  %v402_v48 = vshrl.u32 %v4858_v19, 16 }
  0x2a   : > { %362 = vrot.lane.b32.xlu1 %v4490_v37, %s4670_s8  ;;  %v400_v46 = vrot.slane %v398_v35, 1  ;;  %v4544_v35 = vld [vmem:[%s4729_s5 + $0x108] sm:$0xff]  }
  0x2b   : > { %615 = vrot.lane.b32.xlu0 %v4769_v39, %s4670_s8  ;;  %v4561_v39 = vld [vmem:[%s4729_s5 + $0x48] ss:$0 sps:$4 sm:$0x11]  }
  0x2c   : > { %v404_v5 = vor.u32 %v402_v48, %v400_v46 }
  0x2e   : > { %490 = vrot.lane.b32.xlu1 %v4491_v26, %s4670_s8  ;;  %v384_v26 = vrot.slane %v382_v13, 1  ;;  %v410_v13 = vshrl.u32 %v4874_v28, 16  ;;  %v4978_v23 = vsel %vm373_vm0, %v404_v5, %v408_v60 }
  0x2f   : > { %364 = vrot.lane.b32.xlu0 %v4492_v42, %s4670_s8  ;;  %v4907_v42 = vld [vmem:[%s4729_s5 + $0xf8] sm:$0xff]   ;;  %6623 = vst [vmem:[#allocation12_spill] sm:$0xff] %v4978_v23 }
  0x30   : > { %v4898_v37 = vsel %vm373_vm0, %v380_v25, %v384_v26  ;;  %v388_v38 = vor.u32 %v386_v22, %v384_v26  ;;  %v4975_v22 = vld [vmem:[%s4729_s5 + $0x30] sm:$0xff]   ;;  %v1581_v26 = vshll.u32 %v4939_v62, 16 }
  0x32   : > { %617 = vrot.lane.b32.xlu1 %v4787_v49, %s4670_s8  ;;  %v4926_v51 = vsel %vm373_vm0, %v388_v38, %v392_v40  ;;  %v418_v38 = vshrl.u32 %v4935_v58, 16  ;;  %v1583_v48 = vrot.slane %v1581_v26, 1 }
  0x33   : > { %492 = vrot.lane.b32.xlu0 %v4493_v36, %s4670_s8  ;;  %v4521_v36 = vld [vmem:[%s4729_s5 + $0xf0] sm:$0xff]   ;;  %6621 = vst [vmem:[#allocation10_spill] sm:$0xff] %v4926_v51 }
  0x34   : > { %v1568_v53 = vshll.u32 %v4521_v36, 16  ;;  %v1566_v1 = vshrl.u32 %v4521_v36, 16  ;;  %v416_v36 = vrot.slane %v414_v17, 1 }
  0x36   : > { %366 = vrot.lane.b32.xlu1 %v4494_v54, %s4670_s8  ;;  %v4538_v54 = vld [vmem:[%s6547_s1 + $0xd0] sm:$0xff]   ;;  %v1570_v6 = vrot.slane %v1568_v53, 1  ;;  %v5013_v53 = vld [vmem:[%s4729_s5 + $0x38] sm:$0xff]  }
  0x37   : > { %619 = vrot.lane.b32.xlu0 %v4808_v59, %s4670_s8  ;;  %3890 = vmatprep.subr.bf16.mxu1 %v4538_v54  ;;  %v5019_v54 = vld [vmem:[%s6547_s1 + $0x80] sm:$0xff]   ;;  %v430_v17 = vshll.u32 %v5013_v53, 16 }
  0x38   : > { %3891 = vmatpush3.bf16.msra.mxu1 %v4541_v8  ;;  %v1571_v25 = vor.u32 %v1570_v6, %v1566_v1  ;;  %6624 = vst [vmem:[#allocation13_spill] sm:$0xff] %v5019_v54  ;;  %v1585_v1 = vshrl.u32 %v4939_v62, 16  ;;  %v420_v6 = vor.u32 %v418_v38, %v416_v36  ;;  %v1589_v8 = vshll.u32 %v4544_v35, 16  ;;  %v5054_v38 = vld [vmem:[%s4729_s5 + $0x120] sm:$0xff]  }
  0x39   : > { %3892 = vmatprep.subr.bf16.mxu1 %v4543_v15  ;;  %v5036_v15 = vld [vmem:[%s4729_s5 + $0x118] sm:$0xff]  }
  0x3a   : > { %494 = vrot.lane.b32.xlu1 %v4495_v41, %s4670_s8  ;;  %v4904_v41 = vld [vmem:[%s6547_s1 + $0x10] sm:$0xff]   ;;  %v5005_v44 = vsel %vm373_vm0, %v1571_v25, %v1575_v16  ;;  %v1587_v62 = vor.u32 %v1585_v1, %v1583_v48  ;;  %v1591_v26 = vrot.slane %v1589_v8, 1 }
  0x3b   : > { %368 = vrot.lane.b32.xlu0 %v4496_v63, %s4670_s8  ;;  %3827 = vmatpush3.bf16.msra.mxu0 %v4904_v41  ;;  %v4944_v63 = vld [vmem:[%s6547_s1 + $0x8] sm:$0xff]  }
  0x3c   : > { %3828 = vmatprep.subr.bf16.mxu0 %v4923_v50 }
  0x3e   : > { %621 = vrot.lane.b32.xlu1 %v4850_v14, %s4670_s8 }
  0x3f   : > { %496 = vrot.lane.b32.xlu0 %v4497_v52, %s4670_s8  ;;  %v396_v52 = vor.u32 %v394_v34, %v392_v40  ;;  %3829 = vmatpush3.bf16.msra.mxu0 %v4944_v63  ;;  %v4546_v34 = vld [vmem:[%s6547_s1 + $0x88] sm:$0xff]   ;;  %v422_v40 = vshll.u32 %v4975_v22, 16 }
  0x40   : > { %3830 = vmatprep.subr.bf16.mxu0 %v4963_v12  ;;  %3893 = vmatpush3.bf16.msra.mxu1 %v4546_v34 }
  0x41   : > { %v4951_v4 = vsel %vm373_vm0, %v396_v52, %v400_v46  ;;  %v5010_v52 = vld [vmem:[%s6547_s1 + $0x118] sm:$0xff]   ;;  %3894 = vmatprep.subr.bf16.mxu1 %v4548_v43  ;;  %v434_v43 = vshrl.u32 %v5013_v53, 16 }
  0x42   : > { %635 = vrot.lane.b32.xlu1 %v4498_v18, %s4670_s8  ;;  %6622 = vst [vmem:[#allocation11_spill] sm:$0xff] %v4951_v4  ;;  %v1577_v18 = vshrl.u32 %v4522_v45, 16  ;;  %v412_v45 = vor.u32 %v410_v13, %v408_v60  ;;  %v424_v60 = vrot.slane %v422_v40, 1  ;;  %v4552_v13 = vld [vmem:[%s4729_s5 + $0x110] sm:$0xff]   ;;  %v432_v40 = vrot.slane %v430_v17, 1 }
  0x43   : > { %623 = vrot.lane.b32.xlu0 %v4871_v24, %s4670_s8  ;;  %3831 = vmatpush3.bf16.msra.mxu0 %v4985_v29  ;;  %v1597_v34 = vshll.u32 %v4552_v13, 16  ;;  %v1601_v8 = vshrl.u32 %v4552_v13, 16 }
  0x44   : > { %v1579_v46 = vor.u32 %v1577_v18, %v1575_v16  ;;  %4376 = vmatprep.subr.bf16.mxu0 %v5010_v52  ;;  %v5027_v2 = vsel %vm373_vm0, %v412_v45, %v416_v36  ;;  %3895 = vmatpush3.bf16.msra.mxu1 %v5019_v54  ;;  %v426_v16 = vshrl.u32 %v4975_v22, 16  ;;  %v4554_v18 = vld [vmem:[%s4729_s5 + $0x40] ss:$0 sps:$4 sm:$0x11]   ;;  %v5046_v25 = vsel %vm373_vm0, %v420_v6, %v424_v60  ;;  %v4555_v36 = vld [vmem:[%s4729_s5 + $0x118] sm:$0xff]  }
  0x45   : > { %6625 = vst [vmem:[#allocation14_spill] sm:$0xff] %v5027_v2  ;;  %3956 = vmatprep.subr.bf16.mxu1 %v4710_v0  ;;  %6626 = vst [vmem:[#allocation15_spill] sm:$0xff] %v5046_v25  ;;  %v1593_v0 = vshrl.u32 %v4544_v35, 16  ;;  %v438_v45 = vshll.u32 %v4554_v18, 16  ;;  %v1599_v1 = vrot.slane %v1597_v34, 1  ;;  %v4557_v6 = vld [vmem:[%s4729_s5 + $0x120] sm:$0xff]   ;;  %v436_v13 = vor.u32 %v434_v43, %v432_v40 }
  0x46   : > { %1506 = vrot.lane.b32.xlu1 %v4881_v30, %s4670_s8  ;;  %v5030_v5 = vsel %vm373_vm0, %v1579_v46, %v1583_v48  ;;  %v5058_v46 = vsel %vm373_vm0, %v1587_v62, %v1591_v26  ;;  %v428_v35 = vor.u32 %v426_v16, %v424_v60  ;;  %v1605_v24 = vshll.u32 %v4555_v36, 16  ;;  %v5066_v62 = vld [vmem:[%s4729_s5 + $0x40] sm:$0xff]   ;;  %v5076_v34 = vld [vmem:[%s4729_s5 + $0x128] sm:$0xff]  }
  0x47   : > { %1379 = vrot.lane.b32.xlu0 %v4898_v37, %s4670_s8  ;;  %v1595_v48 = vor.u32 %v1593_v0, %v1591_v26  ;;  %v440_v17 = vrot.slane %v438_v45, 1  ;;  %v1609_v18 = vshrl.u32 %v4555_v36, 16  ;;  %v1613_v26 = vshll.u32 %v4557_v6, 16  ;;  %v4559_v0 = vld [vmem:[%s4729_s5 + $0x128] sm:$0xff]  }
  0x48   : > { %v5069_v60 = vsel %vm373_vm0, %v428_v35, %v432_v40  ;;  %v1603_v14 = vor.u32 %v1601_v8, %v1599_v1  ;;  %v1607_v59 = vrot.slane %v1605_v24, 1  ;;  %v1617_v49 = vshrl.u32 %v4557_v6, 16  ;;  %v4562_v45 = vld [vmem:[%s4729_s5 + $0x130] ss:$0 sps:$4 sm:$0x11]  }
  0x49   : > { %6627 = vst [vmem:[#allocation16_spill] sm:$0xff] %v5069_v60  ;;  %v5072_v16 = vsel %vm373_vm0, %v1595_v48, %v1599_v1  ;;  %v641_v36 = vshll.u32 %v5066_v62, 16  ;;  %v5086_v35 = vsel %vm373_vm0, %v436_v13, %v440_v17  ;;  %v1615_v43 = vrot.slane %v1613_v26, 1 }
  0x4a   : > { %1508 = vrot.lane.b32.xlu1 %v4907_v42, %s4670_s8  ;;  %v1611_v40 = vor.u32 %v1609_v18, %v1607_v59  ;;  %v1621_v48 = vshll.u32 %v4559_v0, 16  ;;  %v5089_v1 = vsel %vm373_vm0, %v1603_v14, %v1607_v59  ;;  %v645_v8 = vshrl.u32 %v5066_v62, 16 }
  0x4b   : > { %1381 = vrot.lane.b32.xlu0 %v4926_v51, %s4670_s8  ;;  %v643_v24 = vrot.slane %v641_v36, 1  ;;  %v1619_v6 = vor.u32 %v1617_v49, %v1615_v43  ;;  %v1625_v33 = vshrl.u32 %v4559_v0, 16  ;;  %v649_v26 = vshll.u32 %v4561_v39, 16 }
  0x4c   : > { %v5097_v17 = vsel %vm373_vm0, %v1611_v40, %v1615_v43  ;;  %v1623_v18 = vrot.slane %v1621_v48, 1  ;;  %v1629_v27 = vshll.u32 %v4562_v45, 16  ;;  %v4563_v40 = vld [vmem:[%s4729_s5 + $0xf8] sm:$0xff]   ;;  %v4569_v43 = vld [vmem:[%s4729_s5 + $0x110] sm:$0xff]  }
  0x4d   : > { %v5104_v59 = vsel %vm373_vm0, %v436_v13, %v643_v24  ;;  %v647_v49 = vor.u32 %v645_v8, %v643_v24  ;;  %v651_v0 = vrot.slane %v649_v26, 1  ;;  %v4571_v26 = vld [vmem:[%s4729_s5 + $0x118] sm:$0xff]  }
  0x4e   : > { %1510 = vrot.lane.b32.xlu1 %v4932_v57, %s4670_s8  ;;  %6628 = vst [vmem:[#allocation17_spill] sm:$0xff] %v5104_v59  ;;  %v5107_v14 = vsel %vm373_vm0, %v1619_v6, %v1623_v18  ;;  %v1627_v36 = vor.u32 %v1625_v33, %v1623_v18  ;;  %v1631_v39 = vrot.slane %v1629_v27, 1  ;;  %v4565_v27 = vld [vmem:[%s4729_s5 + $0x100] sm:$0xff]   ;;  %v4566_v33 = vld [vmem:[%s4729_s5 + $0x108] sm:$0xff]  }
  0x4f   : > { %1383 = vrot.lane.b32.xlu0 %v4951_v4, %s4670_s8  ;;  %v5114_v45 = vsel %vm373_vm0, %v647_v49, %v651_v0  ;;  %v5151_v49 = vld [vmem:[%s6547_s1 + $0x110] sm:$0xff]  }
  0x50   : > { %6629 = vst [vmem:[#allocation18_spill] sm:$0xff] %v5114_v45  ;;  %v5117_v13 = vsel %vm373_vm0, %v1627_v36, %v1631_v39  ;;  %v5163_v36 = vld [vmem:[%s6547_s1 + $0x108] sm:$0xff]  }
  0x52   : > { %1512 = vrot.lane.b32.xlu1 %v4958_v10, %s4670_s8 }
  0x53   : > { %1385 = vrot.lane.b32.xlu0 %v4978_v23, %s4670_s8 }
  0x56   : > { %1633 = vrot.lane.b32.xlu1 %v5005_v44, %s4670_s8 }
  0x57   : > { %1514 = vrot.lane.b32.xlu0 %v4988_v32, %s4670_s8 }
  0x5a   : > { %1387 = vrot.lane.b32.xlu1 %v5027_v2, %s4670_s8 }
  0x5b   : > { %1635 = vrot.lane.b32.xlu0 %v5030_v5, %s4670_s8 }
  0x5e   : > { %1516 = vrot.lane.b32.xlu1 %v5036_v15, %s4670_s8 }
  0x5f   : > { %1389 = vrot.lane.b32.xlu0 %v5046_v25, %s4670_s8 }
  0x62   : > { %1637 = vrot.lane.b32.xlu1 %v5058_v46, %s4670_s8 }
  0x63   : > { %1518 = vrot.lane.b32.xlu0 %v5054_v38, %s4670_s8 }
  0x66   : > { %1391 = vrot.lane.b32.xlu1 %v5069_v60, %s4670_s8 }
  0x67   : > { %1639 = vrot.lane.b32.xlu0 %v5072_v16, %s4670_s8 }
  0x6a   : > { %1520 = vrot.lane.b32.xlu1 %v5076_v34, %s4670_s8 }
  0x6b   : > { %1393 = vrot.lane.b32.xlu0 %v5086_v35, %s4670_s8 }
  0x6e   : > { %1641 = vrot.lane.b32.xlu1 %v5089_v1, %s4670_s8 }
  0x6f   : > { %1643 = vrot.lane.b32.xlu0 %v5097_v17, %s4670_s8 }
  0x72   : > { %1649 = vrot.lane.b32.xlu1 %v5104_v59, %s4670_s8 }
  0x73   : > { %1645 = vrot.lane.b32.xlu0 %v5107_v14, %s4670_s8 }
  0x76   : > { %1651 = vrot.lane.b32.xlu1 %v5114_v45, %s4670_s8 }
  0x77   : > { %1647 = vrot.lane.b32.xlu0 %v5117_v13, %s4670_s8 }
  0x7a   : > { %2135 = vrot.lane.b32.xlu1 %v4825_v3, %s4670_s8 }
  0x7b   : > { %2231 = vrot.lane.b32.xlu0 %v4563_v40, %s4670_s8  ;;  %v4568_v40 = vld [vmem:[%s4729_s5 + $0x58] sm:$0xff]  }
  0x7e   : > { %2137 = vrot.lane.b32.xlu1 %v4837_v9, %s4670_s8 }
  0x7f   : > { %2233 = vrot.lane.b32.xlu0 %v4565_v27, %s4670_s8  ;;  %v4573_v27 = vld [vmem:[%s4729_s5 + $0x120] sm:$0xff]  }
  0x82   : > { %2139 = vrot.lane.b32.xlu1 %v4858_v19, %s4670_s8 }
  0x83   : > { %2235 = vrot.lane.b32.xlu0 %v4566_v33, %s4670_s8  ;;  %v5174_v33 = vld [vmem:[%s4729_s5 + $0xa8] sm:$0xff]  }
  0x84   : > { %6632 = vst [vmem:[#allocation21_spill] sm:$0xff] %v5174_v33 }
  0x85   : > { %v483_v48 = vpop.permute.xlu0 %482  ;;  %v357_v6 = vpop.permute.xlu1 %356 }
  0x86   : > { %v680_v24 = vsel %vm653_vm1, %v4898_v37, %v483_v48  ;;  %v658_v8 = vsel %vm653_vm1, %v4825_v3, %v357_v6  ;;  %2141 = vrot.lane.b32.xlu1 %v4874_v28, %s4670_s8  ;;  %v5144_v18 = vsel %vm653_vm1, %v5005_v44, %v357_v6  ;;  %v2253_v48 = vshll.u32 %v5174_v33, 16 }
  0x87   : > { %1083 = vmatprep.mubr.bf16.mxu0 %v680_v24  ;;  %6630 = vst [vmem:[#allocation19_spill] sm:$0xff] %v5144_v18  ;;  %1180 = vmatprep.mubr.bf16.mxu1 %v658_v8 }
  0x88   : > { %2237 = vrot.lane.b32.xlu0 %v4569_v43, %s4670_s8  ;;  %v5180_v43 = vld [vmem:[%s6547_s1 + $0x38] sm:$0xff]   ;;  %v2255_v18 = vrot.slane %v2253_v48, 1 }
  0x89   : > { %v355_v37 = vpop.permute.xlu0 %354  ;;  %6633 = vst [vmem:[#allocation22_spill] sm:$0xff] %v5180_v43 }
  0x8a   : > { %v655_v3 = vsel %vm653_vm1, %v4799_v56, %v355_v37  ;;  %2143 = vrot.lane.b32.xlu1 %v4935_v58, %s4670_s8  ;;  %v5198_v37 = vld [vmem:[%s6547_s1 + $0x100] sm:$0xff]  }
  0x8b   : > { %1084 = vmatmul.mubr.bf16.vlgmr.msra.gmra.mxu0 %v655_v3 }
  0x8c   : > { %4377 = vmatpush3.bf16.msra.mxu0 %v5010_v52  ;;  %2239 = vrot.lane.b32.xlu0 %v4571_v26, %s4670_s8  ;;  %v610_v44 = vpop.permute.xlu1 %609  ;;  %v5191_v26 = vld [vmem:[%s6547_s1 + $0x70] sm:$0xff]  }
  0x8d   : > { %v485_v0 = vpop.permute.xlu0 %484  ;;  %4378 = vmatprep.subr.bf16.mxu0 %v5151_v49  ;;  %v5167_v56 = vsel %vm653_vm1, %v4881_v30, %v610_v44  ;;  %v5185_v30 = vld [vmem:[%s4729_s5 + $0xb0] sm:$0xff]   ;;  %6635 = vst [vmem:[#allocation24_spill] sm:$0xff] %v5191_v26  ;;  %v1446_v44 = vshll.u32 %v4568_v40, 16 }
  0x8e   : > { %6631 = vst [vmem:[#allocation20_spill] sm:$0xff] %v5167_v56  ;;  %v684_v39 = vsel %vm653_vm1, %v4926_v51, %v485_v0  ;;  %1181 = vmatmul.mubr.bf16.vlgmr.msra.gmra.mxu1 %v5167_v56  ;;  %6634 = vst [vmem:[#allocation23_spill] sm:$0xff] %v5185_v30  ;;  %v4570_v0 = vld [vmem:[%s4729_s5 + $0x60] sm:$0xff]   ;;  %2145 = vrot.lane.b32.xlu1 %v4975_v22, %s4670_s8  ;;  %v2251_v56 = vshrl.u32 %v5174_v33, 16 }
  0x8f   : > { %1091 = vmatprep.mubr.bf16.mxu0 %v684_v39  ;;  %3957 = vmatpush3.bf16.msra.mxu1 %v5180_v43  ;;  %v4575_v39 = vld [vmem:[%s4729_s5 + $0x128] sm:$0xff]  }
  0x90   : > { %4379 = vmatpush3.bf16.msra.mxu0 %v5151_v49  ;;  %v359_v24 = vpop.permute.xlu1 %358  ;;  %3958 = vmatprep.subr.bf16.mxu1 %v5191_v26  ;;  %v2258_v26 = vshll.u32 %v5185_v30, 16  ;;  %v2256_v33 = vor.u32 %v2255_v18, %v2251_v56  ;;  %v5257_v56 = vld [vmem:[%s6547_s1 + $0xf8] sm:$0xff]  }
  0x91   : > { %v612_v6 = vpop.permute.xlu0 %611  ;;  %4380 = vmatprep.subr.bf16.mxu0 %v5163_v36  ;;  %v661_v3 = vsel %vm653_vm1, %v4837_v9, %v359_v24  ;;  %2241 = vrot.lane.b32.xlu0 %v4573_v27, %s4670_s8  ;;  %v5211_v43 = vsel %vm653_vm1, %v5030_v5, %v359_v24  ;;  %v5220_v27 = vld [vmem:[%s6547_s1 + $0x30] sm:$0xff]   ;;  %v1450_v5 = vshrl.u32 %v4568_v40, 16  ;;  %v5241_v40 = vrot.slane %v1446_v44, 1 }
  0x92   : > { %1188 = vmatprep.mubr.bf16.mxu1 %v661_v3  ;;  %6636 = vst [vmem:[#allocation25_spill] sm:$0xff] %v5211_v43  ;;  %v5215_v9 = vsel %vm653_vm1, %v4907_v42, %v612_v6  ;;  %6638 = vst [vmem:[#allocation27_spill] sm:$0xff] %v5220_v27  ;;  %v4572_v42 = vld [vmem:[%s4729_s5 + $0x68] sm:$0xff]   ;;  %v1454_v43 = vshll.u32 %v4570_v0, 16  ;;  %2147 = vrot.lane.b32.xlu1 %v5013_v53, %s4670_s8  ;;  %v1458_v44 = vshrl.u32 %v4570_v0, 16 }
  0x93   : > { %1092 = vmatmul.mubr.bf16.gmra.mxu0 %v658_v8  ;;  %6637 = vst [vmem:[#allocation26_spill] sm:$0xff] %v5215_v9  ;;  %3959 = vmatpush3.bf16.msra.mxu1 %v5220_v27  ;;  %v5247_v27 = vld [vmem:[%s4729_s5 + $0xb8] sm:$0xff]  }
  0x94   : > { %4381 = vmatpush3.bf16.msra.mxu0 %v5163_v36  ;;  %v487_v8 = vpop.permute.xlu1 %486  ;;  %3960 = vmatprep.subr.bf16.mxu1 %v4779_v47  ;;  %v2266_v0 = vshll.u32 %v5247_v27, 16 }
  0x95   : > { %v361_v48 = vpop.permute.xlu0 %360  ;;  %4382 = vmatprep.subr.bf16.mxu0 %v5198_v37  ;;  %v688_v24 = vsel %vm653_vm1, %v4951_v4, %v487_v8  ;;  %2243 = vrot.lane.b32.xlu0 %v4575_v39, %s4670_s8  ;;  %v4577_v8 = vld [vmem:[%s4729_s5 + $0x130] sm:$0xff]  }
  0x96   : > { %v5231_v6 = vsel %vm653_vm1, %v4858_v19, %v361_v48  ;;  %v5238_v47 = vsel %vm653_vm1, %v5058_v46, %v361_v48  ;;  %1189 = vmatmul.mubr.bf16.gmra.mxu1 %v5215_v9  ;;  %1099 = vmatprep.mubr.bf16.mxu0 %v688_v24  ;;  %v2260_v19 = vrot.slane %v2258_v26, 1  ;;  %v1452_v46 = vor.u32 %v1450_v5, %v5241_v40  ;;  %v4574_v26 = vld [vmem:[%s4729_s5 + $0x70] sm:$0xff]  }
  0x97   : > { %6639 = vst [vmem:[#allocation28_spill] sm:$0xff] %v5238_v47  ;;  %1196 = vmatprep.mubr.bf16.mxu1 %v5231_v6  ;;  %3961 = vmatpush3.bf16.msra.mxu1 %v4796_v55  ;;  %v1462_v48 = vshll.u32 %v4572_v42, 16  ;;  %v1456_v55 = vrot.slane %v1454_v43, 1  ;;  %v2268_v24 = vrot.slane %v2266_v0, 1 }
  0x98   : > { %v614_v39 = vpop.permute.xlu1 %613  ;;  %3962 = vmatprep.subr.bf16.mxu1 %v4814_v61  ;;  %4383 = vmatpush3.bf16.msra.mxu0 %v5198_v37  ;;  %v2262_v61 = vshrl.u32 %v5185_v30, 16  ;;  %v1466_v30 = vshrl.u32 %v4572_v42, 16 }
  0x99   : > { %v489_v20 = vpop.permute.xlu0 %488  ;;  %4020 = vmatprep.subr.bf16.mxu0 %v5257_v56  ;;  %2149 = vrot.lane.b32.xlu1 %v5066_v62, %s4670_s8  ;;  %v5271_v5 = vsel %vm653_vm1, %v4932_v57, %v614_v39  ;;  %v5278_v54 = vsel %vm373_vm0, %v1452_v46, %v1456_v55  ;;  %v1470_v57 = vshll.u32 %v4574_v26, 16  ;;  %v4576_v39 = vld [vmem:[%s4729_s5 + $0x78] sm:$0xff]   ;;  %v1474_v46 = vshrl.u32 %v4574_v26, 16 }
  0x9a   : > { %v692_v18 = vsel %vm653_vm1, %v4978_v23, %v489_v20  ;;  %2245 = vrot.lane.b32.xlu0 %v4577_v8, %s4670_s8  ;;  %v5267_v20 = vsel %vm373_vm0, %v2256_v33, %v2260_v19  ;;  %6641 = vst [vmem:[#allocation30_spill] sm:$0xff] %v5271_v5  ;;  %v2264_v43 = vor.u32 %v2262_v61, %v2260_v19  ;;  %v1464_v8 = vrot.slane %v1462_v48, 1 }
  0x9b   : > { %1100 = vmatmul.mubr.bf16.gmra.mxu0 %v661_v3  ;;  %6640 = vst [vmem:[#allocation29_spill] sm:$0xff] %v5267_v20  ;;  %3963 = vmatpush3.bf16.msra.mxu1 %v4831_v7  ;;  %v1460_v3 = vor.u32 %v1458_v44, %v1456_v55  ;;  %v1472_v48 = vrot.slane %v1470_v57, 1  ;;  %v4578_v55 = vld [vmem:[%s4729_s5 + $0x80] sm:$0xff]  }
  0x9c   : > { %1107 = vmatprep.mubr.bf16.mxu0 %v692_v18  ;;  %v363_v47 = vpop.permute.xlu1 %362  ;;  %3964 = vmatprep.subr.bf16.mxu1 %v4843_v11  ;;  %v5291_v11 = vsel %vm373_vm0, %v2264_v43, %v2268_v24  ;;  %v1478_v18 = vshll.u32 %v4576_v39, 16 }
  0x9d   : > { %v616_v9 = vpop.permute.xlu0 %615  ;;  %v667_v33 = vsel %vm653_vm1, %v4874_v28, %v363_v47  ;;  %2746 = vrot.lane.b32.xlu1 %v5267_v20, %s4670_s8  ;;  %v5285_v7 = vsel %vm653_vm1, %v5072_v16, %v363_v47  ;;  %6643 = vst [vmem:[#allocation32_spill] sm:$0xff] %v5291_v11  ;;  %v5295_v28 = vld [vmem:[%s4729_s5 + $0xc0] sm:$0xff]   ;;  %v5299_v16 = vsel %vm373_vm0, %v1460_v3, %v1464_v8 }
  0x9e   : > { %6642 = vst [vmem:[#allocation31_spill] sm:$0xff] %v5285_v7  ;;  %1197 = vmatmul.mubr.bf16.gmra.mxu1 %v5271_v5  ;;  %2730 = vrot.lane.b32.xlu0 %v5278_v54, %s4670_s8  ;;  %v1468_v47 = vor.u32 %v1466_v30, %v1464_v8  ;;  %v5317_v26 = vsel %vm653_vm1, %v4958_v10, %v616_v9  ;;  %v1480_v57 = vrot.slane %v1478_v18, 1  ;;  %v1482_v10 = vshrl.u32 %v4576_v39, 16  ;;  %v6670_v7 = vld [vmem:[#allocation27_spill] sm:$0xff]  ;;  %v4631_v20 = vld [vmem:[%s4729_s5 + $0x80] sm:$0xff]  }
  0x9f   : > { %1204 = vmatprep.mubr.bf16.mxu1 %v667_v33  ;;  %3965 = vmatpush3.bf16.msra.mxu1 %v4863_v21  ;;  %v2270_v21 = vshrl.u32 %v5247_v27, 16  ;;  %6645 = vst [vmem:[#allocation34_spill] sm:$0xff] %v5317_v26  ;;  %v1476_v8 = vor.u32 %v1474_v46, %v1472_v48  ;;  %v1486_v9 = vshll.u32 %v4578_v55, 16  ;;  %v2278_v46 = vshrl.u32 %v5295_v28, 16 }
  0xa0   : > { %v491_v42 = vpop.permute.xlu1 %490  ;;  %3966 = vmatprep.subr.bf16.mxu1 %v4886_v31  ;;  %v2274_v31 = vshll.u32 %v5295_v28, 16 }
  0xa1   : > { %v365_v19 = vpop.permute.xlu0 %364  ;;  %v696_v44 = vsel %vm653_vm1, %v5027_v2, %v491_v42  ;;  %2748 = vrot.lane.b32.xlu1 %v5291_v11, %s4670_s8  ;;  %v2272_v61 = vor.u32 %v2270_v21, %v2268_v24  ;;  %v5343_v39 = vsel %vm373_vm0, %v1476_v8, %v1480_v57  ;;  %v4584_v21 = vld [vmem:[%s4729_s5 + $0x90] sm:$0xff]   ;;  %v5679_v11 = vld [vmem:[%s6547_s1 + $0x58] sm:$0xff]  }
  0xa2   : > { %2732 = vrot.lane.b32.xlu0 %v5299_v16, %s4670_s8  ;;  %v5313_v30 = vsel %vm653_vm1, %v5089_v1, %v365_v19  ;;  %v670_v0 = vsel %vm653_vm1, %v4935_v58, %v365_v19  ;;  %v2276_v3 = vrot.slane %v2274_v31, 1  ;;  %v5324_v1 = vsel %vm373_vm0, %v1468_v47, %v1472_v48 }
  0xa3   : > { %1108 = vmatmul.mubr.bf16.gmra.mxu0 %v5231_v6  ;;  %6644 = vst [vmem:[#allocation33_spill] sm:$0xff] %v5313_v30  ;;  %3967 = vmatpush3.bf16.msra.mxu1 %v4904_v41  ;;  %v4579_v41 = vld [vmem:[%s4729_s5 + $0x88] sm:$0xff]   ;;  %v1490_v47 = vshrl.u32 %v4578_v55, 16  ;;  %v1488_v48 = vrot.slane %v1486_v9, 1 }
  0xa4   : > { %1115 = vmatprep.mubr.bf16.mxu0 %v696_v44  ;;  %v618_v6 = vpop.permute.xlu1 %617  ;;  %3968 = vmatprep.subr.bf16.mxu1 %v4923_v50  ;;  %v5329_v24 = vsel %vm373_vm0, %v2272_v61, %v2276_v3  ;;  %v5335_v50 = vld [vmem:[%s4729_s5 + $0xc8] sm:$0xff]   ;;  %v1484_v44 = vor.u32 %v1482_v10, %v1480_v57  ;;  %v1494_v18 = vshll.u32 %v4579_v41, 16  ;;  %v4586_v57 = vld [vmem:[%s4729_s5 + $0x98] ss:$0 sps:$4 sm:$0x11]   ;;  %v5377_v10 = vld [vmem:[%s4729_s5 + $0xd0] sm:$0xff]  }
  0xa5   : > { %v493_v43 = vpop.permute.xlu0 %492  ;;  %6646 = vst [vmem:[#allocation35_spill] sm:$0xff] %v5329_v24  ;;  %2750 = vrot.lane.b32.xlu1 %v5329_v24, %s4670_s8  ;;  %v5356_v31 = vsel %vm653_vm1, %v4988_v32, %v618_v6  ;;  %v1492_v6 = vor.u32 %v1490_v47, %v1488_v48  ;;  %6651 = vst [vmem:[#allocation40_spill] sm:$0xff] %v5377_v10  ;;  %v2286_v47 = vshrl.u32 %v5335_v50, 16  ;;  %v5673_v24 = vld [vmem:[%s6547_s1 + $0x20] sm:$0xff]  }
  0xa6   : > { %1205 = vmatmul.mubr.bf16.gmra.mxu1 %v5317_v26  ;;  %2734 = vrot.lane.b32.xlu0 %v5324_v1, %s4670_s8  ;;  %v700_v58 = vsel %vm653_vm1, %v5046_v25, %v493_v43  ;;  %6648 = vst [vmem:[#allocation37_spill] sm:$0xff] %v5356_v31  ;;  %v4580_v26 = vld [vmem:[%s4729_s5 + $0x90] ss:$0 sps:$4 sm:$0x11]  }
  0xa7   : > { %1212 = vmatprep.mubr.bf16.mxu1 %v670_v0  ;;  %3969 = vmatpush3.bf16.msra.mxu1 %v4944_v63  ;;  %v2282_v63 = vshll.u32 %v5335_v50, 16 }
  0xa8   : > { %v367_v42 = vpop.permute.xlu1 %366  ;;  %3970 = vmatprep.subr.bf16.mxu1 %v4963_v12 }
  0xa9   : > { %v620_v19 = vpop.permute.xlu0 %619  ;;  %v5352_v12 = vsel %vm653_vm1, %v5097_v17, %v367_v42  ;;  %v2284_v55 = vrot.slane %v2282_v63, 1  ;;  %v673_v61 = vsel %vm653_vm1, %v4975_v22, %v367_v42  ;;  %v1662_v22 = vshll.u32 %v4584_v21, 16  ;;  %v4567_v42 = vld [vmem:[%s4729_s5 + $0x50] sm:$0xff]  }
  0xaa   : > { %2736 = vrot.lane.b32.xlu0 %v5343_v39, %s4670_s8  ;;  %6647 = vst [vmem:[#allocation36_spill] sm:$0xff] %v5352_v12 }
  0xab   : > { %1116 = vmatmul.mubr.bf16.gmra.mxu0 %v667_v33  ;;  %3971 = vmatpush3.bf16.msra.mxu1 %v4985_v29  ;;  %v2280_v33 = vor.u32 %v2278_v46, %v2276_v3  ;;  %v5371_v29 = vsel %vm373_vm0, %v1484_v44, %v1488_v48  ;;  %v1496_v3 = vrot.slane %v1494_v18, 1  ;;  %v2290_v46 = vshll.u32 %v5377_v10, 16 }
  0xac   : > { %1123 = vmatprep.mubr.bf16.mxu0 %v700_v58  ;;  %v495_v43 = vpop.permute.xlu1 %494  ;;  %4400 = vmatprep.subr.bf16.mxu1 %v5010_v52  ;;  %v1498_v58 = vshrl.u32 %v4579_v41, 16  ;;  %v1664_v44 = vrot.slane %v1662_v22, 1  ;;  %v1666_v48 = vshrl.u32 %v4584_v21, 16  ;;  %v1670_v18 = vshll.u32 %v4586_v57, 16 }
  0xad   : > { %v369_v8 = vpop.permute.xlu0 %368  ;;  %v5363_v17 = vsel %vm373_vm0, %v2280_v33, %v2284_v55  ;;  %v5387_v63 = vsel %vm373_vm0, %v1492_v6, %v1496_v3  ;;  %v5391_v33 = vsel %vm653_vm1, %v5036_v15, %v620_v19  ;;  %v2292_v41 = vrot.slane %v2290_v46, 1 }
  0xae   : > { %6649 = vst [vmem:[#allocation38_spill] sm:$0xff] %v5363_v17  ;;  %v5367_v32 = vsel %vm653_vm1, %v5107_v14, %v369_v8  ;;  %1213 = vmatmul.mubr.bf16.gmra.mxu1 %v5356_v31  ;;  %2752 = vrot.lane.b32.xlu1 %v5363_v17, %s4670_s8  ;;  %v704_v14 = vsel %vm653_vm1, %v5069_v60, %v495_v43  ;;  %6652 = vst [vmem:[#allocation41_spill] sm:$0xff] %v5391_v33  ;;  %v1441_v21 = vshll.u32 %v4567_v42, 16  ;;  %v6667_v31 = vld [vmem:[#allocation22_spill] sm:$0xff] }
  0xaf   : > { %6650 = vst [vmem:[#allocation39_spill] sm:$0xff] %v5367_v32  ;;  %1220 = vmatprep.mubr.bf16.mxu1 %v673_v61  ;;  %2738 = vrot.lane.b32.xlu0 %v5371_v29, %s4670_s8  ;;  %v2288_v43 = vor.u32 %v2286_v47, %v2284_v55  ;;  %v5397_v6 = vor.u32 %v1498_v58, %v1496_v3  ;;  %v1439_v3 = vshrl.u32 %v4567_v42, 16  ;;  %v2294_v58 = vshrl.u32 %v5377_v10, 16  ;;  %v5732_v10 = vld [vmem:[%s6547_s1 + $0x40] sm:$0xff]  }
  0xb0   : > { %v622_v9 = vpop.permute.xlu1 %621  ;;  %v1668_v55 = vor.u32 %v1666_v48, %v1664_v44 }
  0xb1   : > { %v497_v22 = vpop.permute.xlu0 %496  ;;  %v5400_v57 = vsel %vm373_vm0, %v2288_v43, %v2292_v41  ;;  %v5409_v19 = vsel %vm373_vm0, %v5397_v6, %v1664_v44  ;;  %v5427_v44 = vsel %vm653_vm1, %v5054_v38, %v622_v9  ;;  %v2296_v48 = vor.u32 %v2294_v58, %v2292_v41  ;;  %v5440_v38 = vld [vmem:[%s4729_s5 + $0xe0] sm:$0xff]   ;;  %v5471_v58 = vld [vmem:[%s6547_s1 + $0xb8] sm:$0xff]  }
  0xb2   : > { %6653 = vst [vmem:[#allocation42_spill] sm:$0xff] %v5400_v57  ;;  %2754 = vrot.lane.b32.xlu1 %v5400_v57, %s4670_s8  ;;  %6656 = vst [vmem:[#allocation45_spill] sm:$0xff] %v5427_v44  ;;  %v2306_v41 = vshll.u32 %v5440_v38, 16 }
  0xb3   : > { %1124 = vmatmul.mubr.bf16.gmra.mxu0 %v670_v0  ;;  %2740 = vrot.lane.b32.xlu0 %v5387_v63, %s4670_s8  ;;  %v676_v0 = vsel %vm653_vm1, %v5013_v53, %v369_v8  ;;  %v1672_v53 = vrot.slane %v1670_v18, 1  ;;  %v5414_v8 = vld [vmem:[%s4729_s5 + $0xd8] sm:$0xff]   ;;  %6658 = vst [vmem:[#allocation47_spill] sm:$0xff] %v5440_v38  ;;  %6661 = vst [vmem:[#allocation50_spill] sm:$0xff] %v5471_v58 }
  0xb4   : > { %1131 = vmatprep.mubr.bf16.mxu0 %v704_v14  ;;  %v636_v32 = vpop.permute.xlu1 %635  ;;  %6655 = vst [vmem:[#allocation44_spill] sm:$0xff] %v5414_v8  ;;  %v1443_v14 = vrot.slane %v1441_v21, 1  ;;  %v2298_v46 = vshll.u32 %v5414_v8, 16 }
  0xb5   : > { %v5404_v15 = vsel %vm653_vm1, %v5117_v13, %v636_v32  ;;  %v708_v13 = vsel %vm653_vm1, %v5086_v35, %v497_v22  ;;  %v5422_v47 = vsel %vm373_vm0, %v1668_v55, %v1672_v53  ;;  %v743_v35 = vsel %vm653_vm1, %v5066_v62, %v636_v32  ;;  %v624_v9 = vpop.permute.xlu0 %623 }
  0xb6   : > { %6654 = vst [vmem:[#allocation43_spill] sm:$0xff] %v5404_v15  ;;  %1221 = vmatmul.mubr.bf16.gmra.mxu1 %v5391_v33  ;;  %v2300_v42 = vrot.slane %v2298_v46, 1  ;;  %v1444_v18 = vor.u32 %v1443_v14, %v1439_v3  ;;  %v2302_v32 = vshrl.u32 %v5414_v8, 16  ;;  %v5450_v22 = vsel %vm653_vm1, %v5076_v34, %v624_v9  ;;  %v4591_v34 = vld [vmem:[%s4729_s5 + $0xe8] ss:$0 sps:$4 sm:$0x11]  }
  0xb7   : > { %1228 = vmatprep.mubr.bf16.mxu1 %v676_v0  ;;  %2742 = vrot.lane.b32.xlu0 %v5409_v19, %s4670_s8  ;;  %6659 = vst [vmem:[#allocation48_spill] sm:$0xff] %v5450_v22  ;;  %v2308_v53 = vrot.slane %v2306_v41, 1  ;;  %v2314_v14 = vshll.u32 %v4591_v34, 16  ;;  %v4606_v46 = vld [vmem:[%s4729_s5 + $0x50] sm:$0xff]   ;;  %v5500_v41 = vld [vmem:[%s6547_s1 + $0xe8] sm:$0xff]   ;;  %v5606_v15 = vld [vmem:[%s6547_s1 + $0xc0] sm:$0xff]  }
  0xb8   : > { %v5442_v43 = vpop.permute.xlu1 %1506  ;;  %v1449_v62 = vsel %vm373_vm0, %v1444_v18, %v5241_v40  ;;  %v2304_v21 = vor.u32 %v2302_v32, %v2300_v42  ;;  %v5493_v32 = vld [vmem:[%s6547_s1 + $0xb0] sm:$0xff]  }
  0xb9   : > { %v1708_v55 = vsel %vm653_vm1, %v1449_v62, %v5442_v43  ;;  %v2316_v18 = vrot.slane %v2314_v14, 1  ;;  %v5537_v14 = vld [vmem:[%s6547_s1 + $0xa0] sm:$0xff]  }
  0xba   : > { %v5458_v40 = vsel %vm373_vm0, %v2304_v21, %v2308_v53 }
  0xbb   : > { %1132 = vmatmul.mubr.bf16.gmra.mxu0 %v673_v61  ;;  %2744 = vrot.lane.b32.xlu0 %v5422_v47, %s4670_s8  ;;  %v5435_v61 = vsel %vm373_vm0, %v2296_v48, %v2300_v42  ;;  %6660 = vst [vmem:[#allocation49_spill] sm:$0xff] %v5458_v40  ;;  %v5481_v42 = vld [vmem:[%s6547_s1 + $0xf0] sm:$0xff]  }
  0xbc   : > { %1139 = vmatprep.mubr.bf16.mxu0 %v708_v13  ;;  %6657 = vst [vmem:[#allocation46_spill] sm:$0xff] %v5435_v61  ;;  %2756 = vrot.lane.b32.xlu1 %v5435_v61, %s4670_s8  ;;  %v2310_v13 = vshrl.u32 %v5440_v38, 16  ;;  %v5466_v3 = vpop.permute.xlu1 %1508  ;;  %v4626_v61 = vld [vmem:[%s4729_s5 + $0x78] sm:$0xff]  }
  0xbd   : > { %v1712_v9 = vsel %vm653_vm1, %v5278_v54, %v5466_v3 }
  0xbe   : > { %1229 = vmatmul.mubr.bf16.gmra.mxu1 %v5427_v44 }
  0xbf   : > { %1236 = vmatprep.mubr.bf16.mxu1 %v743_v35  ;;  %v2312_v35 = vor.u32 %v2310_v13, %v2308_v53  ;;  %v4611_v53 = vld [vmem:[%s4729_s5 + $0x58] sm:$0xff]  }
  0xc0   : > { %2758 = vrot.lane.b32.xlu1 %v5458_v40, %s4670_s8  ;;  %v1502_v40 = vshll.u32 %v4580_v26, 16  ;;  %v5664_v26 = vld [vmem:[%s6547_s1 + $0x60] sm:$0xff]  }
  0xc1   : > { %v5488_v62 = vsel %vm373_vm0, %v2312_v35, %v2316_v18  ;;  %v5555_v18 = vld [vmem:[%s6547_s1 + $0x98] sm:$0xff]  }
  0xc2   : > { %6662 = vst [vmem:[#allocation51_spill] sm:$0xff] %v5488_v62 }
  0xc3   : > { %1140 = vmatmul.mubr.bf16.gmra.mxu0 %v676_v0  ;;  %v1380_v0 = vpop.permute.xlu0 %1379 }
  0xc4   : > { %4384 = vmatprep.mubr.msk.bf16.mxu0 %vm653_vm1, %v4926_v51  ;;  %v1676_v48 = vsel %vm653_vm1, %v4606_v46, %v1380_v0  ;;  %2760 = vrot.lane.b32.xlu1 %v5488_v62, %s4670_s8  ;;  %v5525_v0 = vld [vmem:[%s6547_s1 + $0xe0] sm:$0xff]   ;;  %v5543_v46 = vld [vmem:[%s6547_s1 + $0xd8] sm:$0xff]  }
  0xc6   : > { %1237 = vmatmul.mubr.bf16.gmra.mxu1 %v5450_v22  ;;  %v5595_v22 = vld [vmem:[%s6547_s1 + $0x88] sm:$0xff]  }
  0xc7   : > { %1827 = vmatprep.mubr.bf16.mxu1 %v1708_v55  ;;  %v1382_v21 = vpop.permute.xlu0 %1381  ;;  %v5503_v55 = vpop.permute.xlu1 %1510 }
  0xc8   : > { %v5518_v34 = vsel %vm653_vm1, %v4611_v53, %v1382_v21  ;;  %v1716_v13 = vsel %vm653_vm1, %v5299_v16, %v5503_v55  ;;  %v5567_v53 = vld [vmem:[%s6547_s1 + $0xd0] sm:$0xff]  }
  0xcb   : > { %4385 = vmatmul.mubr.msk.bf16.vlgmr.msra.gmra.mxu0 %vm653_vm1, %v4951_v4  ;;  %v5547_v35 = vpop.permute.xlu1 %1512  ;;  %v5619_v4 = vld [vmem:[%s6547_s1 + $0x78] sm:$0xff]  }
  0xcc   : > { %4021 = vmatpush3.bf16.msra.mxu0 %v5471_v58  ;;  %4388 = vmatprep.mubr.msk.bf16.mxu0 %vm653_vm1, %v4978_v23  ;;  %v6664_v23 = vld [vmem:[#allocation13_spill] sm:$0xff] }
  0xcd   : > { %4022 = vmatprep.subr.bf16.mxu0 %v5481_v42 }
  0xce   : > { %1828 = vmatmul.mubr.bf16.vlgmr.msra.gmra.mxu1 %v1676_v48  ;;  %v1384_v48 = vpop.permute.xlu0 %1383 }
  0xcf   : > { %4401 = vmatpush3.bf16.msra.mxu1 %v5010_v52  ;;  %1835 = vmatprep.mubr.bf16.mxu1 %v1712_v9  ;;  %v5513_v52 = vld [vmem:[%s6547_s1 + $0xa8] sm:$0xff]   ;;  %v4616_v9 = vld [vmem:[%s4729_s5 + $0x60] sm:$0xff]  }
  0xd0   : > { %4023 = vmatpush3.bf16.msra.mxu0 %v5493_v32  ;;  %4402 = vmatprep.subr.bf16.mxu1 %v5151_v49  ;;  %v5560_v21 = vsel %vm653_vm1, %v4616_v9, %v1384_v48  ;;  %v5579_v48 = vld [vmem:[%s6547_s1 + $0x90] sm:$0xff]   ;;  %v1634_v9 = vpop.permute.xlu1 %1633 }
  0xd1   : > { %4024 = vmatprep.subr.bf16.mxu0 %v5500_v41 }
  0xd3   : > { %4389 = vmatmul.mubr.msk.bf16.gmra.mxu0 %vm653_vm1, %v5027_v2  ;;  %4403 = vmatpush3.bf16.msra.mxu1 %v5151_v49 }
  0xd4   : > { %4025 = vmatpush3.bf16.msra.mxu0 %v5513_v52  ;;  %4392 = vmatprep.mubr.msk.bf16.mxu0 %vm653_vm1, %v5046_v25  ;;  %v1388_v44 = vpop.permute.xlu1 %1387 }
  0xd5   : > { %4026 = vmatprep.subr.bf16.mxu0 %v5525_v0  ;;  %4404 = vmatprep.subr.bf16.mxu1 %v5163_v36 }
  0xd6   : > { %1836 = vmatmul.mubr.bf16.gmra.mxu1 %v5518_v34 }
  0xd7   : > { %1843 = vmatprep.mubr.bf16.mxu1 %v1716_v13  ;;  %4405 = vmatpush3.bf16.msra.mxu1 %v5163_v36  ;;  %v1720_v13 = vsel %vm653_vm1, %v5324_v1, %v5547_v35 }
  0xd8   : > { %4027 = vmatpush3.bf16.msra.mxu0 %v5537_v14  ;;  %4406 = vmatprep.subr.bf16.mxu1 %v5198_v37  ;;  %v5622_v12 = vpop.permute.xlu1 %1516 }
  0xd9   : > { %4028 = vmatprep.subr.bf16.mxu0 %v5543_v46  ;;  %6666 = vst [vmem:[#allocation13_spill] sm:$0xff] %v5622_v12 }
  0xdb   : > { %4393 = vmatmul.mubr.msk.bf16.gmra.mxu0 %vm653_vm1, %v5069_v60  ;;  %4407 = vmatpush3.bf16.msra.mxu1 %v5198_v37  ;;  %v1386_v60 = vpop.permute.xlu0 %1385 }
  0xdc   : > { %4029 = vmatpush3.bf16.msra.mxu0 %v5555_v18  ;;  %4396 = vmatprep.mubr.msk.bf16.mxu0 %vm653_vm1, %v5104_v59  ;;  %v5585_v59 = vld [vmem:[%s6547_s1 + $0xc8] sm:$0xff]   ;;  %v1638_v5 = vpop.permute.xlu1 %1637 }
  0xdd   : > { %4030 = vmatprep.subr.bf16.mxu0 %v5567_v53  ;;  %4160 = vmatprep.subr.bf16.mxu1 %v5257_v56 }
  0xde   : > { %1844 = vmatmul.mubr.bf16.gmra.mxu1 %v5560_v21 }
  0xdf   : > { %1851 = vmatprep.mubr.bf16.mxu1 %v1720_v13  ;;  %v5588_v25 = vpop.permute.xlu0 %1514  ;;  %v4621_v13 = vld [vmem:[%s4729_s5 + $0x68] sm:$0xff]  }
  0xe0   : > { %4031 = vmatpush3.bf16.msra.mxu0 %v5579_v48  ;;  %6663 = vst [vmem:[#allocation52_spill] sm:$0xff] %v5588_v25  ;;  %v5601_v2 = vsel %vm653_vm1, %v4621_v13, %v1386_v60  ;;  %v6665_v60 = vld [vmem:[#allocation2_spill] sm:$0xff] }
  0xe1   : > { %4032 = vmatprep.subr.bf16.mxu0 %v5585_v59  ;;  %v1740_v13 = vsel %vm653_vm1, %v6665_v60, %v1634_v9  ;;  %v1728_v9 = vsel %vm653_vm1, %v5371_v29, %v5622_v12 }
  0xe3   : > { %4397 = vmatmul.mubr.msk.bf16.gmra.mxu0 %vm653_vm1, %v5114_v45  ;;  %v1724_v45 = vsel %vm653_vm1, %v5343_v39, %v5588_v25  ;;  %v1636_v33 = vpop.permute.xlu0 %1635  ;;  %v5748_v25 = vld [vmem:[%s6547_s1 + $0x118] sm:$0xff]  }
  0xe4   : > { %4033 = vmatpush3.bf16.msra.mxu0 %v5595_v22  ;;  %1924 = vmatprep.mubr.bf16.mxu0 %v5518_v34 }
  0xe5   : > { %4034 = vmatprep.subr.bf16.mxu0 %v5606_v15 }
  0xe6   : > { %1852 = vmatmul.mubr.bf16.gmra.mxu1 %v5601_v2 }
  0xe7   : > { %1859 = vmatprep.mubr.bf16.mxu1 %v1724_v45  ;;  %v6668_v45 = vld [vmem:[#allocation24_spill] sm:$0xff]  ;;  %v1390_v30 = vpop.permute.xlu0 %1389 }
  0xe8   : > { %4035 = vmatpush3.bf16.msra.mxu0 %v6664_v23  ;;  %v4624_v23 = vld [vmem:[%s4729_s5 + $0x70] sm:$0xff]  }
  0xe9   : > { %4096 = vmatprep.subr.bf16.mxu0 %v5619_v4  ;;  %v5628_v51 = vsel %vm653_vm1, %v4624_v23, %v1388_v44  ;;  %v5642_v44 = vld [vmem:[%s6547_s1 + $0x68] sm:$0xff]  }
  0xeb   : > { %1925 = vmatmul.mubr.bf16.vlgmr.msra.gmra.mxu0 %v1740_v13  ;;  %v6669_v13 = vld [vmem:[#allocation3_spill] sm:$0xff]  ;;  %v5645_v23 = vpop.permute.xlu0 %1518 }
  0xec   : > { %4097 = vmatpush3.bf16.msra.mxu0 %v6667_v31  ;;  %1932 = vmatprep.mubr.bf16.mxu0 %v5560_v21  ;;  %v1744_v62 = vsel %vm653_vm1, %v6669_v13, %v1636_v33  ;;  %6671 = vst [vmem:[#allocation2_spill] sm:$0xff] %v5645_v23  ;;  %v5650_v33 = vsel %vm653_vm1, %v4626_v61, %v1390_v30  ;;  %v1392_v30 = vpop.permute.xlu1 %1391  ;;  %v1504_v61 = vrot.slane %v1502_v40, 1 }
  0xed   : > { %4098 = vmatprep.subr.bf16.mxu0 %v6668_v45  ;;  %6672 = vst [vmem:[#allocation22_spill] sm:$0xff] %v5650_v33  ;;  %v1732_v57 = vsel %vm653_vm1, %v5387_v63, %v5645_v23  ;;  %v5689_v38 = vsel %vm653_vm1, %v4631_v20, %v1392_v30  ;;  %v5694_v23 = vld [vmem:[%s6547_s1 + $0x18] sm:$0xff]   ;;  %v5711_v30 = vld [vmem:[%s6547_s1 + $0x10] sm:$0xff]  }
  0xee   : > { %1860 = vmatmul.mubr.bf16.gmra.mxu1 %v5628_v51  ;;  %v6675_v20 = vld [vmem:[#allocation5_spill] sm:$0xff] }
  0xef   : > { %1867 = vmatprep.mubr.bf16.mxu1 %v1728_v9  ;;  %v5655_v9 = vld [vmem:[%s6547_s1 + $0x28] sm:$0xff]  }
  0xf0   : > { %4099 = vmatpush3.bf16.msra.mxu0 %v6670_v7  ;;  %v5682_v40 = vpop.permute.xlu1 %1520 }
  0xf1   : > { %4100 = vmatprep.subr.bf16.mxu0 %v5642_v44  ;;  %6674 = vst [vmem:[#allocation24_spill] sm:$0xff] %v5682_v40 }
  0xf3   : > { %1933 = vmatmul.mubr.bf16.gmra.mxu0 %v1744_v62  ;;  %v6673_v62 = vld [vmem:[#allocation4_spill] sm:$0xff] }
  0xf4   : > { %1940 = vmatprep.mubr.bf16.mxu0 %v5601_v2  ;;  %4101 = vmatpush3.bf16.msra.mxu0 %v5655_v9  ;;  %v1748_v17 = vsel %vm653_vm1, %v6673_v62, %v1638_v5  ;;  %v1505_v5 = vsel %vm373_vm0, %v5397_v6, %v1504_v61  ;;  %v1642_v12 = vpop.permute.xlu1 %1641 }
  0xf5   : > { %4102 = vmatprep.subr.bf16.mxu0 %v5664_v26  ;;  %v1736_v8 = vsel %vm653_vm1, %v1505_v5, %v5682_v40  ;;  %v5717_v5 = vld [vmem:[%s6547_s1 + $0x48] sm:$0xff]  }
  0xf6   : > { %1868 = vmatmul.mubr.bf16.gmra.mxu1 %v5650_v33  ;;  %v5726_v40 = vld [vmem:[%s6547_s1 + $0x8] sm:$0xff]  }
  0xf7   : > { %1875 = vmatprep.mubr.bf16.mxu1 %v1732_v57  ;;  %v1640_v57 = vpop.permute.xlu0 %1639 }
  0xf8   : > { %4103 = vmatpush3.bf16.msra.mxu0 %v5673_v24  ;;  %v1752_v6 = vsel %vm653_vm1, %v6675_v20, %v1640_v57  ;;  %v4636_v57 = vld [vmem:[%s4729_s5 + $0x88] sm:$0xff]  }
  0xf9   : > { %4104 = vmatprep.subr.bf16.mxu0 %v5679_v11 }
  0xfb   : > { %1941 = vmatmul.mubr.bf16.gmra.mxu0 %v1748_v17  ;;  %v5702_v17 = vld [vmem:[%s6547_s1 + $0x50] sm:$0xff]   ;;  %v1394_v61 = vpop.permute.xlu0 %1393 }
  0xfc   : > { %1948 = vmatprep.mubr.bf16.mxu0 %v5628_v51  ;;  %4105 = vmatpush3.bf16.msra.mxu0 %v5694_v23 }
  0xfd   : > { %4106 = vmatprep.subr.bf16.mxu0 %v5702_v17 }
  0xfe   : > { %1876 = vmatmul.mubr.bf16.gmra.mxu1 %v5689_v38 }
  0xff   : > { %1883 = vmatprep.mubr.bf16.mxu1 %v1736_v8  ;;  %v1704_v8 = vsel %vm653_vm1, %v4636_v57, %v1394_v61  ;;  %v5742_v61 = vld [vmem:[%s6547_s1] sm:$0xff]  }
 0x100   : > { %4107 = vmatpush3.bf16.msra.mxu0 %v5711_v30  ;;  %6677 = vst [vmem:[#allocation3_spill] sm:$0xff] %v5742_v61 }
 0x101   : > { %4108 = vmatprep.subr.bf16.mxu0 %v5717_v5 }
 0x103   : > { %1949 = vmatmul.mubr.bf16.gmra.mxu0 %v1752_v6  ;;  %v6676_v6 = vld [vmem:[#allocation6_spill] sm:$0xff] }
 0x104   : > { %1956 = vmatprep.mubr.bf16.mxu0 %v5650_v33  ;;  %4109 = vmatpush3.bf16.msra.mxu0 %v5726_v40  ;;  %v1756_v33 = vsel %vm653_vm1, %v6676_v6, %v1642_v12  ;;  %v1644_v12 = vpop.permute.xlu0 %1643 }
 0x105   : > { %4110 = vmatprep.subr.bf16.mxu0 %v5732_v10 }
 0x106   : > { %1884 = vmatmul.mubr.bf16.gmra.mxu1 %v1704_v8  ;;  %v1650_v8 = vpop.permute.xlu1 %1649 }
 0x107   : > { %4408 = vmatprep.mubr.msk.bf16.mxu1 %vm653_vm1, %v5278_v54  ;;  %v6678_v54 = vld [vmem:[#allocation7_spill] sm:$0xff] }
 0x108   : > { %4111 = vmatpush3.bf16.msra.mxu0 %v5742_v61  ;;  %v1760_v61 = vsel %vm653_vm1, %v6678_v54, %v1644_v12 }
 0x109   : > { %4424 = vmatprep.subr.bf16.mxu0 %v5748_v25 }
 0x10b   : > { %1957 = vmatmul.mubr.bf16.gmra.mxu0 %v1756_v33  ;;  %v5761_v33 = vsel %vm653_vm1, %v4636_v57, %v1650_v8  ;;  %v4641_v57 = vld [vmem:[%s4729_s5 + $0x90] sm:$0xff]  }
 0x10c   : > { %1964 = vmatprep.mubr.bf16.mxu0 %v5689_v38 }
 0x10e   : > { %4409 = vmatmul.mubr.msk.bf16.vlgmr.msra.gmra.mxu1 %vm653_vm1, %v5299_v16  ;;  %v1646_v16 = vpop.permute.xlu0 %1645 }
 0x10f   : > { %4161 = vmatpush3.bf16.msra.mxu1 %v5471_v58  ;;  %4412 = vmatprep.mubr.msk.bf16.mxu1 %vm653_vm1, %v5324_v1  ;;  %v1652_v58 = vpop.permute.xlu1 %1651  ;;  %v6679_v1 = vld [vmem:[#allocation8_spill] sm:$0xff] }
 0x110   : > { %4162 = vmatprep.subr.bf16.mxu1 %v5481_v42  ;;  %v1764_v12 = vsel %vm653_vm1, %v6679_v1, %v1646_v16 }
 0x113   : > { %1965 = vmatmul.mubr.bf16.gmra.mxu0 %v1760_v61  ;;  %4163 = vmatpush3.bf16.msra.mxu1 %v5493_v32  ;;  %v5776_v61 = vsel %vm653_vm1, %v4641_v57, %v1652_v58  ;;  %v2136_v8 = vpop.permute.xlu1 %2135 }
 0x114   : > { %1972 = vmatprep.mubr.bf16.mxu0 %v5761_v33  ;;  %4164 = vmatprep.subr.bf16.mxu1 %v5500_v41  ;;  %v2335_v58 = vsel %vm653_vm1, %v6665_v60, %v2136_v8 }
 0x116   : > { %4413 = vmatmul.mubr.msk.bf16.gmra.mxu1 %vm653_vm1, %v5343_v39  ;;  %v1648_v39 = vpop.permute.xlu0 %1647 }
 0x117   : > { %4165 = vmatpush3.bf16.msra.mxu1 %v5513_v52  ;;  %4416 = vmatprep.mubr.msk.bf16.mxu1 %vm653_vm1, %v5371_v29  ;;  %v6680_v29 = vld [vmem:[#allocation9_spill] sm:$0xff] }
 0x118   : > { %4166 = vmatprep.subr.bf16.mxu1 %v5525_v0  ;;  %v1768_v16 = vsel %vm653_vm1, %v6680_v29, %v1648_v39  ;;  %v2138_v39 = vpop.permute.xlu1 %2137 }
 0x119   : > { %v2338_v8 = vsel %vm653_vm1, %v6669_v13, %v2138_v39 }
 0x11b   : > { %1973 = vmatmul.mubr.bf16.gmra.mxu0 %v1764_v12  ;;  %4167 = vmatpush3.bf16.msra.mxu1 %v5537_v14  ;;  %v2232_v12 = vpop.permute.xlu0 %2231 }
 0x11c   : > { %1980 = vmatprep.mubr.bf16.mxu0 %v5776_v61  ;;  %4168 = vmatprep.subr.bf16.mxu1 %v5543_v46 }
 0x11e   : > { %4417 = vmatmul.mubr.msk.bf16.gmra.mxu1 %vm653_vm1, %v5387_v63  ;;  %v6681_v63 = vld [vmem:[#allocation21_spill] sm:$0xff] }
 0x11f   : > { %4169 = vmatpush3.bf16.msra.mxu1 %v5555_v18  ;;  %4420 = vmatprep.mubr.msk.bf16.mxu1 %vm653_vm1, %v5409_v19  ;;  %v2359_v57 = vsel %vm653_vm1, %v6681_v63, %v2232_v12  ;;  %v4642_v19 = vld [vmem:[%s4729_s5 + $0xa0] sm:$0xff]   ;;  %v2140_v12 = vpop.permute.xlu1 %2139 }
 0x120   : > { %4170 = vmatprep.subr.bf16.mxu1 %v5567_v53  ;;  %v2318_v60 = vsel %vm653_vm1, %v4642_v19, %v5442_v43  ;;  %v2341_v13 = vsel %vm653_vm1, %v6673_v62, %v2140_v12 }
 0x123   : > { %1981 = vmatmul.mubr.bf16.gmra.mxu0 %v1768_v16  ;;  %4171 = vmatpush3.bf16.msra.mxu1 %v5579_v48  ;;  %v2234_v16 = vpop.permute.xlu0 %2233 }
 0x124   : > { %2438 = vmatprep.mubr.bf16.mxu0 %v2335_v58  ;;  %4172 = vmatprep.subr.bf16.mxu1 %v5585_v59  ;;  %v6682_v58 = vld [vmem:[#allocation23_spill] sm:$0xff] }
 0x125   : > { %v2362_v43 = vsel %vm653_vm1, %v6682_v58, %v2234_v16 }
 0x126   : > { %4421 = vmatmul.mubr.msk.bf16.gmra.mxu1 %vm653_vm1, %v5422_v47  ;;  %v5807_v47 = vld [vmem:[%s6547_s1 + $0x80] sm:$0xff]  }
 0x127   : > { %4173 = vmatpush3.bf16.msra.mxu1 %v5595_v22  ;;  %2535 = vmatprep.mubr.bf16.mxu1 %v2359_v57  ;;  %v2236_v57 = vpop.permute.xlu0 %2235 }
 0x128   : > { %4174 = vmatprep.subr.bf16.mxu1 %v5606_v15 }
 0x12b   : > { %2439 = vmatmul.mubr.bf16.vlgmr.msra.gmra.mxu0 %v2318_v60  ;;  %4175 = vmatpush3.bf16.msra.mxu1 %v5807_v47  ;;  %v4648_v60 = vld [vmem:[%s4729_s5 + $0xc8] sm:$0xff]  }
 0x12c   : > { %4425 = vmatpush3.bf16.msra.mxu0 %v5748_v25  ;;  %4236 = vmatprep.subr.bf16.mxu1 %v5619_v4  ;;  %v4644_v4 = vld [vmem:[%s4729_s5 + $0xa8] sm:$0xff]  }
 0x12d   : > { %2446 = vmatprep.mubr.bf16.mxu0 %v2338_v8  ;;  %4426 = vmatprep.subr.bf16.mxu0 %v5151_v49  ;;  %v2320_v63 = vsel %vm653_vm1, %v4644_v4, %v5466_v3  ;;  %v6687_v8 = vld [vmem:[#allocation13_spill] sm:$0xff] }
 0x12e   : > { %2536 = vmatmul.mubr.bf16.vlgmr.msra.gmra.mxu1 %v5518_v34  ;;  %v2328_v16 = vsel %vm653_vm1, %v4648_v60, %v6687_v8  ;;  %v6692_v60 = vld [vmem:[#allocation29_spill] sm:$0xff] }
 0x12f   : > { %4237 = vmatpush3.bf16.msra.mxu1 %v6667_v31  ;;  %2543 = vmatprep.mubr.bf16.mxu1 %v2362_v43  ;;  %v2365_v31 = vsel %vm653_vm1, %v5247_v27, %v2236_v57  ;;  %v4645_v27 = vld [vmem:[%s4729_s5 + $0xb0] sm:$0xff]  }
 0x130   : > { %4238 = vmatprep.subr.bf16.mxu1 %v6668_v45  ;;  %4427 = vmatpush3.bf16.msra.mxu0 %v5151_v49  ;;  %v2142_v49 = vpop.permute.xlu1 %2141  ;;  %v6683_v45 = vld [vmem:[#allocation52_spill] sm:$0xff] }
 0x131   : > { %4428 = vmatprep.subr.bf16.mxu0 %v5163_v36  ;;  %v2344_v3 = vsel %vm653_vm1, %v6675_v20, %v2142_v49  ;;  %v6686_v20 = vld [vmem:[#allocation22_spill] sm:$0xff]  ;;  %v6688_v57 = vld [vmem:[#allocation44_spill] sm:$0xff] }
 0x133   : > { %2447 = vmatmul.mubr.bf16.gmra.mxu0 %v2320_v63  ;;  %4239 = vmatpush3.bf16.msra.mxu1 %v6670_v7  ;;  %v2238_v7 = vpop.permute.xlu0 %2237 }
 0x134   : > { %2454 = vmatprep.mubr.bf16.mxu0 %v2341_v13  ;;  %4240 = vmatprep.subr.bf16.mxu1 %v5642_v44  ;;  %v2368_v34 = vsel %vm653_vm1, %v5295_v28, %v2238_v7 }
 0x135   : > { %4429 = vmatpush3.bf16.msra.mxu0 %v5163_v36  ;;  %v2322_v36 = vsel %vm653_vm1, %v4645_v27, %v5503_v55 }
 0x136   : > { %4430 = vmatprep.subr.bf16.mxu0 %v5198_v37  ;;  %2544 = vmatmul.mubr.bf16.gmra.mxu1 %v5560_v21  ;;  %v2144_v21 = vpop.permute.xlu1 %2143 }
 0x137   : > { %2551 = vmatprep.mubr.bf16.mxu1 %v2365_v31  ;;  %4241 = vmatpush3.bf16.msra.mxu1 %v5655_v9  ;;  %v2240_v55 = vpop.permute.xlu0 %2239 }
 0x138   : > { %4242 = vmatprep.subr.bf16.mxu1 %v5664_v26  ;;  %v6685_v26 = vld [vmem:[#allocation40_spill] sm:$0xff] }
 0x139   : > { %4431 = vmatpush3.bf16.msra.mxu0 %v5198_v37  ;;  %v2347_v37 = vsel %vm653_vm1, %v6676_v6, %v2144_v21 }
 0x13a   : > { %4300 = vmatprep.subr.bf16.mxu0 %v5257_v56  ;;  %v4646_v56 = vld [vmem:[%s4729_s5 + $0xb8] sm:$0xff]  }
 0x13b   : > { %2455 = vmatmul.mubr.bf16.gmra.mxu0 %v2322_v36  ;;  %4243 = vmatpush3.bf16.msra.mxu1 %v5673_v24  ;;  %v2324_v24 = vsel %vm653_vm1, %v4646_v56, %v5547_v35  ;;  %v4647_v35 = vld [vmem:[%s4729_s5 + $0xc0] sm:$0xff]  }
 0x13c   : > { %2462 = vmatprep.mubr.bf16.mxu0 %v2344_v3  ;;  %4244 = vmatprep.subr.bf16.mxu1 %v5679_v11  ;;  %v2146_v11 = vpop.permute.xlu1 %2145  ;;  %v2326_v44 = vsel %vm653_vm1, %v4647_v35, %v6683_v45 }
 0x13d   : > { %v2350_v28 = vsel %vm653_vm1, %v6678_v54, %v2146_v11 }
 0x13e   : > { %2552 = vmatmul.mubr.bf16.gmra.mxu1 %v5601_v2  ;;  %v2371_v2 = vsel %vm653_vm1, %v5335_v50, %v2240_v55  ;;  %v6684_v50 = vld [vmem:[#allocation3_spill] sm:$0xff]  ;;  %v4649_v55 = vld [vmem:[%s4729_s5 + $0xd0] sm:$0xff]  }
 0x13f   : > { %2559 = vmatprep.mubr.bf16.mxu1 %v2368_v34  ;;  %4245 = vmatpush3.bf16.msra.mxu1 %v5694_v23  ;;  %v2242_v23 = vpop.permute.xlu0 %2241 }
 0x140   : > { %4246 = vmatprep.subr.bf16.mxu1 %v5702_v17  ;;  %v2374_v62 = vsel %vm653_vm1, %v6685_v26, %v2242_v23  ;;  %v2148_v17 = vpop.permute.xlu1 %2147 }
 0x141   : > { %v2353_v54 = vsel %vm653_vm1, %v6679_v1, %v2148_v17 }
 0x143   : > { %2463 = vmatmul.mubr.bf16.gmra.mxu0 %v2324_v24  ;;  %4247 = vmatpush3.bf16.msra.mxu1 %v5711_v30  ;;  %v2244_v58 = vpop.permute.xlu0 %2243 }
 0x144   : > { %2470 = vmatprep.mubr.bf16.mxu0 %v2347_v37  ;;  %4248 = vmatprep.subr.bf16.mxu1 %v5717_v5  ;;  %v2377_v31 = vsel %vm653_vm1, %v6688_v57, %v2244_v58  ;;  %v2150_v3 = vpop.permute.xlu1 %2149 }
 0x145   : > { %v2356_v37 = vsel %vm653_vm1, %v6680_v29, %v2150_v3 }
 0x146   : > { %2560 = vmatmul.mubr.bf16.gmra.mxu1 %v5628_v51 }
 0x147   : > { %2567 = vmatprep.mubr.bf16.mxu1 %v2371_v2  ;;  %4249 = vmatpush3.bf16.msra.mxu1 %v5726_v40  ;;  %v6689_v2 = vld [vmem:[#allocation2_spill] sm:$0xff] }
 0x148   : > { %4250 = vmatprep.subr.bf16.mxu1 %v5732_v10  ;;  %v2330_v11 = vsel %vm653_vm1, %v4649_v55, %v6689_v2 }
 0x14b   : > { %v3832_v9 = vpop.f32.mrf.mxu0  ;;  %2471 = vmatmul.mubr.bf16.gmra.mxu0 %v2326_v44  ;;  %4251 = vmatpush3.bf16.msra.mxu1 %v6684_v50 }
 0x14c   : > { %2478 = vmatprep.mubr.bf16.mxu0 %v2350_v28  ;;  %4448 = vmatprep.subr.bf16.mxu1 %v5748_v25  ;;  %v2246_v28 = vpop.permute.xlu0 %2245 }
 0x14d   : > { %v3833_v51 = vpop.f32.mrf.mxu0 }
 0x14e   : > { %v3834_v40 = vadd.f32 %v3833_v51, %v3832_v9  ;;  %v3896_v10 = vpop.f32.mrf.mxu1  ;;  %2568 = vmatmul.mubr.bf16.gmra.mxu1 %v6686_v20  ;;  %v6690_v9 = vld [vmem:[#allocation47_spill] sm:$0xff] }
 0x14f   : > { %v3835_v30 = vpop.f32.mrf.mxu0  ;;  %2575 = vmatprep.mubr.bf16.mxu1 %v2374_v62  ;;  %v2380_v50 = vsel %vm653_vm1, %v6690_v9, %v2246_v28  ;;  %v6697_v28 = vld [vmem:[#allocation20_spill] sm:$0xff] }
 0x150   : > { %v3897_v5 = vpop.f32.mrf.mxu1 }
 0x151   : > { %v3836_v6 = vpop.f32.mrf.mxu0  ;;  %v3898_v39 = vadd.f32 %v3897_v5, %v3896_v10  ;;  %v4650_v5 = vld [vmem:[%s4729_s5 + $0xd8] sm:$0xff]  }
 0x152   : > { %v3837_v19 = vadd.f32 %v3836_v6, %v3835_v30  ;;  %v3899_v43 = vpop.f32.mrf.mxu1  ;;  %v6691_v6 = vld [vmem:[#allocation24_spill] sm:$0xff] }
 0x153   : > { %v3838_v12 = vpop.f32.mrf.mxu0  ;;  %2479 = vmatmul.mubr.bf16.gmra.mxu0 %v2328_v16  ;;  %v5875_v13 = vadd.f32 %v3898_v39, %v3834_v40 }
 0x154   : > { %2486 = vmatprep.mubr.bf16.mxu0 %v2353_v54  ;;  %v3900_v4 = vpop.f32.mrf.mxu1  ;;  %v2332_v54 = vsel %vm653_vm1, %v4650_v5, %v6691_v6  ;;  %v6701_v6 = vld [vmem:[#allocation26_spill] sm:$0xff] }
 0x155   : > { %v3839_v63 = vpop.f32.mrf.mxu0  ;;  %v3901_v1 = vadd.f32 %v3900_v4, %v3899_v43 }
 0x156   : > { %v3840_v49 = vadd.f32 %v3839_v63, %v3838_v12  ;;  %v3902_v27 = vpop.f32.mrf.mxu1  ;;  %2576 = vmatmul.mubr.bf16.gmra.mxu1 %v5689_v38  ;;  %v6693_v63 = vld [vmem:[#allocation19_spill] sm:$0xff] }
 0x157   : > { %v3841_v36 = vpop.f32.mrf.mxu0  ;;  %2583 = vmatprep.mubr.bf16.mxu1 %v2377_v31  ;;  %v5880_v7 = vadd.f32 %v3901_v1, %v3837_v19 }
 0x158   : > { %v3903_v34 = vpop.f32.mrf.mxu1 }
 0x159   : > { %v3842_v21 = vpop.f32.mrf.mxu0  ;;  %v3904_v56 = vadd.f32 %v3903_v34, %v3902_v27  ;;  %v6694_v34 = vld [vmem:[#allocation32_spill] sm:$0xff] }
 0x15a   : > { %v3843_v24 = vadd.f32 %v3842_v21, %v3841_v36  ;;  %v3905_v35 = vpop.f32.mrf.mxu1  ;;  %v6695_v21 = vld [vmem:[#allocation50_spill] sm:$0xff] }
 0x15b   : > { %v3844_v45 = vpop.f32.mrf.mxu0  ;;  %2487 = vmatmul.mubr.bf16.gmra.mxu0 %v2330_v11  ;;  %v5887_v38 = vadd.f32 %v3904_v56, %v3840_v49 }
 0x15c   : > { %2494 = vmatprep.mubr.bf16.mxu0 %v2356_v37  ;;  %v3906_v44 = vpop.f32.mrf.mxu1  ;;  %v6696_v37 = vld [vmem:[#allocation35_spill] sm:$0xff] }
 0x15d   : > { %v3845_v23 = vpop.f32.mrf.mxu0  ;;  %v3907_v29 = vadd.f32 %v3906_v44, %v3905_v35 }
 0x15e   : > { %v3846_v51 = vadd.f32 %v3845_v23, %v3844_v45  ;;  %v3908_v26 = vpop.f32.mrf.mxu1  ;;  %2584 = vmatmul.mubr.bf16.gmra.mxu1 %v5761_v33  ;;  %v6698_v45 = vld [vmem:[#allocation25_spill] sm:$0xff] }
 0x15f   : > { %v3847_v62 = vpop.f32.mrf.mxu0  ;;  %2591 = vmatprep.mubr.bf16.mxu1 %v2380_v50  ;;  %v5892_v40 = vadd.f32 %v3907_v29, %v3843_v24  ;;  %v4651_v29 = vld [vmem:[%s6547_s1 + $0x110] sm:$0xff]  }
 0x160   : > { %v3909_v17 = vpop.f32.mrf.mxu1 }
 0x161   : > { %v3848_v10 = vpop.f32.mrf.mxu0  ;;  %v3910_v20 = vadd.f32 %v3909_v17, %v3908_v26 }
 0x162   : > { %v3849_v30 = vadd.f32 %v3848_v10, %v3847_v62  ;;  %v3911_v39 = vpop.f32.mrf.mxu1  ;;  %v6699_v62 = vld [vmem:[#allocation38_spill] sm:$0xff] }
 0x163   : > { %v3850_v19 = vpop.f32.mrf.mxu0  ;;  %2495 = vmatmul.mubr.bf16.gmra.mxu0 %v2332_v54  ;;  %v5899_v8 = vadd.f32 %v3910_v20, %v3846_v51  ;;  %v6702_v54 = vld [vmem:[#allocation28_spill] sm:$0xff] }
 0x164   : > { %4432 = vmatprep.mubr.msk.bf16.mxu0 %vm653_vm1, %v6692_v60  ;;  %v3912_v33 = vpop.f32.mrf.mxu1 }
 0x165   : > { %v3851_v16 = vpop.f32.mrf.mxu0  ;;  %v3913_v58 = vadd.f32 %v3912_v33, %v3911_v39 }
 0x166   : > { %v3852_v43 = vadd.f32 %v3851_v16, %v3850_v19  ;;  %v3914_v12 = vpop.f32.mrf.mxu1  ;;  %2592 = vmatmul.mubr.bf16.gmra.mxu1 %v5776_v61  ;;  %v4653_v16 = vld [vmem:[%s6547_s1 + $0x100] sm:$0xff]  }
 0x167   : > { %v3853_v4 = vpop.f32.mrf.mxu0  ;;  %3009 = vmatprep.mubr.bf16.mxu1 %v6693_v63  ;;  %v5903_v57 = vadd.f32 %v3913_v58, %v3849_v30  ;;  %v4652_v30 = vld [vmem:[%s6547_s1 + $0x108] sm:$0xff]  }
 0x168   : > { %v3915_v31 = vpop.f32.mrf.mxu1 }
 0x169   : > { %v3854_v1 = vpop.f32.mrf.mxu0  ;;  %v3916_v49 = vadd.f32 %v3915_v31, %v3914_v12  ;;  %v6703_v12 = vld [vmem:[#allocation46_spill] sm:$0xff] }
 0x16a   : > { %v3855_v3 = vadd.f32 %v3854_v1, %v3853_v4  ;;  %v3917_v27 = vpop.f32.mrf.mxu1 }
 0x16b   : > { %v3856_v36 = vpop.f32.mrf.mxu0  ;;  %4433 = vmatmul.mubr.msk.bf16.vlgmr.msra.gmra.mxu0 %vm653_vm1, %v6694_v34  ;;  %v5910_v61 = vadd.f32 %v3916_v49, %v3852_v43  ;;  %v2747_v49 = vpop.permute.xlu1 %2746  ;;  %v6706_v34 = vld [vmem:[#allocation31_spill] sm:$0xff] }
 0x16c   : > { %4301 = vmatpush3.bf16.msra.mxu0 %v6695_v21  ;;  %4436 = vmatprep.mubr.msk.bf16.mxu0 %vm653_vm1, %v6696_v37  ;;  %v3918_v56 = vpop.f32.mrf.mxu1 }
 0x16d   : > { %v3857_v24 = vpop.f32.mrf.mxu0  ;;  %4302 = vmatprep.subr.bf16.mxu0 %v5481_v42  ;;  %v3919_v55 = vadd.f32 %v3918_v56, %v3917_v27  ;;  %v6705_v27 = vld [vmem:[#allocation30_spill] sm:$0xff]  ;;  %v4654_v56 = vld [vmem:[%s4729_s5 + $0xf8] sm:$0xff]  }
 0x16e   : > { %v3858_v2 = vadd.f32 %v3857_v24, %v3856_v36  ;;  %v3920_v11 = vpop.f32.mrf.mxu1  ;;  %3010 = vmatmul.mubr.bf16.vlgmr.msra.gmra.mxu1 %v6697_v28  ;;  %v6707_v28 = vld [vmem:[#allocation51_spill] sm:$0xff] }
 0x16f   : > { %v3859_v35 = vpop.f32.mrf.mxu0  ;;  %3017 = vmatprep.mubr.bf16.mxu1 %v6698_v45  ;;  %v5916_v44 = vadd.f32 %v3919_v55, %v3855_v3  ;;  %4449 = vmatpush3.bf16.msra.mxu1 %v5748_v25 }
 0x170   : > { %4303 = vmatpush3.bf16.msra.mxu0 %v5493_v32  ;;  %v3921_v23 = vpop.f32.mrf.mxu1  ;;  %4450 = vmatprep.subr.bf16.mxu1 %v4651_v29  ;;  %v6700_v32 = vld [vmem:[#allocation42_spill] sm:$0xff] }
 0x171   : > { %v3860_v9 = vpop.f32.mrf.mxu0  ;;  %4304 = vmatprep.subr.bf16.mxu0 %v5500_v41  ;;  %v3922_v50 = vadd.f32 %v3921_v23, %v3920_v11 }
 0x172   : > { %v3861_v42 = vadd.f32 %v3860_v9, %v3859_v35  ;;  %v3923_v51 = vpop.f32.mrf.mxu1  ;;  %v2731_v35 = vpop.permute.xlu0 %2730 }
 0x173   : > { %v3862_v26 = vpop.f32.mrf.mxu0  ;;  %4437 = vmatmul.mubr.msk.bf16.gmra.mxu0 %vm653_vm1, %v6699_v62  ;;  %v5928_v25 = vadd.f32 %v3922_v50, %v3858_v2  ;;  %4451 = vmatpush3.bf16.msra.mxu1 %v4651_v29  ;;  %v2749_v50 = vpop.permute.xlu1 %2748  ;;  %v6708_v29 = vld [vmem:[#allocation34_spill] sm:$0xff] }
 0x174   : > { %4305 = vmatpush3.bf16.msra.mxu0 %v5513_v52  ;;  %4440 = vmatprep.mubr.msk.bf16.mxu0 %vm653_vm1, %v6700_v32  ;;  %v3924_v41 = vpop.f32.mrf.mxu1 }
 0x175   : > { %v3863_v17 = vpop.f32.mrf.mxu0  ;;  %4306 = vmatprep.subr.bf16.mxu0 %v5525_v0  ;;  %v3925_v10 = vadd.f32 %v3924_v41, %v3923_v51  ;;  %4452 = vmatprep.subr.bf16.mxu1 %v4652_v30 }
 0x176   : > { %v3864_v20 = vadd.f32 %v3863_v17, %v3862_v26  ;;  %v3926_v5 = vpop.f32.mrf.mxu1  ;;  %3018 = vmatmul.mubr.bf16.gmra.mxu1 %v6701_v6  ;;  %v6709_v26 = vld [vmem:[#allocation33_spill] sm:$0xff] }
 0x177   : > { %v3865_v52 = vpop.f32.mrf.mxu0  ;;  %3025 = vmatprep.mubr.bf16.mxu1 %v6702_v54  ;;  %v5937_v39 = vadd.f32 %v3925_v10, %v3861_v42  ;;  %4453 = vmatpush3.bf16.msra.mxu1 %v4652_v30  ;;  %v4655_v10 = vld [vmem:[%s4729_s5 + $0x100] sm:$0xff]   ;;  %v2733_v54 = vpop.permute.xlu0 %2732 }
 0x178   : > { %4307 = vmatpush3.bf16.msra.mxu0 %v5537_v14  ;;  %v3927_v19 = vpop.f32.mrf.mxu1  ;;  %4454 = vmatprep.subr.bf16.mxu1 %v4653_v16  ;;  %v6704_v14 = vld [vmem:[#allocation49_spill] sm:$0xff] }
 0x179   : > { %v3866_v0 = vpop.f32.mrf.mxu0  ;;  %4308 = vmatprep.subr.bf16.mxu0 %v5543_v46  ;;  %v3928_v60 = vadd.f32 %v3927_v19, %v3926_v5 }
 0x17a   : > { %v3867_v33 = vadd.f32 %v3866_v0, %v3865_v52  ;;  %v3929_v58 = vpop.f32.mrf.mxu1 }
 0x17b   : > { %v3868_v43 = vpop.f32.mrf.mxu0  ;;  %4441 = vmatmul.mubr.msk.bf16.gmra.mxu0 %vm653_vm1, %v6703_v12  ;;  %v5948_v4 = vadd.f32 %v3928_v60, %v3864_v20  ;;  %4455 = vmatpush3.bf16.msra.mxu1 %v4653_v16  ;;  %v2751_v16 = vpop.permute.xlu1 %2750 }
 0x17c   : > { %4309 = vmatpush3.bf16.msra.mxu0 %v5555_v18  ;;  %4444 = vmatprep.mubr.msk.bf16.mxu0 %vm653_vm1, %v6704_v14  ;;  %v3930_v46 = vpop.f32.mrf.mxu1 }
 0x17d   : > { %v3869_v63 = vpop.f32.mrf.mxu0  ;;  %4310 = vmatprep.subr.bf16.mxu0 %v5567_v53  ;;  %v3931_v31 = vadd.f32 %v3930_v46, %v3929_v58  ;;  %v2923_v53 = vsel %vm653_vm1, %v4654_v56, %v2747_v49  ;;  %v6713_v46 = vld [vmem:[#allocation11_spill] sm:$0xff] }
 0x17e   : > { %v3870_v1 = vadd.f32 %v3869_v63, %v3868_v43  ;;  %v3932_v3 = vpop.f32.mrf.mxu1  ;;  %3026 = vmatmul.mubr.bf16.gmra.mxu1 %v6705_v27  ;;  %v6711_v43 = vld [vmem:[#allocation37_spill] sm:$0xff]  ;;  %v2901_v63 = vsel %vm653_vm1, %v6713_v46, %v2733_v54 }
 0x17f   : > { %v3871_v36 = vpop.f32.mrf.mxu0  ;;  %3033 = vmatprep.mubr.bf16.mxu1 %v6706_v34  ;;  %v5954_v18 = vadd.f32 %v3931_v31, %v3867_v33 }
 0x180   : > { %4311 = vmatpush3.bf16.msra.mxu0 %v5579_v48  ;;  %v3933_v21 = vpop.f32.mrf.mxu1 }
 0x181   : > { %v3872_v37 = vpop.f32.mrf.mxu0  ;;  %4312 = vmatprep.subr.bf16.mxu0 %v5585_v59  ;;  %v3934_v24 = vadd.f32 %v3933_v21, %v3932_v3 }
 0x182   : > { %v3873_v55 = vadd.f32 %v3872_v37, %v3871_v36  ;;  %v3935_v2 = vpop.f32.mrf.mxu1  ;;  %v2735_v37 = vpop.permute.xlu0 %2734 }
 0x183   : > { %v3874_v11 = vpop.f32.mrf.mxu0  ;;  %4445 = vmatmul.mubr.msk.bf16.gmra.mxu0 %vm653_vm1, %v6707_v28  ;;  %v5962_v48 = vadd.f32 %v3934_v24, %v3870_v1  ;;  %v4592_v24 = vld [vmem:[%s4729_s5 + $0xf8] sm:$0xff]  }
 0x184   : > { %4313 = vmatpush3.bf16.msra.mxu0 %v5595_v22  ;;  %3106 = vmatprep.mubr.bf16.mxu0 %v2923_v53  ;;  %v3936_v45 = vpop.f32.mrf.mxu1  ;;  %v6710_v22 = vld [vmem:[#allocation10_spill] sm:$0xff]  ;;  %v6714_v28 = vld [vmem:[#allocation41_spill] sm:$0xff] }
 0x185   : > { %v3875_v23 = vpop.f32.mrf.mxu0  ;;  %4314 = vmatprep.subr.bf16.mxu0 %v5606_v15  ;;  %v3937_v59 = vadd.f32 %v3936_v45, %v3935_v2  ;;  %v2898_v62 = vsel %vm653_vm1, %v6710_v22, %v2731_v35  ;;  %v2927_v15 = vsel %vm653_vm1, %v4655_v10, %v2749_v50  ;;  %v6715_v45 = vld [vmem:[#allocation39_spill] sm:$0xff] }
 0x186   : > { %v3876_v9 = vadd.f32 %v3875_v23, %v3874_v11  ;;  %v3938_v42 = vpop.f32.mrf.mxu1  ;;  %3034 = vmatmul.mubr.bf16.gmra.mxu1 %v6708_v29  ;;  %v6716_v23 = vld [vmem:[#allocation12_spill] sm:$0xff] }
 0x187   : > { %v3877_v51 = vpop.f32.mrf.mxu0  ;;  %3041 = vmatprep.mubr.bf16.mxu1 %v6709_v26  ;;  %v5970_v32 = vadd.f32 %v3937_v59, %v3873_v55  ;;  %v2904_v59 = vsel %vm653_vm1, %v6716_v23, %v2735_v37 }
 0x188   : > { %4315 = vmatpush3.bf16.msra.mxu0 %v5807_v47  ;;  %v3939_v41 = vpop.f32.mrf.mxu1 }
 0x189   : > { %v3878_v17 = vpop.f32.mrf.mxu0  ;;  %v3940_v20 = vadd.f32 %v3939_v41, %v3938_v42  ;;  %v4657_v42 = vld [vmem:[%s4729_s5 + $0x110] sm:$0xff]  }
 0x18a   : > { %v3879_v30 = vadd.f32 %v3878_v17, %v3877_v51  ;;  %v3941_v5 = vpop.f32.mrf.mxu1  ;;  %v2808_v51 = vshll.u32 %v4592_v24, 16  ;;  %v2737_v17 = vpop.permute.xlu0 %2736 }
 0x18b   : > { %v4386_v6 = vpop.f32.mrf.mxu0  ;;  %3107 = vmatmul.mubr.bf16.vlgmr.msra.gmra.mxu0 %v2898_v62  ;;  %v5977_v47 = vadd.f32 %v3940_v20, %v3876_v9  ;;  %v2806_v20 = vshrl.u32 %v4592_v24, 16 }
 0x18c   : > { %v5975_v52 = vadd.f32 %v4386_v6, %v5887_v38  ;;  %3114 = vmatprep.mubr.bf16.mxu0 %v2927_v15  ;;  %v3942_v19 = vpop.f32.mrf.mxu1  ;;  %v6712_v38 = vld [vmem:[#allocation36_spill] sm:$0xff] }
 0x18d   : > { %v1279_v0 = vpop.f32.mrf.mxu0  ;;  %v3943_v60 = vadd.f32 %v3942_v19, %v3941_v5 }
 0x18e   : > { %v5980_v33 = vadd.f32 %v1279_v0, %v5875_v13  ;;  %v3972_v58 = vpop.f32.mrf.mxu1  ;;  %3042 = vmatmul.mubr.bf16.gmra.mxu1 %v6711_v43  ;;  %v4656_v13 = vld [vmem:[%s4729_s5 + $0x108] sm:$0xff]   ;;  %v6717_v0 = vld [vmem:[#allocation45_spill] sm:$0xff]  ;;  %v6719_v43 = vld [vmem:[#allocation14_spill] sm:$0xff] }
 0x18f   : > { %v4387_v12 = vpop.f32.mrf.mxu0  ;;  %3049 = vmatprep.mubr.bf16.mxu1 %v6712_v38  ;;  %v5989_v31 = vadd.f32 %v3943_v60, %v3879_v30  ;;  %v2931_v3 = vsel %vm653_vm1, %v4656_v13, %v2751_v16  ;;  %v2810_v30 = vrot.slane %v2808_v51, 1  ;;  %v4594_v60 = vld [vmem:[%s4729_s5 + $0x108] sm:$0xff]   ;;  %v4595_v13 = vld [vmem:[%s4729_s5 + $0x110] sm:$0xff]  }
 0x190   : > { %v5984_v14 = vadd.f32 %v4387_v12, %v5892_v40  ;;  %v3973_v1 = vpop.f32.mrf.mxu1  ;;  %v2907_v12 = vsel %vm653_vm1, %v6719_v43, %v2737_v17  ;;  %v2821_v37 = vshll.u32 %v4594_v60, 16  ;;  %v6721_v51 = vld [vmem:[#allocation15_spill] sm:$0xff]  ;;  %v2833_v43 = vshrl.u32 %v4595_v13, 16 }
 0x191   : > { %v1282_v49 = vpop.f32.mrf.mxu0  ;;  %v5993_v27 = vadd.f32 %v3973_v1, %v3972_v58  ;;  %v6718_v58 = vld [vmem:[#allocation43_spill] sm:$0xff]  ;;  %v2811_v1 = vor.u32 %v2810_v30, %v2806_v20 }
 0x192   : > { %v5996_v36 = vadd.f32 %v1282_v49, %v5880_v7  ;;  %v3975_v40 = vpop.f32.mrf.mxu1  ;;  %v2753_v7 = vpop.permute.xlu1 %2752 }
 0x193   : > { %v4390_v34 = vpop.f32.mrf.mxu0  ;;  %3115 = vmatmul.mubr.bf16.gmra.mxu0 %v2901_v63  ;;  %v2935_v29 = vsel %vm653_vm1, %v4657_v42, %v2753_v7  ;;  %v4658_v63 = vld [vmem:[%s4729_s5 + $0x118] sm:$0xff]   ;;  %v2823_v42 = vrot.slane %v2821_v37, 1 }
 0x194   : > { %v5999_v21 = vadd.f32 %v4390_v34, %v5910_v61  ;;  %3122 = vmatprep.mubr.bf16.mxu0 %v2931_v3  ;;  %v3976_v56 = vpop.f32.mrf.mxu1 }
 0x195   : > { %v1295_v53 = vpop.f32.mrf.mxu0  ;;  %v6002_v55 = vadd.f32 %v3976_v56, %v3975_v40 }
 0x196   : > { %v6005_v2 = vadd.f32 %v1295_v53, %v5899_v8  ;;  %v3978_v11 = vpop.f32.mrf.mxu1  ;;  %3050 = vmatmul.mubr.bf16.gmra.mxu1 %v6714_v28  ;;  %v4593_v8 = vld [vmem:[%s4729_s5 + $0x100] sm:$0xff]   ;;  %v2755_v54 = vpop.permute.xlu1 %2754 }
 0x197   : > { %v4391_v35 = vpop.f32.mrf.mxu0  ;;  %3057 = vmatprep.mubr.bf16.mxu1 %v6715_v45  ;;  %v2813_v5 = vshll.u32 %v4593_v8, 16  ;;  %v2739_v53 = vpop.permute.xlu0 %2738  ;;  %v2817_v24 = vshrl.u32 %v4593_v8, 16  ;;  %v2829_v45 = vshll.u32 %v4595_v13, 16 }
 0x198   : > { %v6009_v61 = vadd.f32 %v4391_v35, %v5916_v44  ;;  %v3979_v9 = vpop.f32.mrf.mxu1  ;;  %v2825_v35 = vshrl.u32 %v4594_v60, 16 }
 0x199   : > { %v1298_v50 = vpop.f32.mrf.mxu0  ;;  %v6017_v26 = vadd.f32 %v3979_v9, %v3978_v11  ;;  %v2815_v49 = vrot.slane %v2813_v5, 1  ;;  %v6720_v9 = vld [vmem:[#allocation48_spill] sm:$0xff]  ;;  %v2831_v30 = vrot.slane %v2829_v45, 1  ;;  %v4597_v5 = vld [vmem:[%s4729_s5 + $0x120] sm:$0xff]   ;;  %v4660_v45 = vld [vmem:[%s4729_s5 + $0x128] sm:$0xff]  }
 0x19a   : > { %v6020_v22 = vadd.f32 %v1298_v50, %v5903_v57  ;;  %v3981_v62 = vpop.f32.mrf.mxu1  ;;  %v2827_v20 = vor.u32 %v2825_v35, %v2823_v42 }
 0x19b   : > { %v4394_v44 = vpop.f32.mrf.mxu0  ;;  %3123 = vmatmul.mubr.bf16.gmra.mxu0 %v2904_v59  ;;  %v2816_v28 = vsel %vm373_vm0, %v2811_v1, %v2815_v49  ;;  %v2757_v59 = vpop.permute.xlu1 %2756 }
 0x19c   : > { %v6023_v41 = vadd.f32 %v4394_v44, %v5948_v4  ;;  %3130 = vmatprep.mubr.bf16.mxu0 %v2935_v29  ;;  %v3982_v10 = vpop.f32.mrf.mxu1  ;;  %v4596_v29 = vld [vmem:[%s4729_s5 + $0x118] sm:$0xff]   ;;  %v2819_v44 = vor.u32 %v2817_v24, %v2815_v49  ;;  %v6723_v24 = vld [vmem:[#allocation16_spill] sm:$0xff] }
 0x19d   : > { %v1311_v15 = vpop.f32.mrf.mxu0  ;;  %v6025_v6 = vadd.f32 %v3982_v10, %v3981_v62  ;;  %v2910_v62 = vsel %vm653_vm1, %v6721_v51, %v2739_v53  ;;  %v4659_v10 = vld [vmem:[%s4729_s5 + $0x120] sm:$0xff]   ;;  %v4598_v53 = vld [vmem:[%s4729_s5 + $0x128] sm:$0xff]  }
 0x19e   : > { %v6028_v57 = vadd.f32 %v1311_v15, %v5928_v25  ;;  %v3984_v19 = vpop.f32.mrf.mxu1  ;;  %3058 = vmatmul.mubr.bf16.gmra.mxu1 %v6717_v0  ;;  %v2939_v25 = vsel %vm653_vm1, %v4658_v63, %v2755_v54  ;;  %v2943_v15 = vsel %vm653_vm1, %v4659_v10, %v2757_v59  ;;  %v2824_v60 = vsel %vm373_vm0, %v2819_v44, %v2823_v42 }
 0x19f   : > { %v4395_v4 = vpop.f32.mrf.mxu0  ;;  %3065 = vmatprep.mubr.bf16.mxu1 %v6718_v58  ;;  %v2741_v58 = vpop.permute.xlu0 %2740  ;;  %v2841_v63 = vshrl.u32 %v4596_v29, 16  ;;  %v2853_v44 = vshll.u32 %v4598_v53, 16 }
 0x1a0   : > { %v6033_v16 = vadd.f32 %v4395_v4, %v5954_v18  ;;  %v3985_v38 = vpop.f32.mrf.mxu1  ;;  %v2837_v4 = vshll.u32 %v4596_v29, 16  ;;  %v2759_v49 = vpop.permute.xlu1 %2758  ;;  %v2913_v13 = vsel %vm653_vm1, %v6723_v24, %v2741_v58 }
 0x1a1   : > { %v1314_v46 = vpop.f32.mrf.mxu0  ;;  %v6041_v3 = vadd.f32 %v3985_v38, %v3984_v19  ;;  %v2947_v59 = vsel %vm653_vm1, %v4660_v45, %v2759_v49 }
 0x1a2   : > { %v6044_v40 = vadd.f32 %v1314_v46, %v5937_v39  ;;  %v3987_v18 = vpop.f32.mrf.mxu1  ;;  %v2832_v46 = vsel %vm373_vm0, %v2827_v20, %v2831_v30  ;;  %v2839_v37 = vrot.slane %v2837_v4, 1 }
 0x1a3   : > { %v4398_v34 = vpop.f32.mrf.mxu0  ;;  %3131 = vmatmul.mubr.bf16.gmra.mxu0 %v2907_v12 }
 0x1a4   : > { %v6047_v56 = vadd.f32 %v4398_v34, %v5977_v47  ;;  %3138 = vmatprep.mubr.bf16.mxu0 %v2939_v25  ;;  %v3988_v7 = vpop.f32.mrf.mxu1  ;;  %v2845_v25 = vshll.u32 %v4597_v5, 16  ;;  %v2761_v58 = vpop.permute.xlu1 %2760 }
 0x1a5   : > { %v1327_v11 = vpop.f32.mrf.mxu0  ;;  %v6050_v39 = vadd.f32 %v3988_v7, %v3987_v18  ;;  %v2835_v7 = vor.u32 %v2833_v43, %v2831_v30 }
 0x1a6   : > { %v6053_v23 = vadd.f32 %v1327_v11, %v5962_v48  ;;  %v3990_v47 = vpop.f32.mrf.mxu1  ;;  %3066 = vmatmul.mubr.bf16.gmra.mxu1 %v6720_v9  ;;  %v2847_v9 = vrot.slane %v2845_v25, 1 }
 0x1a7   : > { %v4399_v50 = vpop.f32.mrf.mxu0  ;;  %4456 = vmatprep.mubr.msk.bf16.mxu1 %vm653_vm1, %v2816_v28 }
 0x1a8   : > { %v6058_v8 = vadd.f32 %v4399_v50, %v5989_v31  ;;  %v3991_v17 = vpop.f32.mrf.mxu1  ;;  %v4599_v50 = vld [vmem:[%s4729_s5 + $0x130] sm:$0xff]  }
 0x1a9   : > { %v1330_v48 = vpop.f32.mrf.mxu0  ;;  %v6066_v54 = vadd.f32 %v3991_v17, %v3990_v47  ;;  %v2843_v47 = vor.u32 %v2841_v63, %v2839_v37  ;;  %v2840_v17 = vsel %vm373_vm0, %v2835_v7, %v2839_v37  ;;  %v4600_v63 = vld [vmem:[%s4729_s5 + $0x138] ss:$0 sps:$4 sm:$0x11]  }
 0x1aa   : > { %v6069_v19 = vadd.f32 %v1330_v48, %v5970_v32  ;;  %v3993_v31 = vpop.f32.mrf.mxu1  ;;  %v2743_v48 = vpop.permute.xlu0 %2742 }
 0x1ab   : > { %v4036_v0 = vpop.f32.mrf.mxu0  ;;  %3139 = vmatmul.mubr.bf16.gmra.mxu0 %v2910_v62  ;;  %v2848_v30 = vsel %vm373_vm0, %v2843_v47, %v2847_v9  ;;  %v2869_v47 = vshll.u32 %v4600_v63, 16 }
 0x1ac   : > { %6722 = vst [vmem:[#allocation27_spill] sm:$0xff] %v6069_v19  ;;  %3146 = vmatprep.mubr.bf16.mxu0 %v2943_v15  ;;  %v3994_v12 = vpop.f32.mrf.mxu1 }
 0x1ad   : > { %v4037_v38 = vpop.f32.mrf.mxu0  ;;  %v6073_v1 = vadd.f32 %v3994_v12, %v3993_v31  ;;  %v2857_v31 = vshrl.u32 %v4598_v53, 16 }
 0x1ae   : > { %v4038_v32 = vadd.f32 %v4037_v38, %v4036_v0  ;;  %v3996_v18 = vpop.f32.mrf.mxu1  ;;  %4457 = vmatmul.mubr.msk.bf16.vlgmr.msra.gmra.mxu1 %vm653_vm1, %v2824_v60  ;;  %v2861_v0 = vshll.u32 %v4599_v50, 16  ;;  %v6724_v38 = vld [vmem:[#allocation17_spill] sm:$0xff]  ;;  %v2745_v45 = vpop.permute.xlu0 %2744 }
 0x1af   : > { %v4039_v34 = vpop.f32.mrf.mxu0  ;;  %4460 = vmatprep.mubr.msk.bf16.mxu1 %vm653_vm1, %v2832_v46 }
 0x1b0   : > { %v6081_v11 = vadd.f32 %v4038_v32, %v5993_v27  ;;  %v3997_v28 = vpop.f32.mrf.mxu1  ;;  %v2849_v27 = vshrl.u32 %v4597_v5, 16  ;;  %v2855_v5 = vrot.slane %v2853_v44, 1  ;;  %v2863_v53 = vrot.slane %v2861_v0, 1 }
 0x1b1   : > { %v4040_v35 = vpop.f32.mrf.mxu0  ;;  %v6086_v42 = vadd.f32 %v3997_v28, %v3996_v18  ;;  %v4661_v18 = vld [vmem:[%s4729_s5 + $0x130] sm:$0xff]   ;;  %s3489_s5 = sshll.u32 %s4702_s16, 4 }
 0x1b2   : > { %v4041_v29 = vadd.f32 %v4040_v35, %v4039_v34  ;;  %v3999_v51 = vpop.f32.mrf.mxu1  ;;  %v2851_v46 = vor.u32 %v2849_v27, %v2847_v9  ;;  %v2951_v34 = vsel %vm653_vm1, %v4661_v18, %v2761_v58  ;;  %v2859_v37 = vor.u32 %v2857_v31, %v2855_v5  ;;  %v6725_v27 = vld [vmem:[#allocation18_spill] sm:$0xff]  ;;  %p6395_p4 = scmp.lt.s32.totalorder %s3489_s5, 31 }
 0x1b3   : > { %v4042_v62 = vpop.f32.mrf.mxu0  ;;  %3147 = vmatmul.mubr.bf16.gmra.mxu0 %v2913_v13 }
 0x1b4   : > { %3154 = vmatprep.mubr.bf16.mxu0 %v2947_v59  ;;  %v6090_v10 = vadd.f32 %v4041_v29, %v6002_v55  ;;  %v4000_v15 = vpop.f32.mrf.mxu1  ;;  %v2916_v55 = vsel %vm653_vm1, %v6724_v38, %v2743_v48  ;;  %v2856_v35 = vsel %vm373_vm0, %v2851_v46, %v2855_v5  ;;  %v2865_v59 = vshrl.u32 %v4599_v50, 16  ;;  %s6767_s5 = smov (!%p6395_p4, %s3489_s5), 31 }
 0x1b5   : > { %v4043_v20 = vpop.f32.mrf.mxu0  ;;  %v6093_v4 = vadd.f32 %v4000_v15, %v3999_v51  ;;  %v2864_v51 = vsel %vm373_vm0, %v2859_v37, %v2863_v53  ;;  %v2919_v15 = vsel %vm653_vm1, %v6725_v27, %v2745_v45  ;;  %v2871_v50 = vrot.slane %v2869_v47, 1  ;;  %s3490_s10 = sshll.u32 %s6767_s5, 2 }
 0x1b6   : > { %v4044_v60 = vadd.f32 %v4043_v20, %v4042_v62  ;;  %v4002_v43 = vpop.f32.mrf.mxu1  ;;  %4461 = vmatmul.mubr.msk.bf16.gmra.mxu1 %vm653_vm1, %v2840_v17  ;;  %v2867_v20 = vor.u32 %v2865_v59, %v2863_v53  ;;  %s6453_s13 = scalar_lea.vmem %s6550_s4, %s3490_s10 }
 0x1b7   : > { %v4045_v12 = vpop.f32.mrf.mxu0  ;;  %4464 = vmatprep.mubr.msk.bf16.mxu1 %vm653_vm1, %v2848_v30 }
 0x1b8   : > { %v1935_v25 = vadd.f32 %v4044_v60, %v6017_v26  ;;  %v4003_v32 = vpop.f32.mrf.mxu1 }
 0x1b9   : > { %v4046_v49 = vpop.f32.mrf.mxu0  ;;  %v6103_v24 = vadd.f32 %v4003_v32, %v4002_v43 }
 0x1ba   : > { %v4047_v13 = vadd.f32 %v4046_v49, %v4045_v12  ;;  %v4005_v7 = vpop.f32.mrf.mxu1  ;;  %v2872_v12 = vsel %vm373_vm0, %v2867_v20, %v2871_v50 }
 0x1bb   : > { %v4048_v28 = vpop.f32.mrf.mxu0  ;;  %3155 = vmatmul.mubr.bf16.gmra.mxu0 %v2916_v55 }
 0x1bc   : > { %3162 = vmatprep.mubr.bf16.mxu0 %v2951_v34  ;;  %v1938_v26 = vadd.f32 %v4047_v13, %v6025_v6  ;;  %v4006_v9 = vpop.f32.mrf.mxu1 }
 0x1bd   : > { %v4049_v29 = vpop.f32.mrf.mxu0  ;;  %v6108_v62 = vadd.f32 %v4006_v9, %v4005_v7 }
 0x1be   : > { %v4050_v44 = vadd.f32 %v4049_v29, %v4048_v28  ;;  %v4008_v17 = vpop.f32.mrf.mxu1  ;;  %4465 = vmatmul.mubr.msk.bf16.gmra.mxu1 %vm653_vm1, %v2856_v35 }
 0x1bf   : > { %v4051_v48 = vpop.f32.mrf.mxu0  ;;  %4468 = vmatprep.mubr.msk.bf16.mxu1 %vm653_vm1, %v2864_v51 }
 0x1c0   : > { %v1943_v6 = vadd.f32 %v4050_v44, %v6041_v3  ;;  %v4009_v30 = vpop.f32.mrf.mxu1 }
 0x1c1   : > { %v4052_v31 = vpop.f32.mrf.mxu0  ;;  %v6115_v0 = vadd.f32 %v4009_v30, %v4008_v17 }
 0x1c2   : > { %v4053_v60 = vadd.f32 %v4052_v31, %v4051_v48  ;;  %v4011_v58 = vpop.f32.mrf.mxu1 }
 0x1c3   : > { %v4054_v43 = vpop.f32.mrf.mxu0  ;;  %3163 = vmatmul.mubr.bf16.gmra.mxu0 %v2919_v15 }
 0x1c4   : > { %v1946_v5 = vadd.f32 %v4053_v60, %v6050_v39  ;;  %v4012_v38 = vpop.f32.mrf.mxu1 }
 0x1c5   : > { %v4055_v55 = vpop.f32.mrf.mxu0  ;;  %v6119_v46 = vadd.f32 %v4012_v38, %v4011_v58 }
 0x1c6   : > { %v4056_v63 = vadd.f32 %v4055_v55, %v4054_v43  ;;  %v4014_v32 = vpop.f32.mrf.mxu1  ;;  %4469 = vmatmul.mubr.msk.bf16.gmra.mxu1 %vm653_vm1, %v2872_v12 }
 0x1c7   : > { %v4057_v3 = vpop.f32.mrf.mxu0 }
 0x1c8   : > { %v1951_v49 = vadd.f32 %v4056_v63, %v6066_v54  ;;  %v4015_v18 = vpop.f32.mrf.mxu1 }
 0x1c9   : > { %v4058_v34 = vpop.f32.mrf.mxu0  ;;  %v6123_v37 = vadd.f32 %v4015_v18, %v4014_v32 }
 0x1ca   : > { %v4059_v53 = vadd.f32 %v4058_v34, %v4057_v3  ;;  %v4017_v13 = vpop.f32.mrf.mxu1 }
 0x1cb   : > { %v4060_v7 = vpop.f32.mrf.mxu0 }
 0x1cc   : > { %v1954_v39 = vadd.f32 %v4059_v53, %v6073_v1  ;;  %v4018_v28 = vpop.f32.mrf.mxu1 }
 0x1cd   : > { %v4061_v35 = vpop.f32.mrf.mxu0  ;;  %v6126_v45 = vadd.f32 %v4018_v28, %v4017_v13 }
 0x1ce   : > { %v4062_v59 = vadd.f32 %v4061_v35, %v4060_v7  ;;  %v4410_v47 = vpop.f32.mrf.mxu1 }
 0x1cf   : > { %v4063_v9 = vpop.f32.mrf.mxu0  ;;  %v6128_v29 = vadd.f32 %v4410_v47, %v1935_v25 }
 0x1d0   : > { %v1959_v54 = vadd.f32 %v4062_v59, %v6086_v42  ;;  %v2023_v51 = vpop.f32.mrf.mxu1 }
 0x1d1   : > { %v4064_v44 = vpop.f32.mrf.mxu0  ;;  %v6134_v48 = vadd.f32 %v2023_v51, %v6081_v11 }
 0x1d2   : > { %v4065_v1 = vadd.f32 %v4064_v44, %v4063_v9  ;;  %v4411_v27 = vpop.f32.mrf.mxu1 }
 0x1d3   : > { %v4066_v15 = vpop.f32.mrf.mxu0  ;;  %v6138_v50 = vadd.f32 %v4411_v27, %v1938_v26 }
 0x1d4   : > { %v1962_v25 = vadd.f32 %v4065_v1, %v6093_v4  ;;  %v2026_v30 = vpop.f32.mrf.mxu1 }
 0x1d5   : > { %v4067_v42 = vpop.f32.mrf.mxu0  ;;  %v6144_v60 = vadd.f32 %v2026_v30, %v6090_v10 }
 0x1d6   : > { %v4068_v11 = vadd.f32 %v4067_v42, %v4066_v15  ;;  %v4414_v58 = vpop.f32.mrf.mxu1 }
 0x1d7   : > { %v4069_v43 = vpop.f32.mrf.mxu0  ;;  %v6148_v38 = vadd.f32 %v4414_v58, %v1951_v49 }
 0x1d8   : > { %v1967_v26 = vadd.f32 %v4068_v11, %v6103_v24  ;;  %v2039_v55 = vpop.f32.mrf.mxu1 }
 0x1d9   : > { %v4070_v4 = vpop.f32.mrf.mxu0  ;;  %v6153_v32 = vadd.f32 %v2039_v55, %v1943_v6 }
 0x1da   : > { %v4071_v3 = vadd.f32 %v4070_v4, %v4069_v43  ;;  %v4415_v10 = vpop.f32.mrf.mxu1 }
 0x1db   : > { %v4072_v18 = vpop.f32.mrf.mxu0  ;;  %v6157_v53 = vadd.f32 %v4415_v10, %v1954_v39 }
 0x1dc   : > { %v1970_v49 = vadd.f32 %v4071_v3, %v6108_v62  ;;  %v2042_v13 = vpop.f32.mrf.mxu1 }
 0x1dd   : > { %v4073_v7 = vpop.f32.mrf.mxu0  ;;  %v6162_v28 = vadd.f32 %v2042_v13, %v1946_v5 }
 0x1de   : > { %v4074_v35 = vadd.f32 %v4073_v7, %v4072_v18  ;;  %v4418_v6 = vpop.f32.mrf.mxu1 }
 0x1df   : > { %v4075_v59 = vpop.f32.mrf.mxu0  ;;  %v6166_v9 = vadd.f32 %v4418_v6, %v1967_v26 }
 0x1e0   : > { %v1975_v39 = vadd.f32 %v4074_v35, %v6115_v0  ;;  %v2055_v51 = vpop.f32.mrf.mxu1 }
 0x1e1   : > { %v4076_v44 = vpop.f32.mrf.mxu0  ;;  %v6171_v1 = vadd.f32 %v2055_v51, %v1959_v54 }
 0x1e2   : > { %v4077_v27 = vadd.f32 %v4076_v44, %v4075_v59  ;;  %v4419_v5 = vpop.f32.mrf.mxu1 }
 0x1e3   : > { %v4078_v15 = vpop.f32.mrf.mxu0  ;;  %v6175_v42 = vadd.f32 %v4419_v5, %v1970_v49 }
 0x1e4   : > { %v1978_v11 = vadd.f32 %v4077_v27, %v6119_v46  ;;  %v2058_v58 = vpop.f32.mrf.mxu1 }
 0x1e5   : > { %v4079_v43 = vpop.f32.mrf.mxu0  ;;  %v6180_v26 = vadd.f32 %v2058_v58, %v1962_v25 }
 0x1e6   : > { %v4080_v55 = vadd.f32 %v4079_v43, %v4078_v15  ;;  %v4422_v54 = vpop.f32.mrf.mxu1 }
 0x1e7   : > { %v4081_v4 = vpop.f32.mrf.mxu0 }
 0x1e8   : > { %v1983_v10 = vadd.f32 %v4080_v55, %v6123_v37  ;;  %v2071_v18 = vpop.f32.mrf.mxu1 }
 0x1e9   : > { %v4082_v49 = vpop.f32.mrf.mxu0  ;;  %v6187_v46 = vadd.f32 %v2071_v18, %v1975_v39 }
 0x1ea   : > { %v6185_v13 = vadd.f32 %v4422_v54, %v1983_v10  ;;  %v4083_v7 = vadd.f32 %v4082_v49, %v4081_v4  ;;  %v4423_v35 = vpop.f32.mrf.mxu1 }
 0x1eb   : > { %v4112_v6 = vpop.f32.mrf.mxu0 }
 0x1ec   : > { %v1986_v51 = vadd.f32 %v4083_v7, %v6126_v45  ;;  %v2074_v44 = vpop.f32.mrf.mxu1 }
 0x1ed   : > { %v4113_v27 = vpop.f32.mrf.mxu0  ;;  %v6196_v5 = vadd.f32 %v2074_v44, %v1978_v11 }
 0x1ee   : > { %v6194_v37 = vadd.f32 %v4423_v35, %v1986_v51  ;;  %v4114_v15 = vadd.f32 %v4113_v27, %v4112_v6  ;;  %v4176_v39 = vpop.f32.mrf.mxu1 }
 0x1ef   : > { %6727 = vst [vmem:[#allocation5_spill] sm:$0xff] %v6196_v5  ;;  %v4115_v58 = vpop.f32.mrf.mxu0 }
 0x1f0   : > { %6726 = vst [vmem:[#allocation4_spill] sm:$0xff] %v6194_v37  ;;  %v4177_v54 = vpop.f32.mrf.mxu1 }
 0x1f1   : > { %v4116_v4 = vpop.f32.mrf.mxu0  ;;  %v4178_v10 = vadd.f32 %v4177_v54, %v4176_v39 }
 0x1f2   : > { %v4117_v18 = vadd.f32 %v4116_v4, %v4115_v58  ;;  %v4179_v45 = vpop.f32.mrf.mxu1 }
 0x1f3   : > { %v4118_v49 = vpop.f32.mrf.mxu0  ;;  %v6202_v7 = vadd.f32 %v4178_v10, %v4114_v15 }
 0x1f4   : > { %v4180_v35 = vpop.f32.mrf.mxu1 }
 0x1f5   : > { %v4119_v11 = vpop.f32.mrf.mxu0  ;;  %v4181_v51 = vadd.f32 %v4180_v35, %v4179_v45 }
 0x1f6   : > { %v4120_v6 = vadd.f32 %v4119_v11, %v4118_v49  ;;  %v4182_v44 = vpop.f32.mrf.mxu1 }
 0x1f7   : > { %v4121_v27 = vpop.f32.mrf.mxu0  ;;  %v6204_v59 = vadd.f32 %v4181_v51, %v4117_v18 }
 0x1f8   : > { %v4183_v43 = vpop.f32.mrf.mxu1 }
 0x1f9   : > { %v4122_v25 = vpop.f32.mrf.mxu0  ;;  %v4184_v3 = vadd.f32 %v4183_v43, %v4182_v44 }
 0x1fa   : > { %v4123_v55 = vadd.f32 %v4122_v25, %v4121_v27  ;;  %v4185_v0 = vpop.f32.mrf.mxu1 }
 0x1fb   : > { %v4124_v30 = vpop.f32.mrf.mxu0  ;;  %v6206_v39 = vadd.f32 %v4184_v3, %v4120_v6 }
 0x1fc   : > { %v4186_v58 = vpop.f32.mrf.mxu1 }
 0x1fd   : > { %v4125_v54 = vpop.f32.mrf.mxu0  ;;  %v4187_v15 = vadd.f32 %v4186_v58, %v4185_v0 }
 0x1fe   : > { %v4126_v4 = vadd.f32 %v4125_v54, %v4124_v30  ;;  %v4188_v10 = vpop.f32.mrf.mxu1 }
 0x1ff   : > { %v4127_v62 = vpop.f32.mrf.mxu0  ;;  %v6208_v45 = vadd.f32 %v4187_v15, %v4123_v55 }
 0x200   : > { %v4189_v49 = vpop.f32.mrf.mxu1 }
 0x201   : > { %v4128_v35 = vpop.f32.mrf.mxu0  ;;  %v4190_v18 = vadd.f32 %v4189_v49, %v4188_v10 }
 0x202   : > { %v4129_v11 = vadd.f32 %v4128_v35, %v4127_v62  ;;  %v4191_v51 = vpop.f32.mrf.mxu1 }
 0x203   : > { %v4130_v47 = vpop.f32.mrf.mxu0  ;;  %v6210_v43 = vadd.f32 %v4190_v18, %v4126_v4 }
 0x204   : > { %v4192_v25 = vpop.f32.mrf.mxu1 }
 0x205   : > { %v4131_v44 = vpop.f32.mrf.mxu0  ;;  %v4193_v3 = vadd.f32 %v4192_v25, %v4191_v51 }
 0x206   : > { %v4132_v6 = vadd.f32 %v4131_v44, %v4130_v47  ;;  %v4194_v27 = vpop.f32.mrf.mxu1 }
 0x207   : > { %v4133_v24 = vpop.f32.mrf.mxu0  ;;  %v6212_v0 = vadd.f32 %v4193_v3, %v4129_v11 }
 0x208   : > { %v4195_v30 = vpop.f32.mrf.mxu1 }
 0x209   : > { %v4134_v58 = vpop.f32.mrf.mxu0  ;;  %v4196_v55 = vadd.f32 %v4195_v30, %v4194_v27 }
 0x20a   : > { %v4135_v54 = vadd.f32 %v4134_v58, %v4133_v24  ;;  %v4197_v15 = vpop.f32.mrf.mxu1 }
 0x20b   : > { %v4136_v34 = vpop.f32.mrf.mxu0  ;;  %v6214_v10 = vadd.f32 %v4196_v55, %v4132_v6 }
 0x20c   : > { %v4198_v62 = vpop.f32.mrf.mxu1 }
 0x20d   : > { %v4137_v49 = vpop.f32.mrf.mxu0  ;;  %v4199_v4 = vadd.f32 %v4198_v62, %v4197_v15 }
 0x20e   : > { %v4138_v35 = vadd.f32 %v4137_v49, %v4136_v34  ;;  %v4200_v18 = vpop.f32.mrf.mxu1 }
 0x20f   : > { %v4139_v63 = vpop.f32.mrf.mxu0  ;;  %v6216_v51 = vadd.f32 %v4199_v4, %v4135_v54 }
 0x210   : > { %v4201_v47 = vpop.f32.mrf.mxu1 }
 0x211   : > { %v4140_v25 = vpop.f32.mrf.mxu0  ;;  %v4202_v11 = vadd.f32 %v4201_v47, %v4200_v18 }
 0x212   : > { %v4141_v44 = vadd.f32 %v4140_v25, %v4139_v63  ;;  %v4203_v3 = vpop.f32.mrf.mxu1 }
 0x213   : > { %v4142_v12 = vpop.f32.mrf.mxu0  ;;  %v6218_v27 = vadd.f32 %v4202_v11, %v4138_v35 }
 0x214   : > { %v4204_v24 = vpop.f32.mrf.mxu1 }
 0x215   : > { %v4143_v30 = vpop.f32.mrf.mxu0  ;;  %v4205_v6 = vadd.f32 %v4204_v24, %v4203_v3 }
 0x216   : > { %v4144_v58 = vadd.f32 %v4143_v30, %v4142_v12  ;;  %v4206_v55 = vpop.f32.mrf.mxu1 }
 0x217   : > { %v4145_v31 = vpop.f32.mrf.mxu0  ;;  %v6220_v15 = vadd.f32 %v4205_v6, %v4141_v44 }
 0x218   : > { %v4207_v34 = vpop.f32.mrf.mxu1 }
 0x219   : > { %v4146_v62 = vpop.f32.mrf.mxu0  ;;  %v4208_v54 = vadd.f32 %v4207_v34, %v4206_v55 }
 0x21a   : > { %v4147_v49 = vadd.f32 %v4146_v62, %v4145_v31  ;;  %v4209_v4 = vpop.f32.mrf.mxu1 }
 0x21b   : > { %v4148_v20 = vpop.f32.mrf.mxu0  ;;  %v6222_v18 = vadd.f32 %v4208_v54, %v4144_v58 }
 0x21c   : > { %v4210_v63 = vpop.f32.mrf.mxu1 }
 0x21d   : > { %v4149_v47 = vpop.f32.mrf.mxu0  ;;  %v4211_v35 = vadd.f32 %v4210_v63, %v4209_v4 }
 0x21e   : > { %v4150_v25 = vadd.f32 %v4149_v47, %v4148_v20  ;;  %v4212_v11 = vpop.f32.mrf.mxu1 }
 0x21f   : > { %v4151_v17 = vpop.f32.mrf.mxu0  ;;  %v6224_v3 = vadd.f32 %v4211_v35, %v4147_v49 }
 0x220   : > { %v4213_v12 = vpop.f32.mrf.mxu1 }
 0x221   : > { %v4152_v24 = vpop.f32.mrf.mxu0  ;;  %v4214_v44 = vadd.f32 %v4213_v12, %v4212_v11 }
 0x222   : > { %v4153_v30 = vadd.f32 %v4152_v24, %v4151_v17  ;;  %v4215_v6 = vpop.f32.mrf.mxu1  ;;  %v6728_v24 = vmax.f32 %v5975_v52, %v6128_v29  ;;  %v6730_v52 = vmax.f32 %v5984_v14, %v6138_v50  ;;  %v6732_v14 = vmax.f32 %v5999_v21, %v6148_v38 }
 0x223   : > { %v4154_v5 = vpop.f32.mrf.mxu0  ;;  %v6226_v55 = vadd.f32 %v4214_v44, %v4150_v25  ;;  %v6734_v21 = vmax.f32 %v6009_v61, %v6157_v53  ;;  %v6736_v61 = vmax.f32 %v6023_v41, %v6166_v9  ;;  %v6738_v41 = vmax.f32 %v6033_v16, %v6175_v42 }
 0x224   : > { %v4216_v31 = vpop.f32.mrf.mxu1 }
 0x225   : > { %v4155_v34 = vpop.f32.mrf.mxu0  ;;  %v4217_v58 = vadd.f32 %v4216_v31, %v4215_v6 }
 0x226   : > { %v4156_v62 = vadd.f32 %v4155_v34, %v4154_v5  ;;  %v4218_v54 = vpop.f32.mrf.mxu1 }
 0x227   : > { %v4157_v19 = vpop.f32.mrf.mxu0  ;;  %v6228_v4 = vadd.f32 %v4217_v58, %v4153_v30 }
 0x228   : > { %v4219_v20 = vpop.f32.mrf.mxu1 }
 0x229   : > { %v4158_v63 = vpop.f32.mrf.mxu0  ;;  %v4220_v49 = vadd.f32 %v4219_v20, %v4218_v54 }
 0x22a   : > { %v4159_v47 = vadd.f32 %v4158_v63, %v4157_v19  ;;  %v4221_v35 = vpop.f32.mrf.mxu1  ;;  %v6729_v19 = vmax.f32 %v5980_v33, %v6134_v48  ;;  %v6731_v33 = vmax.f32 %v5996_v36, %v6144_v60  ;;  %v6733_v36 = vmax.f32 %v6005_v2, %v6153_v32 }
 0x22b   : > { %v4434_v37 = vpop.f32.mrf.mxu0  ;;  %v2594_v11 = vadd.f32 %v4220_v49, %v4156_v62  ;;  %v6735_v2 = vmax.f32 %v6020_v22, %v6162_v28  ;;  %v6737_v22 = vmax.f32 %v6028_v57, %v6171_v1  ;;  %v6740_v57 = vmax.f32 %v6044_v40, %v6180_v26 }
 0x22c   : > { %v2643_v17 = vadd.f32 %v4434_v37, %v6206_v39  ;;  %v4222_v12 = vpop.f32.mrf.mxu1 }
 0x22d   : > { %v2634_v25 = vpop.f32.mrf.mxu0  ;;  %v4223_v5 = vadd.f32 %v4222_v12, %v4221_v35 }
 0x22e   : > { %v6234_v44 = vmax.f32 %v6728_v24, %v2643_v17  ;;  %v2635_v30 = vadd.f32 %v2634_v25, %v6202_v7  ;;  %v6237_v6 = vpop.f32.mrf.mxu1 }
 0x22f   : > { %v4435_v31 = vpop.f32.mrf.mxu0  ;;  %v2597_v39 = vadd.f32 %v4223_v5, %v4159_v47 }
 0x230   : > { %v6242_v34 = vmax.f32 %v6729_v19, %v2635_v30  ;;  %v2646_v37 = vadd.f32 %v4435_v31, %v6208_v45  ;;  %v6245_v58 = vpop.f32.mrf.mxu1 }
 0x231   : > { %v2637_v62 = vpop.f32.mrf.mxu0 }
 0x232   : > { %v6250_v29 = vmax.f32 %v6730_v52, %v2646_v37  ;;  %v2638_v7 = vadd.f32 %v2637_v62, %v6204_v59  ;;  %v6253_v54 = vpop.f32.mrf.mxu1 }
 0x233   : > { %v4438_v20 = vpop.f32.mrf.mxu0 }
 0x234   : > { %v6258_v48 = vmax.f32 %v6731_v33, %v2638_v7  ;;  %v2659_v45 = vadd.f32 %v4438_v20, %v6214_v10  ;;  %v6261_v63 = vpop.f32.mrf.mxu1 }
 0x235   : > { %v2650_v49 = vpop.f32.mrf.mxu0 }
 0x236   : > { %v6266_v50 = vmax.f32 %v6732_v14, %v2659_v45  ;;  %v2651_v59 = vadd.f32 %v2650_v49, %v6210_v43  ;;  %v6269_v47 = vpop.f32.mrf.mxu1  ;;  %v6742_v45 = vmax.f32 %v6047_v56, %v6185_v13  ;;  %v6744_v14 = vmax.f32 %v6053_v23, %v6187_v46 }
 0x237   : > { %v4439_v35 = vpop.f32.mrf.mxu0 }
 0x238   : > { %v6274_v60 = vmax.f32 %v6733_v36, %v2651_v59  ;;  %v2662_v10 = vadd.f32 %v4439_v35, %v6216_v51  ;;  %v6277_v17 = vpop.f32.mrf.mxu1  ;;  %v6746_v35 = vld [vmem:[#allocation4_spill] sm:$0xff] }
 0x239   : > { %v2653_v12 = vpop.f32.mrf.mxu0  ;;  %v6747_v36 = vmax.f32 %v6058_v8, %v6746_v35 }
 0x23a   : > { %v6282_v38 = vmax.f32 %v6734_v21, %v2662_v10  ;;  %v2654_v43 = vadd.f32 %v2653_v12, %v6212_v0  ;;  %v6285_v25 = vpop.f32.mrf.mxu1  ;;  %v6749_v12 = vld [vmem:[#allocation27_spill] sm:$0xff]  ;;  %v6750_v21 = vld [vmem:[#allocation5_spill] sm:$0xff] }
 0x23b   : > { %v4442_v24 = vpop.f32.mrf.mxu0 }
 0x23c   : > { %v6290_v32 = vmax.f32 %v6735_v2, %v2654_v43  ;;  %v2675_v51 = vadd.f32 %v4442_v24, %v6222_v18  ;;  %v6293_v5 = vpop.f32.mrf.mxu1  ;;  %v6751_v43 = vmax.f32 %v6749_v12, %v6750_v21 }
 0x23d   : > { %v2666_v30 = vpop.f32.mrf.mxu0 }
 0x23e   : > { %v6298_v53 = vmax.f32 %v6736_v61, %v2675_v51  ;;  %v2667_v0 = vadd.f32 %v2666_v30, %v6218_v27  ;;  %v6301_v31 = vpop.f32.mrf.mxu1 }
 0x23f   : > { %v4443_v19 = vpop.f32.mrf.mxu0 }
 0x240   : > { %v6306_v28 = vmax.f32 %v6737_v22, %v2667_v0  ;;  %v2678_v18 = vadd.f32 %v4443_v19, %v6224_v3  ;;  %v6309_v37 = vpop.f32.mrf.mxu1 }
 0x241   : > { %v2669_v62 = vpop.f32.mrf.mxu0 }
 0x242   : > { %v6314_v9 = vmax.f32 %v6738_v41, %v2678_v18  ;;  %v2670_v27 = vadd.f32 %v2669_v62, %v6220_v15  ;;  %v6317_v52 = vpop.f32.mrf.mxu1 }
 0x243   : > { %v4446_v7 = vpop.f32.mrf.mxu0 }
 0x244   : > { %6739 = vst [vmem:[#allocation6_spill] sm:$0xff] %v6314_v9  ;;  %v6322_v1 = vmax.f32 %v6740_v57, %v2670_v27  ;;  %v2691_v20 = vadd.f32 %v4446_v7, %v2594_v11  ;;  %v6324_v3 = vpop.f32.mrf.mxu1  ;;  %v4254_v9 = vadd.f32 %v6245_v58, %v6237_v6  ;;  %v6408_v6 = vld [vmem:[%s6548_s2] ss:$0 sm:$0xff] }
 0x245   : > { %v2682_v33 = vpop.f32.mrf.mxu0 }
 0x246   : > { %6741 = vst [vmem:[#allocation7_spill] sm:$0xff] %v6322_v1  ;;  %v6329_v16 = vmax.f32 %v6742_v45, %v2691_v20  ;;  %v2683_v42 = vadd.f32 %v2682_v33, %v6226_v55  ;;  %v6332_v15 = vpop.f32.mrf.mxu1 }
 0x247   : > { %v4447_v49 = vpop.f32.mrf.mxu0 }
 0x248   : > { %6743 = vst [vmem:[#allocation8_spill] sm:$0xff] %v6329_v16  ;;  %v6337_v40 = vmax.f32 %v6744_v14, %v2683_v42  ;;  %v2694_v26 = vadd.f32 %v4447_v49, %v2597_v39  ;;  %v6339_v11 = vpop.f32.mrf.mxu1 }
 0x249   : > { %v2685_v59 = vpop.f32.mrf.mxu0 }
 0x24a   : > { %6745 = vst [vmem:[#allocation9_spill] sm:$0xff] %v6337_v40  ;;  %v6344_v56 = vmax.f32 %v6747_v36, %v2694_v26  ;;  %v2686_v13 = vadd.f32 %v2685_v59, %v6228_v4  ;;  %v6347_v55 = vpop.f32.mrf.mxu1 }
 0x24b   : > { %v4316_v10 = vpop.f32.mrf.mxu0 }
 0x24c   : > { %6748 = vst [vmem:[#allocation21_spill] sm:$0xff] %v6344_v56  ;;  %v6352_v23 = vmax.f32 %v6751_v43, %v2686_v13  ;;  %v4274_v46 = vpop.f32.mrf.mxu1  ;;  %v4260_v56 = vadd.f32 %v6277_v17, %v6269_v47  ;;  %v4263_v47 = vadd.f32 %v6293_v5, %v6285_v25 }
 0x24d   : > { %v4317_v39 = vpop.f32.mrf.mxu0 }
 0x24e   : > { %6752 = vst [vmem:[#allocation23_spill] sm:$0xff] %v6352_v23  ;;  %v6354_v24 = vpop.f32.mrf.mxu1  ;;  %v4318_v16 = vadd.f32 %v4317_v39, %v4316_v10 }
 0x24f   : > { %v4319_v2 = vpop.f32.mrf.mxu0 }
 0x250   : > { %v6356_v51 = vpop.f32.mrf.mxu1  ;;  %v3109_v39 = vadd.f32 %v4318_v16, %v4254_v9  ;;  %v4275_v16 = vadd.f32 %v4274_v46, %v6347_v55 }
 0x251   : > { %v4320_v8 = vpop.f32.mrf.mxu0 }
 0x252   : > { %v6358_v30 = vpop.f32.mrf.mxu1  ;;  %v4321_v17 = vadd.f32 %v4320_v8, %v4319_v2 }
 0x253   : > { %v4322_v61 = vpop.f32.mrf.mxu0 }
 0x254   : > { %v4280_v4 = vpop.f32.mrf.mxu1 }
 0x255   : > { %v4323_v0 = vpop.f32.mrf.mxu0 }
 0x256   : > { %v6360_v19 = vpop.f32.mrf.mxu1  ;;  %v4324_v21 = vadd.f32 %v4323_v0, %v4322_v61 }
 0x257   : > { %v4325_v22 = vpop.f32.mrf.mxu0 }
 0x258   : > { %v6362_v18 = vpop.f32.mrf.mxu1  ;;  %v3117_v61 = vadd.f32 %v4324_v21, %v4260_v56 }
 0x259   : > { %v4326_v62 = vpop.f32.mrf.mxu0 }
 0x25a   : > { %v6364_v41 = vpop.f32.mrf.mxu1 }
 0x25b   : > { %v4328_v27 = vpop.f32.mrf.mxu0 }
 0x25c   : > { %v6366_v7 = vpop.f32.mrf.mxu1 }
 0x25d   : > { %v4329_v57 = vpop.f32.mrf.mxu0 }
 0x25e   : > { %v6368_v20 = vpop.f32.mrf.mxu1 }
 0x25f   : > { %v6370_v33 = vpop.f32.mrf.mxu0 }
 0x260   : > { %v6372_v45 = vpop.f32.mrf.mxu1 }
 0x261   : > { %v4332_v42 = vpop.f32.mrf.mxu0 }
 0x262   : > { %v6374_v49 = vpop.f32.mrf.mxu1 }
 0x263   : > { %v4334_v14 = vpop.f32.mrf.mxu0 }
 0x264   : > { %v6376_v26 = vpop.f32.mrf.mxu1 }
 0x265   : > { %v4335_v59 = vpop.f32.mrf.mxu0 }
 0x266   : > { %v6378_v35 = vpop.f32.mrf.mxu1  ;;  %v4336_v2 = vadd.f32 %v4335_v59, %v4334_v14 }
 0x267   : > { %6753 = vst [vmem:[#allocation52_spill] sm:$0xff] %v6378_v35  ;;  %v4337_v36 = vpop.f32.mrf.mxu0  ;;  %v4327_v35 = vadd.f32 %v4326_v62, %v4325_v22  ;;  %v4266_v22 = vadd.f32 %v6309_v37, %v6301_v31  ;;  %v6427_v31 = vld [vmem:[%s6549_s3] ss:$0 sm:$0xff] }
 0x268   : > { %v6380_v13 = vpop.f32.mrf.mxu1 }
 0x269   : > { %v4338_v12 = vpop.f32.mrf.mxu0  ;;  %v3120_v9 = vadd.f32 %v4327_v35, %v4263_v47 }
 0x26a   : > { %v6382_v43 = vpop.f32.mrf.mxu1  ;;  %v4339_v55 = vadd.f32 %v4338_v12, %v4337_v36 }
 0x26b   : > { %6754 = vst [vmem:[#allocation3_spill] sm:$0xff] %v6382_v43  ;;  %v6384_v23 = vpop.f32.mrf.mxu0 }
 0x26c   : > { %v6389_v40 = vpop.f32.mrf.mxu1 }
 0x26d   : > { %6755 = vst [vmem:[#allocation40_spill] sm:$0xff] %v6389_v40  ;;  %v6391_v1 = vpop.f32.mrf.mxu0  ;;  %v4257_v40 = vadd.f32 %v6261_v63, %v6253_v54  ;;  %v4269_v54 = vadd.f32 %v6324_v3, %v6317_v52  ;;  %v4272_v63 = vadd.f32 %v6339_v11, %v6332_v15  ;;  %v4278_v3 = vadd.f32 %v6356_v51, %v6354_v24 }
 0x26e   : > { %v4458_v0 = vpop.f32.mrf.mxu1  ;;  %v6434_v15 = vadd.f32 %v4280_v4, %v6358_v30  ;;  %v4330_v11 = vadd.f32 %v4329_v57, %v4328_v27  ;;  %v6444_v24 = vadd.f32 %v6366_v7, %v6364_v41  ;;  %v4333_v51 = vadd.f32 %v4332_v42, %v6370_v33 }
 0x26f   : > { %v6399_v43 = vpop.f32.mrf.mxu0  ;;  %v3214_v10 = vadd.f32 %v4458_v0, %v3117_v61  ;;  %v3112_v52 = vadd.f32 %v4321_v17, %v4257_v40  ;;  %v4284_v40 = vadd.f32 %v6362_v18, %v6360_v19  ;;  %v3133_v30 = vadd.f32 %v4336_v2, %v4272_v63 }
 0x270   : > { %v3205_v58 = vpop.f32.mrf.mxu1  ;;  %v3125_v41 = vadd.f32 %v4330_v11, %v4266_v22  ;;  %v3136_v42 = vadd.f32 %v4339_v55, %v4275_v16 }
 0x271   : > { %v6410_v56 = vpop.f32.mrf.mxu0  ;;  %v3270_v25 = vmax.f32 %v6234_v44, %v3214_v10  ;;  %v3206_v5 = vadd.f32 %v3205_v58, %v3109_v39 }
 0x272   : > { %v4459_v37 = vpop.f32.mrf.mxu1 }
 0x273   : > { %v4346_v8 = vpop.f32.mrf.mxu0  ;;  %v3293_v44 = vmul.f32 %v6408_v6, %v3270_v25  ;;  %v3268_v62 = vmax.f32 %v6242_v34, %v3206_v5  ;;  %v3217_v35 = vadd.f32 %v4459_v37, %v3120_v9  ;;  %v3128_v9 = vadd.f32 %v4333_v51, %v4269_v54 }
 0x274   : > { %v3208_v46 = vpop.f32.mrf.mxu1  ;;  %v4290_v37 = vadd.f32 %v6372_v45, %v6368_v20 }
 0x275   : > { %v4347_v14 = vpop.f32.mrf.mxu0  ;;  %v3316_v59 = vadd.f32 %v6427_v31, %v3293_v44  ;;  %v3291_v21 = vmul.f32 %v6408_v6, %v3268_v62  ;;  %v3271_v61 = vmax.f32 %v6250_v29, %v3217_v35  ;;  %v3209_v34 = vadd.f32 %v3208_v46, %v3112_v52 }
 0x276   : > { %v4462_v4 = vpop.f32.mrf.mxu1  ;;  %v4348_v19 = vadd.f32 %v4347_v14, %v4346_v8 }
 0x277   : > { %v4349_v27 = vpop.f32.mrf.mxu0  ;;  %v3332_v57 = vmax.f32 %v3316_v59, 0.0  ;;  %v3314_v36 = vadd.f32 %v6427_v31, %v3291_v21  ;;  %v3294_v12 = vmul.f32 %v6408_v6, %v3271_v61  ;;  %v3269_v29 = vmax.f32 %v6258_v48, %v3209_v34 }
 0x278   : > { %v3230_v18 = vadd.f32 %v4462_v4, %v3133_v30  ;;  %v3221_v7 = vpop.f32.mrf.mxu1  ;;  %v4342_v48 = vadd.f32 %v6391_v1, %v6384_v23  ;;  %v3149_v44 = vadd.f32 %v4348_v19, %v4284_v40  ;;  %v4345_v34 = vadd.f32 %v6410_v56, %v6399_v43 }
 0x279   : > { %v4350_v33 = vpop.f32.mrf.mxu0  ;;  %v3802_v0 = vpack.c.bf16 %v3332_v57, %v3332_v57  ;;  %v3330_v47 = vmax.f32 %v3314_v36, 0.0  ;;  %v3317_v17 = vadd.f32 %v6427_v31, %v3294_v12  ;;  %v3292_v10 = vmul.f32 %v6408_v6, %v3269_v29 }
 0x27a   : > { %v3274_v39 = vmax.f32 %v6266_v50, %v3230_v18  ;;  %v3222_v58 = vadd.f32 %v3221_v7, %v3125_v41  ;;  %v4463_v25 = vpop.f32.mrf.mxu1  ;;  %v4351_v20 = vadd.f32 %v4350_v33, %v4349_v27  ;;  %v3141_v14 = vadd.f32 %v4342_v48, %v4278_v3  ;;  %v6757_v7 = vld [vmem:[#allocation52_spill] sm:$0xff] }
 0x27b   : > { %v4352_v5 = vpop.f32.mrf.mxu0  ;;  %3413 = vst.msk [vmem:[%s6453_s13 + $0x8] sm:$0xf] %vm3410_vm2, %v3802_v0  ;;  %v3800_v22 = vpack.c.bf16 %v3330_v47, %v3330_v47  ;;  %v3333_v63 = vmax.f32 %v3317_v17, 0.0  ;;  %v3315_v16 = vadd.f32 %v6427_v31, %v3292_v10  ;;  %v3233_v2 = vadd.f32 %v4463_v25, %v3136_v42 }
 0x27c   : > { %v3297_v8 = vmul.f32 %v6408_v6, %v3274_v39  ;;  %v3272_v50 = vmax.f32 %v6274_v60, %v3222_v58  ;;  %v3224_v1 = vpop.f32.mrf.mxu1  ;;  %v3152_v43 = vadd.f32 %v4351_v20, %v6444_v24  ;;  %v4296_v33 = vadd.f32 %v6380_v13, %v6757_v7 }
 0x27d   : > { %v4353_v23 = vpop.f32.mrf.mxu0  ;;  %3411 = vst.msk [vmem:[%s6453_s13] sm:$0xf] %vm3410_vm2, %v3800_v22  ;;  %v3803_v54 = vpack.c.bf16 %v3333_v63, %v3333_v63  ;;  %v3331_v62 = vmax.f32 %v3315_v16, 0.0  ;;  %v3275_v35 = vmax.f32 %v6282_v38, %v3233_v2  ;;  %v3225_v52 = vadd.f32 %v3224_v1, %v3128_v9 }
 0x27e   : > { %v3320_v11 = vadd.f32 %v6427_v31, %v3297_v8  ;;  %v3295_v55 = vmul.f32 %v6408_v6, %v3272_v50  ;;  %v4466_v45 = vpop.f32.mrf.mxu1  ;;  %v6478_v38 = vadd.f32 %v6376_v26, %v6374_v49  ;;  %v4354_v36 = vadd.f32 %v4353_v23, %v4352_v5  ;;  %v6759_v8 = vld [vmem:[#allocation3_spill] sm:$0xff]  ;;  %v6760_v50 = vld [vmem:[#allocation40_spill] sm:$0xff] }
 0x27f   : > { %v4355_v46 = vpop.f32.mrf.mxu0  ;;  %3414 = vst.msk [vmem:[%s6453_s13 + $0xc] sm:$0xf] %vm3410_vm2, %v3803_v54  ;;  %v3801_v60 = vpack.c.bf16 %v3331_v62, %v3331_v62  ;;  %v3298_v59 = vmul.f32 %v6408_v6, %v3275_v35  ;;  %v3273_v21 = vmax.f32 %v6290_v32, %v3225_v52  ;;  %v3246_v61 = vadd.f32 %v4466_v45, %v3149_v44  ;;  %v6761_v44 = vld [vmem:[#allocation7_spill] sm:$0xff] }
 0x280   : > { %v3336_v40 = vmax.f32 %v3320_v11, 0.0  ;;  %v3318_v51 = vadd.f32 %v6427_v31, %v3295_v55  ;;  %v3237_v30 = vpop.f32.mrf.mxu1  ;;  %v3144_v24 = vadd.f32 %v4345_v34, %v6434_v15  ;;  %v3157_v22 = vadd.f32 %v4354_v36, %v4290_v37 }
 0x281   : > { %v4356_v3 = vpop.f32.mrf.mxu0  ;;  %3412 = vst.msk [vmem:[%s6453_s13 + $0x4] sm:$0xf] %vm3410_vm2, %v3801_v60  ;;  %v3321_v4 = vadd.f32 %v6427_v31, %v3298_v59  ;;  %v3296_v32 = vmul.f32 %v6408_v6, %v3273_v21  ;;  %v3278_v27 = vmax.f32 %v6298_v53, %v3246_v61  ;;  %v3238_v57 = vadd.f32 %v3237_v30, %v3141_v14  ;;  %v6762_v21 = vld [vmem:[#allocation9_spill] sm:$0xff] }
 0x282   : > { %v3806_v49 = vpack.c.bf16 %v3336_v40, %v3336_v40  ;;  %v3334_v26 = vmax.f32 %v3318_v51, 0.0  ;;  %v4467_v56 = vpop.f32.mrf.mxu1  ;;  %v4357_v2 = vadd.f32 %v4356_v3, %v4355_v46  ;;  %v4299_v1 = vadd.f32 %v6760_v50, %v6759_v8  ;;  %v6763_v3 = vld [vmem:[#allocation8_spill] sm:$0xff] }
 0x283   : > { %v4358_v12 = vpop.f32.mrf.mxu0  ;;  %v3337_v29 = vmax.f32 %v3321_v4, 0.0  ;;  %v3319_v19 = vadd.f32 %v6427_v31, %v3296_v32  ;;  %v3301_v18 = vmul.f32 %v6408_v6, %v3278_v27  ;;  %v3276_v41 = vmax.f32 %v6306_v28, %v3238_v57  ;;  %v6758_v28 = vld [vmem:[#allocation6_spill] sm:$0xff] }
 0x284   : > { %3417 = vst.msk [vmem:[%s6453_s13 + $0x18] sm:$0xf] %vm3410_vm2, %v3806_v49  ;;  %v3804_v53 = vpack.c.bf16 %v3334_v26, %v3334_v26  ;;  %v3249_v42 = vadd.f32 %v4467_v56, %v3152_v43  ;;  %v3240_v0 = vpop.f32.mrf.mxu1  ;;  %v3160_v40 = vadd.f32 %v4357_v2, %v6478_v38  ;;  %v6764_v56 = vld [vmem:[#allocation21_spill] sm:$0xff] }
 0x285   : > { %v4359_v47 = vpop.f32.mrf.mxu0  ;;  %v3807_v17 = vpack.c.bf16 %v3337_v29, %v3337_v29  ;;  %v3335_v10 = vmax.f32 %v3319_v19, 0.0  ;;  %v3324_v48 = vadd.f32 %v6427_v31, %v3301_v18  ;;  %v3299_v39 = vmul.f32 %v6408_v6, %v3276_v41  ;;  %v6765_v29 = vld [vmem:[#allocation23_spill] sm:$0xff] }
 0x286   : > { %3415 = vst.msk [vmem:[%s6453_s13 + $0x10] sm:$0xf] %vm3410_vm2, %v3804_v53  ;;  %v3279_v58 = vmax.f32 %v6758_v28, %v3249_v42  ;;  %v3241_v13 = vadd.f32 %v3240_v0, %v3144_v24  ;;  %v4360_v25 = vadd.f32 %v4359_v47, %v4358_v12  ;;  %v4470_v5 = vpop.f32.mrf.mxu1 }
 0x287   : > { %v4361_v9 = vpop.f32.mrf.mxu0  ;;  %3418 = vst.msk [vmem:[%s6453_s13 + $0x1c] sm:$0xf] %vm3410_vm2, %v3807_v17  ;;  %v3805_v15 = vpack.c.bf16 %v3335_v10, %v3335_v10  ;;  %v3340_v63 = vmax.f32 %v3324_v48, 0.0  ;;  %v3322_v16 = vadd.f32 %v6427_v31, %v3299_v39 }
 0x288   : > { %v3302_v23 = vmul.f32 %v6408_v6, %v3279_v58  ;;  %v3277_v54 = vmax.f32 %v6761_v44, %v3241_v13  ;;  %v3165_v62 = vadd.f32 %v4360_v25, %v4296_v33  ;;  %v3253_v35 = vpop.f32.mrf.mxu1 }
 0x289   : > { %v4362_v52 = vpop.f32.mrf.mxu0  ;;  %3416 = vst.msk [vmem:[%s6453_s13 + $0x14] sm:$0xf] %vm3410_vm2, %v3805_v15  ;;  %v3810_v37 = vpack.c.bf16 %v3340_v63, %v3340_v63  ;;  %v3338_v11 = vmax.f32 %v3322_v16, 0.0  ;;  %v3254_v55 = vadd.f32 %v3253_v35, %v3157_v22 }
 0x28a   : > { %v4363_v20 = vadd.f32 %v4362_v52, %v4361_v9  ;;  %v3325_v45 = vadd.f32 %v6427_v31, %v3302_v23  ;;  %v3300_v46 = vmul.f32 %v6408_v6, %v3277_v54  ;;  %v3262_v14 = vadd.f32 %v4470_v5, %v3165_v62  ;;  %v4471_v60 = vpop.f32.mrf.mxu1 }
 0x28b   : > { %3421 = vst.msk [vmem:[%s6453_s13 + $0x28] sm:$0xf] %vm3410_vm2, %v3810_v37  ;;  %v3808_v59 = vpack.c.bf16 %v3338_v11, %v3338_v11  ;;  %v3280_v61 = vmax.f32 %v6762_v21, %v3254_v55 }
 0x28c   : > { %v3168_v34 = vadd.f32 %v4363_v20, %v4299_v1  ;;  %v3341_v51 = vmax.f32 %v3325_v45, 0.0  ;;  %v3323_v30 = vadd.f32 %v6427_v31, %v3300_v46  ;;  %v3282_v4 = vmax.f32 %v6763_v3, %v3262_v14  ;;  %v3256_v32 = vpop.f32.mrf.mxu1 }
 0x28d   : > { %3419 = vst.msk [vmem:[%s6453_s13 + $0x20] sm:$0xf] %vm3410_vm2, %v3808_v59  ;;  %v3303_v27 = vmul.f32 %v6408_v6, %v3280_v61  ;;  %v3257_v49 = vadd.f32 %v3256_v32, %v3160_v40 }
 0x28e   : > { %v3265_v57 = vadd.f32 %v4471_v60, %v3168_v34  ;;  %v3811_v26 = vpack.c.bf16 %v3341_v51, %v3341_v51  ;;  %v3339_v36 = vmax.f32 %v3323_v30, 0.0  ;;  %v3305_v43 = vmul.f32 %v6408_v6, %v3282_v4 }
 0x28f   : > { %v3326_v38 = vadd.f32 %v6427_v31, %v3303_v27  ;;  %v3281_v19 = vmax.f32 %v6765_v29, %v3257_v49 }
 0x290   : > { %v3283_v12 = vmax.f32 %v6764_v56, %v3265_v57  ;;  %3422 = vst.msk [vmem:[%s6453_s13 + $0x2c] sm:$0xf] %vm3410_vm2, %v3811_v26  ;;  %v3809_v18 = vpack.c.bf16 %v3339_v36, %v3339_v36  ;;  %v3328_v41 = vadd.f32 %v6427_v31, %v3305_v43 }
 0x291   : > { %v3342_v7 = vmax.f32 %v3326_v38, 0.0  ;;  %v3304_v53 = vmul.f32 %v6408_v6, %v3281_v19 }
 0x292   : > { %v3306_v33 = vmul.f32 %v6408_v6, %v3283_v12  ;;  %3420 = vst.msk [vmem:[%s6453_s13 + $0x24] sm:$0xf] %vm3410_vm2, %v3809_v18  ;;  %v3344_v42 = vmax.f32 %v3328_v41, 0.0 }
 0x293   : > { %v3812_v24 = vpack.c.bf16 %v3342_v7, %v3342_v7  ;;  %v3327_v47 = vadd.f32 %v6427_v31, %v3304_v53 }
 0x294   : > { %v3329_v0 = vadd.f32 %v6427_v31, %v3306_v33  ;;  %v3814_v17 = vpack.c.bf16 %v3344_v42, %v3344_v42 }
 0x295   : > { %3423 = vst.msk [vmem:[%s6453_s13 + $0x30] sm:$0xf] %vm3410_vm2, %v3812_v24  ;;  %v3343_v48 = vmax.f32 %v3327_v47, 0.0 }
 0x296   : > { %v3345_v10 = vmax.f32 %v3329_v0, 0.0  ;;  %3425 = vst.msk [vmem:[%s6453_s13 + $0x38] sm:$0xf] %vm3410_vm2, %v3814_v17 }
 0x297   : > { %v3813_v28 = vpack.c.bf16 %v3343_v48, %v3343_v48 }
 0x298   : > { %v3815_v39 = vpack.c.bf16 %v3345_v10, %v3345_v10 }
 0x299   : > { %3424 = vst.msk [vmem:[%s6453_s13 + $0x34] sm:$0xf] %vm3410_vm2, %v3813_v28 }
 0x29a   : > { %3426 = vst.msk [vmem:[%s6453_s13 + $0x3c] sm:$0xf] %vm3410_vm2, %v3815_v39 }
 0x29b PF: > { %s14_s15 = sadd.s32 1, %s4668_s15  }
 0x29c   : > { %p11_p5 = scmp.ge.s32.totalorder %s14_s15, 4  }
 0x29e   :  { %13 = sbr.rel (!%p11_p5) target bundleno = 1 (0x1), region = 69 }

// kernel: classifier_forward.7
= control target key start
LH: loop header
LB: loop body
LE: loop exit
PB: predicated region body
PF: predicated region fallthrough
CT: control target
= control target key end

     0   :  { %13 = vsyncpa [#allocation3], 0  ;;  %s2909_s0 = inlined_call_operand.vmem [shape: bf16[2,4,32,64], index: 0, kind: input, shape index: {}]   ;;  %s2910_s1 = inlined_call_operand.vmem [shape: bf16[576,64], index: 1, kind: input, shape index: {}]   ;;  %s2911_s2 = inlined_call_operand.vmem [shape: f32[1,64], index: 2, kind: input, shape index: {}]   ;;  %s2912_s3 = inlined_call_operand.vmem [shape: f32[1,64], index: 3, kind: input, shape index: {}]   ;;  %s2913_s4 = inlined_call_operand.vmem [shape: f32[64,5], index: 4, kind: input, shape index: {}]   ;;  %s2914_s5 = inlined_call_operand.vmem [shape: f32[1,5], index: 5, kind: input, shape index: {}]   ;;  %s2915_s6 = inlined_call_operand.hbm [shape: f32[2,1,64], index: 6, kind: output, shape index: {0}]   ;;  %s2916_s7 = inlined_call_operand.hbm [shape: f32[2,1,5], index: 7, kind: output, shape index: {1}]  }
   0x1   :  { %15 = vsyncpa [#allocation3 + $0x1], 0 }
   0x2   :  { %16 = vsyncpa [#allocation5], 0 }
   0x3   :  { %18 = vsyncpa [#allocation5 + $0x1], 0  ;;  %s2238_s24 = smov 0   ;;  %s2240_s25 = smov 0  }
   0x4   :  { %s2242_s26 = smov 0   ;;  %s2244_s27 = smov 0  }
   0x5 LB: > { %s2259_s28 = sadd.s32 4294967295, %s2191_s27   ;;  %s1627_s29 = sadd.s32 4294967294, %s2191_s27   ;;  %s2191_s27 = sphi %s2244_s27, %s2927_s27   ;;  %s2187_s26 = sphi %s2242_s26, %s2926_s26   ;;  %s2183_s25 = sphi %s2240_s25, %s2925_s25   ;;  %s2179_s24 = sphi %s2238_s24, %s2924_s24  }
   0x6   : > { %s2263_s30 = sadd.s32 1, %s2191_s27   ;;  %s162_s8 = sadd.s32 1, %s2187_s26 }
   0x7   : > { %s159_s9 = ssub.s32 %s2191_s27, %s2263_s30  ;;  %p172_p0 = scmp.ne.s32.totalorder %s2187_s26, %s2183_s25 }
   0x8   : > { %p160_p1 = scmp.eq.s32.totalorder %s159_s9, 0  ;;  %p173_p2 = scmp.eq.s32.totalorder %s2259_s28, 1 }
   0x9   : > { %p178_p3 = scmp.ne.s32.totalorder %s2183_s25, %s2179_s24  ;;  %p179_p4 = scmp.eq.s32.totalorder %s1627_s29, 1 }
   0xa   : > { %s2274_s10 = scalar_select %p160_p1, %s2187_s26, %s162_s8  }
   0xb   : > { %p2276_p5 = por %p173_p2, %p172_p0  ;;  %p2280_p6 = por %p179_p4, %p178_p3 }
   0xc   : > { %p1630_p7 = scmp.ge.s32.totalorder %s2191_s27, 1  ;;  %p246_p8 = scmp.lt.s32.totalorder %s2191_s27, 3 }
   0xe   : > { %p247_p9 = pnand %p1630_p7, %p246_p8 }
   0xf   : > { %p281_p10 = scmp.lt.s32.totalorder (!%p247_p9), %s2259_s28, 1  ;;  %s2193_s14 = smov (!%p247_p9), 64  }
  0x10   : > { %250 = sbr.rel (%p247_p9) target bundleno = 713 (0x2c9), region = 44  ;;  %s2919_s22 = sshll.u32 (!%p247_p9), %s2259_s28, 4 }
  0x11   : > { %s1529_s9 = scalar_lea.hbm (!%p247_p9), %s2915_s6, %s2919_s22  ;;  %s2196_s16 = smov (!%p247_p9), [#allocation2]  }
  0x12   : > { %s2105_s17 = sshll.u32 (!%p247_p9), %s2196_s16, 4  ;;  %s2106_s17 = int_to_ptr.vmem [resolvable:$false] %s2105_s17 }
  0x13   : > { %s2107_s18 = scalar_lea.vmem (!%p247_p9), %s2106_s17, 32 }
  0x15   : > { %v2290_v0 = vld [vmem:[%s2910_s1 + $0x78] sm:$0xff]   ;;  %s282_s15 = scalar_select %p281_p10, %s2259_s28, 1  ;;  %v2308_v3 = vld [vmem:[%s2910_s1 + $0x70] sm:$0xff]   ;;  %vm318_vm0 = vsmask.f32 7424  ;;  %v2386_v38 = vld [vmem:[%s2910_s1 + $0x68] sm:$0xff]  }
  0x16   : > { %v2296_v1 = vld [vmem:[%s2910_s1 + $0x38] sm:$0xff]   ;;  %1725 = vmatprep.subr.bf16.mxu0 %v2290_v0  ;;  %v2352_v18 = vld [vmem:[%s2910_s1 + $0x30] sm:$0xff]   ;;  %v2403_v50 = vld [vmem:[%s2910_s1 + $0x28] sm:$0xff]   ;;  %vm383_vm1 = vcmask 523264   ;;  %vm2195_vm2 = vmmov 0   ;;  %vm1428_vm5 = vcmask 516096  }
  0x17   : > { %v2302_v2 = vld [vmem:[%s2910_s1 + $0xf8] sm:$0xff]   ;;  %s1724_s20 = sshll.u32 %s282_s15, 6  ;;  %1726 = vmatpush3.bf16.msra.mxu0 %v2296_v1  ;;  %v2358_v21 = vld [vmem:[%s2910_s1 + $0xf0] sm:$0xff]   ;;  %v2408_v53 = vld [vmem:[%s2910_s1 + $0xe8] sm:$0xff]  }
  0x18   : > { %s2313_s8 = scalar_lea.vmem %s2909_s0, %s1724_s20  ;;  %1747 = vmatprep.subr.bf16.mxu1 %v2302_v2  ;;  %v2319_v4 = vld [vmem:[%s2910_s1 + $0xb8] sm:$0xff]   ;;  %1727 = vmatprep.subr.bf16.mxu0 %v2308_v3  ;;  %v2394_v43 = vld [vmem:[%s2910_s1 + $0xb0] sm:$0xff]   ;;  %v2418_v57 = vld [vmem:[%s2910_s1 + $0x60] sm:$0xff]  }
  0x19   : > { %v1635_v5 = vld [vmem:[%s2313_s8 + $0x20] sm:$0xf]  ;;  %v2323_v6 = vld [vmem:[%s2313_s8 + $0x24] sm:$0xf]  ;;  %v2326_v7 = vld [vmem:[%s2313_s8 + $0x14] sm:$0xf]  ;;  %1748 = vmatpush3.bf16.msra.mxu1 %v2319_v4 }
  0x1a   : > { %v2330_v8 = vcombine.low %v1635_v5, %v2323_v6  ;;  %v1640_v9 = vld [vmem:[%s2313_s8 + $0x18] sm:$0xf]  ;;  %v1633_v10 = vld [vmem:[%s2313_s8 + $0x10] sm:$0xf]  ;;  %v287_v17 = vld [vmem:[%s2313_s8] sm:$0xf]  ;;  %1749 = vmatprep.subr.bf16.mxu1 %v2358_v21 }
  0x1b   : > { %v2336_v11 = vcombine.low %v2326_v7, %v1640_v9  ;;  %v2048_v12 = vld [vmem:[%s2313_s8 + $0x28] ss:$0 sps:$4 sm:$0x11]   ;;  %v2342_v13 = vcombine.low %v1633_v10, %v2326_v7  ;;  %v288_v20 = vld [vmem:[%s2313_s8 + $0x4] sm:$0xf]  ;;  %v2361_v23 = vld [vmem:[%s2313_s8 + $0x30] sm:$0xff]   ;;  %1728 = vmatpush3.bf16.msra.mxu0 %v2352_v18 }
  0x1c   : > { %336 = vrot.lane.b32.xlu0 %v2330_v8, %s2193_s14  ;;  %v347_v14 = vshrl.u32 %v2330_v8, 16  ;;  %v349_v15 = vshll.u32 %v2330_v8, 16  ;;  %v354_v16 = vshll.u32 %v2048_v12, 16  ;;  %v300_v24 = vld [vmem:[%s2313_s8 + $0x8] sm:$0xf]  ;;  %v2364_v25 = vcombine.low %v287_v17, %v288_v20  ;;  %1729 = vmatprep.subr.bf16.mxu0 %v2386_v38  ;;  %v2445_v5 = vld [vmem:[%s2910_s1 + $0x20] sm:$0xff]  }
  0x1d   : > { %366 = vrot.lane.b32.xlu1 %v2336_v11, %s2193_s14  ;;  %v2051_v27 = vld [vmem:[%s2313_s8 + $0x8] ss:$0 sps:$4 sm:$0x11]   ;;  %v2370_v28 = vcombine.low %v288_v20, %v300_v24  ;;  %v2053_v29 = vld [vmem:[%s2313_s8 + $0xc] ss:$0 sps:$4 sm:$0x11]   ;;  %1750 = vmatpush3.bf16.msra.mxu1 %v2394_v43 }
  0x1e   : > { %v351_v19 = vrot.slane %v349_v15, 1  ;;  %v356_v22 = vrot.slane %v354_v16, 1  ;;  %v320_v30 = vshrl.u32 %v2364_v25, 16  ;;  %v322_v31 = vshll.u32 %v2364_v25, 16  ;;  %v1689_v32 = vld [vmem:[%s2313_s8 + $0x30] sm:$0xf]  ;;  %1751 = vmatprep.subr.bf16.mxu1 %v2408_v53 }
  0x1f   : > { %v1690_v33 = vld [vmem:[%s2313_s8 + $0x34] sm:$0xf]  ;;  %v327_v35 = vshll.u32 %v2051_v27, 16  ;;  %v372_v36 = vshrl.u32 %v2370_v28, 16  ;;  %v374_v37 = vshll.u32 %v2370_v28, 16  ;;  %v379_v40 = vshll.u32 %v2053_v29, 16  ;;  %1730 = vmatpush3.bf16.msra.mxu0 %v2403_v50 }
  0x20   : > { %313 = vrot.lane.b32.xlu0 %v2342_v13, %s2193_s14  ;;  %v352_v26 = vor.u32 %v351_v19, %v347_v14  ;;  %v324_v39 = vrot.slane %v322_v31, 1  ;;  %v1697_v41 = vcombine.low %v1689_v32, %v1690_v33  ;;  %v2055_v42 = vld [vmem:[%s2313_s8 + $0x38] ss:$0 sps:$4 sm:$0x11]   ;;  %v2429_v60 = vld [vmem:[%s2910_s1 + $0xa8] sm:$0xff]   ;;  %1731 = vmatprep.subr.bf16.mxu0 %v2418_v57  ;;  %v2452_v9 = vld [vmem:[%s2910_s1 + $0xe0] sm:$0xff]  }
  0x21   : > { %v329_v44 = vrot.slane %v327_v35, 1  ;;  %v376_v45 = vrot.slane %v374_v37, 1  ;;  %v381_v47 = vrot.slane %v379_v40, 1  ;;  %v858_v52 = vshll.u32 %v2055_v42, 16  ;;  %v1703_v56 = vld [vmem:[%s2313_s8 + $0x38] sm:$0xf]  ;;  %1752 = vmatpush3.bf16.msra.mxu1 %v2429_v60 }
  0x22   : > { %v2379_v34 = vsel %vm318_vm0, %v352_v26, %v356_v22  ;;  %v325_v46 = vor.u32 %v324_v39, %v320_v30  ;;  %v851_v48 = vshrl.u32 %v1697_v41, 16  ;;  %v853_v49 = vshll.u32 %v1697_v41, 16  ;;  %v2458_v10 = vld [vmem:[%s2910_s1 + $0x58] sm:$0xff]   ;;  %1753 = vmatprep.subr.bf16.mxu1 %v2452_v9  ;;  %v2464_v12 = vld [vmem:[%s2910_s1 + $0xa0] sm:$0xff]   ;;  %v2484_v16 = vld [vmem:[%s2910_s1 + $0x50] sm:$0xff]  }
  0x23   : > { %358 = vrot.lane.b32.xlu1 %v2379_v34, %s2193_s14  ;;  %v377_v51 = vor.u32 %v376_v45, %v372_v36  ;;  %v860_v59 = vrot.slane %v858_v52, 1  ;;  %v2440_v63 = vcombine.low %v1690_v33, %v1703_v56  ;;  %1732 = vmatpush3.bf16.msra.mxu0 %v2445_v5  ;;  %v2472_v14 = vld [vmem:[%s2910_s1 + $0x18] sm:$0xff]   ;;  %v2496_v19 = vld [vmem:[%s2910_s1 + $0x10] sm:$0xff]   ;;  %v2508_v22 = vld [vmem:[%s2910_s1 + $0x48] sm:$0xff]   ;;  %v2917_v35 = vmov 0.0  }
  0x24   : > { %840 = vrot.lane.b32.xlu0 %v2361_v23, %s2193_s14  ;;  %v2411_v54 = vsel %vm318_vm0, %v325_v46, %v329_v44  ;;  %v855_v55 = vrot.slane %v853_v49, 1  ;;  %1733 = vmatprep.subr.bf16.mxu0 %v2458_v10  ;;  %v2478_v15 = vld [vmem:[%s2910_s1 + $0xd8] sm:$0xff]   ;;  %v2502_v20 = vld [vmem:[%s2910_s1 + $0xd0] sm:$0xff]   ;;  %v2520_v26 = vld [vmem:[%s2910_s1 + $0x8] sm:$0xff]  }
  0x25   : > { %v2423_v58 = vsel %vm318_vm0, %v377_v51, %v381_v47  ;;  %1754 = vmatpush3.bf16.msra.mxu1 %v2464_v12  ;;  %v2490_v17 = vld [vmem:[%s2910_s1 + $0x98] sm:$0xff]   ;;  %v2514_v24 = vld [vmem:[%s2910_s1 + $0x90] sm:$0xff]   ;;  %v2526_v27 = vld [vmem:[%s2910_s1 + $0xc8] sm:$0xff]  }
  0x26   : > { %v856_v61 = vor.u32 %v855_v55, %v851_v48  ;;  %1755 = vmatprep.subr.bf16.mxu1 %v2478_v15  ;;  %v2532_v29 = vld [vmem:[%s2910_s1 + $0x40] sm:$0xff]   ;;  %v2538_v30 = vld [vmem:[%s2910_s1 + $0x88] sm:$0xff]   ;;  %v2094_v41 = vld [vmem:[%s2313_s8 + $0x14] sm:$0xff]  }
  0x27   : > { %820 = vrot.lane.b32.xlu1 %v2411_v54, %s2193_s14  ;;  %1734 = vmatpush3.bf16.msra.mxu0 %v2472_v14  ;;  %v2544_v31 = vld [vmem:[%s2910_s1] sm:$0xff]   ;;  %v2562_v36 = vld [vmem:[%s2313_s8 + $0x28] sm:$0xf]  ;;  %v2093_v40 = vld [vmem:[%s2313_s8 + $0x2c] ss:$0 sps:$4 sm:$0x11]  }
  0x28   : > { %864 = vrot.lane.b32.xlu0 %v2423_v58, %s2193_s14  ;;  %v2436_v62 = vsel %vm318_vm0, %v856_v61, %v860_v59  ;;  %1735 = vmatprep.subr.bf16.mxu0 %v2484_v16  ;;  %v2550_v32 = vld [vmem:[%s2910_s1 + $0xc0] sm:$0xff]   ;;  %v1058_v45 = vshll.u32 %v2093_v40, 16  ;;  %v2095_v46 = vld [vmem:[%s2313_s8 + $0x1c] ss:$0 sps:$4 sm:$0x11]   ;;  %v875_v47 = vshrl.u32 %v2094_v41, 16 }
  0x29   : > { %1756 = vmatpush3.bf16.msra.mxu1 %v2490_v17  ;;  %v2556_v33 = vld [vmem:[%s2910_s1 + $0x80] sm:$0xff]   ;;  %v877_v48 = vshll.u32 %v2094_v41, 16  ;;  %v882_v52 = vshll.u32 %v2095_v46, 16 }
  0x2a   : > { %1757 = vmatprep.subr.bf16.mxu1 %v2502_v20  ;;  %v1704_v37 = vld [vmem:[%s2313_s8 + $0x24] sm:$0xf]  ;;  %v1060_v51 = vrot.slane %v1058_v45, 1 }
  0x2b   : > { %862 = vrot.lane.b32.xlu1 %v2436_v62, %s2193_s14  ;;  %1736 = vmatpush3.bf16.msra.mxu0 %v2496_v19  ;;  %v1708_v39 = vcombine.low %v1704_v37, %v2562_v36  ;;  %v879_v55 = vrot.slane %v877_v48, 1  ;;  %v884_v59 = vrot.slane %v882_v52, 1 }
  0x2c   : > { %1034 = vrot.lane.b32.xlu0 %v2370_v28, %s2193_s14  ;;  %1737 = vmatprep.subr.bf16.mxu0 %v2508_v22 }
  0x2d   : > { %1758 = vmatpush3.bf16.msra.mxu1 %v2514_v24  ;;  %v1051_v42 = vshrl.u32 %v1708_v39, 16  ;;  %v1053_v44 = vshll.u32 %v1708_v39, 16  ;;  %v880_v61 = vor.u32 %v879_v55, %v875_v47  ;;  %v1687_v39 = vld [vmem:[%s2313_s8 + $0x10] sm:$0xf] }
  0x2e   : > { %1759 = vmatprep.subr.bf16.mxu1 %v2526_v27  ;;  %v1695_v40 = vcombine.low %v1687_v39, %v2326_v7  ;;  %v2593_v7 = vld [vmem:[%s2910_s1 + $0x118] sm:$0xff]   ;;  %v2922_v39 = vmov 0.0  }
  0x2f   : > { %1042 = vrot.lane.b32.xlu1 %v2440_v63, %s2193_s14  ;;  %1738 = vmatpush3.bf16.msra.mxu0 %v2520_v26  ;;  %v1055_v49 = vrot.slane %v1053_v44, 1  ;;  %v2576_v37 = vsel %vm318_vm0, %v880_v61, %v884_v59  ;;  %v2097_v44 = vld [vmem:[%s2313_s8 + $0x18] ss:$0 sps:$4 sm:$0x11]  }
  0x30   : > { %1739 = vmatprep.subr.bf16.mxu0 %v2532_v29  ;;  %v831_v41 = vshll.u32 %v1695_v40, 16  ;;  %v836_v46 = vshll.u32 %v2097_v44, 16  ;;  %v2631_v44 = vld [vmem:[%s2910_s1 + $0x100] sm:$0xff]  }
  0x31   : > { %1760 = vmatpush3.bf16.msra.mxu1 %v2538_v30  ;;  %v1056_v56 = vor.u32 %v1055_v49, %v1051_v42  ;;  %v829_v42 = vshrl.u32 %v1695_v40, 16 }
  0x32   : > { %1761 = vmatprep.subr.bf16.mxu1 %v2550_v32  ;;  %v833_v45 = vrot.slane %v831_v41, 1  ;;  %v838_v55 = vrot.slane %v836_v46, 1 }
  0x33   : > { %1740 = vmatpush3.bf16.msra.mxu0 %v2544_v31  ;;  %1202 = vrot.lane.b32.xlu1 %v2576_v37, %s2193_s14 }
  0x34   : > { %1930 = vmatprep.subr.bf16.mxu0 %v2917_v35  ;;  %v2571_v35 = vsel %vm318_vm0, %v1056_v56, %v1060_v51  ;;  %v834_v52 = vor.u32 %v833_v45, %v829_v42 }
  0x35   : > { %1762 = vmatpush3.bf16.msra.mxu1 %v2556_v33  ;;  %1204 = vrot.lane.b32.xlu0 %v2571_v35, %s2193_s14  ;;  %s2841_s14 = sand.u32 1, %s2183_s25  }
  0x36   : > { %1774 = vmatprep.subr.bf16.mxu1 %v2290_v0  ;;  %s274_s21 = scalar_lea.vmem [#allocation2], %s2841_s14  ;;  %s1515_s15 = scalar_lea.sflag [#allocation3], %s2841_s14 }
  0x37   : > { %s1531_s13 = sshll.u32 %s274_s21, 4  ;;  %s1532_s13 = int_to_ptr.vmem [resolvable:$true] %s1531_s13 }
  0x38   : > { %p2108_p0 = scmp.lt.s32.totalorder %s1532_s13, %s2106_s17 }
  0x8e   : > { %v337_v47 = vpop.permute.xlu0 %336 }
  0x8f   : > { %v389_v48 = vsel %vm383_vm1, %v2411_v54, %v337_v47  ;;  %v2585_v49 = vpop.permute.xlu1 %366  ;;  %v839_v54 = vsel %vm318_vm0, %v834_v52, %v838_v55 }
  0x90   : > { %721 = vmatprep.mubr.bf16.mxu0 %v389_v48  ;;  %v396_v51 = vsel %vm383_vm1, %v2370_v28, %v2585_v49  ;;  %v2602_v28 = vld [vmem:[%s2910_s1 + $0x110] sm:$0xff]  }
  0x91   : > { %762 = vmatprep.mubr.bf16.mxu1 %v396_v51  ;;  %v1706_v51 = vcombine.low %v2323_v6, %v2562_v36  ;;  %v1433_v36 = vld [vmem:[%s2913_s4 + $0x18] sm:$0xff] }
  0x92   : > { %v314_v56 = vpop.permute.xlu0 %313 }
  0x93   : > { %v385_v59 = vsel %vm383_vm1, %v2364_v25, %v314_v56 }
  0x94   : > { %722 = vmatmul.mubr.bf16.vlgmr.msra.gmra.mxu0 %v385_v59 }
  0x95   : > { %1931 = vmatpush3.bf16.msra.mxu0 %v2593_v7  ;;  %v359_v61 = vpop.permute.xlu1 %358  ;;  %1938 = vmatprep.mubr.msk.bf16.mxu0 %vm2195_vm2, %v2922_v39 }
  0x96   : > { %v2608_v40 = vsel %vm383_vm1, %v2361_v23, %v359_v61  ;;  %1932 = vmatprep.subr.bf16.mxu0 %v2922_v39  ;;  %v2611_v25 = vpop.permute.xlu0 %840  ;;  %v2622_v23 = vld [vmem:[%s2910_s1 + $0x108] sm:$0xff]  }
  0x97   : > { %763 = vmatmul.mubr.bf16.vlgmr.msra.gmra.mxu1 %v2608_v40  ;;  %v892_v41 = vsel %vm383_vm1, %v839_v54, %v2611_v25  ;;  %v1062_v6 = vsel %vm383_vm1, %v2330_v8, %v2611_v25 }
  0x98   : > { %1775 = vmatpush3.bf16.msra.mxu1 %v2296_v1  ;;  %937 = vmatprep.mubr.bf16.mxu1 %v892_v41 }
  0x99   : > { %1933 = vmatpush3.bf16.msra.mxu0 %v2602_v28  ;;  %1776 = vmatprep.subr.bf16.mxu1 %v2308_v3 }
  0x9a   : > { %1934 = vmatprep.subr.bf16.mxu0 %v2922_v39  ;;  %v865_v42 = vpop.permute.xlu0 %864 }
  0x9b   : > { %v2640_v45 = vsel %vm383_vm1, %v2336_v11, %v865_v42  ;;  %v821_v11 = vpop.permute.xlu1 %820 }
  0x9c   : > { %1777 = vmatpush3.bf16.msra.mxu1 %v2352_v18  ;;  %v888_v46 = vsel %vm383_vm1, %v2342_v13, %v821_v11 }
  0x9d   : > { %1935 = vmatpush3.bf16.msra.mxu0 %v2622_v23  ;;  %1778 = vmatprep.subr.bf16.mxu1 %v2386_v38 }
  0x9e   : > { %1936 = vmatprep.subr.bf16.mxu0 %v2922_v39  ;;  %v1035_v47 = vpop.permute.xlu0 %1034 }
  0x9f   : > { %v863_v13 = vpop.permute.xlu1 %862  ;;  %v1065_v55 = vsel %vm383_vm1, %v2379_v34, %v1035_v47 }
  0xa0   : > { %1779 = vmatpush3.bf16.msra.mxu1 %v2403_v50  ;;  %v896_v48 = vsel %vm383_vm1, %v2379_v34, %v863_v13  ;;  %v1227_v34 = vsel %vm383_vm1, %v2436_v62, %v2585_v49  ;;  %v1431_v49 = vld [vmem:[%s2913_s4 + $0x8] sm:$0xff] }
  0xa1   : > { %1937 = vmatpush3.bf16.msra.mxu0 %v2631_v44  ;;  %1780 = vmatprep.subr.bf16.mxu1 %v2418_v57 }
  0xa2   : > { %1796 = vmatprep.subr.bf16.mxu0 %v2302_v2 }
  0xa3   : > { %v1043_v52 = vpop.permute.xlu1 %1042 }
  0xa4   : > { %1939 = vmatmul.mubr.msk.bf16.vlgmr.msra.gmra.mxu0 %vm383_vm1, %v2423_v58  ;;  %1781 = vmatpush3.bf16.msra.mxu1 %v2445_v5  ;;  %v1069_v56 = vsel %vm383_vm1, %v1706_v51, %v1043_v52 }
  0xa5   : > { %1797 = vmatpush3.bf16.msra.mxu0 %v2319_v4  ;;  %1782 = vmatprep.subr.bf16.mxu1 %v2458_v10 }
  0xa6   : > { %1798 = vmatprep.subr.bf16.mxu0 %v2358_v21  ;;  %978 = vmatprep.mubr.bf16.mxu0 %v2640_v45 }
  0xa8   : > { %1783 = vmatpush3.bf16.msra.mxu1 %v2472_v14 }
  0xa9   : > { %1799 = vmatpush3.bf16.msra.mxu0 %v2394_v43  ;;  %1784 = vmatprep.subr.bf16.mxu1 %v2484_v16 }
  0xaa   : > { %1800 = vmatprep.subr.bf16.mxu0 %v2408_v53 }
  0xac   : > { %1785 = vmatpush3.bf16.msra.mxu1 %v2496_v19 }
  0xad   : > { %1801 = vmatpush3.bf16.msra.mxu0 %v2429_v60  ;;  %1786 = vmatprep.subr.bf16.mxu1 %v2508_v22 }
  0xae   : > { %1802 = vmatprep.subr.bf16.mxu0 %v2452_v9 }
  0xb0   : > { %1787 = vmatpush3.bf16.msra.mxu1 %v2520_v26 }
  0xb1   : > { %1803 = vmatpush3.bf16.msra.mxu0 %v2464_v12  ;;  %1788 = vmatprep.subr.bf16.mxu1 %v2532_v29 }
  0xb2   : > { %1804 = vmatprep.subr.bf16.mxu0 %v2478_v15 }
  0xb4   : > { %1789 = vmatpush3.bf16.msra.mxu1 %v2544_v31 }
  0xb5   : > { %1805 = vmatpush3.bf16.msra.mxu0 %v2490_v17  ;;  %1942 = vmatprep.subr.bf16.mxu1 %v2922_v39 }
  0xb6   : > { %1806 = vmatprep.subr.bf16.mxu0 %v2502_v20 }
  0xb7   : > { %938 = vmatmul.mubr.bf16.vlgmr.msra.gmra.mxu1 %v888_v46 }
  0xb8   : > { %1943 = vmatpush3.bf16.msra.mxu1 %v2593_v7  ;;  %1950 = vmatprep.mubr.msk.bf16.mxu1 %vm2195_vm2, %v2922_v39 }
  0xb9   : > { %1807 = vmatpush3.bf16.msra.mxu0 %v2514_v24  ;;  %1944 = vmatprep.subr.bf16.mxu1 %v2922_v39 }
  0xba   : > { %1808 = vmatprep.subr.bf16.mxu0 %v2526_v27 }
  0xbc   : > { %1945 = vmatpush3.bf16.msra.mxu1 %v2602_v28 }
  0xbd   : > { %1809 = vmatpush3.bf16.msra.mxu0 %v2538_v30  ;;  %1946 = vmatprep.subr.bf16.mxu1 %v2922_v39 }
  0xbe   : > { %1810 = vmatprep.subr.bf16.mxu0 %v2550_v32 }
  0xc0   : > { %1947 = vmatpush3.bf16.msra.mxu1 %v2622_v23 }
  0xc1   : > { %1811 = vmatpush3.bf16.msra.mxu0 %v2556_v33  ;;  %1948 = vmatprep.subr.bf16.mxu1 %v2922_v39 }
  0xc2   : > { %1823 = vmatprep.subr.bf16.mxu0 %v2290_v0 }
  0xc4   : > { %979 = vmatmul.mubr.bf16.vlgmr.msra.gmra.mxu0 %v896_v48  ;;  %1949 = vmatpush3.bf16.msra.mxu1 %v2631_v44 }
  0xc5   : > { %1824 = vmatpush3.bf16.msra.mxu0 %v2296_v1  ;;  %1845 = vmatprep.subr.bf16.mxu1 %v2302_v2 }
  0xc6   : > { %1825 = vmatprep.subr.bf16.mxu0 %v2308_v3  ;;  %1106 = vmatprep.mubr.bf16.mxu0 %v1065_v55 }
  0xc7   : > { %1951 = vmatmul.mubr.msk.bf16.vlgmr.msra.gmra.mxu1 %vm383_vm1, %v2576_v37  ;;  %v1432_v37 = vld [vmem:[%s2913_s4 + $0x10] sm:$0xff] }
  0xc8   : > { %1846 = vmatpush3.bf16.msra.mxu1 %v2319_v4  ;;  %1147 = vmatprep.mubr.bf16.mxu1 %v1069_v56 }
  0xc9   : > { %1826 = vmatpush3.bf16.msra.mxu0 %v2352_v18  ;;  %1847 = vmatprep.subr.bf16.mxu1 %v2358_v21 }
  0xca   : > { %1827 = vmatprep.subr.bf16.mxu0 %v2386_v38 }
  0xcc   : > { %1848 = vmatpush3.bf16.msra.mxu1 %v2394_v43 }
  0xcd   : > { %1828 = vmatpush3.bf16.msra.mxu0 %v2403_v50  ;;  %1849 = vmatprep.subr.bf16.mxu1 %v2408_v53 }
  0xce   : > { %1829 = vmatprep.subr.bf16.mxu0 %v2418_v57 }
  0xd0   : > { %1850 = vmatpush3.bf16.msra.mxu1 %v2429_v60 }
  0xd1   : > { %1830 = vmatpush3.bf16.msra.mxu0 %v2445_v5  ;;  %1851 = vmatprep.subr.bf16.mxu1 %v2452_v9 }
  0xd2   : > { %1831 = vmatprep.subr.bf16.mxu0 %v2458_v10 }
  0xd4   : > { %1852 = vmatpush3.bf16.msra.mxu1 %v2464_v12 }
  0xd5   : > { %1832 = vmatpush3.bf16.msra.mxu0 %v2472_v14  ;;  %1853 = vmatprep.subr.bf16.mxu1 %v2478_v15 }
  0xd6   : > { %1833 = vmatprep.subr.bf16.mxu0 %v2484_v16 }
  0xd8   : > { %1854 = vmatpush3.bf16.msra.mxu1 %v2490_v17 }
  0xd9   : > { %1834 = vmatpush3.bf16.msra.mxu0 %v2496_v19  ;;  %1855 = vmatprep.subr.bf16.mxu1 %v2502_v20 }
  0xda   : > { %1835 = vmatprep.subr.bf16.mxu0 %v2508_v22 }
  0xdc   : > { %1856 = vmatpush3.bf16.msra.mxu1 %v2514_v24 }
  0xdd   : > { %1836 = vmatpush3.bf16.msra.mxu0 %v2520_v26  ;;  %1857 = vmatprep.subr.bf16.mxu1 %v2526_v27 }
  0xde   : > { %1837 = vmatprep.subr.bf16.mxu0 %v2532_v29 }
  0xe0   : > { %1858 = vmatpush3.bf16.msra.mxu1 %v2538_v30 }
  0xe1   : > { %1838 = vmatpush3.bf16.msra.mxu0 %v2544_v31  ;;  %1859 = vmatprep.subr.bf16.mxu1 %v2550_v32 }
  0xe2   : > { %1954 = vmatprep.subr.bf16.mxu0 %v2922_v39 }
  0xe4   : > { %1860 = vmatpush3.bf16.msra.mxu1 %v2556_v33  ;;  %1107 = vmatmul.mubr.bf16.vlgmr.msra.gmra.mxu0 %v1062_v6 }
  0xe5   : > { %1955 = vmatpush3.bf16.msra.mxu0 %v2593_v7  ;;  %1872 = vmatprep.subr.bf16.mxu1 %v2290_v0  ;;  %v1205_v0 = vpop.permute.xlu0 %1204 }
  0xe6   : > { %1956 = vmatprep.subr.bf16.mxu0 %v2922_v39  ;;  %1962 = vmatprep.mubr.msk.bf16.mxu0 %vm2195_vm2, %v2922_v39 }
  0xe7   : > { %1148 = vmatmul.mubr.bf16.vlgmr.msra.gmra.mxu1 %v2640_v45 }
  0xe8   : > { %1873 = vmatpush3.bf16.msra.mxu1 %v2296_v1  ;;  %1271 = vmatprep.mubr.bf16.mxu1 %v1227_v34  ;;  %v1234_v1 = vsel %vm383_vm1, %v2440_v63, %v1205_v0 }
  0xe9   : > { %1957 = vmatpush3.bf16.msra.mxu0 %v2602_v28  ;;  %1874 = vmatprep.subr.bf16.mxu1 %v2308_v3  ;;  %v2100_v3 = vld [vmem:[%s2313_s8 + $0x3c] ss:$0 sps:$4 sm:$0x11]  }
  0xea   : > { %1958 = vmatprep.subr.bf16.mxu0 %v2922_v39 }
  0xec   : > { %1875 = vmatpush3.bf16.msra.mxu1 %v2352_v18 }
  0xed   : > { %1959 = vmatpush3.bf16.msra.mxu0 %v2622_v23  ;;  %1876 = vmatprep.subr.bf16.mxu1 %v2386_v38  ;;  %v1203_v38 = vpop.permute.xlu1 %1202 }
  0xee   : > { %1960 = vmatprep.subr.bf16.mxu0 %v2922_v39 }
  0xf0   : > { %1877 = vmatpush3.bf16.msra.mxu1 %v2403_v50 }
  0xf1   : > { %1961 = vmatpush3.bf16.msra.mxu0 %v2631_v44  ;;  %1878 = vmatprep.subr.bf16.mxu1 %v2418_v57 }
  0xf2   : > { %1894 = vmatprep.subr.bf16.mxu0 %v2302_v2  ;;  %v2099_v2 = vld [vmem:[%s2313_s8 + $0x34] sm:$0xff]   ;;  %s2101_s8 = scalar_lea.vmem %s1532_s13, 16 }
  0xf3   : > { %v1215_v8 = vshrl.u32 %v2099_v2, 16  ;;  %p2102_p11 = scmp.ne.s32.totalorder %s1532_s13, %s2101_s8  ;;  %p2109_p1 = scmp.lt.s32.totalorder %s2107_s18, %s2101_s8 }
  0xf4   : > { %1963 = vmatmul.mubr.msk.bf16.vlgmr.msra.gmra.mxu0 %vm383_vm1, %v2571_v35  ;;  %1879 = vmatpush3.bf16.msra.mxu1 %v2445_v5  ;;  %v1434_v35 = vld [vmem:[%s2913_s4 + $0x20] sm:$0xff] }
  0xf5   : > { %1895 = vmatpush3.bf16.msra.mxu0 %v2319_v4  ;;  %1880 = vmatprep.subr.bf16.mxu1 %v2458_v10  ;;  %v1217_v4 = vshll.u32 %v2099_v2, 16  ;;  %p2103_p12 = pnand %p2102_p11, %p2276_p5  ;;  %p2110_p2 = por %p2109_p1, %p2108_p0 }
  0xf6   : > { %1896 = vmatprep.subr.bf16.mxu0 %v2358_v21  ;;  %1312 = vmatprep.mubr.bf16.mxu0 %v1234_v1  ;;  %v1222_v21 = vshll.u32 %v2100_v3, 16 }
  0xf7   : > { %v1219_v18 = vrot.slane %v1217_v4, 1  ;;  %p2104_p13 = pneg %p2103_p12 }
  0xf8   : > { %1881 = vmatpush3.bf16.msra.mxu1 %v2472_v14  ;;  %v1224_v50 = vrot.slane %v1222_v21, 1 }
  0xf9   : > { %1897 = vmatpush3.bf16.msra.mxu0 %v2394_v43  ;;  %1882 = vmatprep.subr.bf16.mxu1 %v2484_v16  ;;  %v1220_v43 = vor.u32 %v1219_v18, %v1215_v8  ;;  %p2111_p3 = pnand %p2110_p2, %p2104_p13 }
  0xfa   : > { %1898 = vmatprep.subr.bf16.mxu0 %v2408_v53  ;;  %v1230_v53 = vsel %vm383_vm1, %v2423_v58, %v1203_v38 }
  0xfb   : > { %v1225_v57 = vsel %vm318_vm0, %v1220_v43, %v1224_v50 }
  0xfc   : > { %1883 = vmatpush3.bf16.msra.mxu1 %v2496_v19 }
  0xfd   : > { %1899 = vmatpush3.bf16.msra.mxu0 %v2429_v60  ;;  %1884 = vmatprep.subr.bf16.mxu1 %v2508_v22 }
  0xfe   : > { %1900 = vmatprep.subr.bf16.mxu0 %v2452_v9 }
 0x100   : > { %1885 = vmatpush3.bf16.msra.mxu1 %v2520_v26 }
 0x101   : > { %1901 = vmatpush3.bf16.msra.mxu0 %v2464_v12  ;;  %1886 = vmatprep.subr.bf16.mxu1 %v2532_v29 }
 0x102   : > { %1902 = vmatprep.subr.bf16.mxu0 %v2478_v15 }
 0x104   : > { %1887 = vmatpush3.bf16.msra.mxu1 %v2544_v31 }
 0x105   : > { %1903 = vmatpush3.bf16.msra.mxu0 %v2490_v17  ;;  %1966 = vmatprep.subr.bf16.mxu1 %v2922_v39 }
 0x106   : > { %1904 = vmatprep.subr.bf16.mxu0 %v2502_v20 }
 0x107   : > { %1272 = vmatmul.mubr.bf16.vlgmr.msra.gmra.mxu1 %v2608_v40 }
 0x108   : > { %1967 = vmatpush3.bf16.msra.mxu1 %v2593_v7  ;;  %1974 = vmatprep.mubr.msk.bf16.mxu1 %vm2195_vm2, %v2922_v39  ;;  %v1430_v7 = vld [vmem:[%s2913_s4] sm:$0xff] }
 0x109   : > { %1905 = vmatpush3.bf16.msra.mxu0 %v2514_v24  ;;  %1968 = vmatprep.subr.bf16.mxu1 %v2922_v39 }
 0x10a   : > { %1906 = vmatprep.subr.bf16.mxu0 %v2526_v27 }
 0x10c   : > { %1969 = vmatpush3.bf16.msra.mxu1 %v2602_v28 }
 0x10d   : > { %1907 = vmatpush3.bf16.msra.mxu0 %v2538_v30  ;;  %1970 = vmatprep.subr.bf16.mxu1 %v2922_v39  ;;  %v1437_v30 = vld [vmem:[%s2913_s4 + $0x38] sm:$0xff] }
 0x10e   : > { %1908 = vmatprep.subr.bf16.mxu0 %v2550_v32  ;;  %v1436_v32 = vld [vmem:[%s2913_s4 + $0x30] sm:$0xff] }
 0x110   : > { %1971 = vmatpush3.bf16.msra.mxu1 %v2622_v23 }
 0x111   : > { %1909 = vmatpush3.bf16.msra.mxu0 %v2556_v33  ;;  %1972 = vmatprep.subr.bf16.mxu1 %v2922_v39  ;;  %v1435_v33 = vld [vmem:[%s2913_s4 + $0x28] sm:$0xff] }
 0x112   : > { %1978 = vmatprep.subr.mxu0 %v2922_v39 }
 0x114   : > { %1313 = vmatmul.mubr.bf16.vlgmr.msra.gmra.mxu0 %v1230_v53  ;;  %1973 = vmatpush3.bf16.msra.mxu1 %v2631_v44 }
 0x115   : > { %1994 = vmatprep.mubr.msk.f32.mxu0 %vm2195_vm2, %v2922_v39  ;;  %1979 = vmatpush3.msra.mxu0 %v1437_v30 }
 0x116   : > { %1980 = vmatprep.subr.mxu0 %v2922_v39 }
 0x117   : > { %1975 = vmatmul.mubr.msk.bf16.vlgmr.msra.gmra.mxu1 %vm383_vm1, %v1225_v57  ;;  %1981 = vmatpush3.msra.mxu0 %v1436_v32 }
 0x118   : > { %1982 = vmatprep.subr.mxu0 %v2922_v39 }
 0x119   : > { %1983 = vmatpush3.msra.mxu0 %v1435_v33 }
 0x11a   : > { %1984 = vmatprep.subr.mxu0 %v2922_v39 }
 0x11b   : > { %1985 = vmatpush3.msra.mxu0 %v1434_v35 }
 0x11c   : > { %1986 = vmatprep.subr.mxu0 %v2922_v39 }
 0x11d   : > { %1987 = vmatpush3.msra.mxu0 %v1433_v36 }
 0x11e   : > { %1988 = vmatprep.subr.mxu0 %v2922_v39 }
 0x11f   : > { %1989 = vmatpush3.msra.mxu0 %v1432_v37  ;;  %v1717_v37 = vld [vmem:[%s2911_s2] ss:$0 sm:$0xff] }
 0x120   : > { %1990 = vmatprep.subr.mxu0 %v2922_v39 }
 0x121   : > { %1991 = vmatpush3.msra.mxu0 %v1431_v49 }
 0x122   : > { %1992 = vmatprep.subr.mxu0 %v2922_v39 }
 0x123   : > { %1993 = vmatpush3.msra.mxu0 %v1430_v7 }
 0x154   : > { %v1741_v60 = vpop.f32.mrf.mxu0 }
 0x156   : > { %v1742_v62 = vpop.f32.mrf.mxu0 }
 0x157   : > { %v1743_v63 = vadd.f32 %v1742_v62, %v1741_v60  ;;  %v1763_v5 = vpop.f32.mrf.mxu1 }
 0x158   : > { %v1744_v9 = vpop.f32.mrf.mxu0 }
 0x159   : > { %v1764_v58 = vpop.f32.mrf.mxu1 }
 0x15a   : > { %v1765_v10 = vadd.f32 %v1764_v58, %v1763_v5  ;;  %v1745_v12 = vpop.f32.mrf.mxu0 }
 0x15b   : > { %v1746_v14 = vadd.f32 %v1745_v12, %v1744_v9  ;;  %v1766_v15 = vpop.f32.mrf.mxu1 }
 0x15c   : > { %v765_v16 = vadd.f32 %v1765_v10, %v1743_v63 }
 0x15d   : > { %v1767_v17 = vpop.f32.mrf.mxu1 }
 0x15e   : > { %v1768_v19 = vadd.f32 %v1767_v17, %v1766_v15 }
 0x160   : > { %v768_v20 = vadd.f32 %v1768_v19, %v1746_v14 }
 0x164   : > { %v805_v22 = vpop.f32.mrf.mxu0 }
 0x165   : > { %v2795_v24 = vadd.f32 %v805_v22, %v765_v16 }
 0x166   : > { %v1940_v26 = vpop.f32.mrf.mxu0 }
 0x168   : > { %v808_v27 = vpop.f32.mrf.mxu0 }
 0x169   : > { %v2797_v29 = vadd.f32 %v808_v27, %v768_v20  ;;  %v1384_v20 = vlaneseq }
 0x16a   : > { %v1941_v31 = vpop.f32.mrf.mxu0 }
 0x16b   : > { %v1385_v49 = vshrl.u32 %v1384_v20, 7 }
 0x177   : > { %v1790_v59 = vpop.f32.mrf.mxu1 }
 0x179   : > { %v1791_v54 = vpop.f32.mrf.mxu1 }
 0x17a   : > { %v1792_v61 = vadd.f32 %v1791_v54, %v1790_v59 }
 0x17b   : > { %v1793_v28 = vpop.f32.mrf.mxu1 }
 0x17d   : > { %v1794_v40 = vpop.f32.mrf.mxu1 }
 0x17e   : > { %v1795_v25 = vadd.f32 %v1794_v40, %v1793_v28  ;;  %v1386_v28 = vadd.s32 8, %v1385_v49 }
 0x184   : > { %v1812_v41 = vpop.f32.mrf.mxu0 }
 0x186   : > { %v1813_v23 = vpop.f32.mrf.mxu0 }
 0x187   : > { %v1814_v44 = vadd.f32 %v1813_v23, %v1812_v41  ;;  %v1021_v42 = vpop.f32.mrf.mxu1  ;;  %v1391_v23 = vand.u32 7, %v1385_v49 }
 0x188   : > { %v1815_v45 = vpop.f32.mrf.mxu0 }
 0x189   : > { %v981_v11 = vadd.f32 %v1814_v44, %v1792_v61  ;;  %v1952_v46 = vpop.f32.mrf.mxu1  ;;  %v1718_v61 = vld [vmem:[%s2912_s3] ss:$0 sm:$0xff]  ;;  %vm1411_vm3 = vcmp.lt.s32.totalorder %v1391_v23, 2 }
 0x18a   : > { %v1816_v13 = vpop.f32.mrf.mxu0 }
 0x18b   : > { %v1022_v47 = vadd.f32 %v1021_v42, %v981_v11  ;;  %v1817_v48 = vadd.f32 %v1816_v13, %v1815_v45  ;;  %v1024_v51 = vpop.f32.mrf.mxu1  ;;  %v1398_v45 = vand.u32 7, %v1386_v28 }
 0x18d   : > { %v1028_v52 = vmax.f32 %v2795_v24, %v1022_v47  ;;  %v984_v39 = vadd.f32 %v1817_v48, %v1795_v25  ;;  %v1953_v55 = vpop.f32.mrf.mxu1  ;;  %vm1412_vm4 = vcmp.lt.s32.totalorder %v1398_v45, 2 }
 0x18f   : > { %v1025_v56 = vadd.f32 %v1024_v51, %v984_v39 }
 0x191   : > { %v1029_v6 = vmax.f32 %v2797_v29, %v1025_v56 }
 0x1a4   : > { %v1839_v34 = vpop.f32.mrf.mxu0 }
 0x1a6   : > { %v1840_v0 = vpop.f32.mrf.mxu0 }
 0x1a7   : > { %v1861_v21 = vpop.f32.mrf.mxu1  ;;  %v1841_v63 = vadd.f32 %v1840_v0, %v1839_v34 }
 0x1a8   : > { %v1842_v1 = vpop.f32.mrf.mxu0 }
 0x1a9   : > { %v1862_v38 = vpop.f32.mrf.mxu1 }
 0x1aa   : > { %v1843_v2 = vpop.f32.mrf.mxu0  ;;  %v1863_v60 = vadd.f32 %v1862_v38, %v1861_v21 }
 0x1ab   : > { %v1864_v43 = vpop.f32.mrf.mxu1  ;;  %v1844_v15 = vadd.f32 %v1843_v2, %v1842_v1 }
 0x1ac   : > { %v1150_v5 = vadd.f32 %v1863_v60, %v1841_v63 }
 0x1ad   : > { %v1865_v50 = vpop.f32.mrf.mxu1 }
 0x1ae   : > { %v1866_v58 = vadd.f32 %v1865_v50, %v1864_v43 }
 0x1b0   : > { %v1153_v24 = vadd.f32 %v1866_v58, %v1844_v15 }
 0x1b4   : > { %v1190_v3 = vpop.f32.mrf.mxu0 }
 0x1b5   : > { %v1191_v12 = vadd.f32 %v1190_v3, %v1150_v5 }
 0x1b6   : > { %v1964_v4 = vpop.f32.mrf.mxu0 }
 0x1b7   : > { %v1197_v29 = vmax.f32 %v1028_v52, %v1191_v12 }
 0x1b8   : > { %v1193_v8 = vpop.f32.mrf.mxu0 }
 0x1b9   : > { %v1194_v31 = vadd.f32 %v1193_v8, %v1153_v24 }
 0x1ba   : > { %v1965_v18 = vpop.f32.mrf.mxu0 }
 0x1bb   : > { %v1198_v40 = vmax.f32 %v1029_v6, %v1194_v31 }
 0x1c7   : > { %v1888_v53 = vpop.f32.mrf.mxu1 }
 0x1c9   : > { %v1889_v57 = vpop.f32.mrf.mxu1 }
 0x1ca   : > { %v1890_v16 = vadd.f32 %v1889_v57, %v1888_v53 }
 0x1cb   : > { %v1891_v62 = vpop.f32.mrf.mxu1 }
 0x1cd   : > { %v1892_v10 = vpop.f32.mrf.mxu1 }
 0x1ce   : > { %v1893_v32 = vadd.f32 %v1892_v10, %v1891_v62 }
 0x1d4   : > { %v1910_v9 = vpop.f32.mrf.mxu0 }
 0x1d6   : > { %v1911_v14 = vpop.f32.mrf.mxu0 }
 0x1d7   : > { %v1912_v17 = vadd.f32 %v1911_v14, %v1910_v9  ;;  %v1355_v19 = vpop.f32.mrf.mxu1 }
 0x1d8   : > { %v1913_v22 = vpop.f32.mrf.mxu0 }
 0x1d9   : > { %v1315_v26 = vadd.f32 %v1912_v17, %v1890_v16  ;;  %v1976_v27 = vpop.f32.mrf.mxu1 }
 0x1da   : > { %v1914_v30 = vpop.f32.mrf.mxu0 }
 0x1db   : > { %v1356_v33 = vadd.f32 %v1355_v19, %v1315_v26  ;;  %v1915_v35 = vadd.f32 %v1914_v30, %v1913_v22  ;;  %v1358_v36 = vpop.f32.mrf.mxu1 }
 0x1dd   : > { %v1362_v7 = vmax.f32 %v1197_v29, %v1356_v33  ;;  %v1318_v59 = vadd.f32 %v1915_v35, %v1893_v32  ;;  %v1977_v54 = vpop.f32.mrf.mxu1 }
 0x1df   : > { %v1371_v25 = vmul.f32 %v1717_v37, %v1362_v7  ;;  %v1359_v41 = vadd.f32 %v1358_v36, %v1318_v59 }
 0x1e1   : > { %v1380_v44 = vadd.f32 %v1718_v61, %v1371_v25  ;;  %v1363_v42 = vmax.f32 %v1198_v40, %v1359_v41 }
 0x1e3   : > { %v1382_v11 = vmax.f32 %v1380_v44, 0.0  ;;  %v1372_v46 = vmul.f32 %v1717_v37, %v1363_v42 }
 0x1e5   : > { %v1381_v13 = vadd.f32 %v1718_v61, %v1372_v46  ;;  %v1417_v47 = vsel %vm1411_vm3, %v1382_v11, 0.0 }
 0x1e6   : > { %v1419_v52 = vsel %vm383_vm1, %v1417_v47, -inf }
 0x1e7   : > { %v1383_v48 = vmax.f32 %v1381_v13, 0.0 }
 0x1e9   : > { %v1418_v51 = vsel %vm1412_vm4, %v1383_v48, 0.0 }
 0x1ea   : > { %v1420_v39 = vsel %vm383_vm1, %v1418_v51, -inf }
 0x1eb   : > { %v1421_v55 = vmax.f32 %v1419_v52, %v1420_v39 }
 0x1ed   : > { %v1422_v56 = vrot.slane %v1421_v55, 4 }
 0x1ef   : > { %v1423_v6 = vmax.f32 %v1421_v55, %v1422_v56 }
 0x1f1   : > { %v1424_v34 = vrot.slane %v1423_v6, 2 }
 0x1f3   : > { %v1425_v0 = vmax.f32 %v1423_v6, %v1424_v34 }
 0x1f5   : > { %v1426_v1 = vrot.slane %v1425_v0, 1 }
 0x1f7   : > { %v1427_v2 = vmax.f32 %v1425_v0, %v1426_v1 }
 0x1f9   : > { %1995 = vmatmul.mubr.msk.f32.vlgmr.msra.gmra.mxu0 %vm383_vm1, %v1427_v2  ;;  %1429 = vst.msk [vmem:[%s274_s21] sm:$0x1] %vm1428_vm5, %v1427_v2 }
 0x1fa   : > { %2114 = shalt.err (!%p2111_p3)
}
 0x1fb   : > { %s2115_s19 = scalar_lea.hbm %s1529_s9, 16  ;;  %s2119_s23 = scalar_lea.hbm %s2915_s6, 32 }
 0x1fc   : > { %p2116_p4 = scmp.ne.s32.totalorder %s1529_s9, %s2115_s19  ;;  %p2120_p9 = scmp.lt.s32.totalorder %s1529_s9, %s2915_s6 }
 0x1fd   : > { %p2121_p10 = scmp.lt.s32.totalorder %s2119_s23, %s2115_s19 }
 0x1fe   : > { %p2117_p7 = pnand %p2116_p4, %p2276_p5 }
 0x1ff   : > { %p2122_p11 = por %p2121_p10, %p2120_p9 }
 0x200   : > { %p2118_p8 = pneg %p2117_p7 }
 0x202   : > { %p2123_p12 = pnand %p2122_p11, %p2118_p8 }
 0x204   : > { %2126 = shalt.err (!%p2123_p12)
}
 0x205   : > { %1997 = dma.vmem_to_hbm [thread:$0]  (%p2276_p5), %s1532_s13, 16, %s1529_s9, %s1515_s15   ;;  %v1438_v3 = vld [vmem:[%s2914_s5] sm:$0x1]  ;;  %vm1512_vm6 = vcmask 32768  }
 0x206   : > { %s280_s17 = scalar_lea.vmem [#allocation4], %s2841_s14  ;;  %s2923_s22 = sshll.u32 %s2259_s28, 4 }
 0x207   : > { %s1544_s18 = sshll.u32 %s280_s17, 4  ;;  %s2873_s21 = scalar_lea.hbm %s2916_s7, %s2923_s22  ;;  %s1545_s18 = int_to_ptr.vmem [resolvable:$true] %s1544_s18 }
 0x208   : > { %s1519_s23 = scalar_lea.sflag [#allocation5], %s2841_s14  ;;  %s2127_s9 = scalar_lea.vmem %s1545_s18, 16 }
 0x209   : > { %p2128_p13 = scmp.ne.s32.totalorder %s1545_s18, %s2127_s9  ;;  %s2197_s13 = smov [#allocation4]  }
 0x20a   : > { %s2131_s15 = sshll.u32 %s2197_s13, 4  ;;  %s2132_s15 = int_to_ptr.vmem [resolvable:$false] %s2131_s15 }
 0x20b   : > { %p2129_p0 = pnand %p2128_p13, %p2276_p5  ;;  %s2133_s29 = scalar_lea.vmem %s2132_s15, 32 }
 0x20c   : > { %p2134_p2 = scmp.lt.s32.totalorder %s1545_s18, %s2132_s15  ;;  %p2135_p3 = scmp.lt.s32.totalorder %s2133_s29, %s2127_s9 }
 0x20d   : > { %p2130_p1 = pneg %p2129_p0 }
 0x20e   : > { %p2136_p4 = por %p2135_p3, %p2134_p2 }
 0x210   : > { %p2137_p7 = pnand %p2136_p4, %p2130_p1 }
 0x2b9   : > { %v1508_v4 = vpop.f32.mrf.mxu0 }
 0x2ba   : > { %v1509_v8 = vadd.f32 %v1508_v4, %v1438_v3 }
 0x2bb   : > { %v1996_v18 = vpop.f32.mrf.mxu0 }
 0x2bc   : > { %1513 = vst.msk [vmem:[%s280_s17] sm:$0x1] %vm1512_vm6, %v1509_v8 }
 0x2bd   : > { %2140 = shalt.err (!%p2137_p7)
}
 0x2be   : > { %s2141_s28 = scalar_lea.hbm %s2873_s21, 16  ;;  %s2145_s16 = scalar_lea.hbm %s2916_s7, 32 }
 0x2bf   : > { %p2142_p8 = scmp.ne.s32.totalorder %s2873_s21, %s2141_s28  ;;  %p2146_p11 = scmp.lt.s32.totalorder %s2873_s21, %s2916_s7 }
 0x2c0   : > { %p2147_p12 = scmp.lt.s32.totalorder %s2145_s16, %s2141_s28 }
 0x2c1   : > { %p2143_p9 = pnand %p2142_p8, %p2276_p5 }
 0x2c2   : > { %p2148_p13 = por %p2147_p12, %p2146_p11 }
 0x2c3   : > { %p2144_p10 = pneg %p2143_p9 }
 0x2c5   : > { %p2149_p0 = pnand %p2148_p13, %p2144_p10 }
 0x2c7   : > { %2152 = shalt.err (!%p2149_p0)
}
 0x2c8   : > { %1998 = dma.vmem_to_hbm [thread:$0]  (%p2276_p5), %s1545_s18, 16, %s2873_s21, %s1519_s23  }
 0x2c9 PF: > { %p2008_p1 = scmp.ge.s32.totalorder %s2191_s27, 2  ;;  %s1556_s19 = sand.u32 1, %s2179_s24  }
 0x2ca   : > { %s1557_s20 = scalar_lea.sflag [#allocation3], %s1556_s19 }
 0x2cb   : > { %p2002_p2 = pnand %p2008_p1, %p2280_p6 }
 0x2cd   : > { %p2003_p3 = pneg %p2002_p2 }
 0x2cf   : > { %2170 = dma.done.wait (%p2003_p3), %s1557_s20, 16  }
 0x2d0   : > { %2172 = vsyncadd (%p2003_p3), %s1557_s20, 4294967280  ;;  %s1565_s9 = scalar_lea.sflag [#allocation5], %s1556_s19 }
 0x2d1   : > { %2174 = dma.done.wait (%p2003_p3), %s1565_s9, 16  }
 0x2d2   : > { %2176 = vsyncadd (%p2003_p3), %s1565_s9, 4294967280  ;;  %p21_p5 = scmp.ge.s32.totalorder %s2263_s30, 4   ;;  %s2924_s24 = smov %s2183_s25 }
 0x2d3   : > { %s2925_s25 = smov %s2187_s26  ;;  %s2926_s26 = smov %s2274_s10 }
 0x2d4   : > { %s2927_s27 = smov %s2263_s30  ;;  %23 = sbr.rel (!%p21_p5) target bundleno = 5 (0x5), region = 99 }
 0x2d9   :  { %1569 = vsyncpa [#allocation3], 1 }
 0x2da   :  { %1571 = vsyncpa [#allocation3 + $0x1], 1 }
 0x2db   :  { %1572 = vsyncpa [#allocation5], 1 }
 0x2dc   :  { %1574 = vsyncpa [#allocation5 + $0x1], 1 }

</bundles_post_ra>
